<compile_context>
chip_gen: v7x
topology: tpu7x:2x2x1
jax: 0.10.0
libtpu: 0.0.40
codegen_flags: <defaults>
</compile_context>

<pallas_src>
import jax
import jax.numpy as jnp
from jax.experimental import pallas as pl
from jax.experimental.pallas import tpu as pltpu

# ---- static problem dimensions implied by the module -----------------------
D, H, W = 20, 20, 80                     # squeeze(2).squeeze(2) forces D=H=20,
F = D * H                                # view(-1, 50*99) forces W=80.
C = 50                                   # conv output channels
C_PAD = 128                              # per-slice lane padding (vreg lane width)
KWS = (2, 3, 4, 5)                       # conv1..conv4 width kernels
KWOFF = (0, 2, 5, 9)                     # slice-group offset of each conv in the packed weight
NW = sum(KWS)                            # 14 packed width slices
OUTW = tuple(W - k + 1 for k in KWS)     # (79, 78, 77, 76)
POOL = tuple((o - 5) // 3 + 1 for o in OUTW)   # MaxPool1d(3,3,dilation=2) -> (25,25,25,24)
POFF = (0, 25, 50, 75)
NPOOL = sum(POOL)                        # 99
NFEAT = C * NPOOL                        # 4950
KPAD = 4992                              # NFEAT padded to a multiple of 128 (= 39*128)
KTILE = 1664                             # fc1 K-tile (KPAD // 3), multiple of 128
H1, H2, NCLS = 700, 120, 15


# ---------------------------------------------------------------------------
# pltpu.roll convention probe (one tiny eager kernel, memoized).  Keeps the
# shift-and-add / pooling rolls correct regardless of the rotate direction and
# falls back to slice+concat if the rotate fails to lower for this shape.
# ---------------------------------------------------------------------------
_ROLL_MODE = None


def _get_roll_mode():
    global _ROLL_MODE
    if _ROLL_MODE is not None:
        return _ROLL_MODE
    n = 160
    x = jnp.tile(jnp.arange(n, dtype=jnp.float32)[:, None], (1, 128))

    def _probe(x_ref, o_ref):
        o_ref[...] = pltpu.roll(x_ref[...], n - 3, axis=0)

    try:
        y = pl.pallas_call(
            _probe, out_shape=jax.ShapeDtypeStruct((n, 128), jnp.float32))(x)
        v = float(y[0, 0])
        if v == 3.0:
            _ROLL_MODE = "jnp"       # roll(x, s)[i] == x[(i - s) % n]
        elif v == float(n - 3):
            _ROLL_MODE = "flip"      # roll(x, s)[i] == x[(i + s) % n]
        else:
            _ROLL_MODE = "slice"
    except Exception:
        _ROLL_MODE = "slice"
    return _ROLL_MODE


def _shift_up(v, t):
    """Return s with s[i, :] = v[(i + t) % n, :]  (shift toward lower row indices)."""
    if t == 0:
        return v
    n = v.shape[0]
    mode = _get_roll_mode()
    if mode == "jnp":
        return pltpu.roll(v, n - t, axis=0)
    if mode == "flip":
        return pltpu.roll(v, t, axis=0)
    return jnp.concatenate([v[t:], v[:t]], axis=0)       # slice fallback


# ---------------------------------------------------------------------------
# Kernel A: the 4 Conv3d's (one wide matmul + roll shift-adds)
#           + MaxPool1d(3,3,dilation=2) + ReLU
# ---------------------------------------------------------------------------
def conv_pool_kernel(x_ref, w_ref, b_ref, out_ref, mbuf_ref):
    # x_ref:    (BT*W, F)       bf16  batch tile, row = b*W + w
    # w_ref:    (F, NW*C_PAD)   bf16  all 14 width slices, each in its own 128-lane group
    # b_ref:    (4, C_PAD)      f32   per-conv bias (lanes >= C are zero)
    # out_ref:  (BT, NPOOL, C)  f32   pooled + relu features, length-major
    # mbuf_ref: VMEM (BT*W, C_PAD) f32 scratch for the strided pooling read
    bt = out_ref.shape[0]

    # One wide MXU matmul covering all 4 convs and all width taps.
    p_all = jnp.dot(x_ref[...], w_ref[...],
                    preferred_element_type=jnp.float32)          # (BT*W, NW*C_PAD)

    for i, kw in enumerate(KWS):
        L = POOL[i]
        base = KWOFF[i] * C_PAD
        # Width conv = shift-and-add of the 128-aligned result column groups.
        acc = p_all[:, base:base + C_PAD]
        for t in range(1, kw):
            sl = p_all[:, base + t * C_PAD: base + (t + 1) * C_PAD]
            acc = acc + _shift_up(sl, t)
        acc = acc + b_ref[i:i + 1, :]
        # MaxPool1d(3, 3, dilation=2): window {w, w+2, w+4}; ReLU commutes with max.
        m = jnp.maximum(acc, jnp.maximum(_shift_up(acc, 2), _shift_up(acc, 4)))
        m = jnp.maximum(m, 0.0)
        mbuf_ref[...] = m
        for b in range(bt):
            v = mbuf_ref[pl.ds(b * W, L, stride=3), :]           # rows b*W + 3p
            out_ref[b, POFF[i]:POFF[i] + L, :] = v[:, 0:C]


def _pick_bt(batch):
    for bt in (8, 4, 2, 1):
        if batch % bt == 0:
            return bt
    return 1


def conv_pool(x2d, w_all, b_pad):
    batch = x2d.shape[0] // W
    bt = _pick_bt(batch)
    return pl.pallas_call(
        conv_pool_kernel,
        out_shape=jax.ShapeDtypeStruct((batch, NPOOL, C), jnp.float32),
        grid_spec=pltpu.PrefetchScalarGridSpec(
            num_scalar_prefetch=0,
            grid=(batch // bt,),
            in_specs=[
                pl.BlockSpec((bt * W, F), lambda i: (i, 0)),
                pl.BlockSpec((F, NW * C_PAD), lambda i: (0, 0)),
                pl.BlockSpec((len(KWS), C_PAD), lambda i: (0, 0)),
            ],
            out_specs=pl.BlockSpec((bt, NPOOL, C), lambda i: (i, 0, 0)),
            scratch_shapes=[pltpu.VMEM((bt * W, C_PAD), jnp.float32)],
        ),
        compiler_params=pltpu.CompilerParams(
            dimension_semantics=("parallel",),
            vmem_limit_bytes=32 * 1024 * 1024,
        ),
    )(x2d, w_all, b_pad)


# ---------------------------------------------------------------------------
# Kernel B: fc1 (K-tiled, pipelined bf16 weight stream) -> relu -> dropout
#           -> fc2 -> relu -> dropout -> fc3
# ---------------------------------------------------------------------------
def mlp_kernel(f_ref, w1_ref, b1_ref, m1_ref, w2_ref, b2_ref, m2_ref,
               w3_ref, b3_ref, o_ref, acc_ref):
    k = pl.program_id(0)

    @pl.when(k == 0)
    def _():
        acc_ref[...] = jnp.zeros_like(acc_ref)

    acc_ref[...] += jnp.dot(f_ref[...].astype(jnp.bfloat16), w1_ref[...],
                            preferred_element_type=jnp.float32)

    @pl.when(k == pl.num_programs(0) - 1)
    def _():
        h1 = jnp.maximum(acc_ref[...] + b1_ref[...], 0.0) * m1_ref[...]
        h2 = jnp.dot(h1.astype(jnp.bfloat16), w2_ref[...],
                     preferred_element_type=jnp.float32) + b2_ref[...]
        h2 = jnp.maximum(h2, 0.0) * m2_ref[...]
        o_ref[...] = (jnp.dot(h2, w3_ref[...],
                              preferred_element_type=jnp.float32) + b3_ref[...])


def mlp(feats, w1p, b1, m1, w2p, b2, m2, w3p, b3):
    batch = feats.shape[0]
    ksteps = KPAD // KTILE
    return pl.pallas_call(
        mlp_kernel,
        out_shape=jax.ShapeDtypeStruct((batch, NCLS), jnp.float32),
        grid_spec=pltpu.PrefetchScalarGridSpec(
            num_scalar_prefetch=0,
            grid=(ksteps,),
            in_specs=[
                pl.BlockSpec((batch, KTILE), lambda k: (0, k)),
                pl.BlockSpec((KTILE, H1), lambda k: (k, 0)),
                pl.BlockSpec((1, H1), lambda k: (0, 0)),
                pl.BlockSpec((batch, H1), lambda k: (0, 0)),
                pl.BlockSpec((H1, H2), lambda k: (0, 0)),
                pl.BlockSpec((1, H2), lambda k: (0, 0)),
                pl.BlockSpec((batch, H2), lambda k: (0, 0)),
                pl.BlockSpec((H2, NCLS), lambda k: (0, 0)),
                pl.BlockSpec((1, NCLS), lambda k: (0, 0)),
            ],
            out_specs=pl.BlockSpec((batch, NCLS), lambda k: (0, 0)),
            scratch_shapes=[pltpu.VMEM((batch, H1), jnp.float32)],
        ),
        compiler_params=pltpu.CompilerParams(
            dimension_semantics=("arbitrary",),
            vmem_limit_bytes=20 * 1024 * 1024,
        ),
    )(feats, w1p, b1, m1, w2p, b2, m2, w3p, b3)


# ---------------------------------------------------------------------------
# Full forward (glue is free reshapes only; no transposes between kernels)
# ---------------------------------------------------------------------------
@jax.jit
def forward(x, kparams, m1, m2):
    (w_all, b_pad, w1p, b1, w2p, b2, w3p, b3) = kparams
    batch = x.shape[0]
    # NCDHW -> (B*W, D*H), bf16 for the MXU (weights are bf16, accumulation f32).
    x2d = jnp.transpose(x[:, 0], (0, 3, 1, 2)).reshape(batch * W, F)
    x2d = x2d.astype(jnp.bfloat16)
    pooled = conv_pool(x2d, w_all, b_pad)                        # (B, 99, 50)
    # fc1's rows were permuted to length-major order, so the flatten is free.
    feats = pooled.reshape(batch, NFEAT)
    feats = jnp.pad(feats, ((0, 0), (0, KPAD - NFEAT)))
    return mlp(feats, w1p, b1, m1, w2p, b2, m2, w3p, b3)


# ---------------------------------------------------------------------------
# Deterministic parameters (torch-layout) + kernel-layout preparation
# ---------------------------------------------------------------------------
def init_params(key):
    ks = jax.random.split(key, 14)
    idx = 0
    convs, cbias = [], []
    for kw in KWS:
        convs.append(jax.random.normal(ks[idx], (C, 1, D, H, kw), jnp.float32) * 0.05)
        idx += 1
        cbias.append(jax.random.normal(ks[idx], (C,), jnp.float32) * 0.05)
        idx += 1
    w1 = jax.random.normal(ks[idx], (H1, NFEAT), jnp.float32) * 0.02; idx += 1
    b1 = jax.random.normal(ks[idx], (H1,), jnp.float32) * 0.02;       idx += 1
    w2 = jax.random.normal(ks[idx], (H2, H1), jnp.float32) * 0.05;    idx += 1
    b2 = jax.random.normal(ks[idx], (H2,), jnp.float32) * 0.05;       idx += 1
    w3 = jax.random.normal(ks[idx], (NCLS, H2), jnp.float32) * 0.05;  idx += 1
    b3 = jax.random.normal(ks[idx], (NCLS,), jnp.float32) * 0.05;     idx += 1
    return (tuple(convs), tuple(cbias), (w1, b1), (w2, b2), (w3, b3))


def prepare_params(params):
    convs, cbias, (w1, b1), (w2, b2), (w3, b3) = params
    # Packed, 128-lane-aligned conv weight: column group j holds width slice j.
    cols = []
    for i, kw in enumerate(KWS):
        wi = convs[i]                                            # (C, 1, D, H, kw)
        for t in range(kw):
            sl = jnp.transpose(wi[:, 0, :, :, t].reshape(C, F))  # (F, C)
            cols.append(jnp.pad(sl, ((0, 0), (0, C_PAD - C))))
    w_all = jnp.concatenate(cols, axis=1).astype(jnp.bfloat16)   # (F, NW*C_PAD)
    b_pad = jnp.pad(jnp.stack(cbias), ((0, 0), (0, C_PAD - C)))  # (4, C_PAD)

    # fc1: torch flatten is channel-major (index = c*99 + l); permute rows so the
    # kernel can consume length-major features (index = l*50 + c), then zero-pad K.
    w1t = jnp.transpose(w1)                                      # (NFEAT, H1)
    w1_lm = jnp.transpose(w1t.reshape(C, NPOOL, H1), (1, 0, 2)).reshape(NFEAT, H1)
    w1p = jnp.pad(w1_lm, ((0, KPAD - NFEAT), (0, 0))).astype(jnp.bfloat16)

    return (w_all, b_pad,
            w1p, b1.reshape(1, H1),
            jnp.transpose(w2).astype(jnp.bfloat16), b2.reshape(1, H2),
            jnp.transpose(w3), b3.reshape(1, NCLS))


# ---------------------------------------------------------------------------
# Pure-JAX reference (same math, same bf16 quantization points, same masks)
# ---------------------------------------------------------------------------
def reference(x, params, m1, m2):
    hp = jax.lax.Precision.HIGHEST
    convs, cbias, (w1, b1), (w2, b2), (w3, b3) = params
    batch = x.shape[0]
    xq = x.astype(jnp.bfloat16).astype(jnp.float32)
    x_km = jnp.transpose(xq[:, 0], (0, 3, 1, 2)).reshape(batch, W, F)
    parts = []
    for i, kw in enumerate(KWS):
        wq = convs[i].astype(jnp.bfloat16).astype(jnp.float32)
        O, L = OUTW[i], POOL[i]
        acc = jnp.zeros((batch, O, C), jnp.float32)
        for t in range(kw):
            wt = jnp.transpose(wq[:, 0, :, :, t].reshape(C, F))  # (F, C)
            p = jnp.einsum('bwf,fc->bwc', x_km, wt, precision=hp)
            acc = acc + p[:, t:t + O, :]
        acc = acc + cbias[i][None, None, :]
        pooled = jnp.maximum(jnp.maximum(acc[:, 0:3 * L:3],
                                         acc[:, 2:2 + 3 * L:3]),
                             acc[:, 4:4 + 3 * L:3])
        parts.append(jnp.maximum(pooled, 0.0))
    cat = jnp.concatenate(parts, axis=1)                         # (B, 99, 50)
    f = jnp.transpose(cat, (0, 2, 1)).reshape(batch, NFEAT)      # torch channel-major
    w1q = w1.astype(jnp.bfloat16).astype(jnp.float32)
    w2q = w2.astype(jnp.bfloat16).astype(jnp.float32)
    fq = f.astype(jnp.bfloat16).astype(jnp.float32)
    h = jnp.maximum(jnp.dot(fq, w1q.T, precision=hp) + b1, 0.0) * m1
    hq = h.astype(jnp.bfloat16).astype(jnp.float32)
    h = jnp.maximum(jnp.dot(hq, w2q.T, precision=hp) + b2, 0.0) * m2
    return jnp.dot(h, w3.T, precision=hp) + b3


if __name__ == "__main__":
    _get_roll_mode()                       # probe the roll convention once (eager)

    key = jax.random.PRNGKey(0)
    kx, kp, kd1, kd2 = jax.random.split(key, 4)

    B = 2
    x = jax.random.normal(kx, (B, 1, D, H, W), jnp.float32)
    params = init_params(kp)
    kparams = prepare_params(params)

    # F.dropout default p = 0.5, training=True -> scaled Bernoulli masks.
    p_drop = 0.5
    m1 = jax.random.bernoulli(kd1, 1.0 - p_drop, (B, H1)).astype(jnp.float32) / (1.0 - p_drop)
    m2 = jax.random.bernoulli(kd2, 1.0 - p_drop, (B, H2)).astype(jnp.float32) / (1.0 - p_drop)

    out = jax.block_until_ready(forward(x, kparams, m1, m2))
    assert out.shape == (B, NCLS) and out.dtype == jnp.float32

    ref = reference(x, params, m1, m2)
    if not bool(jnp.allclose(out, ref, atol=1e-2, rtol=1e-2)):
        raise AssertionError("Pallas kernel output does not match JAX reference")

    print("KERNEL_OK")
</pallas_src>

<mosaic_0001>
module attributes {stable_mosaic.version = 11 : i64} {
  func.func @_probe(%arg0: memref<160x128xf32, #tpu.memory_space<vmem>>, %arg1: memref<160x128xf32, #tpu.memory_space<vmem>>) attributes {dimension_semantics = [], scalar_prefetch = 0 : i64, scratch_operands = 0 : i64, tpu.core_type = #tpu.core_type<tc>} {
    %c0 = arith.constant 0 : index
    %c0_0 = arith.constant 0 : index
    %0 = vector.load %arg0[%c0, %c0_0] : memref<160x128xf32, #tpu.memory_space<vmem>>, vector<160x128xf32>
    %c157_i32 = arith.constant 157 : i32
    %1 = tpu.dynamic_rotate %0 by %c157_i32 dim 0 : vector<160x128xf32>, i32 -> vector<160x128xf32>
    %c0_1 = arith.constant 0 : index
    %c0_2 = arith.constant 0 : index
    %2 = vector.load %arg1[%c0_1, %c0_2] : memref<160x128xf32, #tpu.memory_space<vmem>>, vector<160x128xf32>
    tpu.vector_store %arg1[%c0_1, %c0_2], %1 {strides = array<i32>} : memref<160x128xf32, #tpu.memory_space<vmem>>, vector<160x128xf32>,
    return
  }
}

module attributes {stable_mosaic.version = 11 : i64} {
  func.func @conv_pool_kernel(%arg0: i32, %arg1: memref<160x400xbf16, #tpu.memory_space<vmem>>, %arg2: memref<400x1792xbf16, #tpu.memory_space<vmem>>, %arg3: memref<4x128xf32, #tpu.memory_space<vmem>>, %arg4: memref<2x99x50xf32, #tpu.memory_space<vmem>>, %arg5: memref<160x128xf32, #tpu.memory_space<vmem>>) attributes {dimension_semantics = [#tpu.dimension_semantics<parallel>], iteration_bounds = array<i64: 1>, scalar_prefetch = 0 : i64, scratch_operands = 1 : i64, tpu.core_type = #tpu.core_type<tc>, window_params = [{transform_indices = @transform_0, window_bounds = array<i64: 160, 400>}, {pipeline_mode = #tpu.pipeline_mode<synchronous>, transform_indices = @transform_1, window_bounds = array<i64: 400, 1792>}, {pipeline_mode = #tpu.pipeline_mode<synchronous>, transform_indices = @transform_2, window_bounds = array<i64: 4, 128>}, {transform_indices = @transform_3, window_bounds = array<i64: 2, 99, 50>}]} {
    %c0 = arith.constant 0 : index
    %c0_0 = arith.constant 0 : index
    %0 = vector.load %arg1[%c0, %c0_0] : memref<160x400xbf16, #tpu.memory_space<vmem>>, vector<160x400xbf16>
    %c0_1 = arith.constant 0 : index
    %c0_2 = arith.constant 0 : index
    %1 = vector.load %arg2[%c0_1, %c0_2] : memref<400x1792xbf16, #tpu.memory_space<vmem>>, vector<400x1792xbf16>
    %cst = arith.constant dense<0.000000e+00> : vector<160x1792xf32>
    %2 = tpu.matmul %0, %1, %cst {dimension_numbers = #tpu.dot_dimension_numbers<[1], [0], [0], [1], [0, 0, 1, 1], [], []>} : vector<160x400xbf16>, vector<400x1792xbf16>, vector<160x1792xf32> -> vector<160x1792xf32>
    %3 = vector.extract_strided_slice %2 {offsets = [0, 0], sizes = [160, 128], strides = [1, 1]} : vector<160x1792xf32> to vector<160x128xf32>
    %4 = vector.extract_strided_slice %2 {offsets = [0, 128], sizes = [160, 128], strides = [1, 1]} : vector<160x1792xf32> to vector<160x128xf32>
    %5 = vector.extract_strided_slice %4 {offsets = [1, 0], sizes = [159, 128], strides = [1, 1]} : vector<160x128xf32> to vector<159x128xf32>
    %6 = vector.extract_strided_slice %4 {offsets = [0, 0], sizes = [1, 128], strides = [1, 1]} : vector<160x128xf32> to vector<1x128xf32>
    %7 = tpu.concatenate %5, %6 in 0 : vector<159x128xf32>, vector<1x128xf32> -> vector<160x128xf32>
    %8 = arith.addf %3, %7 : vector<160x128xf32>
    %c0_3 = arith.constant 0 : index
    %c0_4 = arith.constant 0 : index
    %9 = vector.load %arg3[%c0_3, %c0_4] : memref<4x128xf32, #tpu.memory_space<vmem>>, vector<1x128xf32>
    %10 = vector.broadcast %9 : vector<1x128xf32> to vector<160x128xf32>
    %11 = arith.addf %8, %10 : vector<160x128xf32>
    %12 = vector.extract_strided_slice %11 {offsets = [2, 0], sizes = [158, 128], strides = [1, 1]} : vector<160x128xf32> to vector<158x128xf32>
    %13 = vector.extract_strided_slice %11 {offsets = [0, 0], sizes = [2, 128], strides = [1, 1]} : vector<160x128xf32> to vector<2x128xf32>
    %14 = tpu.concatenate %12, %13 in 0 : vector<158x128xf32>, vector<2x128xf32> -> vector<160x128xf32>
    %15 = vector.extract_strided_slice %11 {offsets = [4, 0], sizes = [156, 128], strides = [1, 1]} : vector<160x128xf32> to vector<156x128xf32>
    %16 = vector.extract_strided_slice %11 {offsets = [0, 0], sizes = [4, 128], strides = [1, 1]} : vector<160x128xf32> to vector<4x128xf32>
    %17 = tpu.concatenate %15, %16 in 0 : vector<156x128xf32>, vector<4x128xf32> -> vector<160x128xf32>
    %18 = arith.maximumf %14, %17 : vector<160x128xf32>
    %19 = arith.maximumf %11, %18 : vector<160x128xf32>
    %cst_5 = arith.constant 0.000000e+00 : f32
    %20 = vector.broadcast %cst_5 : f32 to vector<160x128xf32>
    %21 = arith.maximumf %19, %20 : vector<160x128xf32>
    %c0_6 = arith.constant 0 : index
    %c0_7 = arith.constant 0 : index
    %22 = vector.load %arg5[%c0_6, %c0_7] : memref<160x128xf32, #tpu.memory_space<vmem>>, vector<160x128xf32>
    tpu.vector_store %arg5[%c0_6, %c0_7], %21 {strides = array<i32>} : memref<160x128xf32, #tpu.memory_space<vmem>>, vector<160x128xf32>,
    %c0_8 = arith.constant 0 : index
    %c0_9 = arith.constant 0 : index
    %23 = tpu.strided_load %arg5[%c0_8, %c0_9] {strides = array<i32: 3, 1>} : memref<160x128xf32, #tpu.memory_space<vmem>>, vector<25x128xf32>
    %24 = vector.extract_strided_slice %23 {offsets = [0, 0], sizes = [25, 50], strides = [1, 1]} : vector<25x128xf32> to vector<25x50xf32>
    %c0_10 = arith.constant 0 : index
    %c0_11 = arith.constant 0 : index
    %c0_12 = arith.constant 0 : index
    %25 = vector.load %arg4[%c0_10, %c0_11, %c0_12] : memref<2x99x50xf32, #tpu.memory_space<vmem>>, vector<1x25x50xf32>
    %26 = vector.shape_cast %25 : vector<1x25x50xf32> to vector<25x50xf32>
    %27 = vector.shape_cast %24 : vector<25x50xf32> to vector<1x25x50xf32>
    tpu.vector_store %arg4[%c0_10, %c0_11, %c0_12], %27 {strides = array<i32>} : memref<2x99x50xf32, #tpu.memory_space<vmem>>, vector<1x25x50xf32>,
    %c80 = arith.constant 80 : index
    %c0_13 = arith.constant 0 : index
    %28 = tpu.strided_load %arg5[%c80, %c0_13] {strides = array<i32: 3, 1>} : memref<160x128xf32, #tpu.memory_space<vmem>>, vector<25x128xf32>
    %29 = vector.extract_strided_slice %28 {offsets = [0, 0], sizes = [25, 50], strides = [1, 1]} : vector<25x128xf32> to vector<25x50xf32>
    %c1 = arith.constant 1 : index
    %c0_14 = arith.constant 0 : index
    %c0_15 = arith.constant 0 : index
    %30 = vector.load %arg4[%c1, %c0_14, %c0_15] : memref<2x99x50xf32, #tpu.memory_space<vmem>>, vector<1x25x50xf32>
    %31 = vector.shape_cast %30 : vector<1x25x50xf32> to vector<25x50xf32>
    %32 = vector.shape_cast %29 : vector<25x50xf32> to vector<1x25x50xf32>
    tpu.vector_store %arg4[%c1, %c0_14, %c0_15], %32 {strides = array<i32>} : memref<2x99x50xf32, #tpu.memory_space<vmem>>, vector<1x25x50xf32>,
    %33 = vector.extract_strided_slice %2 {offsets = [0, 256], sizes = [160, 128], strides = [1, 1]} : vector<160x1792xf32> to vector<160x128xf32>
    %34 = vector.extract_strided_slice %2 {offsets = [0, 384], sizes = [160, 128], strides = [1, 1]} : vector<160x1792xf32> to vector<160x128xf32>
    %35 = vector.extract_strided_slice %34 {offsets = [1, 0], sizes = [159, 128], strides = [1, 1]} : vector<160x128xf32> to vector<159x128xf32>
    %36 = vector.extract_strided_slice %34 {offsets = [0, 0], sizes = [1, 128], strides = [1, 1]} : vector<160x128xf32> to vector<1x128xf32>
    %37 = tpu.concatenate %35, %36 in 0 : vector<159x128xf32>, vector<1x128xf32> -> vector<160x128xf32>
    %38 = arith.addf %33, %37 : vector<160x128xf32>
    %39 = vector.extract_strided_slice %2 {offsets = [0, 512], sizes = [160, 128], strides = [1, 1]} : vector<160x1792xf32> to vector<160x128xf32>
    %40 = vector.extract_strided_slice %39 {offsets = [2, 0], sizes = [158, 128], strides = [1, 1]} : vector<160x128xf32> to vector<158x128xf32>
    %41 = vector.extract_strided_slice %39 {offsets = [0, 0], sizes = [2, 128], strides = [1, 1]} : vector<160x128xf32> to vector<2x128xf32>
    %42 = tpu.concatenate %40, %41 in 0 : vector<158x128xf32>, vector<2x128xf32> -> vector<160x128xf32>
    %43 = arith.addf %38, %42 : vector<160x128xf32>
    %c1_16 = arith.constant 1 : index
    %c0_17 = arith.constant 0 : index
    %44 = vector.load %arg3[%c1_16, %c0_17] : memref<4x128xf32, #tpu.memory_space<vmem>>, vector<1x128xf32>
    %45 = vector.broadcast %44 : vector<1x128xf32> to vector<160x128xf32>
    %46 = arith.addf %43, %45 : vector<160x128xf32>
    %47 = vector.extract_strided_slice %46 {offsets = [2, 0], sizes = [158, 128], strides = [1, 1]} : vector<160x128xf32> to vector<158x128xf32>
    %48 = vector.extract_strided_slice %46 {offsets = [0, 0], sizes = [2, 128], strides = [1, 1]} : vector<160x128xf32> to vector<2x128xf32>
    %49 = tpu.concatenate %47, %48 in 0 : vector<158x128xf32>, vector<2x128xf32> -> vector<160x128xf32>
    %50 = vector.extract_strided_slice %46 {offsets = [4, 0], sizes = [156, 128], strides = [1, 1]} : vector<160x128xf32> to vector<156x128xf32>
    %51 = vector.extract_strided_slice %46 {offsets = [0, 0], sizes = [4, 128], strides = [1, 1]} : vector<160x128xf32> to vector<4x128xf32>
    %52 = tpu.concatenate %50, %51 in 0 : vector<156x128xf32>, vector<4x128xf32> -> vector<160x128xf32>
    %53 = arith.maximumf %49, %52 : vector<160x128xf32>
    %54 = arith.maximumf %46, %53 : vector<160x128xf32>
    %cst_18 = arith.constant 0.000000e+00 : f32
    %55 = vector.broadcast %cst_18 : f32 to vector<160x128xf32>
    %56 = arith.maximumf %54, %55 : vector<160x128xf32>
    %c0_19 = arith.constant 0 : index
    %c0_20 = arith.constant 0 : index
    %57 = vector.load %arg5[%c0_19, %c0_20] : memref<160x128xf32, #tpu.memory_space<vmem>>, vector<160x128xf32>
    tpu.vector_store %arg5[%c0_19, %c0_20], %56 {strides = array<i32>} : memref<160x128xf32, #tpu.memory_space<vmem>>, vector<160x128xf32>,
    %c0_21 = arith.constant 0 : index
    %c0_22 = arith.constant 0 : index
    %58 = tpu.strided_load %arg5[%c0_21, %c0_22] {strides = array<i32: 3, 1>} : memref<160x128xf32, #tpu.memory_space<vmem>>, vector<25x128xf32>
    %59 = vector.extract_strided_slice %58 {offsets = [0, 0], sizes = [25, 50], strides = [1, 1]} : vector<25x128xf32> to vector<25x50xf32>
    %c0_23 = arith.constant 0 : index
    %c25 = arith.constant 25 : index
    %c0_24 = arith.constant 0 : index
    %60 = vector.load %arg4[%c0_23, %c25, %c0_24] : memref<2x99x50xf32, #tpu.memory_space<vmem>>, vector<1x25x50xf32>
    %61 = vector.shape_cast %60 : vector<1x25x50xf32> to vector<25x50xf32>
    %62 = vector.shape_cast %59 : vector<25x50xf32> to vector<1x25x50xf32>
    tpu.vector_store %arg4[%c0_23, %c25, %c0_24], %62 {strides = array<i32>} : memref<2x99x50xf32, #tpu.memory_space<vmem>>, vector<1x25x50xf32>,
    %c80_25 = arith.constant 80 : index
    %c0_26 = arith.constant 0 : index
    %63 = tpu.strided_load %arg5[%c80_25, %c0_26] {strides = array<i32: 3, 1>} : memref<160x128xf32, #tpu.memory_space<vmem>>, vector<25x128xf32>
    %64 = vector.extract_strided_slice %63 {offsets = [0, 0], sizes = [25, 50], strides = [1, 1]} : vector<25x128xf32> to vector<25x50xf32>
    %c1_27 = arith.constant 1 : index
    %c25_28 = arith.constant 25 : index
    %c0_29 = arith.constant 0 : index
    %65 = vector.load %arg4[%c1_27, %c25_28, %c0_29] : memref<2x99x50xf32, #tpu.memory_space<vmem>>, vector<1x25x50xf32>
    %66 = vector.shape_cast %65 : vector<1x25x50xf32> to vector<25x50xf32>
    %67 = vector.shape_cast %64 : vector<25x50xf32> to vector<1x25x50xf32>
    tpu.vector_store %arg4[%c1_27, %c25_28, %c0_29], %67 {strides = array<i32>} : memref<2x99x50xf32, #tpu.memory_space<vmem>>, vector<1x25x50xf32>,
    %68 = vector.extract_strided_slice %2 {offsets = [0, 640], sizes = [160, 128], strides = [1, 1]} : vector<160x1792xf32> to vector<160x128xf32>
    %69 = vector.extract_strided_slice %2 {offsets = [0, 768], sizes = [160, 128], strides = [1, 1]} : vector<160x1792xf32> to vector<160x128xf32>
    %70 = vector.extract_strided_slice %69 {offsets = [1, 0], sizes = [159, 128], strides = [1, 1]} : vector<160x128xf32> to vector<159x128xf32>
    %71 = vector.extract_strided_slice %69 {offsets = [0, 0], sizes = [1, 128], strides = [1, 1]} : vector<160x128xf32> to vector<1x128xf32>
    %72 = tpu.concatenate %70, %71 in 0 : vector<159x128xf32>, vector<1x128xf32> -> vector<160x128xf32>
    %73 = arith.addf %68, %72 : vector<160x128xf32>
    %74 = vector.extract_strided_slice %2 {offsets = [0, 896], sizes = [160, 128], strides = [1, 1]} : vector<160x1792xf32> to vector<160x128xf32>
    %75 = vector.extract_strided_slice %74 {offsets = [2, 0], sizes = [158, 128], strides = [1, 1]} : vector<160x128xf32> to vector<158x128xf32>
    %76 = vector.extract_strided_slice %74 {offsets = [0, 0], sizes = [2, 128], strides = [1, 1]} : vector<160x128xf32> to vector<2x128xf32>
    %77 = tpu.concatenate %75, %76 in 0 : vector<158x128xf32>, vector<2x128xf32> -> vector<160x128xf32>
    %78 = arith.addf %73, %77 : vector<160x128xf32>
    %79 = vector.extract_strided_slice %2 {offsets = [0, 1024], sizes = [160, 128], strides = [1, 1]} : vector<160x1792xf32> to vector<160x128xf32>
    %80 = vector.extract_strided_slice %79 {offsets = [3, 0], sizes = [157, 128], strides = [1, 1]} : vector<160x128xf32> to vector<157x128xf32>
    %81 = vector.extract_strided_slice %79 {offsets = [0, 0], sizes = [3, 128], strides = [1, 1]} : vector<160x128xf32> to vector<3x128xf32>
    %82 = tpu.concatenate %80, %81 in 0 : vector<157x128xf32>, vector<3x128xf32> -> vector<160x128xf32>
    %83 = arith.addf %78, %82 : vector<160x128xf32>
    %c2 = arith.constant 2 : index
    %c0_30 = arith.constant 0 : index
    %84 = vector.load %arg3[%c2, %c0_30] : memref<4x128xf32, #tpu.memory_space<vmem>>, vector<1x128xf32>
    %85 = vector.broadcast %84 : vector<1x128xf32> to vector<160x128xf32>
    %86 = arith.addf %83, %85 : vector<160x128xf32>
    %87 = vector.extract_strided_slice %86 {offsets = [2, 0], sizes = [158, 128], strides = [1, 1]} : vector<160x128xf32> to vector<158x128xf32>
    %88 = vector.extract_strided_slice %86 {offsets = [0, 0], sizes = [2, 128], strides = [1, 1]} : vector<160x128xf32> to vector<2x128xf32>
    %89 = tpu.concatenate %87, %88 in 0 : vector<158x128xf32>, vector<2x128xf32> -> vector<160x128xf32>
    %90 = vector.extract_strided_slice %86 {offsets = [4, 0], sizes = [156, 128], strides = [1, 1]} : vector<160x128xf32> to vector<156x128xf32>
    %91 = vector.extract_strided_slice %86 {offsets = [0, 0], sizes = [4, 128], strides = [1, 1]} : vector<160x128xf32> to vector<4x128xf32>
    %92 = tpu.concatenate %90, %91 in 0 : vector<156x128xf32>, vector<4x128xf32> -> vector<160x128xf32>
    %93 = arith.maximumf %89, %92 : vector<160x128xf32>
    %94 = arith.maximumf %86, %93 : vector<160x128xf32>
    %cst_31 = arith.constant 0.000000e+00 : f32
    %95 = vector.broadcast %cst_31 : f32 to vector<160x128xf32>
    %96 = arith.maximumf %94, %95 : vector<160x128xf32>
    %c0_32 = arith.constant 0 : index
    %c0_33 = arith.constant 0 : index
    %97 = vector.load %arg5[%c0_32, %c0_33] : memref<160x128xf32, #tpu.memory_space<vmem>>, vector<160x128xf32>
    tpu.vector_store %arg5[%c0_32, %c0_33], %96 {strides = array<i32>} : memref<160x128xf32, #tpu.memory_space<vmem>>, vector<160x128xf32>,
    %c0_34 = arith.constant 0 : index
    %c0_35 = arith.constant 0 : index
    %98 = tpu.strided_load %arg5[%c0_34, %c0_35] {strides = array<i32: 3, 1>} : memref<160x128xf32, #tpu.memory_space<vmem>>, vector<25x128xf32>
    %99 = vector.extract_strided_slice %98 {offsets = [0, 0], sizes = [25, 50], strides = [1, 1]} : vector<25x128xf32> to vector<25x50xf32>
    %c0_36 = arith.constant 0 : index
    %c50 = arith.constant 50 : index
    %c0_37 = arith.constant 0 : index
    %100 = vector.load %arg4[%c0_36, %c50, %c0_37] : memref<2x99x50xf32, #tpu.memory_space<vmem>>, vector<1x25x50xf32>
    %101 = vector.shape_cast %100 : vector<1x25x50xf32> to vector<25x50xf32>
    %102 = vector.shape_cast %99 : vector<25x50xf32> to vector<1x25x50xf32>
    tpu.vector_store %arg4[%c0_36, %c50, %c0_37], %102 {strides = array<i32>} : memref<2x99x50xf32, #tpu.memory_space<vmem>>, vector<1x25x50xf32>,
    %c80_38 = arith.constant 80 : index
    %c0_39 = arith.constant 0 : index
    %103 = tpu.strided_load %arg5[%c80_38, %c0_39] {strides = array<i32: 3, 1>} : memref<160x128xf32, #tpu.memory_space<vmem>>, vector<25x128xf32>
    %104 = vector.extract_strided_slice %103 {offsets = [0, 0], sizes = [25, 50], strides = [1, 1]} : vector<25x128xf32> to vector<25x50xf32>
    %c1_40 = arith.constant 1 : index
    %c50_41 = arith.constant 50 : index
    %c0_42 = arith.constant 0 : index
    %105 = vector.load %arg4[%c1_40, %c50_41, %c0_42] : memref<2x99x50xf32, #tpu.memory_space<vmem>>, vector<1x25x50xf32>
    %106 = vector.shape_cast %105 : vector<1x25x50xf32> to vector<25x50xf32>
    %107 = vector.shape_cast %104 : vector<25x50xf32> to vector<1x25x50xf32>
    tpu.vector_store %arg4[%c1_40, %c50_41, %c0_42], %107 {strides = array<i32>} : memref<2x99x50xf32, #tpu.memory_space<vmem>>, vector<1x25x50xf32>,
    %108 = vector.extract_strided_slice %2 {offsets = [0, 1152], sizes = [160, 128], strides = [1, 1]} : vector<160x1792xf32> to vector<160x128xf32>
    %109 = vector.extract_strided_slice %2 {offsets = [0, 1280], sizes = [160, 128], strides = [1, 1]} : vector<160x1792xf32> to vector<160x128xf32>
    %110 = vector.extract_strided_slice %109 {offsets = [1, 0], sizes = [159, 128], strides = [1, 1]} : vector<160x128xf32> to vector<159x128xf32>
    %111 = vector.extract_strided_slice %109 {offsets = [0, 0], sizes = [1, 128], strides = [1, 1]} : vector<160x128xf32> to vector<1x128xf32>
    %112 = tpu.concatenate %110, %111 in 0 : vector<159x128xf32>, vector<1x128xf32> -> vector<160x128xf32>
    %113 = arith.addf %108, %112 : vector<160x128xf32>
    %114 = vector.extract_strided_slice %2 {offsets = [0, 1408], sizes = [160, 128], strides = [1, 1]} : vector<160x1792xf32> to vector<160x128xf32>
    %115 = vector.extract_strided_slice %114 {offsets = [2, 0], sizes = [158, 128], strides = [1, 1]} : vector<160x128xf32> to vector<158x128xf32>
    %116 = vector.extract_strided_slice %114 {offsets = [0, 0], sizes = [2, 128], strides = [1, 1]} : vector<160x128xf32> to vector<2x128xf32>
    %117 = tpu.concatenate %115, %116 in 0 : vector<158x128xf32>, vector<2x128xf32> -> vector<160x128xf32>
    %118 = arith.addf %113, %117 : vector<160x128xf32>
    %119 = vector.extract_strided_slice %2 {offsets = [0, 1536], sizes = [160, 128], strides = [1, 1]} : vector<160x1792xf32> to vector<160x128xf32>
    %120 = vector.extract_strided_slice %119 {offsets = [3, 0], sizes = [157, 128], strides = [1, 1]} : vector<160x128xf32> to vector<157x128xf32>
    %121 = vector.extract_strided_slice %119 {offsets = [0, 0], sizes = [3, 128], strides = [1, 1]} : vector<160x128xf32> to vector<3x128xf32>
    %122 = tpu.concatenate %120, %121 in 0 : vector<157x128xf32>, vector<3x128xf32> -> vector<160x128xf32>
    %123 = arith.addf %118, %122 : vector<160x128xf32>
    %124 = vector.extract_strided_slice %2 {offsets = [0, 1664], sizes = [160, 128], strides = [1, 1]} : vector<160x1792xf32> to vector<160x128xf32>
    %125 = vector.extract_strided_slice %124 {offsets = [4, 0], sizes = [156, 128], strides = [1, 1]} : vector<160x128xf32> to vector<156x128xf32>
    %126 = vector.extract_strided_slice %124 {offsets = [0, 0], sizes = [4, 128], strides = [1, 1]} : vector<160x128xf32> to vector<4x128xf32>
    %127 = tpu.concatenate %125, %126 in 0 : vector<156x128xf32>, vector<4x128xf32> -> vector<160x128xf32>
    %128 = arith.addf %123, %127 : vector<160x128xf32>
    %c3 = arith.constant 3 : index
    %c0_43 = arith.constant 0 : index
    %129 = vector.load %arg3[%c3, %c0_43] : memref<4x128xf32, #tpu.memory_space<vmem>>, vector<1x128xf32>
    %130 = vector.broadcast %129 : vector<1x128xf32> to vector<160x128xf32>
    %131 = arith.addf %128, %130 : vector<160x128xf32>
    %132 = vector.extract_strided_slice %131 {offsets = [2, 0], sizes = [158, 128], strides = [1, 1]} : vector<160x128xf32> to vector<158x128xf32>
    %133 = vector.extract_strided_slice %131 {offsets = [0, 0], sizes = [2, 128], strides = [1, 1]} : vector<160x128xf32> to vector<2x128xf32>
    %134 = tpu.concatenate %132, %133 in 0 : vector<158x128xf32>, vector<2x128xf32> -> vector<160x128xf32>
    %135 = vector.extract_strided_slice %131 {offsets = [4, 0], sizes = [156, 128], strides = [1, 1]} : vector<160x128xf32> to vector<156x128xf32>
    %136 = vector.extract_strided_slice %131 {offsets = [0, 0], sizes = [4, 128], strides = [1, 1]} : vector<160x128xf32> to vector<4x128xf32>
    %137 = tpu.concatenate %135, %136 in 0 : vector<156x128xf32>, vector<4x128xf32> -> vector<160x128xf32>
    %138 = arith.maximumf %134, %137 : vector<160x128xf32>
    %139 = arith.maximumf %131, %138 : vector<160x128xf32>
    %cst_44 = arith.constant 0.000000e+00 : f32
    %140 = vector.broadcast %cst_44 : f32 to vector<160x128xf32>
    %141 = arith.maximumf %139, %140 : vector<160x128xf32>
    %c0_45 = arith.constant 0 : index
    %c0_46 = arith.constant 0 : index
    %142 = vector.load %arg5[%c0_45, %c0_46] : memref<160x128xf32, #tpu.memory_space<vmem>>, vector<160x128xf32>
    tpu.vector_store %arg5[%c0_45, %c0_46], %141 {strides = array<i32>} : memref<160x128xf32, #tpu.memory_space<vmem>>, vector<160x128xf32>,
    %c0_47 = arith.constant 0 : index
    %c0_48 = arith.constant 0 : index
    %143 = tpu.strided_load %arg5[%c0_47, %c0_48] {strides = array<i32: 3, 1>} : memref<160x128xf32, #tpu.memory_space<vmem>>, vector<24x128xf32>
    %144 = vector.extract_strided_slice %143 {offsets = [0, 0], sizes = [24, 50], strides = [1, 1]} : vector<24x128xf32> to vector<24x50xf32>
    %c0_49 = arith.constant 0 : index
    %c75 = arith.constant 75 : index
    %c0_50 = arith.constant 0 : index
    %145 = vector.load %arg4[%c0_49, %c75, %c0_50] : memref<2x99x50xf32, #tpu.memory_space<vmem>>, vector<1x24x50xf32>
    %146 = vector.shape_cast %145 : vector<1x24x50xf32> to vector<24x50xf32>
    %147 = vector.shape_cast %144 : vector<24x50xf32> to vector<1x24x50xf32>
    tpu.vector_store %arg4[%c0_49, %c75, %c0_50], %147 {strides = array<i32>} : memref<2x99x50xf32, #tpu.memory_space<vmem>>, vector<1x24x50xf32>,
    %c80_51 = arith.constant 80 : index
    %c0_52 = arith.constant 0 : index
    %148 = tpu.strided_load %arg5[%c80_51, %c0_52] {strides = array<i32: 3, 1>} : memref<160x128xf32, #tpu.memory_space<vmem>>, vector<24x128xf32>
    %149 = vector.extract_strided_slice %148 {offsets = [0, 0], sizes = [24, 50], strides = [1, 1]} : vector<24x128xf32> to vector<24x50xf32>
    %c1_53 = arith.constant 1 : index
    %c75_54 = arith.constant 75 : index
    %c0_55 = arith.constant 0 : index
    %150 = vector.load %arg4[%c1_53, %c75_54, %c0_55] : memref<2x99x50xf32, #tpu.memory_space<vmem>>, vector<1x24x50xf32>
    %151 = vector.shape_cast %150 : vector<1x24x50xf32> to vector<24x50xf32>
    %152 = vector.shape_cast %149 : vector<24x50xf32> to vector<1x24x50xf32>
    tpu.vector_store %arg4[%c1_53, %c75_54, %c0_55], %152 {strides = array<i32>} : memref<2x99x50xf32, #tpu.memory_space<vmem>>, vector<1x24x50xf32>,
    return
  }
  func.func @transform_0(%arg0: i32) -> (i32, i32) {
    %c0_i32 = arith.constant 0 : i32
    %c0_i32_0 = arith.constant 0 : i32
    return %arg0, %c0_i32 : i32, i32
  }
  func.func @transform_1(%arg0: i32) -> (i32, i32) {
    %c0_i32 = arith.constant 0 : i32
    %c0_i32_0 = arith.constant 0 : i32
    %c0_i32_1 = arith.constant 0 : i32
    return %c0_i32, %c0_i32_0 : i32, i32
  }
  func.func @transform_2(%arg0: i32) -> (i32, i32) {
    %c0_i32 = arith.constant 0 : i32
    %c0_i32_0 = arith.constant 0 : i32
    %c0_i32_1 = arith.constant 0 : i32
    return %c0_i32, %c0_i32_0 : i32, i32
  }
  func.func @transform_3(%arg0: i32) -> (i32, i32, i32) {
    %c0_i32 = arith.constant 0 : i32
    %c0_i32_0 = arith.constant 0 : i32
    %c0_i32_1 = arith.constant 0 : i32
    return %arg0, %c0_i32, %c0_i32_0 : i32, i32, i32
  }
}

module attributes {stable_mosaic.version = 11 : i64} {
  func.func @mlp_kernel(%arg0: i32, %arg1: memref<2x1664xf32, #tpu.memory_space<vmem>>, %arg2: memref<1664x700xbf16, #tpu.memory_space<vmem>>, %arg3: memref<1x700xf32, #tpu.memory_space<vmem>>, %arg4: memref<2x700xf32, #tpu.memory_space<vmem>>, %arg5: memref<700x120xbf16, #tpu.memory_space<vmem>>, %arg6: memref<1x120xf32, #tpu.memory_space<vmem>>, %arg7: memref<2x120xf32, #tpu.memory_space<vmem>>, %arg8: memref<120x15xf32, #tpu.memory_space<vmem>>, %arg9: memref<1x15xf32, #tpu.memory_space<vmem>>, %arg10: memref<2x15xf32, #tpu.memory_space<vmem>>, %arg11: memref<2x700xf32, #tpu.memory_space<vmem>>) attributes {dimension_semantics = [#tpu.dimension_semantics<arbitrary>], iteration_bounds = array<i64: 3>, scalar_prefetch = 0 : i64, scratch_operands = 1 : i64, tpu.core_type = #tpu.core_type<tc>, window_params = [{transform_indices = @transform_0, window_bounds = array<i64: 2, 1664>}, {transform_indices = @transform_1, window_bounds = array<i64: 1664, 700>}, {pipeline_mode = #tpu.pipeline_mode<synchronous>, transform_indices = @transform_2, window_bounds = array<i64: 1, 700>}, {pipeline_mode = #tpu.pipeline_mode<synchronous>, transform_indices = @transform_3, window_bounds = array<i64: 2, 700>}, {pipeline_mode = #tpu.pipeline_mode<synchronous>, transform_indices = @transform_4, window_bounds = array<i64: 700, 120>}, {pipeline_mode = #tpu.pipeline_mode<synchronous>, transform_indices = @transform_5, window_bounds = array<i64: 1, 120>}, {pipeline_mode = #tpu.pipeline_mode<synchronous>, transform_indices = @transform_6, window_bounds = array<i64: 2, 120>}, {pipeline_mode = #tpu.pipeline_mode<synchronous>, transform_indices = @transform_7, window_bounds = array<i64: 120, 15>}, {pipeline_mode = #tpu.pipeline_mode<synchronous>, transform_indices = @transform_8, window_bounds = array<i64: 1, 15>}, {pipeline_mode = #tpu.pipeline_mode<synchronous>, transform_indices = @transform_9, window_bounds = array<i64: 2, 15>}]} {
    %c0_i32 = arith.constant 0 : i32
    %0 = arith.cmpi eq, %arg0, %c0_i32 : i32
    %1 = arith.extui %0 : i1 to i32
    %c0_i32_0 = arith.constant 0 : i32
    %2 = arith.cmpi ne, %1, %c0_i32_0 : i32
    scf.if %2 {
      %cst_9 = arith.constant 0.000000e+00 : f32
      %13 = vector.broadcast %cst_9 : f32 to vector<2x700xf32>
      %c0_10 = arith.constant 0 : index
      %c0_11 = arith.constant 0 : index
      %14 = vector.load %arg11[%c0_10, %c0_11] : memref<2x700xf32, #tpu.memory_space<vmem>>, vector<2x700xf32>
      tpu.vector_store %arg11[%c0_10, %c0_11], %13 {strides = array<i32>} : memref<2x700xf32, #tpu.memory_space<vmem>>, vector<2x700xf32>,
    } else {
    }
    %c0 = arith.constant 0 : index
    %c0_1 = arith.constant 0 : index
    %3 = vector.load %arg11[%c0, %c0_1] : memref<2x700xf32, #tpu.memory_space<vmem>>, vector<2x700xf32>
    %c0_2 = arith.constant 0 : index
    %c0_3 = arith.constant 0 : index
    %4 = vector.load %arg1[%c0_2, %c0_3] : memref<2x1664xf32, #tpu.memory_space<vmem>>, vector<2x1664xf32>
    %5 = arith.truncf %4 : vector<2x1664xf32> to vector<2x1664xbf16>
    %c0_4 = arith.constant 0 : index
    %c0_5 = arith.constant 0 : index
    %6 = vector.load %arg2[%c0_4, %c0_5] : memref<1664x700xbf16, #tpu.memory_space<vmem>>, vector<1664x700xbf16>
    %cst = arith.constant dense<0.000000e+00> : vector<2x700xf32>
    %7 = tpu.matmul %5, %6, %cst {dimension_numbers = #tpu.dot_dimension_numbers<[1], [0], [0], [1], [0, 0, 1, 1], [], []>} : vector<2x1664xbf16>, vector<1664x700xbf16>, vector<2x700xf32> -> vector<2x700xf32>
    %8 = arith.addf %3, %7 : vector<2x700xf32>
    %c0_6 = arith.constant 0 : index
    %c0_7 = arith.constant 0 : index
    %9 = vector.load %arg11[%c0_6, %c0_7] : memref<2x700xf32, #tpu.memory_space<vmem>>, vector<2x700xf32>
    tpu.vector_store %arg11[%c0_6, %c0_7], %8 {strides = array<i32>} : memref<2x700xf32, #tpu.memory_space<vmem>>, vector<2x700xf32>,
    %c2_i32 = arith.constant 2 : i32
    %10 = arith.cmpi eq, %arg0, %c2_i32 : i32
    %11 = arith.extui %10 : i1 to i32
    %c0_i32_8 = arith.constant 0 : i32
    %12 = arith.cmpi ne, %11, %c0_i32_8 : i32
    scf.if %12 {
      %c0_9 = arith.constant 0 : index
      %c0_10 = arith.constant 0 : index
      %13 = vector.load %arg11[%c0_9, %c0_10] : memref<2x700xf32, #tpu.memory_space<vmem>>, vector<2x700xf32>
      %c0_11 = arith.constant 0 : index
      %c0_12 = arith.constant 0 : index
      %14 = vector.load %arg3[%c0_11, %c0_12] : memref<1x700xf32, #tpu.memory_space<vmem>>, vector<1x700xf32>
      %15 = vector.broadcast %14 : vector<1x700xf32> to vector<2x700xf32>
      %16 = arith.addf %13, %15 : vector<2x700xf32>
      %cst_13 = arith.constant 0.000000e+00 : f32
      %17 = vector.broadcast %cst_13 : f32 to vector<2x700xf32>
      %18 = arith.maximumf %16, %17 : vector<2x700xf32>
      %c0_14 = arith.constant 0 : index
      %c0_15 = arith.constant 0 : index
      %19 = vector.load %arg4[%c0_14, %c0_15] : memref<2x700xf32, #tpu.memory_space<vmem>>, vector<2x700xf32>
      %20 = arith.mulf %18, %19 : vector<2x700xf32>
      %21 = arith.truncf %20 : vector<2x700xf32> to vector<2x700xbf16>
      %c0_16 = arith.constant 0 : index
      %c0_17 = arith.constant 0 : index
      %22 = vector.load %arg5[%c0_16, %c0_17] : memref<700x120xbf16, #tpu.memory_space<vmem>>, vector<700x120xbf16>
      %cst_18 = arith.constant dense<0.000000e+00> : vector<2x120xf32>
      %23 = tpu.matmul %21, %22, %cst_18 {dimension_numbers = #tpu.dot_dimension_numbers<[1], [0], [0], [1], [0, 0, 1, 1], [], []>} : vector<2x700xbf16>, vector<700x120xbf16>, vector<2x120xf32> -> vector<2x120xf32>
      %c0_19 = arith.constant 0 : index
      %c0_20 = arith.constant 0 : index
      %24 = vector.load %arg6[%c0_19, %c0_20] : memref<1x120xf32, #tpu.memory_space<vmem>>, vector<1x120xf32>
      %25 = vector.broadcast %24 : vector<1x120xf32> to vector<2x120xf32>
      %26 = arith.addf %23, %25 : vector<2x120xf32>
      %cst_21 = arith.constant 0.000000e+00 : f32
      %27 = vector.broadcast %cst_21 : f32 to vector<2x120xf32>
      %28 = arith.maximumf %26, %27 : vector<2x120xf32>
      %c0_22 = arith.constant 0 : index
      %c0_23 = arith.constant 0 : index
      %29 = vector.load %arg7[%c0_22, %c0_23] : memref<2x120xf32, #tpu.memory_space<vmem>>, vector<2x120xf32>
      %30 = arith.mulf %28, %29 : vector<2x120xf32>
      %c0_24 = arith.constant 0 : index
      %c0_25 = arith.constant 0 : index
      %31 = vector.load %arg8[%c0_24, %c0_25] : memref<120x15xf32, #tpu.memory_space<vmem>>, vector<120x15xf32>
      %cst_26 = arith.constant dense<0.000000e+00> : vector<2x15xf32>
      %32 = tpu.matmul %30, %31, %cst_26 {dimension_numbers = #tpu.dot_dimension_numbers<[1], [0], [0], [1], [0, 0, 1, 1], [], []>} : vector<2x120xf32>, vector<120x15xf32>, vector<2x15xf32> -> vector<2x15xf32>
      %c0_27 = arith.constant 0 : index
      %c0_28 = arith.constant 0 : index
      %33 = vector.load %arg9[%c0_27, %c0_28] : memref<1x15xf32, #tpu.memory_space<vmem>>, vector<1x15xf32>
      %34 = vector.broadcast %33 : vector<1x15xf32> to vector<2x15xf32>
      %35 = arith.addf %32, %34 : vector<2x15xf32>
      %c0_29 = arith.constant 0 : index
      %c0_30 = arith.constant 0 : index
      %36 = vector.load %arg10[%c0_29, %c0_30] : memref<2x15xf32, #tpu.memory_space<vmem>>, vector<2x15xf32>
      tpu.vector_store %arg10[%c0_29, %c0_30], %35 {strides = array<i32>} : memref<2x15xf32, #tpu.memory_space<vmem>>, vector<2x15xf32>,
    } else {
    }
    return
  }
  func.func @transform_0(%arg0: i32) -> (i32, i32) {
    %c0_i32 = arith.constant 0 : i32
    %c0_i32_0 = arith.constant 0 : i32
    return %c0_i32, %arg0 : i32, i32
  }
  func.func @transform_1(%arg0: i32) -> (i32, i32) {
    %c0_i32 = arith.constant 0 : i32
    %c0_i32_0 = arith.constant 0 : i32
    return %arg0, %c0_i32 : i32, i32
  }
  func.func @transform_2(%arg0: i32) -> (i32, i32) {
    %c0_i32 = arith.constant 0 : i32
    %c0_i32_0 = arith.constant 0 : i32
    %c0_i32_1 = arith.constant 0 : i32
    return %c0_i32, %c0_i32_0 : i32, i32
  }
  func.func @transform_3(%arg0: i32) -> (i32, i32) {
    %c0_i32 = arith.constant 0 : i32
    %c0_i32_0 = arith.constant 0 : i32
    %c0_i32_1 = arith.constant 0 : i32
    return %c0_i32, %c0_i32_0 : i32, i32
  }
  func.func @transform_4(%arg0: i32) -> (i32, i32) {
    %c0_i32 = arith.constant 0 : i32
    %c0_i32_0 = arith.constant 0 : i32
    %c0_i32_1 = arith.constant 0 : i32
    return %c0_i32, %c0_i32_0 : i32, i32
  }
  func.func @transform_5(%arg0: i32) -> (i32, i32) {
    %c0_i32 = arith.constant 0 : i32
    %c0_i32_0 = arith.constant 0 : i32
    %c0_i32_1 = arith.constant 0 : i32
    return %c0_i32, %c0_i32_0 : i32, i32
  }
  func.func @transform_6(%arg0: i32) -> (i32, i32) {
    %c0_i32 = arith.constant 0 : i32
    %c0_i32_0 = arith.constant 0 : i32
    %c0_i32_1 = arith.constant 0 : i32
    return %c0_i32, %c0_i32_0 : i32, i32
  }
  func.func @transform_7(%arg0: i32) -> (i32, i32) {
    %c0_i32 = arith.constant 0 : i32
    %c0_i32_0 = arith.constant 0 : i32
    %c0_i32_1 = arith.constant 0 : i32
    return %c0_i32, %c0_i32_0 : i32, i32
  }
  func.func @transform_8(%arg0: i32) -> (i32, i32) {
    %c0_i32 = arith.constant 0 : i32
    %c0_i32_0 = arith.constant 0 : i32
    %c0_i32_1 = arith.constant 0 : i32
    return %c0_i32, %c0_i32_0 : i32, i32
  }
  func.func @transform_9(%arg0: i32) -> (i32, i32) {
    %c0_i32 = arith.constant 0 : i32
    %c0_i32_0 = arith.constant 0 : i32
    %c0_i32_1 = arith.constant 0 : i32
    return %c0_i32, %c0_i32_0 : i32, i32
  }
}

</mosaic_0001>

<bundles_post_ra>
// kernel: tpu_custom_call.1
= control target key start
LH: loop header
LB: loop body
LE: loop exit
PB: predicated region body
PF: predicated region fallthrough
CT: control target
= control target key end

     0   :  { %6 = vsyncpa [#allocation3], 0  ;;  %s269_s0 = inlined_call_operand.hbm [shape: f32[160,128], index: 0, kind: input, shape index: {}]   ;;  %s270_s1 = inlined_call_operand.hbm [shape: f32[160,128], index: 1, kind: output, shape index: {}]  }
   0x1   :  { %7 = vsyncpa [#allocation4], 0  ;;  %s175_s6 = smov [#allocation2]   ;;  %s127_s10 = scalar_lea.hbm %s269_s0, 2560 }
   0x2   :  { %s13_s7 = sshll.u32 %s175_s6, 4  ;;  %p128_p0 = scmp.ne.s32.totalorder %s269_s0, %s127_s10  ;;  %s14_s7 = int_to_ptr.vmem [resolvable:$true] %s13_s7 }
   0x3   :  { %p131_p1 = scmp.lt.u32.totalorder %s127_s10, %s269_s0 }
   0x5   :  { %p133_p2 = pnand %p131_p1, %p128_p0 }
   0x7   :  { %136 = shalt.err (!%p133_p2)
}
   0x8   :  { %s137_s15 = scalar_lea.vmem %s14_s7, 2560  ;;  %p142_p4 = scmp.lt.s32.totalorder %s14_s7, %s14_s7 }
   0x9   :  { %p138_p3 = scmp.ne.s32.totalorder %s14_s7, %s137_s15  ;;  %p143_p5 = scmp.lt.s32.totalorder %s137_s15, %s137_s15 }
   0xb   :  { %p144_p6 = por %p143_p5, %p142_p4 }
   0xd   :  { %p145_p7 = pnand %p144_p6, %p138_p3 }
   0xf   :  { %148 = shalt.err (!%p145_p7)
}
  0x10   :  { %s176_s16 = smov 128   ;;  %s177_s17 = smov 8  }
  0x11   :  { %19 = dma.hbm_to_vmem [thread:$0]  %s269_s0, 2560, %s14_s7, [#allocation3], %s176_s16, %s176_s16, %s177_s17  }
  0x12   :  { %171 = dma.done.wait [#allocation3], 2560  }
  0x13   :  { %172 = vsyncadd [#allocation3], 4294964736  ;;  %v63_v0 = vlaneseq  ;;  %v206_v2 = vld [vmem:[#allocation2] sm:$0xff]  ;;  %v24_v3 = vld [vmem:[#allocation2 + $0x8] sm:$0xff]  ;;  %s178_s0 = smov [#allocation5]  }
  0x14   :  { %v25_v4 = vld [vmem:[#allocation2 + $0x10] sm:$0xff]  ;;  %v43_v5 = vrot.slane %v206_v2, 3  ;;  %v44_v6 = vrot.slane %v24_v3, 3  ;;  %v26_v8 = vld [vmem:[#allocation2 + $0x18] sm:$0xff]  ;;  %v27_v9 = vld [vmem:[#allocation2 + $0x20] sm:$0xff]  ;;  %s111_s20 = sshll.u32 %s178_s0, 4  ;;  %s112_s20 = int_to_ptr.vmem [resolvable:$true] %s111_s20 }
  0x15   :  { %v204_v1 = vshrl.u32 %v63_v0, 7  ;;  %v45_v7 = vrot.slane %v25_v4, 3  ;;  %v28_v10 = vld [vmem:[#allocation2 + $0x28] sm:$0xff]  ;;  %v46_v11 = vrot.slane %v26_v8, 3  ;;  %v47_v12 = vrot.slane %v27_v9, 3  ;;  %v29_v14 = vld [vmem:[#allocation2 + $0x30] sm:$0xff]  ;;  %p154_p9 = scmp.lt.s32.totalorder %s112_s20, %s112_s20 }
  0x16   :  { %v48_v13 = vrot.slane %v28_v10, 3  ;;  %v30_v15 = vld [vmem:[#allocation2 + $0x38] sm:$0xff]  ;;  %v31_v16 = vld [vmem:[#allocation2 + $0x40] sm:$0xff]  ;;  %v49_v19 = vrot.slane %v29_v14, 3  ;;  %v32_v21 = vld [vmem:[#allocation2 + $0x48] sm:$0xff]  ;;  %s149_s21 = scalar_lea.vmem %s112_s20, 2560 }
  0x17   :  { %vm65_vm0 = vcmp.lt.s32.totalorder %v204_v1, 5  ;;  %v50_v20 = vrot.slane %v30_v15, 3  ;;  %v33_v22 = vld [vmem:[#allocation2 + $0x50] sm:$0xff]  ;;  %v34_v23 = vld [vmem:[#allocation2 + $0x58] sm:$0xff]  ;;  %v51_v27 = vrot.slane %v31_v16, 3  ;;  %v35_v28 = vld [vmem:[#allocation2 + $0x60] sm:$0xff]  ;;  %p150_p8 = scmp.ne.s32.totalorder %s112_s20, %s149_s21  ;;  %p155_p10 = scmp.lt.s32.totalorder %s149_s21, %s149_s21 }
  0x18   :  { %v84_v17 = vsel %vm65_vm0, %v43_v5, %v44_v6  ;;  %v83_v18 = vsel %vm65_vm0, %v44_v6, %v45_v7  ;;  %v82_v24 = vsel %vm65_vm0, %v45_v7, %v46_v11  ;;  %v81_v25 = vsel %vm65_vm0, %v46_v11, %v47_v12  ;;  %v36_v29 = vld [vmem:[#allocation2 + $0x68] sm:$0xff]  ;;  %v37_v30 = vld [vmem:[#allocation2 + $0x70] sm:$0xff]  ;;  %v38_v35 = vld [vmem:[#allocation2 + $0x78] sm:$0xff] }
  0x19   :  { %86 = vst [vmem:[#allocation5] sm:$0xff] %v84_v17  ;;  %87 = vst [vmem:[#allocation5 + $0x8] sm:$0xff] %v83_v18  ;;  %v80_v26 = vsel %vm65_vm0, %v47_v12, %v48_v13  ;;  %v79_v31 = vsel %vm65_vm0, %v48_v13, %v49_v19  ;;  %v78_v32 = vsel %vm65_vm0, %v49_v19, %v50_v20  ;;  %v52_v33 = vrot.slane %v32_v21, 3  ;;  %v39_v36 = vld [vmem:[#allocation2 + $0x80] sm:$0xff]  ;;  %v40_v41 = vld [vmem:[#allocation2 + $0x88] sm:$0xff]  ;;  %p156_p11 = por %p155_p10, %p154_p9 }
  0x1a   :  { %88 = vst [vmem:[#allocation5 + $0x10] sm:$0xff] %v82_v24  ;;  %89 = vst [vmem:[#allocation5 + $0x18] sm:$0xff] %v81_v25  ;;  %v53_v34 = vrot.slane %v33_v22, 3  ;;  %v77_v37 = vsel %vm65_vm0, %v50_v20, %v51_v27  ;;  %v54_v38 = vrot.slane %v34_v23, 3  ;;  %v55_v39 = vrot.slane %v35_v28, 3  ;;  %v41_v42 = vld [vmem:[#allocation2 + $0x90] sm:$0xff] }
  0x1b   :  { %90 = vst [vmem:[#allocation5 + $0x20] sm:$0xff] %v80_v26  ;;  %91 = vst [vmem:[#allocation5 + $0x28] sm:$0xff] %v79_v31  ;;  %v56_v40 = vrot.slane %v36_v29, 3  ;;  %v76_v43 = vsel %vm65_vm0, %v51_v27, %v52_v33  ;;  %v57_v45 = vrot.slane %v37_v30, 3  ;;  %v58_v46 = vrot.slane %v38_v35, 3  ;;  %v42_v47 = vld [vmem:[#allocation2 + $0x98] sm:$0xff]  ;;  %p157_p12 = pnand %p156_p11, %p150_p8 }
  0x1c   :  { %92 = vst [vmem:[#allocation5 + $0x30] sm:$0xff] %v78_v32  ;;  %93 = vst [vmem:[#allocation5 + $0x38] sm:$0xff] %v77_v37  ;;  %v75_v44 = vsel %vm65_vm0, %v52_v33, %v53_v34  ;;  %v74_v48 = vsel %vm65_vm0, %v53_v34, %v54_v38  ;;  %v73_v49 = vsel %vm65_vm0, %v54_v38, %v55_v39  ;;  %v59_v51 = vrot.slane %v39_v36, 3 }
  0x1d   :  { %94 = vst [vmem:[#allocation5 + $0x40] sm:$0xff] %v76_v43  ;;  %95 = vst [vmem:[#allocation5 + $0x48] sm:$0xff] %v75_v44  ;;  %v72_v50 = vsel %vm65_vm0, %v55_v39, %v56_v40  ;;  %v71_v52 = vsel %vm65_vm0, %v56_v40, %v57_v45  ;;  %v70_v53 = vsel %vm65_vm0, %v57_v45, %v58_v46  ;;  %v60_v54 = vrot.slane %v40_v41, 3 }
  0x1e   :  { %96 = vst [vmem:[#allocation5 + $0x50] sm:$0xff] %v74_v48  ;;  %97 = vst [vmem:[#allocation5 + $0x58] sm:$0xff] %v73_v49  ;;  %v61_v55 = vrot.slane %v41_v42, 3  ;;  %v69_v56 = vsel %vm65_vm0, %v58_v46, %v59_v51  ;;  %v62_v57 = vrot.slane %v42_v47, 3 }
  0x1f   :  { %98 = vst [vmem:[#allocation5 + $0x60] sm:$0xff] %v72_v50  ;;  %99 = vst [vmem:[#allocation5 + $0x68] sm:$0xff] %v71_v52  ;;  %v68_v58 = vsel %vm65_vm0, %v59_v51, %v60_v54 }
  0x20   :  { %100 = vst [vmem:[#allocation5 + $0x70] sm:$0xff] %v70_v53  ;;  %101 = vst [vmem:[#allocation5 + $0x78] sm:$0xff] %v69_v56  ;;  %v67_v59 = vsel %vm65_vm0, %v60_v54, %v61_v55  ;;  %v66_v60 = vsel %vm65_vm0, %v61_v55, %v62_v57  ;;  %v85_v61 = vsel %vm65_vm0, %v62_v57, %v43_v5 }
  0x21   :  { %102 = vst [vmem:[#allocation5 + $0x80] sm:$0xff] %v68_v58  ;;  %103 = vst [vmem:[#allocation5 + $0x88] sm:$0xff] %v67_v59 }
  0x22   :  { %104 = vst [vmem:[#allocation5 + $0x90] sm:$0xff] %v66_v60  ;;  %105 = vst [vmem:[#allocation5 + $0x98] sm:$0xff] %v85_v61 }
  0x23   :  { %160 = shalt.err (!%p157_p12)
}
  0x24   :  { %s161_s24 = scalar_lea.hbm %s270_s1, 2560 }
  0x25   :  { %p162_p13 = scmp.ne.s32.totalorder %s270_s1, %s161_s24  ;;  %p165_p0 = scmp.lt.u32.totalorder %s161_s24, %s270_s1 }
  0x27   :  { %p167_p1 = pnand %p165_p0, %p162_p13 }
  0x29   :  { %170 = shalt.err (!%p167_p1)
}
  0x2a   :  { %117 = dma.vmem_to_hbm [thread:$0]  %s112_s20, 2560, %s270_s1, [#allocation4], %s176_s16, %s176_s16, %s177_s17  }
  0x2b   :  { %173 = dma.done.wait [#allocation4], 2560  }
  0x2c   :  { %174 = vsyncadd [#allocation4], 4294964736 }
  0x2d   :  { %121 = vsyncpa [#allocation3], 1 }
  0x2e   :  { %122 = vsyncpa [#allocation4], 1 }

// kernel: forward.2
= control target key start
LH: loop header
LB: loop body
LE: loop exit
PB: predicated region body
PF: predicated region fallthrough
CT: control target
= control target key end

     0   :  { %8 = vsyncpa [#allocation4], 0  ;;  %s10253_s0 = inlined_call_operand.vmem [shape: bf16[160,400], index: 0, kind: input, shape index: {}]   ;;  %s10254_s1 = inlined_call_operand.hbm [shape: bf16[400,1792], index: 1, kind: input, shape index: {}]   ;;  %s10255_s2 = inlined_call_operand.hbm [shape: f32[4,128], index: 2, kind: input, shape index: {}]   ;;  %s10256_s3 = inlined_call_operand.vmem [shape: f32[2,99,50], index: 3, kind: output, shape index: {}]  }
   0x1   :  { %9 = vsyncpa [#allocation6], 0  ;;  %s7838_s12 = smov [#allocation3]   ;;  %s7790_s16 = scalar_lea.hbm %s10254_s1, 44800 }
   0x2   :  { %s17_s13 = sshll.u32 %s7838_s12, 4  ;;  %p7791_p0 = scmp.ne.s32.totalorder %s10254_s1, %s7790_s16  ;;  %s18_s13 = int_to_ptr.vmem [resolvable:$true] %s17_s13 }
   0x3   :  { %p7794_p1 = scmp.lt.u32.totalorder %s7790_s16, %s10254_s1 }
   0x5   :  { %p7796_p2 = pnand %p7794_p1, %p7791_p0 }
   0x7   :  { %7799 = shalt.err (!%p7796_p2)
}
   0x8   :  { %s7800_s21 = scalar_lea.vmem %s18_s13, 44800  ;;  %p7805_p4 = scmp.lt.s32.totalorder %s18_s13, %s18_s13 }
   0x9   :  { %p7801_p3 = scmp.ne.s32.totalorder %s18_s13, %s7800_s21  ;;  %p7806_p5 = scmp.lt.s32.totalorder %s7800_s21, %s7800_s21 }
   0xb   :  { %p7807_p6 = por %p7806_p5, %p7805_p4 }
   0xd   :  { %p7808_p7 = pnand %p7807_p6, %p7801_p3 }
   0xf   :  { %7811 = shalt.err (!%p7808_p7)
}
  0x10   :  { %s7839_s22 = smov 896   ;;  %s7840_s23 = smov 56  }
  0x11   :  { %23 = dma.hbm_to_vmem [thread:$0]  %s10254_s1, 44800, %s18_s13, [#allocation4], %s7839_s22, %s7839_s22, %s7840_s23  }
  0x12   :  { %s7841_s26 = smov [#allocation5]   ;;  %s7812_s30 = scalar_lea.hbm %s10255_s2, 64 }
  0x13   :  { %s30_s27 = sshll.u32 %s7841_s26, 4  ;;  %p7813_p8 = scmp.ne.s32.totalorder %s10255_s2, %s7812_s30  ;;  %s31_s27 = int_to_ptr.vmem [resolvable:$true] %s30_s27 }
  0x14   :  { %p7816_p9 = scmp.lt.u32.totalorder %s7812_s30, %s10255_s2 }
  0x16   :  { %p7818_p10 = pnand %p7816_p9, %p7813_p8 }
  0x18   :  { %7821 = shalt.err (!%p7818_p10)
}
  0x19   :  { %s7822_s8 = scalar_lea.vmem %s31_s27, 64  ;;  %p7827_p12 = scmp.lt.s32.totalorder %s31_s27, %s31_s27 }
  0x1a   :  { %p7823_p11 = scmp.ne.s32.totalorder %s31_s27, %s7822_s8  ;;  %p7828_p13 = scmp.lt.s32.totalorder %s7822_s8, %s7822_s8 }
  0x1c   :  { %p7829_p0 = por %p7828_p13, %p7827_p12 }
  0x1e   :  { %p7830_p1 = pnand %p7829_p0, %p7823_p11 }
  0x20   :  { %7833 = shalt.err (!%p7830_p1)
}
  0x21   :  { %33 = dma.hbm_to_vmem [thread:$0]  %s10255_s2, 64, %s31_s27, [#allocation6]  }
  0x22   :  { %7834 = dma.done.wait [#allocation4], 44800  }
  0x23   :  { %7835 = vsyncadd [#allocation4], 4294922496 }
  0x24   :  { %7836 = dma.done.wait [#allocation6], 64  }
  0x25   :  { %7837 = vsyncadd [#allocation6], 4294967232  ;;  %v7105_v0 = vld [vmem:[#allocation3 + $0x4] ss:$56 sps:$4 sm:$0xff]   ;;  %v7109_v2 = vld [vmem:[#allocation3] ss:$56 sps:$4 sm:$0xff]  }
  0x26   :  { %v7107_v1 = vld [vmem:[#allocation3 + $0x704] ss:$56 sps:$4 sm:$0xff]   ;;  %2402 = vmatprep.subr.bf16.mxu1 %v7105_v0  ;;  %v7110_v3 = vld [vmem:[#allocation3 + $0x700] ss:$56 sps:$4 sm:$0xff]   ;;  %v7111_v4 = vld [vmem:[#allocation3 + $0x74] ss:$56 sps:$4 sm:$0xff]  }
  0x27   :  { %2535 = vmatprep.subr.bf16.mxu0 %v7107_v1  ;;  %2403 = vmatpush1.bf16.msra.mxu1 %v7109_v2  ;;  %v7113_v5 = vld [vmem:[#allocation3 + $0x774] ss:$56 sps:$4 sm:$0xff]   ;;  %v7115_v6 = vld [vmem:[#allocation3 + $0x70] ss:$56 sps:$4 sm:$0xff]   ;;  %v7117_v8 = vld [vmem:[#allocation3 + $0xe4] ss:$56 sps:$4 sm:$0xff]  }
  0x28   :  { %2536 = vmatpush1.bf16.msra.mxu0 %v7110_v3  ;;  %2404 = vmatprep.subr.bf16.mxu1 %v7111_v4  ;;  %v7116_v7 = vld [vmem:[#allocation3 + $0x770] ss:$56 sps:$4 sm:$0xff]   ;;  %v7119_v9 = vld [vmem:[#allocation3 + $0x7e4] ss:$56 sps:$4 sm:$0xff]   ;;  %v7121_v10 = vld [vmem:[#allocation3 + $0xe0] ss:$56 sps:$4 sm:$0xff]  }
  0x29   :  { %2537 = vmatprep.subr.bf16.mxu0 %v7113_v5  ;;  %v7122_v11 = vld [vmem:[#allocation3 + $0x7e0] ss:$56 sps:$4 sm:$0xff]   ;;  %v7123_v12 = vld [vmem:[#allocation3 + $0x154] ss:$56 sps:$4 sm:$0xff]   ;;  %v7127_v14 = vld [vmem:[#allocation3 + $0x150] ss:$56 sps:$4 sm:$0xff]  }
  0x2a   :  { %v7125_v13 = vld [vmem:[#allocation3 + $0x854] ss:$56 sps:$4 sm:$0xff]   ;;  %v7128_v15 = vld [vmem:[#allocation3 + $0x850] ss:$56 sps:$4 sm:$0xff]   ;;  %v7129_v16 = vld [vmem:[#allocation3 + $0x1c4] ss:$56 sps:$4 sm:$0xff]  }
  0x2b   :  { %2405 = vmatpush1.bf16.msra.mxu1 %v7115_v6  ;;  %v7131_v17 = vld [vmem:[#allocation3 + $0x8c4] ss:$56 sps:$4 sm:$0xff]   ;;  %v7133_v18 = vld [vmem:[#allocation3 + $0x1c0] ss:$56 sps:$4 sm:$0xff]   ;;  %v7135_v20 = vld [vmem:[#allocation3 + $0x234] ss:$56 sps:$4 sm:$0xff]  }
  0x2c   :  { %2538 = vmatpush1.bf16.msra.mxu0 %v7116_v7  ;;  %2406 = vmatprep.subr.bf16.mxu1 %v7117_v8  ;;  %v7134_v19 = vld [vmem:[#allocation3 + $0x8c0] ss:$56 sps:$4 sm:$0xff]   ;;  %v7137_v21 = vld [vmem:[#allocation3 + $0x934] ss:$56 sps:$4 sm:$0xff]   ;;  %v7139_v22 = vld [vmem:[#allocation3 + $0x230] ss:$56 sps:$4 sm:$0xff]  }
  0x2d   :  { %2539 = vmatprep.subr.bf16.mxu0 %v7119_v9  ;;  %v7140_v23 = vld [vmem:[#allocation3 + $0x930] ss:$56 sps:$4 sm:$0xff]   ;;  %v7141_v24 = vld [vmem:[#allocation3 + $0x2a4] ss:$56 sps:$4 sm:$0xff]   ;;  %vm2371_vm0 = vcmask 130048   ;;  %vm4284_vm1 = vcmask 1046528  }
  0x2e   :  { %v7143_v25 = vld [vmem:[#allocation3 + $0x9a4] ss:$56 sps:$4 sm:$0xff]   ;;  %v7145_v26 = vld [vmem:[#allocation3 + $0x2a0] ss:$56 sps:$4 sm:$0xff]   ;;  %v7147_v28 = vld [vmem:[#allocation3 + $0x314] ss:$56 sps:$4 sm:$0xff]  }
  0x2f   :  { %2407 = vmatpush1.bf16.msra.mxu1 %v7121_v10  ;;  %v7146_v27 = vld [vmem:[#allocation3 + $0x9a0] ss:$56 sps:$4 sm:$0xff]   ;;  %v7159_v29 = vld [vmem:[%s10253_s0 + $0xc] ss:$16 sps:$4 sm:$0xff]   ;;  %v7151_v31 = vld [vmem:[#allocation3 + $0x310] ss:$56 sps:$4 sm:$0xff]  }
  0x30   :  { %2540 = vmatpush1.bf16.msra.mxu0 %v7122_v11  ;;  %2408 = vmatprep.subr.bf16.mxu1 %v7123_v12  ;;  %v7149_v30 = vld [vmem:[#allocation3 + $0xa14] ss:$56 sps:$4 sm:$0xff]   ;;  %v7152_v32 = vld [vmem:[#allocation3 + $0xa10] ss:$56 sps:$4 sm:$0xff]   ;;  %v7153_v33 = vld [vmem:[#allocation3 + $0x384] ss:$56 sps:$4 sm:$0xff]  }
  0x31   :  { %2541 = vmatprep.subr.bf16.mxu0 %v7125_v13  ;;  %6732 = vmatprep.mubr.msk.bf16.mxu0 %vm2371_vm0, %v7159_v29  ;;  %v7155_v34 = vld [vmem:[#allocation3 + $0xa84] ss:$56 sps:$4 sm:$0xff]   ;;  %v7157_v35 = vld [vmem:[#allocation3 + $0x380] ss:$56 sps:$4 sm:$0xff]   ;;  %v7161_v37 = vld [vmem:[#allocation3 + $0x3f4] ss:$56 sps:$4 sm:$0xff]  }
  0x32   :  { %v7158_v36 = vld [vmem:[#allocation3 + $0xa80] ss:$56 sps:$4 sm:$0xff]   ;;  %v7164_v39 = vld [vmem:[#allocation3 + $0x3f0] ss:$56 sps:$4 sm:$0xff]   ;;  %v7165_v40 = vld [vmem:[#allocation3 + $0x464] ss:$56 sps:$4 sm:$0xff]  }
  0x33   :  { %2409 = vmatpush1.bf16.msra.mxu1 %v7127_v14  ;;  %v7163_v38 = vld [vmem:[%s10253_s0 + $0x8] ss:$16 sps:$4 sm:$0xff]   ;;  %v7184_v41 = vld [vmem:[#allocation3 + $0x14] ss:$56 sps:$4 sm:$0xff]   ;;  %v7190_v44 = vld [vmem:[#allocation3 + $0x84] ss:$56 sps:$4 sm:$0xff]  }
  0x34   :  { %2542 = vmatpush1.bf16.msra.mxu0 %v7128_v15  ;;  %2410 = vmatprep.subr.bf16.mxu1 %v7129_v16  ;;  %v7168_v42 = vld [vmem:[%s10253_s0 + $0x2c] ss:$16 sps:$4 sm:$0xff]   ;;  %v7182_v43 = vld [vmem:[#allocation3 + $0x10] ss:$56 sps:$4 sm:$0xff]   ;;  %v7167_v45 = vld [vmem:[#allocation3 + $0x460] ss:$56 sps:$4 sm:$0xff]  }
  0x35   :  { %2543 = vmatprep.subr.bf16.mxu0 %v7131_v17  ;;  %v7170_v46 = vld [vmem:[#allocation3 + $0x4d4] ss:$56 sps:$4 sm:$0xff]   ;;  %v7172_v47 = vld [vmem:[%s10253_s0 + $0x28] ss:$16 sps:$4 sm:$0xff]   ;;  %v7174_v51 = vld [vmem:[#allocation3 + $0x544] ss:$56 sps:$4 sm:$0xff]  }
  0x36   :  { %v7188_v48 = vld [vmem:[#allocation3 + $0x80] ss:$56 sps:$4 sm:$0xff]   ;;  %v7173_v49 = vld [vmem:[#allocation3 + $0x4d0] ss:$56 sps:$4 sm:$0xff]   ;;  %v7199_v50 = vld [vmem:[#allocation3 + $0xf4] ss:$56 sps:$4 sm:$0xff]  }
  0x37   :  { %2411 = vmatpush1.bf16.msra.mxu1 %v7133_v18  ;;  %v7903_v52 = vld [vmem:[%s10253_s0 + $0x4] ss:$16 sps:$4 sm:$0xff]   ;;  %v7177_v53 = vld [vmem:[%s10253_s0 + $0x4c] ss:$16 sps:$4 sm:$0xff]   ;;  %v7197_v54 = vld [vmem:[#allocation3 + $0xf0] ss:$56 sps:$4 sm:$0xff]  }
  0x38   :  { %2544 = vmatpush1.bf16.msra.mxu0 %v7134_v19  ;;  %2412 = vmatprep.subr.bf16.mxu1 %v7135_v20  ;;  %v7209_v55 = vld [vmem:[#allocation3 + $0x164] ss:$56 sps:$4 sm:$0xff]   ;;  %v7176_v56 = vld [vmem:[#allocation3 + $0x540] ss:$56 sps:$4 sm:$0xff]   ;;  %v7179_v57 = vld [vmem:[#allocation3 + $0x5b4] ss:$56 sps:$4 sm:$0xff]  }
  0x39   :  { %2545 = vmatprep.subr.bf16.mxu0 %v7137_v21  ;;  %2434 = vmatprep.mubr.bf16.mxu1 %v7903_v52  ;;  %v7207_v58 = vld [vmem:[#allocation3 + $0x160] ss:$56 sps:$4 sm:$0xff]   ;;  %v7215_v60 = vld [vmem:[#allocation3 + $0x1d4] ss:$56 sps:$4 sm:$0xff]   ;;  %v7185_v61 = vld [vmem:[#allocation3 + $0x5b0] ss:$56 sps:$4 sm:$0xff]  }
  0x3a   :  { %v7181_v59 = vld [vmem:[%s10253_s0 + $0x48] ss:$16 sps:$4 sm:$0xff]   ;;  %v7186_v62 = vld [vmem:[#allocation3 + $0x624] ss:$56 sps:$4 sm:$0xff]   ;;  %v7194_v3 = vld [vmem:[#allocation3 + $0x694] ss:$56 sps:$4 sm:$0xff]  }
  0x3b   :  { %2413 = vmatpush1.bf16.msra.mxu1 %v7139_v22  ;;  %v7192_v63 = vld [vmem:[%s10253_s0 + $0x6c] ss:$16 sps:$4 sm:$0xff]   ;;  %v7213_v0 = vld [vmem:[#allocation3 + $0x1d0] ss:$56 sps:$4 sm:$0xff]   ;;  %v7191_v2 = vld [vmem:[#allocation3 + $0x620] ss:$56 sps:$4 sm:$0xff]  }
  0x3c   :  { %2546 = vmatpush1.bf16.msra.mxu0 %v7140_v23  ;;  %2414 = vmatprep.subr.bf16.mxu1 %v7141_v24  ;;  %v7224_v1 = vld [vmem:[#allocation3 + $0x244] ss:$56 sps:$4 sm:$0xff]   ;;  %v7222_v4 = vld [vmem:[#allocation3 + $0x240] ss:$56 sps:$4 sm:$0xff]   ;;  %v7233_v5 = vld [vmem:[#allocation3 + $0x2b4] ss:$56 sps:$4 sm:$0xff]  }
  0x3d   :  { %2547 = vmatprep.subr.bf16.mxu0 %v7143_v25  ;;  %v7196_v6 = vld [vmem:[%s10253_s0 + $0x68] ss:$16 sps:$4 sm:$0xff]   ;;  %v7206_v8 = vld [vmem:[#allocation3 + $0xc] ss:$56 sps:$4 sm:$0xff]   ;;  %v7926_v11 = vld [vmem:[%s10253_s0] ss:$16 sps:$4 sm:$0xff]  }
  0x3e   :  { %v7200_v7 = vld [vmem:[#allocation3 + $0x690] ss:$56 sps:$4 sm:$0xff]   ;;  %v7210_v9 = vld [vmem:[%s10253_s0 + $0x8c] ss:$16 sps:$4 sm:$0xff]   ;;  %v7932_v15 = vld [vmem:[%s10253_s0 + $0x24] ss:$16 sps:$4 sm:$0xff]  }
  0x3f   :  { %2415 = vmatpush1.bf16.msra.mxu1 %v7145_v26  ;;  %v7231_v10 = vld [vmem:[#allocation3 + $0x2b0] ss:$56 sps:$4 sm:$0xff]   ;;  %v7242_v12 = vld [vmem:[#allocation3 + $0x324] ss:$56 sps:$4 sm:$0xff]   ;;  %v7240_v16 = vld [vmem:[#allocation3 + $0x320] ss:$56 sps:$4 sm:$0xff]  }
  0x40   :  { %2548 = vmatpush1.bf16.msra.mxu0 %v7146_v27  ;;  %2416 = vmatprep.subr.bf16.mxu1 %v7147_v28  ;;  %v7204_v13 = vld [vmem:[#allocation3 + $0x8] ss:$56 sps:$4 sm:$0xff]   ;;  %v7218_v14 = vld [vmem:[#allocation3 + $0x7c] ss:$56 sps:$4 sm:$0xff]   ;;  %v7216_v19 = vld [vmem:[#allocation3 + $0x78] ss:$56 sps:$4 sm:$0xff]  }
  0x41   :  { %2549 = vmatprep.subr.bf16.mxu0 %v7149_v30  ;;  %v7212_v17 = vld [vmem:[%s10253_s0 + $0x88] ss:$16 sps:$4 sm:$0xff]   ;;  %v7251_v18 = vld [vmem:[#allocation3 + $0x394] ss:$56 sps:$4 sm:$0xff]   ;;  %v7945_v23 = vld [vmem:[%s10253_s0 + $0x20] ss:$16 sps:$4 sm:$0xff]  }
  0x42   :  { %v7227_v20 = vld [vmem:[#allocation3 + $0xec] ss:$56 sps:$4 sm:$0xff]   ;;  %v7249_v22 = vld [vmem:[#allocation3 + $0x390] ss:$56 sps:$4 sm:$0xff]   ;;  %v7238_v27 = vld [vmem:[#allocation3 + $0x15c] ss:$56 sps:$4 sm:$0xff]  }
  0x43   :  { %2417 = vmatpush1.bf16.msra.mxu1 %v7151_v31  ;;  %v7228_v21 = vld [vmem:[%s10253_s0 + $0xac] ss:$16 sps:$4 sm:$0xff]   ;;  %v7225_v25 = vld [vmem:[#allocation3 + $0xe8] ss:$56 sps:$4 sm:$0xff]   ;;  %v7950_v26 = vld [vmem:[%s10253_s0 + $0x44] ss:$16 sps:$4 sm:$0xff]  }
  0x44   :  { %2550 = vmatpush1.bf16.msra.mxu0 %v7152_v32  ;;  %2418 = vmatprep.subr.bf16.mxu1 %v7153_v33  ;;  %v7257_v24 = vld [vmem:[#allocation3 + $0x404] ss:$56 sps:$4 sm:$0xff]   ;;  %v7255_v28 = vld [vmem:[#allocation3 + $0x400] ss:$56 sps:$4 sm:$0xff]   ;;  %v7266_v30 = vld [vmem:[#allocation3 + $0x474] ss:$56 sps:$4 sm:$0xff]  }
  0x45   :  { %2551 = vmatprep.subr.bf16.mxu0 %v7155_v34  ;;  %v7230_v29 = vld [vmem:[%s10253_s0 + $0xa8] ss:$16 sps:$4 sm:$0xff]   ;;  %v7243_v32 = vld [vmem:[%s10253_s0 + $0xcc] ss:$16 sps:$4 sm:$0xff]   ;;  %vm4411_vm2 = vcmask 1045504   ;;  %vm4473_vm3 = vcmask 1043456  }
  0x46   :  { %v7236_v31 = vld [vmem:[#allocation3 + $0x158] ss:$56 sps:$4 sm:$0xff]   ;;  %v7248_v33 = vld [vmem:[#allocation3 + $0x1cc] ss:$56 sps:$4 sm:$0xff]   ;;  %vm4622_vm4 = vcmask 408576   ;;  %vm4626_vm5 = vcmask 401408  }
  0x47   :  { %2419 = vmatpush1.bf16.msra.mxu1 %v7157_v35  ;;  %v7264_v34 = vld [vmem:[#allocation3 + $0x470] ss:$56 sps:$4 sm:$0xff]   ;;  %vm5328_vm6 = vcmask 1044480  }
  0x48   :  { %2552 = vmatpush1.bf16.msra.mxu0 %v7158_v36  ;;  %2420 = vmatprep.subr.bf16.mxu1 %v7161_v37  ;;  %v7964_v35 = vld [vmem:[%s10253_s0 + $0x40] ss:$16 sps:$4 sm:$0xff]   ;;  %v7275_v36 = vld [vmem:[#allocation3 + $0x4e4] ss:$56 sps:$4 sm:$0xff]  }
  0x49   :  { %2934 = vmatprep.subr.bf16.mxu0 %v7184_v41  ;;  %v7246_v37 = vld [vmem:[#allocation3 + $0x1c8] ss:$56 sps:$4 sm:$0xff]  }
  0x4a   :  { %v7245_v41 = vld [vmem:[%s10253_s0 + $0xc8] ss:$16 sps:$4 sm:$0xff]  }
  0x4b   :  { %2568 = vmatmul.mubr.bf16.vlgmr.msra.gmra.mrb[0].mxu0 %v7163_v38  ;;  %2421 = vmatpush1.bf16.msra.mxu1 %v7164_v39  ;;  %v7969_v38 = vld [vmem:[%s10253_s0 + $0x64] ss:$16 sps:$4 sm:$0xff]  }
  0x4c   :  { %6733 = vmatprep.mubr.msk.bf16.mxu0 %vm2371_vm0, %v7168_v42  ;;  %2422 = vmatprep.subr.bf16.mxu1 %v7165_v40  ;;  %v7260_v39 = vld [vmem:[#allocation3 + $0x23c] ss:$56 sps:$4 sm:$0xff]   ;;  %v7273_v40 = vld [vmem:[#allocation3 + $0x4e0] ss:$56 sps:$4 sm:$0xff]  }
  0x4d   :  { %2935 = vmatpush1.bf16.msra.mxu0 %v7182_v43  ;;  %v7284_v42 = vld [vmem:[#allocation3 + $0x554] ss:$56 sps:$4 sm:$0xff]   ;;  %v7258_v43 = vld [vmem:[#allocation3 + $0x238] ss:$56 sps:$4 sm:$0xff]  }
  0x4e   :  { %2936 = vmatprep.subr.bf16.mxu0 %v7190_v44  ;;  %v7261_v44 = vld [vmem:[%s10253_s0 + $0xec] ss:$16 sps:$4 sm:$0xff]  }
  0x4f   :  { %2423 = vmatpush1.bf16.msra.mxu1 %v7167_v45  ;;  %v7269_v45 = vld [vmem:[#allocation3 + $0x2ac] ss:$56 sps:$4 sm:$0xff]  }
  0x50   :  { %2424 = vmatprep.subr.bf16.mxu1 %v7170_v46  ;;  %v7282_v46 = vld [vmem:[#allocation3 + $0x550] ss:$56 sps:$4 sm:$0xff]  }
  0x51   :  { %2937 = vmatpush1.bf16.msra.mxu0 %v7188_v48  ;;  %v7293_v48 = vld [vmem:[#allocation3 + $0x5c4] ss:$56 sps:$4 sm:$0xff]  }
  0x52   :  { %2938 = vmatprep.subr.bf16.mxu0 %v7199_v50  ;;  %v7988_v50 = vld [vmem:[%s10253_s0 + $0x84] ss:$16 sps:$4 sm:$0xff]  }
  0x53   :  { %2578 = vmatmul.mubr.bf16.gmra.mrb[4].mxu0 %v7172_v47  ;;  %2425 = vmatpush1.bf16.msra.mxu1 %v7173_v49  ;;  %v7983_v47 = vld [vmem:[%s10253_s0 + $0x60] ss:$16 sps:$4 sm:$0xff]  }
  0x54   :  { %6734 = vmatprep.mubr.msk.bf16.mxu0 %vm2371_vm0, %v7177_v53  ;;  %2426 = vmatprep.subr.bf16.mxu1 %v7174_v51  ;;  %v7267_v49 = vld [vmem:[#allocation3 + $0x2a8] ss:$56 sps:$4 sm:$0xff]   ;;  %v7280_v51 = vld [vmem:[#allocation3 + $0x31c] ss:$56 sps:$4 sm:$0xff]  }
  0x55   :  { %2939 = vmatpush1.bf16.msra.mxu0 %v7197_v54  ;;  %v7291_v53 = vld [vmem:[#allocation3 + $0x5c0] ss:$56 sps:$4 sm:$0xff]  }
  0x56   :  { %2940 = vmatprep.subr.bf16.mxu0 %v7209_v55  ;;  %v7263_v54 = vld [vmem:[%s10253_s0 + $0xe8] ss:$16 sps:$4 sm:$0xff]   ;;  %v7299_v55 = vld [vmem:[#allocation3 + $0x634] ss:$56 sps:$4 sm:$0xff]  }
  0x57   :  { %2427 = vmatpush1.bf16.msra.mxu1 %v7176_v56  ;;  %v7276_v56 = vld [vmem:[%s10253_s0 + $0x10c] ss:$16 sps:$4 sm:$0xff]  }
  0x58   :  { %2428 = vmatprep.subr.bf16.mxu1 %v7179_v57  ;;  %v7278_v57 = vld [vmem:[#allocation3 + $0x318] ss:$56 sps:$4 sm:$0xff]  }
  0x59   :  { %2941 = vmatpush1.bf16.msra.mxu0 %v7207_v58  ;;  %v7290_v58 = vld [vmem:[#allocation3 + $0x38c] ss:$56 sps:$4 sm:$0xff]  }
  0x5a   :  { %2942 = vmatprep.subr.bf16.mxu0 %v7215_v60  ;;  %v8002_v60 = vld [vmem:[%s10253_s0 + $0x80] ss:$16 sps:$4 sm:$0xff]  }
  0x5b   :  { %2588 = vmatmul.mubr.bf16.gmra.mrb[8].mxu0 %v7181_v59  ;;  %2429 = vmatpush1.bf16.msra.mxu1 %v7185_v61  ;;  %v7297_v59 = vld [vmem:[#allocation3 + $0x630] ss:$56 sps:$4 sm:$0xff]   ;;  %v7308_v61 = vld [vmem:[#allocation3 + $0x6a4] ss:$56 sps:$4 sm:$0xff]  }
  0x5c   :  { %6735 = vmatprep.mubr.msk.bf16.mxu0 %vm2371_vm0, %v7192_v63  ;;  %2430 = vmatprep.subr.bf16.mxu1 %v7186_v62  ;;  %v8007_v62 = vld [vmem:[%s10253_s0 + $0xa4] ss:$16 sps:$4 sm:$0xff]   ;;  %v7288_v63 = vld [vmem:[#allocation3 + $0x388] ss:$56 sps:$4 sm:$0xff]  }
  0x5d   :  { %2943 = vmatpush1.bf16.msra.mxu0 %v7213_v0  ;;  %v7302_v0 = vld [vmem:[#allocation3 + $0x3fc] ss:$56 sps:$4 sm:$0xff]  }
  0x5e   :  { %2944 = vmatprep.subr.bf16.mxu0 %v7224_v1  ;;  %v7306_v1 = vld [vmem:[#allocation3 + $0x6a0] ss:$56 sps:$4 sm:$0xff]  }
  0x5f   :  { %2431 = vmatpush1.bf16.msra.mxu1 %v7191_v2  ;;  %v7281_v2 = vld [vmem:[%s10253_s0 + $0x108] ss:$16 sps:$4 sm:$0xff]  }
  0x60   :  { %2432 = vmatprep.subr.bf16.mxu1 %v7194_v3  ;;  %v7294_v3 = vld [vmem:[%s10253_s0 + $0x12c] ss:$16 sps:$4 sm:$0xff]  }
  0x61   :  { %2945 = vmatpush1.bf16.msra.mxu0 %v7222_v4  ;;  %v7300_v4 = vld [vmem:[#allocation3 + $0x3f8] ss:$56 sps:$4 sm:$0xff]  }
  0x62   :  { %2946 = vmatprep.subr.bf16.mxu0 %v7233_v5  ;;  %v7311_v5 = vld [vmem:[#allocation3 + $0x46c] ss:$56 sps:$4 sm:$0xff]  }
  0x63   :  { %2598 = vmatmul.mubr.bf16.gmra.mrb[12].mxu0 %v7196_v6  ;;  %2433 = vmatpush1.bf16.msra.mxu1 %v7200_v7  ;;  %v8021_v6 = vld [vmem:[%s10253_s0 + $0xa0] ss:$16 sps:$4 sm:$0xff]   ;;  %v8026_v7 = vld [vmem:[%s10253_s0 + $0xc4] ss:$16 sps:$4 sm:$0xff]  }
  0x64   :  { %6736 = vmatprep.mubr.msk.bf16.mxu0 %vm2371_vm0, %v7210_v9  ;;  %2668 = vmatprep.subr.bf16.mxu1 %v7206_v8  ;;  %v7309_v8 = vld [vmem:[#allocation3 + $0x468] ss:$56 sps:$4 sm:$0xff]   ;;  %v7316_v9 = vld [vmem:[#allocation3 + $0x4dc] ss:$56 sps:$4 sm:$0xff]  }
  0x65   :  { %2947 = vmatpush1.bf16.msra.mxu0 %v7231_v10  ;;  %v7341_v10 = vld [vmem:[#allocation3 + $0x714] ss:$56 sps:$4 sm:$0xff]  }
  0x66   :  { %2948 = vmatprep.subr.bf16.mxu0 %v7242_v12  ;;  %2435 = vmatmul.mubr.bf16.vlgmr.msra.gmra.mrb[0].mxu1 %v7926_v11  ;;  %v7296_v12 = vld [vmem:[%s10253_s0 + $0x128] ss:$16 sps:$4 sm:$0xff]  }
  0x67   :  { %2669 = vmatpush1.bf16.msra.mxu1 %v7204_v13  ;;  %2444 = vmatprep.mubr.bf16.mxu1 %v7932_v15  ;;  %v7314_v13 = vld [vmem:[#allocation3 + $0x4d8] ss:$56 sps:$4 sm:$0xff]  }
  0x68   :  { %2670 = vmatprep.subr.bf16.mxu1 %v7218_v14  ;;  %v7320_v14 = vld [vmem:[#allocation3 + $0x54c] ss:$56 sps:$4 sm:$0xff]  }
  0x69   :  { %2949 = vmatpush1.bf16.msra.mxu0 %v7240_v16  ;;  %v8037_v16 = vld [vmem:[%s10253_s0 + $0xc0] ss:$16 sps:$4 sm:$0xff]  }
  0x6a   :  { %2950 = vmatprep.subr.bf16.mxu0 %v7251_v18  ;;  %v7318_v18 = vld [vmem:[#allocation3 + $0x548] ss:$56 sps:$4 sm:$0xff]  }
  0x6b   :  { %2608 = vmatmul.mubr.bf16.gmra.mrb[16].mxu0 %v7212_v17  ;;  %2671 = vmatpush1.bf16.msra.mxu1 %v7216_v19  ;;  %v8042_v17 = vld [vmem:[%s10253_s0 + $0xe4] ss:$16 sps:$4 sm:$0xff]  }
  0x6c   :  { %6737 = vmatprep.mubr.msk.bf16.mxu0 %vm2371_vm0, %v7228_v21  ;;  %2672 = vmatprep.subr.bf16.mxu1 %v7227_v20  ;;  %v7326_v19 = vld [vmem:[#allocation3 + $0x5bc] ss:$56 sps:$4 sm:$0xff]   ;;  %v7324_v20 = vld [vmem:[#allocation3 + $0x5b8] ss:$56 sps:$4 sm:$0xff]   ;;  %v7329_v21 = vld [vmem:[#allocation3 + $0x62c] ss:$56 sps:$4 sm:$0xff]  }
  0x6d   :  { %2951 = vmatpush1.bf16.msra.mxu0 %v7249_v22  ;;  %v7339_v22 = vld [vmem:[#allocation3 + $0x710] ss:$56 sps:$4 sm:$0xff]  }
  0x6e   :  { %2952 = vmatprep.subr.bf16.mxu0 %v7257_v24  ;;  %2445 = vmatmul.mubr.bf16.gmra.mrb[4].mxu1 %v7945_v23  ;;  %v8050_v24 = vld [vmem:[%s10253_s0 + $0xe0] ss:$16 sps:$4 sm:$0xff]  }
  0x6f   :  { %2673 = vmatpush1.bf16.msra.mxu1 %v7225_v25  ;;  %2454 = vmatprep.mubr.bf16.mxu1 %v7950_v26  ;;  %v7347_v25 = vld [vmem:[#allocation3 + $0x784] ss:$56 sps:$4 sm:$0xff]  }
  0x70   :  { %2674 = vmatprep.subr.bf16.mxu1 %v7238_v27  ;;  %v8056_v27 = vld [vmem:[%s10253_s0 + $0x104] ss:$16 sps:$4 sm:$0xff]  }
  0x71   :  { %2953 = vmatpush1.bf16.msra.mxu0 %v7255_v28  ;;  %v7327_v28 = vld [vmem:[#allocation3 + $0x628] ss:$56 sps:$4 sm:$0xff]  }
  0x72   :  { %2954 = vmatprep.subr.bf16.mxu0 %v7266_v30  ;;  %v7345_v30 = vld [vmem:[#allocation3 + $0x780] ss:$56 sps:$4 sm:$0xff]  }
  0x73   :  { %2618 = vmatmul.mubr.bf16.gmra.mrb[20].mxu0 %v7230_v29  ;;  %2675 = vmatpush1.bf16.msra.mxu1 %v7236_v31  ;;  %v7335_v29 = vld [vmem:[#allocation3 + $0x69c] ss:$56 sps:$4 sm:$0xff]  }
  0x74   :  { %6738 = vmatprep.mubr.msk.bf16.mxu0 %vm2371_vm0, %v7243_v32  ;;  %2676 = vmatprep.subr.bf16.mxu1 %v7248_v33  ;;  %v7353_v31 = vld [vmem:[#allocation3 + $0x7f4] ss:$56 sps:$4 sm:$0xff]   ;;  %v7333_v32 = vld [vmem:[#allocation3 + $0x698] ss:$56 sps:$4 sm:$0xff]  }
  0x75   :  { %2955 = vmatpush1.bf16.msra.mxu0 %v7264_v34  ;;  %v7338_v33 = vld [vmem:[#allocation3 + $0x70c] ss:$56 sps:$4 sm:$0xff]   ;;  %v7351_v34 = vld [vmem:[#allocation3 + $0x7f0] ss:$56 sps:$4 sm:$0xff]  }
  0x76   :  { %2956 = vmatprep.subr.bf16.mxu0 %v7275_v36  ;;  %2455 = vmatmul.mubr.bf16.gmra.mrb[8].mxu1 %v7964_v35  ;;  %v7359_v36 = vld [vmem:[#allocation3 + $0x864] ss:$56 sps:$4 sm:$0xff]  }
  0x77   :  { %2677 = vmatpush1.bf16.msra.mxu1 %v7246_v37  ;;  %2464 = vmatprep.mubr.bf16.mxu1 %v7969_v38  ;;  %v8065_v37 = vld [vmem:[%s10253_s0 + $0x100] ss:$16 sps:$4 sm:$0xff]  }
  0x78   :  { %2678 = vmatprep.subr.bf16.mxu1 %v7260_v39  ;;  %v8071_v39 = vld [vmem:[%s10253_s0 + $0x124] ss:$16 sps:$4 sm:$0xff]  }
  0x79   :  { %2957 = vmatpush1.bf16.msra.mxu0 %v7273_v40  ;;  %v7357_v40 = vld [vmem:[#allocation3 + $0x860] ss:$56 sps:$4 sm:$0xff]  }
  0x7a   :  { %2958 = vmatprep.subr.bf16.mxu0 %v7284_v42  ;;  %v7360_v42 = vld [vmem:[#allocation3 + $0x8d0] ss:$56 sps:$4 sm:$0xff]  }
  0x7b   :  { %2628 = vmatmul.mubr.bf16.gmra.mrb[24].mxu0 %v7245_v41  ;;  %2679 = vmatpush1.bf16.msra.mxu1 %v7258_v43  ;;  %v7362_v41 = vld [vmem:[#allocation3 + $0x8d4] ss:$56 sps:$4 sm:$0xff]   ;;  %v7368_v43 = vld [vmem:[#allocation3 + $0x944] ss:$56 sps:$4 sm:$0xff]  }
  0x7c   :  { %6739 = vmatprep.mubr.msk.bf16.mxu0 %vm2371_vm0, %v7261_v44  ;;  %2680 = vmatprep.subr.bf16.mxu1 %v7269_v45  ;;  %v8079_v44 = vld [vmem:[%s10253_s0 + $0x120] ss:$16 sps:$4 sm:$0xff]  }
  0x7d   :  { %2959 = vmatpush1.bf16.msra.mxu0 %v7282_v46  ;;  %v7366_v45 = vld [vmem:[#allocation3 + $0x940] ss:$56 sps:$4 sm:$0xff]   ;;  %v7371_v46 = vld [vmem:[#allocation3 + $0x9b4] ss:$56 sps:$4 sm:$0xff]  }
  0x7e   :  { %2960 = vmatprep.subr.bf16.mxu0 %v7293_v48  ;;  %2465 = vmatmul.mubr.bf16.gmra.mrb[12].mxu1 %v7983_v47  ;;  %v7369_v48 = vld [vmem:[#allocation3 + $0x9b0] ss:$56 sps:$4 sm:$0xff]  }
  0x7f   :  { %2474 = vmatprep.mubr.bf16.mxu1 %v7988_v50  ;;  %2681 = vmatpush1.bf16.msra.mxu1 %v7267_v49  ;;  %v7374_v49 = vld [vmem:[#allocation3 + $0xa24] ss:$56 sps:$4 sm:$0xff]  }
  0x80   :  { %2682 = vmatprep.subr.bf16.mxu1 %v7280_v51  ;;  %v7336_v51 = vld [vmem:[#allocation3 + $0x708] ss:$56 sps:$4 sm:$0xff]  }
  0x81   :  { %2961 = vmatpush1.bf16.msra.mxu0 %v7291_v53  ;;  %v7344_v53 = vld [vmem:[#allocation3 + $0x77c] ss:$56 sps:$4 sm:$0xff]  }
  0x82   :  { %2962 = vmatprep.subr.bf16.mxu0 %v7299_v55  ;;  %v7380_v55 = vld [vmem:[#allocation3 + $0xa94] ss:$56 sps:$4 sm:$0xff]  }
  0x83   :  { %2638 = vmatmul.mubr.bf16.gmra.mrb[28].mxu0 %v7263_v54  ;;  %2683 = vmatpush1.bf16.msra.mxu1 %v7278_v57  ;;  %v7372_v54 = vld [vmem:[#allocation3 + $0xa20] ss:$56 sps:$4 sm:$0xff]   ;;  %v7378_v57 = vld [vmem:[#allocation3 + $0xa90] ss:$56 sps:$4 sm:$0xff]  }
  0x84   :  { %6740 = vmatprep.mubr.msk.bf16.mxu0 %vm2371_vm0, %v7276_v56  ;;  %2684 = vmatprep.subr.bf16.mxu1 %v7290_v58  ;;  %v7342_v56 = vld [vmem:[#allocation3 + $0x778] ss:$56 sps:$4 sm:$0xff]   ;;  %v7389_v58 = vld [vmem:[#allocation3 + $0x24] ss:$56 sps:$4 sm:$0xff]  }
  0x85   :  { %2963 = vmatpush1.bf16.msra.mxu0 %v7297_v59  ;;  %v7348_v59 = vld [vmem:[#allocation3 + $0x7e8] ss:$56 sps:$4 sm:$0xff]  }
  0x86   :  { %2964 = vmatprep.subr.bf16.mxu0 %v7308_v61  ;;  %2475 = vmatmul.mubr.bf16.gmra.mrb[16].mxu1 %v8002_v60  ;;  %v7356_v61 = vld [vmem:[#allocation3 + $0x85c] ss:$56 sps:$4 sm:$0xff]  }
  0x87   :  { %2484 = vmatprep.mubr.bf16.mxu1 %v8007_v62  ;;  %2685 = vmatpush1.bf16.msra.mxu1 %v7288_v63  ;;  %v7363_v63 = vld [vmem:[#allocation3 + $0x8c8] ss:$56 sps:$4 sm:$0xff]  }
  0x88   :  { %2686 = vmatprep.subr.bf16.mxu1 %v7302_v0  ;;  %v7377_v0 = vld [vmem:[#allocation3 + $0x93c] ss:$56 sps:$4 sm:$0xff]  }
  0x89   :  { %2965 = vmatpush1.bf16.msra.mxu0 %v7306_v1  ;;  %v7381_v1 = vld [vmem:[#allocation3 + $0x9a8] ss:$56 sps:$4 sm:$0xff]  }
  0x8a   :  { %3067 = vmatprep.subr.bf16.mxu0 %v7341_v10  ;;  %v7402_v10 = vld [vmem:[#allocation3 + $0x170] ss:$56 sps:$4 sm:$0xff]  }
  0x8b   :  { %2648 = vmatmul.mubr.bf16.gmra.mrb[32].mxu0 %v7281_v2  ;;  %2687 = vmatpush1.bf16.msra.mxu1 %v7300_v4  ;;  %v7386_v2 = vld [vmem:[#allocation3 + $0xa1c] ss:$56 sps:$4 sm:$0xff]  }
  0x8c   :  { %6741 = vmatprep.mubr.msk.bf16.mxu0 %vm2371_vm0, %v7294_v3  ;;  %2688 = vmatprep.subr.bf16.mxu1 %v7311_v5  ;;  %v7384_v3 = vld [vmem:[#allocation3 + $0xa18] ss:$56 sps:$4 sm:$0xff]   ;;  %v7401_v4 = vld [vmem:[#allocation3 + $0x1c] ss:$56 sps:$4 sm:$0xff]  }
  0x8d   :  { %v7691_v5 = vld [vmem:[%s10253_s0 + $0x8] ss:$16 sps:$4 sm:$0xff]  }
  0x8e   :  { %2485 = vmatmul.mubr.bf16.gmra.mrb[20].mxu1 %v8021_v6 }
  0x8f   :  { %2494 = vmatprep.mubr.bf16.mxu1 %v8026_v7  ;;  %2689 = vmatpush1.bf16.msra.mxu1 %v7309_v8  ;;  %v7396_v8 = vld [vmem:[#allocation3 + $0x100] ss:$56 sps:$4 sm:$0xff]  }
  0x90   :  { %2690 = vmatprep.subr.bf16.mxu1 %v7316_v9  ;;  %v7404_v9 = vld [vmem:[#allocation3 + $0x174] ss:$56 sps:$4 sm:$0xff]  }
  0x93   :  { %2658 = vmatmul.mubr.bf16.gmra.mrb[36].mxu0 %v7296_v12  ;;  %2691 = vmatpush1.bf16.msra.mxu1 %v7314_v13  ;;  %v7693_v12 = vld [vmem:[%s10253_s0 + $0x28] ss:$16 sps:$4 sm:$0xff]   ;;  %v7694_v13 = vld [vmem:[%s10253_s0 + $0x4c] ss:$16 sps:$4 sm:$0xff]  }
  0x94   :  { %2966 = vmatprep.mubr.bf16.mxu0 %v7903_v52  ;;  %2692 = vmatprep.subr.bf16.mxu1 %v7320_v14  ;;  %v7407_v14 = vld [vmem:[#allocation3 + $0x1e4] ss:$56 sps:$4 sm:$0xff]  }
  0x96   :  { %2495 = vmatmul.mubr.bf16.gmra.mrb[24].mxu1 %v8037_v16 }
  0x97   :  { %2504 = vmatprep.mubr.bf16.mxu1 %v8042_v17  ;;  %2693 = vmatpush1.bf16.msra.mxu1 %v7318_v18  ;;  %v7411_v18 = vld [vmem:[#allocation3 + $0x250] ss:$56 sps:$4 sm:$0xff]  }
  0x98   :  { %2694 = vmatprep.subr.bf16.mxu1 %v7326_v19  ;;  %v8136_v19 = vld [vmem:[%s10253_s0 + $0x48] ss:$16 sps:$4 sm:$0xff]  }
  0x9b   :  { %2967 = vmatmul.mubr.bf16.vlgmr.msra.gmra.mrb[40].mxu0 %v7926_v11  ;;  %2695 = vmatpush1.bf16.msra.mxu1 %v7324_v20  ;;  %v8142_v20 = vld [vmem:[%s10253_s0 + $0x6c] ss:$16 sps:$4 sm:$0xff]  }
  0x9c   :  { %2976 = vmatprep.mubr.bf16.mxu0 %v7932_v15  ;;  %2696 = vmatprep.subr.bf16.mxu1 %v7329_v21  ;;  %v7419_v21 = vld [vmem:[#allocation3 + $0x2c4] ss:$56 sps:$4 sm:$0xff]  }
  0x9d   :  { %3068 = vmatpush1.bf16.msra.mxu0 %v7339_v22  ;;  %v7417_v22 = vld [vmem:[#allocation3 + $0x2c0] ss:$56 sps:$4 sm:$0xff]  }
  0x9e   :  { %3069 = vmatprep.subr.bf16.mxu0 %v7347_v25  ;;  %2505 = vmatmul.mubr.bf16.gmra.mrb[28].mxu1 %v8050_v24  ;;  %v8151_v25 = vld [vmem:[%s10253_s0 + $0x68] ss:$16 sps:$4 sm:$0xff]  }
  0x9f   :  { %2514 = vmatprep.mubr.bf16.mxu1 %v8056_v27  ;;  %2697 = vmatpush1.bf16.msra.mxu1 %v7327_v28  ;;  %v8157_v28 = vld [vmem:[%s10253_s0 + $0x8c] ss:$16 sps:$4 sm:$0xff]  }
  0xa0   :  { %2698 = vmatprep.subr.bf16.mxu1 %v7335_v29  ;;  %v7410_v29 = vld [vmem:[#allocation3 + $0x8c] ss:$56 sps:$4 sm:$0xff]  }
  0xa1   :  { %3070 = vmatpush1.bf16.msra.mxu0 %v7345_v30  ;;  %v7423_v30 = vld [vmem:[#allocation3 + $0x330] ss:$56 sps:$4 sm:$0xff]  }
  0xa2   :  { %3071 = vmatprep.subr.bf16.mxu0 %v7353_v31  ;;  %v7431_v31 = vld [vmem:[#allocation3 + $0x3a4] ss:$56 sps:$4 sm:$0xff]  }
  0xa3   :  { %2977 = vmatmul.mubr.bf16.gmra.mrb[44].mxu0 %v7945_v23  ;;  %2699 = vmatpush1.bf16.msra.mxu1 %v7333_v32  ;;  %v7408_v32 = vld [vmem:[#allocation3 + $0x88] ss:$56 sps:$4 sm:$0xff]  }
  0xa4   :  { %2986 = vmatprep.mubr.bf16.mxu0 %v7950_v26  ;;  %2801 = vmatprep.subr.bf16.mxu1 %v7338_v33  ;;  %v7416_v33 = vld [vmem:[#allocation3 + $0xfc] ss:$56 sps:$4 sm:$0xff]  }
  0xa5   :  { %3072 = vmatpush1.bf16.msra.mxu0 %v7351_v34  ;;  %v7429_v34 = vld [vmem:[#allocation3 + $0x3a0] ss:$56 sps:$4 sm:$0xff]  }
  0xa6   :  { %3073 = vmatprep.subr.bf16.mxu0 %v7359_v36  ;;  %2515 = vmatmul.mubr.bf16.gmra.mrb[32].mxu1 %v8065_v37  ;;  %v7434_v36 = vld [vmem:[#allocation3 + $0x414] ss:$56 sps:$4 sm:$0xff]  }
  0xa7   :  { %2524 = vmatprep.mubr.bf16.mxu1 %v8071_v39 }
  0xa9   :  { %3074 = vmatpush1.bf16.msra.mxu0 %v7357_v40  ;;  %v8171_v40 = vld [vmem:[%s10253_s0 + $0xac] ss:$16 sps:$4 sm:$0xff]  }
  0xaa   :  { %3075 = vmatprep.subr.bf16.mxu0 %v7362_v41  ;;  %v7422_v41 = vld [vmem:[#allocation3 + $0x16c] ss:$56 sps:$4 sm:$0xff]  }
  0xab   :  { %2987 = vmatmul.mubr.bf16.gmra.mrb[48].mxu0 %v7964_v35 }
  0xac   :  { %2996 = vmatprep.mubr.bf16.mxu0 %v7969_v38 }
  0xad   :  { %3076 = vmatpush1.bf16.msra.mxu0 %v7360_v42  ;;  %v7432_v42 = vld [vmem:[#allocation3 + $0x410] ss:$56 sps:$4 sm:$0xff]  }
  0xae   :  { %3077 = vmatprep.subr.bf16.mxu0 %v7368_v43  ;;  %2525 = vmatmul.mubr.bf16.gmra.mrb[36].mxu1 %v8079_v44  ;;  %v7440_v43 = vld [vmem:[#allocation3 + $0x484] ss:$56 sps:$4 sm:$0xff]  }
  0xaf   :  { %2700 = vmatprep.mubr.bf16.mxu1 %v7903_v52  ;;  %v7350_v52 = vld [vmem:[#allocation3 + $0x7ec] ss:$56 sps:$4 sm:$0xff]  }
  0xb1   :  { %3078 = vmatpush1.bf16.msra.mxu0 %v7366_v45  ;;  %v7428_v45 = vld [vmem:[#allocation3 + $0x1dc] ss:$56 sps:$4 sm:$0xff]  }
  0xb2   :  { %3079 = vmatprep.subr.bf16.mxu0 %v7371_v46  ;;  %v7438_v46 = vld [vmem:[#allocation3 + $0x480] ss:$56 sps:$4 sm:$0xff]  }
  0xb3   :  { %2997 = vmatmul.mubr.bf16.gmra.mrb[52].mxu0 %v7983_v47 }
  0xb4   :  { %3006 = vmatprep.mubr.bf16.mxu0 %v7988_v50 }
  0xb5   :  { %3080 = vmatpush1.bf16.msra.mxu0 %v7369_v48  ;;  %v7446_v48 = vld [vmem:[#allocation3 + $0x4f4] ss:$56 sps:$4 sm:$0xff]  }
  0xb6   :  { %3081 = vmatprep.subr.bf16.mxu0 %v7374_v49  ;;  %2701 = vmatmul.mubr.bf16.vlgmr.msra.gmra.mrb[40].mxu1 %v7926_v11  ;;  %v7354_v11 = vld [vmem:[#allocation3 + $0x858] ss:$56 sps:$4 sm:$0xff]  }
  0xb7   :  { %2802 = vmatpush1.bf16.msra.mxu1 %v7336_v51  ;;  %2710 = vmatprep.mubr.bf16.mxu1 %v7932_v15  ;;  %v7365_v15 = vld [vmem:[#allocation3 + $0x8cc] ss:$56 sps:$4 sm:$0xff]   ;;  %v8179_v49 = vld [vmem:[%s10253_s0 + $0xa8] ss:$16 sps:$4 sm:$0xff]  }
  0xb8   :  { %2803 = vmatprep.subr.bf16.mxu1 %v7344_v53  ;;  %v8185_v51 = vld [vmem:[%s10253_s0 + $0xcc] ss:$16 sps:$4 sm:$0xff]   ;;  %v7426_v53 = vld [vmem:[#allocation3 + $0x1d8] ss:$56 sps:$4 sm:$0xff]  }
  0xb9   :  { %3082 = vmatpush1.bf16.msra.mxu0 %v7372_v54  ;;  %v7437_v54 = vld [vmem:[#allocation3 + $0x24c] ss:$56 sps:$4 sm:$0xff]  }
  0xba   :  { %3083 = vmatprep.subr.bf16.mxu0 %v7380_v55  ;;  %v7444_v55 = vld [vmem:[#allocation3 + $0x4f0] ss:$56 sps:$4 sm:$0xff]  }
  0xbb   :  { %3007 = vmatmul.mubr.bf16.gmra.mrb[56].mxu0 %v8002_v60  ;;  %2804 = vmatpush1.bf16.msra.mxu1 %v7342_v56  ;;  %v7452_v56 = vld [vmem:[#allocation3 + $0x564] ss:$56 sps:$4 sm:$0xff]  }
  0xbc   :  { %3016 = vmatprep.mubr.bf16.mxu0 %v8007_v62  ;;  %2805 = vmatprep.subr.bf16.mxu1 %v7350_v52  ;;  %v7435_v52 = vld [vmem:[#allocation3 + $0x248] ss:$56 sps:$4 sm:$0xff]  }
  0xbd   :  { %3084 = vmatpush1.bf16.msra.mxu0 %v7378_v57  ;;  %v7443_v57 = vld [vmem:[#allocation3 + $0x2bc] ss:$56 sps:$4 sm:$0xff]  }
  0xbe   :  { %3466 = vmatprep.subr.bf16.mxu0 %v7389_v58  ;;  %2711 = vmatmul.mubr.bf16.gmra.mrb[44].mxu1 %v7945_v23  ;;  %v7375_v23 = vld [vmem:[#allocation3 + $0x938] ss:$56 sps:$4 sm:$0xff]  }
  0xbf   :  { %2720 = vmatprep.mubr.bf16.mxu1 %v7950_v26  ;;  %2806 = vmatpush1.bf16.msra.mxu1 %v7348_v59  ;;  %v7383_v26 = vld [vmem:[#allocation3 + $0x9ac] ss:$56 sps:$4 sm:$0xff]   ;;  %v7450_v58 = vld [vmem:[#allocation3 + $0x560] ss:$56 sps:$4 sm:$0xff]  }
  0xc0   :  { %2807 = vmatprep.subr.bf16.mxu1 %v7356_v61  ;;  %v7458_v59 = vld [vmem:[#allocation3 + $0x5d4] ss:$56 sps:$4 sm:$0xff]   ;;  %v8195_v61 = vld [vmem:[%s10253_s0 + $0xc8] ss:$16 sps:$4 sm:$0xff]  }
  0xc3   :  { %3017 = vmatmul.mubr.bf16.gmra.mrb[60].mxu0 %v8021_v6  ;;  %2808 = vmatpush1.bf16.msra.mxu1 %v7354_v11  ;;  %v8201_v11 = vld [vmem:[%s10253_s0 + $0xec] ss:$16 sps:$4 sm:$0xff]  }
  0xc4   :  { %3026 = vmatprep.mubr.bf16.mxu0 %v8026_v7  ;;  %2809 = vmatprep.subr.bf16.mxu1 %v7365_v15  ;;  %v7441_v15 = vld [vmem:[#allocation3 + $0x2b8] ss:$56 sps:$4 sm:$0xff]  }
  0xc6   :  { %2721 = vmatmul.mubr.bf16.gmra.mrb[48].mxu1 %v7964_v35  ;;  %v7392_v35 = vld [vmem:[#allocation3 + $0xa8c] ss:$56 sps:$4 sm:$0xff]  }
  0xc7   :  { %2730 = vmatprep.mubr.bf16.mxu1 %v7969_v38  ;;  %2810 = vmatpush1.bf16.msra.mxu1 %v7363_v63  ;;  %v7390_v38 = vld [vmem:[#allocation3 + $0xa88] ss:$56 sps:$4 sm:$0xff]   ;;  %v7449_v63 = vld [vmem:[#allocation3 + $0x32c] ss:$56 sps:$4 sm:$0xff]  }
  0xc8   :  { %2811 = vmatprep.subr.bf16.mxu1 %v7377_v0  ;;  %v7456_v0 = vld [vmem:[#allocation3 + $0x5d0] ss:$56 sps:$4 sm:$0xff]  }
  0xcb   :  { %3027 = vmatmul.mubr.bf16.gmra.mrb[64].mxu0 %v8037_v16  ;;  %2812 = vmatpush1.bf16.msra.mxu1 %v7375_v23  ;;  %v7461_v23 = vld [vmem:[#allocation3 + $0x644] ss:$56 sps:$4 sm:$0xff]  }
  0xcc   :  { %3036 = vmatprep.mubr.bf16.mxu0 %v8042_v17  ;;  %2813 = vmatprep.subr.bf16.mxu1 %v7383_v26 }
  0xce   :  { %2731 = vmatmul.mubr.bf16.gmra.mrb[52].mxu1 %v7983_v47  ;;  %v7690_v47 = vld [vmem:[%s10253_s0 + $0xc] ss:$16 sps:$4 sm:$0xff]  }
  0xcf   :  { %2740 = vmatprep.mubr.bf16.mxu1 %v7988_v50  ;;  %2814 = vmatpush1.bf16.msra.mxu1 %v7381_v1  ;;  %v7387_v50 = vld [vmem:[#allocation3 + $0x20] ss:$56 sps:$4 sm:$0xff]  }
  0xd0   :  { %2815 = vmatprep.subr.bf16.mxu1 %v7386_v2  ;;  %v7447_v2 = vld [vmem:[#allocation3 + $0x328] ss:$56 sps:$4 sm:$0xff]  }
  0xd3   :  { %3037 = vmatmul.mubr.bf16.gmra.mrb[68].mxu0 %v8050_v24  ;;  %2816 = vmatpush1.bf16.msra.mxu1 %v7384_v3 }
  0xd4   :  { %3046 = vmatprep.mubr.bf16.mxu0 %v8056_v27  ;;  %2817 = vmatprep.subr.bf16.mxu1 %v7392_v35  ;;  %v7455_v35 = vld [vmem:[#allocation3 + $0x39c] ss:$56 sps:$4 sm:$0xff]  }
  0xd6   :  { %2741 = vmatmul.mubr.bf16.gmra.mrb[56].mxu1 %v8002_v60  ;;  %v7395_v60 = vld [vmem:[#allocation3 + $0x94] ss:$56 sps:$4 sm:$0xff]  }
  0xd7   :  { %2750 = vmatprep.mubr.bf16.mxu1 %v8007_v62  ;;  %2818 = vmatpush1.bf16.msra.mxu1 %v7390_v38  ;;  %v7393_v62 = vld [vmem:[#allocation3 + $0x90] ss:$56 sps:$4 sm:$0xff]   ;;  %v7459_v38 = vld [vmem:[#allocation3 + $0x640] ss:$56 sps:$4 sm:$0xff]  }
  0xd8   :  { %3200 = vmatprep.subr.bf16.mxu1 %v7401_v4 }
  0xdb   :  { %3047 = vmatmul.mubr.bf16.gmra.mrb[72].mxu0 %v8065_v37 }
  0xdc   :  { %3056 = vmatprep.mubr.bf16.mxu0 %v8071_v39 }
  0xde   :  { %2751 = vmatmul.mubr.bf16.gmra.mrb[60].mxu1 %v8021_v6  ;;  %v7692_v6 = vld [vmem:[%s10253_s0 + $0x2c] ss:$16 sps:$4 sm:$0xff]  }
  0xdf   :  { %2760 = vmatprep.mubr.bf16.mxu1 %v8026_v7  ;;  %v7398_v7 = vld [vmem:[#allocation3 + $0x104] ss:$56 sps:$4 sm:$0xff]  }
  0xe3   :  { %3057 = vmatmul.mubr.bf16.gmra.mrb[76].mxu0 %v8079_v44 }
  0xe4   :  { %6752 = vmatprep.mubr.msk.bf16.mxu0 %vm2371_vm0, %v7690_v47 }
  0xe6   :  { %2761 = vmatmul.mubr.bf16.gmra.mrb[64].mxu1 %v8037_v16  ;;  %v7405_v16 = vld [vmem:[#allocation3 + $0x1e0] ss:$56 sps:$4 sm:$0xff]  }
  0xe7   :  { %2770 = vmatprep.mubr.bf16.mxu1 %v8042_v17  ;;  %v7413_v17 = vld [vmem:[#allocation3 + $0x254] ss:$56 sps:$4 sm:$0xff]  }
  0xeb   :  { %3100 = vmatmul.mubr.bf16.vlgmr.msra.gmra.mrb[40].mxu0 %v7691_v5 }
  0xec   :  { %6753 = vmatprep.mubr.msk.bf16.mxu0 %vm2371_vm0, %v7692_v6  ;;  %3467 = vmatpush1.bf16.msra.mxu0 %v7387_v50  ;;  %v8219_v50 = vld [vmem:[%s10253_s0 + $0xe8] ss:$16 sps:$4 sm:$0xff]  }
  0xed   :  { %3468 = vmatprep.subr.bf16.mxu0 %v7395_v60  ;;  %v8225_v60 = vld [vmem:[%s10253_s0 + $0x10c] ss:$16 sps:$4 sm:$0xff]  }
  0xee   :  { %2771 = vmatmul.mubr.bf16.gmra.mrb[68].mxu1 %v8050_v24  ;;  %v7425_v24 = vld [vmem:[#allocation3 + $0x334] ss:$56 sps:$4 sm:$0xff]  }
  0xef   :  { %2780 = vmatprep.mubr.bf16.mxu1 %v8056_v27  ;;  %v7399_v27 = vld [vmem:[#allocation3 + $0x18] ss:$56 sps:$4 sm:$0xff]  }
  0xf0   :  { %3469 = vmatpush1.bf16.msra.mxu0 %v7393_v62  ;;  %v7453_v62 = vld [vmem:[#allocation3 + $0x398] ss:$56 sps:$4 sm:$0xff]  }
  0xf1   :  { %3470 = vmatprep.subr.bf16.mxu0 %v7398_v7 }
  0xf3   :  { %3110 = vmatmul.mubr.bf16.gmra.mrb[44].mxu0 %v7693_v12 }
  0xf4   :  { %6754 = vmatprep.mubr.msk.bf16.mxu0 %vm2371_vm0, %v7694_v13  ;;  %3471 = vmatpush1.bf16.msra.mxu0 %v7396_v8  ;;  %v7491_v8 = vld [vmem:[#allocation3 + $0x724] ss:$56 sps:$4 sm:$0xff]  }
  0xf5   :  { %3472 = vmatprep.subr.bf16.mxu0 %v7404_v9 }
  0xf6   :  { %2781 = vmatmul.mubr.bf16.gmra.mrb[72].mxu1 %v8065_v37  ;;  %v8165_v37 = vld [vmem:[%s10253_s0 + $0x88] ss:$16 sps:$4 sm:$0xff]  }
  0xf7   :  { %2790 = vmatprep.mubr.bf16.mxu1 %v8071_v39  ;;  %v7414_v39 = vld [vmem:[#allocation3 + $0xf8] ss:$56 sps:$4 sm:$0xff]  }
  0xf8   :  { %3473 = vmatpush1.bf16.msra.mxu0 %v7402_v10  ;;  %v7462_v10 = vld [vmem:[#allocation3 + $0x408] ss:$56 sps:$4 sm:$0xff]  }
  0xf9   :  { %3474 = vmatprep.subr.bf16.mxu0 %v7407_v14 }
  0xfb   :  { %3120 = vmatmul.mubr.bf16.gmra.mrb[48].mxu0 %v8136_v19 }
  0xfc   :  { %6755 = vmatprep.mubr.msk.bf16.mxu0 %vm2371_vm0, %v8142_v20  ;;  %3475 = vmatpush1.bf16.msra.mxu0 %v7405_v16  ;;  %v8243_v16 = vld [vmem:[%s10253_s0 + $0x108] ss:$16 sps:$4 sm:$0xff]  }
  0xfd   :  { %3476 = vmatprep.subr.bf16.mxu0 %v7413_v17  ;;  %v8249_v17 = vld [vmem:[%s10253_s0 + $0x12c] ss:$16 sps:$4 sm:$0xff]  }
  0xfe   :  { %2791 = vmatmul.mubr.bf16.gmra.mrb[76].mxu1 %v8079_v44  ;;  %v7420_v44 = vld [vmem:[#allocation3 + $0x168] ss:$56 sps:$4 sm:$0xff]  }
  0xff   :  { %6742 = vmatprep.mubr.msk.bf16.mxu1 %vm2371_vm0, %v7690_v47  ;;  %v7467_v47 = vld [vmem:[#allocation3 + $0x6b4] ss:$56 sps:$4 sm:$0xff]  }
 0x100   :  { %3477 = vmatpush1.bf16.msra.mxu0 %v7411_v18  ;;  %v7468_v18 = vld [vmem:[#allocation3 + $0x478] ss:$56 sps:$4 sm:$0xff]  }
 0x101   :  { %3478 = vmatprep.subr.bf16.mxu0 %v7419_v21 }
 0x103   :  { %3130 = vmatmul.mubr.bf16.gmra.mrb[52].mxu0 %v8151_v25 }
 0x104   :  { %6756 = vmatprep.mubr.msk.bf16.mxu0 %vm2371_vm0, %v8157_v28  ;;  %3479 = vmatpush1.bf16.msra.mxu0 %v7417_v22  ;;  %v7471_v22 = vld [vmem:[#allocation3 + $0x4e8] ss:$56 sps:$4 sm:$0xff]  }
 0x105   :  { %3480 = vmatprep.subr.bf16.mxu0 %v7425_v24 }
 0x106   :  { %2834 = vmatmul.mubr.bf16.vlgmr.msra.gmra.mrb[40].mxu1 %v7691_v5  ;;  %v7464_v5 = vld [vmem:[#allocation3 + $0x40c] ss:$56 sps:$4 sm:$0xff]  }
 0x107   :  { %3201 = vmatpush1.bf16.msra.mxu1 %v7399_v27  ;;  %6743 = vmatprep.mubr.msk.bf16.mxu1 %vm2371_vm0, %v7692_v6  ;;  %v7465_v6 = vld [vmem:[#allocation3 + $0x6b0] ss:$56 sps:$4 sm:$0xff]  }
 0x108   :  { %3202 = vmatprep.subr.bf16.mxu1 %v7410_v29  ;;  %3481 = vmatpush1.bf16.msra.mxu0 %v7423_v30  ;;  %v8273_v29 = vld [vmem:[%s10253_s0 + $0x4] ss:$16 sps:$4 sm:$0xff]   ;;  %v7474_v30 = vld [vmem:[#allocation3 + $0x558] ss:$56 sps:$4 sm:$0xff]  }
 0x109   :  { %3482 = vmatprep.subr.bf16.mxu0 %v7431_v31  ;;  %v7479_v31 = vld [vmem:[#allocation3 + $0x5cc] ss:$56 sps:$4 sm:$0xff]  }
 0x10b   :  { %3140 = vmatmul.mubr.bf16.gmra.mrb[56].mxu0 %v8165_v37  ;;  %3203 = vmatpush1.bf16.msra.mxu1 %v7408_v32 }
 0x10c   :  { %6757 = vmatprep.mubr.msk.bf16.mxu0 %vm2371_vm0, %v8171_v40  ;;  %3204 = vmatprep.subr.bf16.mxu1 %v7416_v33 }
 0x10d   :  { %3483 = vmatpush1.bf16.msra.mxu0 %v7429_v34  ;;  %v7477_v34 = vld [vmem:[#allocation3 + $0x5c8] ss:$56 sps:$4 sm:$0xff]  }
 0x10e   :  { %3484 = vmatprep.subr.bf16.mxu0 %v7434_v36  ;;  %2844 = vmatmul.mubr.bf16.gmra.mrb[44].mxu1 %v7693_v12 }
 0x10f   :  { %3205 = vmatpush1.bf16.msra.mxu1 %v7414_v39  ;;  %6744 = vmatprep.mubr.msk.bf16.mxu1 %vm2371_vm0, %v7694_v13  ;;  %v7470_v13 = vld [vmem:[#allocation3 + $0x47c] ss:$56 sps:$4 sm:$0xff]  }
 0x110   :  { %3206 = vmatprep.subr.bf16.mxu1 %v7422_v41 }
 0x111   :  { %3485 = vmatpush1.bf16.msra.mxu0 %v7432_v42  ;;  %v7497_v42 = vld [vmem:[#allocation3 + $0x794] ss:$56 sps:$4 sm:$0xff]  }
 0x112   :  { %3486 = vmatprep.subr.bf16.mxu0 %v7440_v43 }
 0x113   :  { %3150 = vmatmul.mubr.bf16.gmra.mrb[60].mxu0 %v8179_v49  ;;  %3207 = vmatpush1.bf16.msra.mxu1 %v7420_v44 }
 0x114   :  { %6758 = vmatprep.mubr.msk.bf16.mxu0 %vm2371_vm0, %v8185_v51  ;;  %3208 = vmatprep.subr.bf16.mxu1 %v7428_v45  ;;  %v8291_v45 = vld [vmem:[%s10253_s0] ss:$16 sps:$4 sm:$0xff]  }
 0x115   :  { %3487 = vmatpush1.bf16.msra.mxu0 %v7438_v46 }
 0x116   :  { %3488 = vmatprep.subr.bf16.mxu0 %v7446_v48  ;;  %2854 = vmatmul.mubr.bf16.gmra.mrb[48].mxu1 %v8136_v19  ;;  %v7473_v19 = vld [vmem:[#allocation3 + $0x4ec] ss:$56 sps:$4 sm:$0xff]  }
 0x117   :  { %3209 = vmatpush1.bf16.msra.mxu1 %v7426_v53  ;;  %6745 = vmatprep.mubr.msk.bf16.mxu1 %vm2371_vm0, %v8142_v20 }
 0x118   :  { %3210 = vmatprep.subr.bf16.mxu1 %v7437_v54 }
 0x119   :  { %3489 = vmatpush1.bf16.msra.mxu0 %v7444_v55  ;;  %v7485_v55 = vld [vmem:[#allocation3 + $0x6ac] ss:$56 sps:$4 sm:$0xff]  }
 0x11a   :  { %3490 = vmatprep.subr.bf16.mxu0 %v7452_v56  ;;  %v7495_v56 = vld [vmem:[#allocation3 + $0x790] ss:$56 sps:$4 sm:$0xff]  }
 0x11b   :  { %3160 = vmatmul.mubr.bf16.gmra.mrb[64].mxu0 %v8195_v61  ;;  %3211 = vmatpush1.bf16.msra.mxu1 %v7435_v52 }
 0x11c   :  { %6759 = vmatprep.mubr.msk.bf16.mxu0 %vm2371_vm0, %v8201_v11  ;;  %3212 = vmatprep.subr.bf16.mxu1 %v7443_v57 }
 0x11d   :  { %3491 = vmatpush1.bf16.msra.mxu0 %v7450_v58  ;;  %v7503_v58 = vld [vmem:[#allocation3 + $0x804] ss:$56 sps:$4 sm:$0xff]  }
 0x11e   :  { %3492 = vmatprep.subr.bf16.mxu0 %v7458_v59  ;;  %v8205_v26 = vpop.f32.mrb[0].mxu0  ;;  %2864 = vmatmul.mubr.bf16.gmra.mrb[52].mxu1 %v8151_v25  ;;  %v7476_v25 = vld [vmem:[#allocation3 + $0x55c] ss:$56 sps:$4 sm:$0xff]  }
 0x11f   :  { %v8208_v1 = vpop.f32.mrb[1].mxu0  ;;  %6746 = vmatprep.mubr.msk.bf16.mxu1 %vm2371_vm0, %v8157_v28  ;;  %3213 = vmatpush1.bf16.msra.mxu1 %v7441_v15  ;;  %v8267_v28 = vld [vmem:[%s10253_s0 + $0x128] ss:$16 sps:$4 sm:$0xff]  }
 0x120   :  { %v8212_v3 = vpop.f32.mrb[2].mxu0  ;;  %3214 = vmatprep.subr.bf16.mxu1 %v7449_v63  ;;  %v7483_v15 = vld [vmem:[#allocation3 + $0x6a8] ss:$56 sps:$4 sm:$0xff]  }
 0x121   :  { %3493 = vmatpush1.bf16.msra.mxu0 %v7456_v0  ;;  %v8214_v4 = vpop.f32.mrb[3].mxu0  ;;  %v7488_v0 = vld [vmem:[#allocation3 + $0x71c] ss:$56 sps:$4 sm:$0xff]  }
 0x122   :  { %3494 = vmatprep.subr.bf16.mxu0 %v7461_v23 }
 0x123   :  { %3170 = vmatmul.mubr.bf16.gmra.mrb[68].mxu0 %v8219_v50  ;;  %3215 = vmatpush1.bf16.msra.mxu1 %v7447_v2 }
 0x124   :  { %6760 = vmatprep.mubr.msk.bf16.mxu0 %vm2371_vm0, %v8225_v60  ;;  %3216 = vmatprep.subr.bf16.mxu1 %v7455_v35 }
 0x125   :  { %3495 = vmatpush1.bf16.msra.mxu0 %v7459_v38 }
 0x126   :  { %3496 = vmatprep.subr.bf16.mxu0 %v7467_v47  ;;  %v8229_v7 = vpop.f32.mrb[4].mxu0  ;;  %2874 = vmatmul.mubr.bf16.gmra.mrb[56].mxu1 %v8165_v37  ;;  %v7482_v37 = vld [vmem:[#allocation3 + $0x63c] ss:$56 sps:$4 sm:$0xff]   ;;  %v8324_v47 = vld [vmem:[%s10253_s0 + $0x20] ss:$16 sps:$4 sm:$0xff]  }
 0x127   :  { %v8232_v9 = vpop.f32.mrb[5].mxu0  ;;  %6747 = vmatprep.mubr.msk.bf16.mxu1 %vm2371_vm0, %v8171_v40  ;;  %3217 = vmatpush1.bf16.msra.mxu1 %v7453_v62  ;;  %v7489_v40 = vld [vmem:[#allocation3 + $0x720] ss:$56 sps:$4 sm:$0xff]   ;;  %v8331_v62 = vld [vmem:[%s10253_s0 + $0x44] ss:$16 sps:$4 sm:$0xff]  }
 0x128   :  { %v8236_v12 = vpop.f32.mrb[6].mxu0  ;;  %3218 = vmatprep.subr.bf16.mxu1 %v7464_v5  ;;  %v8334_v5 = vld [vmem:[#allocation5] ss:$0 sm:$0xff] }
 0x129   :  { %3497 = vmatpush1.bf16.msra.mxu0 %v7465_v6  ;;  %v8238_v14 = vpop.f32.mrb[7].mxu0 }
 0x12a   :  { %3599 = vmatprep.subr.bf16.mxu0 %v7491_v8  ;;  %v7507_v8 = vld [vmem:[#allocation3 + $0x870] ss:$56 sps:$4 sm:$0xff]  }
 0x12b   :  { %3180 = vmatmul.mubr.bf16.gmra.mrb[72].mxu0 %v8243_v16  ;;  %3219 = vmatpush1.bf16.msra.mxu1 %v7462_v10 }
 0x12c   :  { %6761 = vmatprep.mubr.msk.bf16.mxu0 %vm2371_vm0, %v8249_v17  ;;  %3220 = vmatprep.subr.bf16.mxu1 %v7470_v13 }
 0x12e   :  { %v8253_v20 = vpop.f32.mrb[8].mxu0  ;;  %2884 = vmatmul.mubr.bf16.gmra.mrb[60].mxu1 %v8179_v49  ;;  %v8300_v49 = vld [vmem:[%s10253_s0 + $0x24] ss:$16 sps:$4 sm:$0xff]  }
 0x12f   :  { %v8256_v21 = vpop.f32.mrb[9].mxu0  ;;  %6748 = vmatprep.mubr.msk.bf16.mxu1 %vm2371_vm0, %v8185_v51  ;;  %3221 = vmatpush1.bf16.msra.mxu1 %v7468_v18  ;;  %v7480_v51 = vld [vmem:[#allocation3 + $0x638] ss:$56 sps:$4 sm:$0xff]   ;;  %v7512_v18 = vld [vmem:[#allocation3 + $0x8e4] ss:$56 sps:$4 sm:$0xff]  }
 0x130   :  { %v8260_v24 = vpop.f32.mrb[10].mxu0  ;;  %3222 = vmatprep.subr.bf16.mxu1 %v7473_v19 }
 0x131   :  { %v8262_v27 = vpop.f32.mrb[11].mxu0 }
 0x133   :  { %3190 = vmatmul.mubr.bf16.gmra.mrb[76].mxu0 %v8267_v28  ;;  %3223 = vmatpush1.bf16.msra.mxu1 %v7471_v22 }
 0x134   :  { %3498 = vmatprep.mubr.bf16.mxu0 %v8273_v29  ;;  %3224 = vmatprep.subr.bf16.mxu1 %v7476_v25 }
 0x136   :  { %v8276_v32 = vpop.f32.mrb[12].mxu0  ;;  %2894 = vmatmul.mubr.bf16.gmra.mrb[64].mxu1 %v8195_v61 }
 0x137   :  { %v8279_v33 = vpop.f32.mrb[13].mxu0  ;;  %6749 = vmatprep.mubr.msk.bf16.mxu1 %vm2371_vm0, %v8201_v11  ;;  %3225 = vmatpush1.bf16.msra.mxu1 %v7474_v30 }
 0x138   :  { %v8283_v36 = vpop.f32.mrb[14].mxu0  ;;  %3226 = vmatprep.subr.bf16.mxu1 %v7479_v31 }
 0x139   :  { %v8285_v39 = vpop.f32.mrb[15].mxu0  ;;  %v2436_v41 = vpop.f32.mrb[0].mxu1 }
 0x13a   :  { %v2570_v43 = vadd.f32 %v8205_v26, %v2436_v41  ;;  %v2438_v44 = vpop.f32.mrb[1].mxu1  ;;  %v7501_v26 = vld [vmem:[#allocation3 + $0x800] ss:$56 sps:$4 sm:$0xff]  }
 0x13b   :  { %3499 = vmatmul.mubr.bf16.vlgmr.msra.gmra.mrb[80].mxu0 %v8291_v45  ;;  %v8295_v46 = vadd.f32 %v8208_v1, %v2438_v44  ;;  %v2440_v48 = vpop.f32.mrb[2].mxu1  ;;  %3227 = vmatpush1.bf16.msra.mxu1 %v7477_v34  ;;  %v7510_v34 = vld [vmem:[#allocation3 + $0x8e0] ss:$56 sps:$4 sm:$0xff]  }
 0x13c   :  { %3508 = vmatprep.mubr.bf16.mxu0 %v8300_v49  ;;  %v2574_v53 = vadd.f32 %v8212_v3, %v2440_v48  ;;  %v2442_v54 = vpop.f32.mrb[3].mxu1  ;;  %3228 = vmatprep.subr.bf16.mxu1 %v7482_v37  ;;  %v7509_v3 = vld [vmem:[#allocation3 + $0x874] ss:$56 sps:$4 sm:$0xff]  }
 0x13d   :  { %3600 = vmatpush1.bf16.msra.mxu0 %v7489_v40  ;;  %v2576_v52 = vadd.f32 %v8214_v4, %v2442_v54  ;;  %v4285_v61 = vrot.slane %v8295_v46, 1  ;;  %v7518_v40 = vld [vmem:[#allocation3 + $0x954] ss:$56 sps:$4 sm:$0xff]   ;;  %v7543_v46 = vld [vmem:[#allocation3 + $0xa0] ss:$56 sps:$4 sm:$0xff]  }
 0x13e   :  { %v8305_v57 = vpop.f32.mrb[16].mxu0  ;;  %3601 = vmatprep.subr.bf16.mxu0 %v7497_v42  ;;  %2904 = vmatmul.mubr.bf16.gmra.mrb[68].mxu1 %v8219_v50 }
 0x13f   :  { %v8308_v59 = vpop.f32.mrb[17].mxu0  ;;  %v4286_v11 = vrot.slane %v2576_v52, 1  ;;  %6750 = vmatprep.mubr.msk.bf16.mxu1 %vm2371_vm0, %v8225_v60  ;;  %3229 = vmatpush1.bf16.msra.mxu1 %v7480_v51 }
 0x140   :  { %v8313_v63 = vpop.f32.mrb[18].mxu0  ;;  %3230 = vmatprep.subr.bf16.mxu1 %v7485_v55 }
 0x141   :  { %v8315_v23 = vpop.f32.mrb[19].mxu0  ;;  %3602 = vmatpush1.bf16.msra.mxu0 %v7495_v56  ;;  %v4287_v1 = vsel %vm4284_vm1, %v4285_v61, %v4286_v11  ;;  %v2446_v2 = vpop.f32.mrb[4].mxu1 }
 0x142   :  { %3603 = vmatprep.subr.bf16.mxu0 %v7503_v58  ;;  %v4346_v35 = vadd.f32 %v4287_v1, %v2570_v43  ;;  %v2580_v38 = vadd.f32 %v8229_v7, %v2446_v2  ;;  %v2448_v4 = vpop.f32.mrb[5].mxu1  ;;  %v7521_v1 = vld [vmem:[#allocation3 + $0x9c4] ss:$56 sps:$4 sm:$0xff]  }
 0x143   :  { %3509 = vmatmul.mubr.bf16.gmra.mrb[84].mxu0 %v8324_v47  ;;  %v2582_v50 = vadd.f32 %v8232_v9, %v2448_v4  ;;  %v2450_v60 = vpop.f32.mrb[6].mxu1  ;;  %3231 = vmatpush1.bf16.msra.mxu1 %v7483_v15  ;;  %v7516_v15 = vld [vmem:[#allocation3 + $0x950] ss:$56 sps:$4 sm:$0xff]  }
 0x144   :  { %3518 = vmatprep.mubr.bf16.mxu0 %v8331_v62  ;;  %v8337_v6 = vadd.f32 %v8236_v12, %v2450_v60  ;;  %v2452_v7 = vpop.f32.mrb[7].mxu1  ;;  %3333 = vmatprep.subr.bf16.mxu1 %v7488_v0  ;;  %v8346_v22 = vadd.f32 %v8334_v5, %v4346_v35 }
 0x145   :  { %3604 = vmatpush1.bf16.msra.mxu0 %v7501_v26  ;;  %v4288_v10 = vrot.slane %v2582_v50, 1  ;;  %v2586_v9 = vadd.f32 %v8238_v14, %v2452_v7 }
 0x146   :  { %v8340_v13 = vpop.f32.mrb[20].mxu0  ;;  %3605 = vmatprep.subr.bf16.mxu0 %v7509_v3  ;;  %2914 = vmatmul.mubr.bf16.gmra.mrb[72].mxu1 %v8243_v16  ;;  %v4412_v48 = vrot.slane %v8346_v22, 2  ;;  %v4474_v51 = vrot.slane %v8346_v22, 4 }
 0x147   :  { %v8343_v19 = vpop.f32.mrb[21].mxu0  ;;  %v4289_v12 = vsel %vm4284_vm1, %v4286_v11, %v4288_v10  ;;  %v4290_v25 = vrot.slane %v2586_v9, 1  ;;  %6751 = vmatprep.mubr.msk.bf16.mxu1 %vm2371_vm0, %v8249_v17  ;;  %v8361_v17 = vld [vmem:[%s10253_s0 + $0x40] ss:$16 sps:$4 sm:$0xff]  }
 0x148   :  { %v8351_v30 = vpop.f32.mrb[22].mxu0  ;;  %v4347_v14 = vadd.f32 %v4289_v12, %v2574_v53 }
 0x149   :  { %v8353_v31 = vpop.f32.mrb[23].mxu0  ;;  %3606 = vmatpush1.bf16.msra.mxu0 %v7507_v8  ;;  %v4291_v16 = vsel %vm4284_vm1, %v4288_v10, %v4290_v25  ;;  %v2456_v37 = vpop.f32.mrb[8].mxu1 }
 0x14a   :  { %3607 = vmatprep.subr.bf16.mxu0 %v7512_v18  ;;  %v4372_v41 = vadd.f32 %v8334_v5, %v4347_v14  ;;  %v4348_v42 = vadd.f32 %v4291_v16, %v2580_v38  ;;  %v2590_v43 = vadd.f32 %v8253_v20, %v2456_v37  ;;  %v2458_v44 = vpop.f32.mrb[9].mxu1  ;;  %v8370_v20 = vld [vmem:[%s10253_s0 + $0x64] ss:$16 sps:$4 sm:$0xff]  }
 0x14b   :  { %3519 = vmatmul.mubr.bf16.gmra.mrb[88].mxu0 %v8361_v17  ;;  %v2592_v53 = vadd.f32 %v8256_v21, %v2458_v44  ;;  %v2460_v54 = vpop.f32.mrb[10].mxu1 }
 0x14c   :  { %3528 = vmatprep.mubr.bf16.mxu0 %v8370_v20  ;;  %v4413_v55 = vrot.slane %v4372_v41, 2  ;;  %v4475_v56 = vrot.slane %v4372_v41, 4  ;;  %v8374_v52 = vadd.f32 %v8334_v5, %v4348_v42  ;;  %v8377_v58 = vadd.f32 %v8260_v24, %v2460_v54  ;;  %v2462_v11 = vpop.f32.mrb[11].mxu1 }
 0x14d   :  { %3608 = vmatpush1.bf16.msra.mxu0 %v7510_v34  ;;  %v4292_v21 = vrot.slane %v2592_v53, 1  ;;  %v8380_v0 = vadd.f32 %v8262_v27, %v2462_v11 }
 0x14e   :  { %v8382_v26 = vpop.f32.mrb[24].mxu0  ;;  %3609 = vmatprep.subr.bf16.mxu0 %v7518_v40  ;;  %v4414_v2 = vsel %vm4411_vm2, %v4412_v48, %v4413_v55  ;;  %v4476_v24 = vsel %vm4473_vm3, %v4474_v51, %v4475_v56  ;;  %v4415_v3 = vrot.slane %v8374_v52, 2  ;;  %v4477_v35 = vrot.slane %v8374_v52, 4  ;;  %2924 = vmatmul.mubr.bf16.gmra.mrb[76].mxu1 %v8267_v28  ;;  %v7519_v28 = vld [vmem:[#allocation3 + $0x9c0] ss:$56 sps:$4 sm:$0xff]  }
 0x14f   :  { %v8393_v27 = vpop.f32.mrb[25].mxu0  ;;  %v4535_v38 = vmax.f32 %v4414_v2, %v4476_v24  ;;  %v4293_v4 = vsel %vm4284_vm1, %v4290_v25, %v4292_v21  ;;  %v4294_v50 = vrot.slane %v8380_v0, 1  ;;  %3232 = vmatprep.mubr.bf16.mxu1 %v8273_v29  ;;  %v7524_v29 = vld [vmem:[#allocation3 + $0xa34] ss:$56 sps:$4 sm:$0xff]  }
 0x150   :  { %v8398_v60 = vpop.f32.mrb[26].mxu0  ;;  %v4416_v7 = vsel %vm4411_vm2, %v4413_v55, %v4415_v3  ;;  %v4478_v8 = vsel %vm4473_vm3, %v4475_v56, %v4477_v35  ;;  %v4349_v10 = vadd.f32 %v4293_v4, %v8337_v6  ;;  %v8414_v6 = vld [vmem:[%s10253_s0 + $0x60] ss:$16 sps:$4 sm:$0xff]  }
 0x151   :  { %v8403_v9 = vpop.f32.mrb[27].mxu0  ;;  %3610 = vmatpush1.bf16.msra.mxu0 %v7516_v15  ;;  %v4555_v18 = vmax.f32 %v8346_v22, %v4535_v38  ;;  %v4536_v12 = vmax.f32 %v4416_v7, %v4478_v8  ;;  %v4295_v25 = vsel %vm4284_vm1, %v4292_v21, %v4294_v50  ;;  %v2466_v14 = vpop.f32.mrb[12].mxu1  ;;  %v7486_v55 = vld [vmem:[#allocation3 + $0x718] ss:$56 sps:$4 sm:$0xff]   ;;  %v7530_v38 = vld [vmem:[#allocation3 + $0xaa4] ss:$56 sps:$4 sm:$0xff]  }
 0x152   :  { %3611 = vmatprep.subr.bf16.mxu0 %v7521_v1  ;;  %v8408_v34 = vadd.f32 %v8334_v5, %v4349_v10  ;;  %v4350_v16 = vadd.f32 %v4295_v25, %v2590_v43  ;;  %v2600_v37 = vadd.f32 %v8276_v32, %v2466_v14  ;;  %v2468_v40 = vpop.f32.mrb[13].mxu1  ;;  %v8421_v43 = vld [vmem:[%s10253_s0 + $0x84] ss:$16 sps:$4 sm:$0xff]   ;;  %v7522_v21 = vld [vmem:[#allocation3 + $0xa30] ss:$56 sps:$4 sm:$0xff]  }
 0x153   :  { %3529 = vmatmul.mubr.bf16.gmra.mrb[92].mxu0 %v8414_v6  ;;  %v4575_v42 = vmax.f32 %v4555_v18, 0.0  ;;  %v4556_v44 = vmax.f32 %v4372_v41, %v4536_v12  ;;  %v2602_v53 = vadd.f32 %v8279_v33, %v2468_v40  ;;  %v2470_v54 = vpop.f32.mrb[14].mxu1  ;;  %v7494_v32 = vld [vmem:[#allocation3 + $0x78c] ss:$56 sps:$4 sm:$0xff]   ;;  %v7500_v14 = vld [vmem:[#allocation3 + $0x7fc] ss:$56 sps:$4 sm:$0xff]  }
 0x154   :  { %3538 = vmatprep.mubr.bf16.mxu0 %v8421_v43  ;;  %v4417_v56 = vrot.slane %v8408_v34, 2  ;;  %v4479_v11 = vrot.slane %v8408_v34, 4  ;;  %v8427_v15 = vadd.f32 %v8334_v5, %v4350_v16  ;;  %v8430_v41 = vadd.f32 %v8283_v36, %v2470_v54  ;;  %v2472_v33 = vpop.f32.mrb[15].mxu1  ;;  %v7552_v22 = vld [vmem:[#allocation3 + $0x180] ss:$56 sps:$4 sm:$0xff]  }
 0x155   :  { %3612 = vmatpush1.bf16.msra.mxu0 %v7519_v28  ;;  %4595 = vst [vmem:[#allocation2] sm:$0xff] %v4575_v42  ;;  %v4576_v0 = vmax.f32 %v4556_v44, 0.0  ;;  %v4296_v1 = vrot.slane %v2602_v53, 1  ;;  %v8433_v2 = vadd.f32 %v8285_v39, %v2472_v33  ;;  %v7539_v44 = vld [vmem:[#allocation3 + $0x34] ss:$56 sps:$4 sm:$0xff]  }
 0x156   :  { %v8435_v24 = vpop.f32.mrb[28].mxu0  ;;  %3613 = vmatprep.subr.bf16.mxu0 %v7524_v29  ;;  %v4418_v4 = vsel %vm4411_vm2, %v4415_v3, %v4417_v56  ;;  %v4480_v7 = vsel %vm4473_vm3, %v4477_v35, %v4479_v11  ;;  %v4419_v36 = vrot.slane %v8427_v15, 2  ;;  %v4481_v8 = vrot.slane %v8427_v15, 4  ;;  %3233 = vmatmul.mubr.bf16.vlgmr.msra.gmra.mrb[80].mxu1 %v8291_v45  ;;  %v7492_v3 = vld [vmem:[#allocation3 + $0x788] ss:$56 sps:$4 sm:$0xff]  }
 0x157   :  { %v8442_v10 = vpop.f32.mrb[29].mxu0  ;;  %4596 = vst [vmem:[#allocation2 + $0x8] sm:$0xff] %v4576_v0  ;;  %v4537_v28 = vmax.f32 %v4418_v4, %v4480_v7  ;;  %v4297_v39 = vsel %vm4284_vm1, %v4294_v50, %v4296_v1  ;;  %v4298_v18 = vrot.slane %v8433_v2, 1  ;;  %3334 = vmatpush1.bf16.msra.mxu1 %v7486_v55  ;;  %3242 = vmatprep.mubr.bf16.mxu1 %v8300_v49  ;;  %v7528_v50 = vld [vmem:[#allocation3 + $0xaa0] ss:$56 sps:$4 sm:$0xff]  }
 0x158   :  { %v8447_v12 = vpop.f32.mrb[30].mxu0  ;;  %v4420_v35 = vsel %vm4411_vm2, %v4417_v56, %v4419_v36  ;;  %v4482_v25 = vsel %vm4473_vm3, %v4479_v11, %v4481_v8  ;;  %v4351_v45 = vadd.f32 %v4297_v39, %v8377_v58  ;;  %3335 = vmatprep.subr.bf16.mxu1 %v7494_v32  ;;  %v8461_v32 = vld [vmem:[%s10253_s0 + $0x80] ss:$16 sps:$4 sm:$0xff]  }
 0x159   :  { %v8452_v29 = vpop.f32.mrb[31].mxu0  ;;  %3614 = vmatpush1.bf16.msra.mxu0 %v7522_v21  ;;  %v4557_v16 = vmax.f32 %v8374_v52, %v4537_v28  ;;  %v4538_v40 = vmax.f32 %v4420_v35, %v4482_v25  ;;  %v4299_v49 = vsel %vm4284_vm1, %v4296_v1, %v4298_v18  ;;  %v2476_v42 = vpop.f32.mrb[16].mxu1 }
 0x15a   :  { %3615 = vmatprep.subr.bf16.mxu0 %v7530_v38  ;;  %v4376_v53 = vadd.f32 %v8334_v5, %v4351_v45  ;;  %v4352_v54 = vadd.f32 %v4299_v49, %v2600_v37  ;;  %v2610_v55 = vadd.f32 %v8305_v57, %v2476_v42  ;;  %v2478_v58 = vpop.f32.mrb[17].mxu1  ;;  %v8469_v37 = vld [vmem:[%s10253_s0 + $0xa4] ss:$16 sps:$4 sm:$0xff]   ;;  %v7498_v57 = vld [vmem:[#allocation3 + $0x7f8] ss:$56 sps:$4 sm:$0xff]  }
 0x15b   :  { %3539 = vmatmul.mubr.bf16.gmra.mrb[96].mxu0 %v8461_v32  ;;  %v4577_v52 = vmax.f32 %v4557_v16, 0.0  ;;  %v4558_v56 = vmax.f32 %v8408_v34, %v4538_v40  ;;  %v2612_v11 = vadd.f32 %v8308_v59, %v2478_v58  ;;  %v2480_v33 = vpop.f32.mrb[18].mxu1  ;;  %3336 = vmatpush1.bf16.msra.mxu1 %v7492_v3  ;;  %v7506_v59 = vld [vmem:[#allocation3 + $0x86c] ss:$56 sps:$4 sm:$0xff]   ;;  %v7515_v40 = vld [vmem:[#allocation3 + $0x8dc] ss:$56 sps:$4 sm:$0xff]  }
 0x15c   :  { %3548 = vmatprep.mubr.bf16.mxu0 %v8469_v37  ;;  %v4421_v21 = vrot.slane %v4376_v53, 2  ;;  %v4483_v0 = vrot.slane %v4376_v53, 4  ;;  %v8473_v1 = vadd.f32 %v8334_v5, %v4352_v54  ;;  %v8476_v2 = vadd.f32 %v8313_v63, %v2480_v33  ;;  %v2482_v34 = vpop.f32.mrb[19].mxu1  ;;  %3337 = vmatprep.subr.bf16.mxu1 %v7500_v14 }
 0x15d   :  { %3616 = vmatpush1.bf16.msra.mxu0 %v7528_v50  ;;  %4597 = vst [vmem:[#allocation2 + $0x10] sm:$0xff] %v4577_v52  ;;  %v4578_v38 = vmax.f32 %v4558_v56, 0.0  ;;  %v4300_v4 = vrot.slane %v2612_v11, 1  ;;  %v8479_v7 = vadd.f32 %v8315_v23, %v2482_v34 }
 0x15e   :  { %v8481_v28 = vpop.f32.mrb[32].mxu0  ;;  %3998 = vmatprep.subr.bf16.mxu0 %v7539_v44  ;;  %v4422_v39 = vsel %vm4411_vm2, %v4419_v36, %v4421_v21  ;;  %v4484_v3 = vsel %vm4473_vm3, %v4481_v8, %v4483_v0  ;;  %v4423_v63 = vrot.slane %v8473_v1, 2  ;;  %v4485_v35 = vrot.slane %v8473_v1, 4  ;;  %3243 = vmatmul.mubr.bf16.gmra.mrb[84].mxu1 %v8324_v47  ;;  %v7504_v36 = vld [vmem:[#allocation3 + $0x868] ss:$56 sps:$4 sm:$0xff]  }
 0x15f   :  { %v8488_v25 = vpop.f32.mrb[33].mxu0  ;;  %4598 = vst [vmem:[#allocation2 + $0x18] sm:$0xff] %v4578_v38  ;;  %v4539_v45 = vmax.f32 %v4422_v39, %v4484_v3  ;;  %v4301_v23 = vsel %vm4284_vm1, %v4298_v18, %v4300_v4  ;;  %v4302_v14 = vrot.slane %v8479_v7, 1  ;;  %3252 = vmatprep.mubr.bf16.mxu1 %v8331_v62  ;;  %3338 = vmatpush1.bf16.msra.mxu1 %v7498_v57 }
 0x160   :  { %v8493_v50 = vpop.f32.mrb[34].mxu0  ;;  %v4424_v8 = vsel %vm4411_vm2, %v4421_v21, %v4423_v63  ;;  %v4486_v16 = vsel %vm4473_vm3, %v4483_v0, %v4485_v35  ;;  %v4353_v47 = vadd.f32 %v4301_v23, %v8430_v41  ;;  %3339 = vmatprep.subr.bf16.mxu1 %v7506_v59  ;;  %v8507_v41 = vld [vmem:[%s10253_s0 + $0xa0] ss:$16 sps:$4 sm:$0xff]   ;;  %v8514_v21 = vld [vmem:[%s10253_s0 + $0xc4] ss:$16 sps:$4 sm:$0xff]  }
 0x161   :  { %v8498_v49 = vpop.f32.mrb[35].mxu0  ;;  %v4559_v18 = vmax.f32 %v8427_v15, %v4539_v45  ;;  %v4540_v42 = vmax.f32 %v4424_v8, %v4486_v16  ;;  %v4303_v44 = vsel %vm4284_vm1, %v4300_v4, %v4302_v14  ;;  %v2486_v62 = vpop.f32.mrb[20].mxu1 }
 0x162   :  { %v4378_v54 = vadd.f32 %v8334_v5, %v4353_v47  ;;  %v4354_v58 = vadd.f32 %v4303_v44, %v2610_v55  ;;  %v2620_v52 = vadd.f32 %v8340_v13, %v2486_v62  ;;  %v2488_v56 = vpop.f32.mrb[21].mxu1  ;;  %v7513_v13 = vld [vmem:[#allocation3 + $0x8d8] ss:$56 sps:$4 sm:$0xff]   ;;  %v7527_v55 = vld [vmem:[#allocation3 + $0x94c] ss:$56 sps:$4 sm:$0xff]  }
 0x163   :  { %3549 = vmatmul.mubr.bf16.gmra.mrb[100].mxu0 %v8507_v41  ;;  %v4579_v11 = vmax.f32 %v4559_v18, 0.0  ;;  %v4560_v15 = vmax.f32 %v4376_v53, %v4540_v42  ;;  %v2622_v33 = vadd.f32 %v8343_v19, %v2488_v56  ;;  %v2490_v57 = vpop.f32.mrb[22].mxu1  ;;  %3340 = vmatpush1.bf16.msra.mxu1 %v7504_v36  ;;  %v7533_v44 = vld [vmem:[#allocation3 + $0x9bc] ss:$56 sps:$4 sm:$0xff]  }
 0x164   :  { %3558 = vmatprep.mubr.bf16.mxu0 %v8514_v21  ;;  %v4615_v0 = vld [vmem:[#allocation2] ss:$3 sm:$0xff]  ;;  %v4425_v34 = vrot.slane %v4378_v54, 2  ;;  %v4487_v59 = vrot.slane %v4378_v54, 4  ;;  %v8518_v38 = vadd.f32 %v8334_v5, %v4354_v58  ;;  %v8521_v53 = vadd.f32 %v8351_v30, %v2490_v57  ;;  %v2492_v19 = vpop.f32.mrb[23].mxu1  ;;  %3341 = vmatprep.subr.bf16.mxu1 %v7515_v40 }
 0x165   :  { %4623 = vst.msk [vmem:[%s10256_s3] sm:$0xff] %vm4622_vm4, %v4615_v0  ;;  %4599 = vst [vmem:[#allocation2 + $0x20] sm:$0xff] %v4579_v11  ;;  %v4580_v4 = vmax.f32 %v4560_v15, 0.0  ;;  %v4304_v7 = vrot.slane %v2622_v33, 1  ;;  %v2626_v39 = vadd.f32 %v8353_v31, %v2492_v19  ;;  %v8560_v0 = vld [vmem:[%s10253_s0 + $0xe4] ss:$16 sps:$4 sm:$0xff]  }
 0x166   :  { %v8528_v3 = vpop.f32.mrb[36].mxu0  ;;  %v4426_v45 = vsel %vm4411_vm2, %v4423_v63, %v4425_v34  ;;  %v4488_v23 = vsel %vm4473_vm3, %v4485_v35, %v4487_v59  ;;  %v4427_v30 = vrot.slane %v8518_v38, 2  ;;  %v4489_v36 = vrot.slane %v8518_v38, 4  ;;  %3253 = vmatmul.mubr.bf16.gmra.mrb[88].mxu1 %v8361_v17  ;;  %v7525_v63 = vld [vmem:[#allocation3 + $0x948] ss:$56 sps:$4 sm:$0xff]  }
 0x167   :  { %v8535_v8 = vpop.f32.mrb[37].mxu0  ;;  %4600 = vst [vmem:[#allocation2 + $0x28] sm:$0xff] %v4580_v4  ;;  %v4541_v16 = vmax.f32 %v4426_v45, %v4488_v23  ;;  %v4305_v47 = vsel %vm4284_vm1, %v4302_v14, %v4304_v7  ;;  %v4306_v40 = vrot.slane %v2626_v39, 1  ;;  %3262 = vmatprep.mubr.bf16.mxu1 %v8370_v20  ;;  %3342 = vmatpush1.bf16.msra.mxu1 %v7513_v13 }
 0x168   :  { %v8539_v31 = vpop.f32.mrb[38].mxu0  ;;  %v4428_v35 = vsel %vm4411_vm2, %v4425_v34, %v4427_v30  ;;  %v4490_v18 = vsel %vm4473_vm3, %v4487_v59, %v4489_v36  ;;  %v4355_v42 = vadd.f32 %v4305_v47, %v8476_v2  ;;  %3343 = vmatprep.subr.bf16.mxu1 %v7527_v55  ;;  %v8553_v2 = vld [vmem:[%s10253_s0 + $0xc0] ss:$16 sps:$4 sm:$0xff]  }
 0x169   :  { %v8544_v17 = vpop.f32.mrb[39].mxu0  ;;  %v4561_v62 = vmax.f32 %v8473_v1, %v4541_v16  ;;  %v4542_v14 = vmax.f32 %v4428_v35, %v4490_v18  ;;  %v4307_v58 = vsel %vm4284_vm1, %v4304_v7, %v4306_v40  ;;  %v2496_v20 = vpop.f32.mrb[24].mxu1 }
 0x16a   :  { %v4380_v56 = vadd.f32 %v8334_v5, %v4355_v42  ;;  %v4356_v11 = vadd.f32 %v4307_v58, %v2620_v52  ;;  %v2630_v15 = vadd.f32 %v8382_v26, %v2496_v20  ;;  %v2498_v33 = vpop.f32.mrb[25].mxu1  ;;  %v7531_v26 = vld [vmem:[#allocation3 + $0x9b8] ss:$56 sps:$4 sm:$0xff]   ;;  %v7542_v42 = vld [vmem:[#allocation3 + $0xa9c] ss:$56 sps:$4 sm:$0xff]  }
 0x16b   :  { %3559 = vmatmul.mubr.bf16.gmra.mrb[104].mxu0 %v8553_v2  ;;  %v4581_v57 = vmax.f32 %v4561_v62, 0.0  ;;  %v4562_v13 = vmax.f32 %v4378_v54, %v4542_v14  ;;  %v2632_v1 = vadd.f32 %v8393_v27, %v2498_v33  ;;  %v2500_v55 = vpop.f32.mrb[26].mxu1  ;;  %3344 = vmatpush1.bf16.msra.mxu1 %v7525_v63  ;;  %v7536_v27 = vld [vmem:[#allocation3 + $0xa2c] ss:$56 sps:$4 sm:$0xff]   ;;  %v8591_v33 = vld [vmem:[%s10253_s0 + $0xe0] ss:$16 sps:$4 sm:$0xff]  }
 0x16c   :  { %3568 = vmatprep.mubr.bf16.mxu0 %v8560_v0  ;;  %v4429_v52 = vrot.slane %v4380_v56, 2  ;;  %v4491_v34 = vrot.slane %v4380_v56, 4  ;;  %v8564_v59 = vadd.f32 %v8334_v5, %v4356_v11  ;;  %v8567_v19 = vadd.f32 %v8398_v60, %v2500_v55  ;;  %v2502_v54 = vpop.f32.mrb[27].mxu1  ;;  %3345 = vmatprep.subr.bf16.mxu1 %v7533_v44 }
 0x16d   :  { %4601 = vst [vmem:[#allocation2 + $0x30] sm:$0xff] %v4581_v57  ;;  %v4582_v4 = vmax.f32 %v4562_v13, 0.0  ;;  %v4308_v7 = vrot.slane %v2632_v1, 1  ;;  %v2636_v39 = vadd.f32 %v8403_v9, %v2502_v54  ;;  %v8598_v1 = vld [vmem:[%s10253_s0 + $0x104] ss:$16 sps:$4 sm:$0xff]  }
 0x16e   :  { %v4617_v45 = vld [vmem:[#allocation2 + $0x18] ss:$3 sm:$0xff]  ;;  %v4430_v23 = vsel %vm4411_vm2, %v4427_v30, %v4429_v52  ;;  %v4492_v16 = vsel %vm4473_vm3, %v4489_v36, %v4491_v34  ;;  %v4431_v47 = vrot.slane %v8564_v59, 2  ;;  %v4493_v63 = vrot.slane %v8564_v59, 4  ;;  %3263 = vmatmul.mubr.bf16.gmra.mrb[92].mxu1 %v8414_v6 }
 0x16f   :  { %4624 = vst.msk [vmem:[%s10256_s3 + $0x8] sm:$0xff] %vm4622_vm4, %v4617_v45  ;;  %4602 = vst [vmem:[#allocation2 + $0x38] sm:$0xff] %v4582_v4  ;;  %v4543_v60 = vmax.f32 %v4430_v23, %v4492_v16  ;;  %v4309_v9 = vsel %vm4284_vm1, %v4306_v40, %v4308_v7  ;;  %v4310_v35 = vrot.slane %v2636_v39, 1  ;;  %3272 = vmatprep.mubr.bf16.mxu1 %v8421_v43  ;;  %3346 = vmatpush1.bf16.msra.mxu1 %v7531_v26  ;;  %v7534_v30 = vld [vmem:[#allocation3 + $0xa28] ss:$56 sps:$4 sm:$0xff]  }
 0x170   :  { %v4432_v36 = vsel %vm4411_vm2, %v4429_v52, %v4431_v47  ;;  %v4494_v18 = vsel %vm4473_vm3, %v4491_v34, %v4493_v63  ;;  %v4357_v6 = vadd.f32 %v4309_v9, %v8521_v53  ;;  %3347 = vmatprep.subr.bf16.mxu1 %v7536_v27 }
 0x171   :  { %v4563_v44 = vmax.f32 %v8518_v38, %v4543_v60  ;;  %v4544_v62 = vmax.f32 %v4432_v36, %v4494_v18  ;;  %v4311_v14 = vsel %vm4284_vm1, %v4308_v7, %v4310_v35  ;;  %v2506_v58 = vpop.f32.mrb[28].mxu1 }
 0x172   :  { %v4382_v40 = vadd.f32 %v8334_v5, %v4357_v6  ;;  %v4358_v20 = vadd.f32 %v4311_v14, %v2630_v15  ;;  %v2640_v43 = vadd.f32 %v8435_v24, %v2506_v58  ;;  %v2508_v11 = vpop.f32.mrb[29].mxu1  ;;  %v7540_v24 = vld [vmem:[#allocation3 + $0xa98] ss:$56 sps:$4 sm:$0xff]  }
 0x173   :  { %3569 = vmatmul.mubr.bf16.gmra.mrb[108].mxu0 %v8591_v33  ;;  %v4583_v53 = vmax.f32 %v4563_v44, 0.0  ;;  %v4564_v57 = vmax.f32 %v4380_v56, %v4544_v62  ;;  %v2642_v38 = vadd.f32 %v8442_v10, %v2508_v11  ;;  %v2510_v13 = vpop.f32.mrb[30].mxu1  ;;  %3348 = vmatpush1.bf16.msra.mxu1 %v7534_v30  ;;  %v7551_v10 = vld [vmem:[#allocation3 + $0x2c] ss:$56 sps:$4 sm:$0xff]   ;;  %v8625_v6 = vld [vmem:[%s10253_s0 + $0x100] ss:$16 sps:$4 sm:$0xff]  }
 0x174   :  { %3578 = vmatprep.mubr.bf16.mxu0 %v8598_v1  ;;  %v4433_v15 = vrot.slane %v4382_v40, 2  ;;  %v4495_v55 = vrot.slane %v4382_v40, 4  ;;  %v8602_v26 = vadd.f32 %v8334_v5, %v4358_v20  ;;  %v8605_v52 = vadd.f32 %v8447_v12, %v2510_v13  ;;  %v2512_v56 = vpop.f32.mrb[31].mxu1  ;;  %3349 = vmatprep.subr.bf16.mxu1 %v7542_v42  ;;  %v8632_v62 = vld [vmem:[%s10253_s0 + $0x124] ss:$16 sps:$4 sm:$0xff]  }
 0x175   :  { %4603 = vst [vmem:[#allocation2 + $0x40] sm:$0xff] %v4583_v53  ;;  %v4584_v34 = vmax.f32 %v4564_v57, 0.0  ;;  %v4312_v54 = vrot.slane %v2642_v38, 1  ;;  %v2646_v27 = vadd.f32 %v8452_v29, %v2512_v56 }
 0x176   :  { %v4434_v4 = vsel %vm4411_vm2, %v4431_v47, %v4433_v15  ;;  %v4496_v7 = vsel %vm4473_vm3, %v4493_v63, %v4495_v55  ;;  %v4435_v39 = vrot.slane %v8602_v26, 2  ;;  %v4497_v45 = vrot.slane %v8602_v26, 4  ;;  %3273 = vmatmul.mubr.bf16.gmra.mrb[96].mxu1 %v8461_v32 }
 0x177   :  { %4604 = vst [vmem:[#allocation2 + $0x48] sm:$0xff] %v4584_v34  ;;  %v4545_v12 = vmax.f32 %v4434_v4, %v4496_v7  ;;  %v4313_v23 = vsel %vm4284_vm1, %v4310_v35, %v4312_v54  ;;  %v4314_v16 = vrot.slane %v2646_v27, 1  ;;  %3282 = vmatprep.mubr.bf16.mxu1 %v8469_v37  ;;  %3350 = vmatpush1.bf16.msra.mxu1 %v7540_v24 }
 0x178   :  { %v4436_v29 = vsel %vm4411_vm2, %v4433_v15, %v4435_v39  ;;  %v4498_v47 = vsel %vm4473_vm3, %v4495_v55, %v4497_v45  ;;  %v4359_v63 = vadd.f32 %v4313_v23, %v8567_v19  ;;  %3732 = vmatprep.subr.bf16.mxu1 %v7551_v10 }
 0x179   :  { %v4565_v60 = vmax.f32 %v8564_v59, %v4545_v12  ;;  %v4546_v9 = vmax.f32 %v4436_v29, %v4498_v47  ;;  %v4315_v32 = vsel %vm4284_vm1, %v4312_v54, %v4314_v16  ;;  %v2516_v30 = vpop.f32.mrb[32].mxu1  ;;  %v8665_v12 = vld [vmem:[%s10253_s0 + $0x120] ss:$16 sps:$4 sm:$0xff]   ;;  %v8672_v29 = vld [vmem:[%s10253_s0 + $0xc] ss:$16 sps:$4 sm:$0xff]  }
 0x17a   :  { %v4384_v36 = vadd.f32 %v8334_v5, %v4359_v63  ;;  %v4360_v35 = vadd.f32 %v4315_v32, %v2640_v43  ;;  %v2650_v18 = vadd.f32 %v8481_v28, %v2516_v30  ;;  %v2518_v37 = vpop.f32.mrb[33].mxu1 }
 0x17b   :  { %3579 = vmatmul.mubr.bf16.gmra.mrb[112].mxu0 %v8625_v6  ;;  %v4585_v19 = vmax.f32 %v4565_v60, 0.0  ;;  %v4566_v42 = vmax.f32 %v4382_v40, %v4546_v9  ;;  %v2652_v59 = vadd.f32 %v8488_v25, %v2518_v37  ;;  %v2520_v44 = vpop.f32.mrb[34].mxu1 }
 0x17c   :  { %3588 = vmatprep.mubr.bf16.mxu0 %v8632_v62  ;;  %v4619_v28 = vld [vmem:[#allocation2 + $0x30] ss:$3 sm:$0xff]  ;;  %v4437_v14 = vrot.slane %v4384_v36, 2  ;;  %v4499_v58 = vrot.slane %v4384_v36, 4  ;;  %v8636_v20 = vadd.f32 %v8334_v5, %v4360_v35  ;;  %v2654_v43 = vadd.f32 %v8493_v50, %v2520_v44  ;;  %v2522_v40 = vpop.f32.mrb[35].mxu1 }
 0x17d   :  { %4625 = vst.msk [vmem:[%s10256_s3 + $0x10] sm:$0xff] %vm4622_vm4, %v4619_v28  ;;  %4605 = vst [vmem:[#allocation2 + $0x50] sm:$0xff] %v4585_v19  ;;  %v4586_v25 = vmax.f32 %v4566_v42, 0.0  ;;  %v4316_v11 = vrot.slane %v2652_v59, 1  ;;  %v2656_v53 = vadd.f32 %v8498_v49, %v2522_v40  ;;  %v7537_v59 = vld [vmem:[#allocation3 + $0x30] ss:$56 sps:$4 sm:$0xff]  }
 0x17e   :  { %v4438_v57 = vsel %vm4411_vm2, %v4435_v39, %v4437_v14  ;;  %v4500_v38 = vsel %vm4473_vm3, %v4497_v45, %v4499_v58  ;;  %v4439_v13 = vrot.slane %v8636_v20, 2  ;;  %v4501_v24 = vrot.slane %v8636_v20, 4  ;;  %3283 = vmatmul.mubr.bf16.gmra.mrb[100].mxu1 %v8507_v41  ;;  %v4621_v50 = vld [vmem:[#allocation2 + $0x48] ss:$3 sm:$0x1] }
 0x17f   :  { %4606 = vst [vmem:[#allocation2 + $0x58] sm:$0xff] %v4586_v25  ;;  %v4547_v15 = vmax.f32 %v4438_v57, %v4500_v38  ;;  %v4317_v55 = vsel %vm4284_vm1, %v4314_v16, %v4316_v11  ;;  %v4318_v56 = vrot.slane %v2656_v53, 1  ;;  %3292 = vmatprep.mubr.bf16.mxu1 %v8514_v21  ;;  %4627 = vst.msk [vmem:[%s10256_s3 + $0x18] sm:$0x1] %vm4626_vm5, %v4621_v50  ;;  %v8699_v57 = vld [vmem:[%s10253_s0 + $0x8] ss:$16 sps:$4 sm:$0xff]  }
 0x180   :  { %v4440_v49 = vsel %vm4411_vm2, %v4437_v14, %v4439_v13  ;;  %v4502_v10 = vsel %vm4473_vm3, %v4499_v58, %v4501_v24  ;;  %v4361_v34 = vadd.f32 %v4317_v55, %v8605_v52  ;;  %v7545_v14 = vld [vmem:[#allocation3 + $0xa4] ss:$56 sps:$4 sm:$0xff]   ;;  %v7548_v55 = vld [vmem:[#allocation3 + $0x114] ss:$56 sps:$4 sm:$0xff]  }
 0x181   :  { %v4567_v41 = vmax.f32 %v8602_v26, %v4547_v15  ;;  %v4548_v54 = vmax.f32 %v4440_v49, %v4502_v10  ;;  %v4319_v27 = vsel %vm4284_vm1, %v4316_v11, %v4318_v56  ;;  %v2526_v4 = vpop.f32.mrb[36].mxu1  ;;  %v8705_v38 = vld [vmem:[%s10253_s0 + $0x2c] ss:$16 sps:$4 sm:$0xff]  }
 0x182   :  { %v4386_v7 = vadd.f32 %v8334_v5, %v4361_v34  ;;  %v4362_v21 = vadd.f32 %v4319_v27, %v2650_v18  ;;  %v2660_v39 = vadd.f32 %v8528_v3, %v2526_v4  ;;  %v2528_v45 = vpop.f32.mrb[37].mxu1  ;;  %v7546_v4 = vld [vmem:[#allocation3 + $0x110] ss:$56 sps:$4 sm:$0xff]  }
 0x183   :  { %3589 = vmatmul.mubr.bf16.gmra.mrb[116].mxu0 %v8665_v12  ;;  %v4587_v52 = vmax.f32 %v4567_v41, 0.0  ;;  %v4568_v23 = vmax.f32 %v4384_v36, %v4548_v54  ;;  %v2662_v26 = vadd.f32 %v8535_v8, %v2528_v45  ;;  %v2530_v16 = vpop.f32.mrb[38].mxu1  ;;  %v7554_v45 = vld [vmem:[#allocation3 + $0x184] ss:$56 sps:$4 sm:$0xff]  }
 0x184   :  { %6772 = vmatprep.mubr.msk.bf16.mxu0 %vm2371_vm0, %v8672_v29  ;;  %v4441_v3 = vrot.slane %v4386_v7, 2  ;;  %v4503_v47 = vrot.slane %v4386_v7, 4  ;;  %v8677_v63 = vadd.f32 %v8334_v5, %v4362_v21  ;;  %v2664_v60 = vadd.f32 %v8539_v31, %v2530_v16  ;;  %v2532_v9 = vpop.f32.mrb[39].mxu1 }
 0x185   :  { %4607 = vst [vmem:[#allocation2 + $0x60] sm:$0xff] %v4587_v52  ;;  %v4588_v32 = vmax.f32 %v4568_v23, 0.0  ;;  %v4320_v8 = vrot.slane %v2662_v26, 1  ;;  %v2666_v30 = vadd.f32 %v8544_v17, %v2532_v9 }
 0x186   :  { %v4442_v36 = vsel %vm4411_vm2, %v4439_v13, %v4441_v3  ;;  %v4504_v35 = vsel %vm4473_vm3, %v4501_v24, %v4503_v47  ;;  %v4443_v18 = vrot.slane %v8677_v63, 2  ;;  %v4505_v37 = vrot.slane %v8677_v63, 4  ;;  %3293 = vmatmul.mubr.bf16.gmra.mrb[104].mxu1 %v8553_v2 }
 0x187   :  { %4608 = vst [vmem:[#allocation2 + $0x68] sm:$0xff] %v4588_v32  ;;  %v4549_v19 = vmax.f32 %v4442_v36, %v4504_v35  ;;  %v4321_v31 = vsel %vm4284_vm1, %v4318_v56, %v4320_v8  ;;  %v4322_v42 = vrot.slane %v2666_v30, 1  ;;  %3302 = vmatprep.mubr.bf16.mxu1 %v8560_v0  ;;  %v7557_v32 = vld [vmem:[#allocation3 + $0x1f4] ss:$56 sps:$4 sm:$0xff]  }
 0x188   :  { %v4444_v17 = vsel %vm4411_vm2, %v4441_v3, %v4443_v18  ;;  %v4506_v44 = vsel %vm4473_vm3, %v4503_v47, %v4505_v37  ;;  %v4363_v28 = vadd.f32 %v4321_v31, %v2654_v43  ;;  %v8733_v47 = vld [vmem:[%s10253_s0 + $0x28] ss:$16 sps:$4 sm:$0xff]   ;;  %v7569_v31 = vld [vmem:[#allocation3 + $0x2d4] ss:$56 sps:$4 sm:$0xff]  }
 0x189   :  { %v4569_v58 = vmax.f32 %v8636_v20, %v4549_v19  ;;  %v4550_v40 = vmax.f32 %v4444_v17, %v4506_v44  ;;  %v4323_v25 = vsel %vm4284_vm1, %v4320_v8, %v4322_v42  ;;  %v4345_v2 = vsel %vm4284_vm1, %v4322_v42, %v4285_v61  ;;  %v8752_v19 = vld [vmem:[%s10253_s0 + $0x48] ss:$16 sps:$4 sm:$0xff]   ;;  %v7575_v17 = vld [vmem:[#allocation3 + $0x344] ss:$56 sps:$4 sm:$0xff]  }
 0x18a   :  { %v4388_v11 = vadd.f32 %v8334_v5, %v4363_v28  ;;  %v4364_v53 = vadd.f32 %v4323_v25, %v2660_v39  ;;  %v4365_v0 = vadd.f32 %v4345_v2, %v2664_v60  ;;  %v8782_v28 = vld [vmem:[%s10253_s0 + $0x8c] ss:$16 sps:$4 sm:$0xff]   ;;  %v7558_v25 = vld [vmem:[#allocation3 + $0x98] ss:$56 sps:$4 sm:$0xff]  }
 0x18b   :  { %3632 = vmatmul.mubr.bf16.vlgmr.msra.gmra.mrb[80].mxu0 %v8699_v57  ;;  %v4589_v43 = vmax.f32 %v4569_v58, 0.0  ;;  %v4570_v20 = vmax.f32 %v4386_v7, %v4550_v40  ;;  %v7573_v58 = vld [vmem:[#allocation3 + $0x340] ss:$56 sps:$4 sm:$0xff]   ;;  %v7581_v40 = vld [vmem:[#allocation3 + $0x3b4] ss:$56 sps:$4 sm:$0xff]  }
 0x18c   :  { %6773 = vmatprep.mubr.msk.bf16.mxu0 %vm2371_vm0, %v8705_v38  ;;  %3999 = vmatpush1.bf16.msra.mxu0 %v7537_v59  ;;  %v4629_v61 = vld [vmem:[#allocation2 + $0x50] ss:$3 sm:$0xff]  ;;  %v4445_v13 = vrot.slane %v4388_v11, 2  ;;  %v4507_v24 = vrot.slane %v4388_v11, 4  ;;  %v4389_v50 = vadd.f32 %v8334_v5, %v4364_v53  ;;  %v4390_v15 = vadd.f32 %v8334_v5, %v4365_v0 }
 0x18d   :  { %4000 = vmatprep.subr.bf16.mxu0 %v7545_v14  ;;  %6803 = vst.msk [vmem:[%s10256_s3 + $0x68] sm:$0xff] %vm4622_vm4, %v4629_v61  ;;  %4609 = vst [vmem:[#allocation2 + $0x70] sm:$0xff] %v4589_v43  ;;  %v4590_v56 = vmax.f32 %v4570_v20, 0.0  ;;  %v7567_v59 = vld [vmem:[#allocation3 + $0x2d0] ss:$56 sps:$4 sm:$0xff]  }
 0x18e   :  { %v4446_v49 = vsel %vm4411_vm2, %v4443_v18, %v4445_v13  ;;  %v4508_v10 = vsel %vm4473_vm3, %v4505_v37, %v4507_v24  ;;  %v4447_v34 = vrot.slane %v4389_v50, 2  ;;  %v4449_v41 = vrot.slane %v4390_v15, 2  ;;  %3303 = vmatmul.mubr.bf16.gmra.mrb[108].mxu1 %v8591_v33  ;;  %v7555_v18 = vld [vmem:[#allocation3 + $0x1f0] ss:$56 sps:$4 sm:$0xff]   ;;  %v7563_v37 = vld [vmem:[#allocation3 + $0x264] ss:$56 sps:$4 sm:$0xff]  }
 0x18f   :  { %4610 = vst [vmem:[#allocation2 + $0x78] sm:$0xff] %v4590_v56  ;;  %v4551_v54 = vmax.f32 %v4446_v49, %v4508_v10  ;;  %v4509_v5 = vrot.slane %v4389_v50, 4  ;;  %v4511_v27 = vrot.slane %v4390_v15, 4  ;;  %3312 = vmatprep.mubr.bf16.mxu1 %v8598_v1  ;;  %v7560_v14 = vld [vmem:[#allocation3 + $0x9c] ss:$56 sps:$4 sm:$0xff]  }
 0x190   :  { %4001 = vmatpush1.bf16.msra.mxu0 %v7543_v46  ;;  %v4448_v7 = vsel %vm4411_vm2, %v4445_v13, %v4447_v34  ;;  %v4450_v21 = vsel %vm4411_vm2, %v4447_v34, %v4449_v41  ;;  %v4472_v39 = vsel %vm4411_vm2, %v4449_v41, %v4412_v48  ;;  %v7566_v2 = vld [vmem:[#allocation3 + $0x10c] ss:$56 sps:$4 sm:$0xff]   ;;  %v8792_v0 = vld [vmem:[%s10253_s0 + $0x88] ss:$16 sps:$4 sm:$0xff]   ;;  %v7572_v20 = vld [vmem:[#allocation3 + $0x17c] ss:$56 sps:$4 sm:$0xff]  }
 0x191   :  { %4002 = vmatprep.subr.bf16.mxu0 %v7548_v55  ;;  %v4571_v33 = vmax.f32 %v8677_v63, %v4551_v54  ;;  %v4510_v52 = vsel %vm4473_vm3, %v4507_v24, %v4509_v5  ;;  %v4512_v23 = vsel %vm4473_vm3, %v4509_v5, %v4511_v27  ;;  %v4534_v1 = vsel %vm4473_vm3, %v4511_v27, %v4474_v51  ;;  %v8739_v63 = vld [vmem:[%s10253_s0 + $0x4c] ss:$16 sps:$4 sm:$0xff]   ;;  %v7570_v61 = vld [vmem:[#allocation3 + $0x178] ss:$56 sps:$4 sm:$0xff]   ;;  %v7576_v56 = vld [vmem:[#allocation3 + $0x1e8] ss:$56 sps:$4 sm:$0xff]  }
 0x192   :  { %v4552_v26 = vmax.f32 %v4448_v7, %v4510_v52  ;;  %v4553_v16 = vmax.f32 %v4450_v21, %v4512_v23  ;;  %v4554_v3 = vmax.f32 %v4472_v39, %v4534_v1  ;;  %v7584_v53 = vld [vmem:[#allocation3 + $0x424] ss:$56 sps:$4 sm:$0xff]   ;;  %v7590_v46 = vld [vmem:[#allocation3 + $0x494] ss:$56 sps:$4 sm:$0xff]   ;;  %v7588_v24 = vld [vmem:[#allocation3 + $0x490] ss:$56 sps:$4 sm:$0xff]  }
 0x193   :  { %3642 = vmatmul.mubr.bf16.gmra.mrb[84].mxu0 %v8733_v47  ;;  %v4591_v48 = vmax.f32 %v4571_v33, 0.0  ;;  %v8798_v43 = vld [vmem:[%s10253_s0 + $0xac] ss:$16 sps:$4 sm:$0xff]   ;;  %v7594_v10 = vld [vmem:[#allocation3 + $0x500] ss:$56 sps:$4 sm:$0xff]  }
 0x194   :  { %6774 = vmatprep.mubr.msk.bf16.mxu0 %vm2371_vm0, %v8739_v63  ;;  %4003 = vmatpush1.bf16.msra.mxu0 %v7546_v4  ;;  %v4572_v51 = vmax.f32 %v4388_v11, %v4552_v26  ;;  %v4573_v60 = vmax.f32 %v4389_v50, %v4553_v16  ;;  %v4574_v9 = vmax.f32 %v4390_v15, %v4554_v3  ;;  %v7579_v11 = vld [vmem:[#allocation3 + $0x3b0] ss:$56 sps:$4 sm:$0xff]   ;;  %v7578_v13 = vld [vmem:[#allocation3 + $0x1ec] ss:$56 sps:$4 sm:$0xff]   ;;  %v7587_v49 = vld [vmem:[#allocation3 + $0x25c] ss:$56 sps:$4 sm:$0xff]  }
 0x195   :  { %4004 = vmatprep.subr.bf16.mxu0 %v7554_v45  ;;  %4611 = vst [vmem:[#allocation2 + $0x80] sm:$0xff] %v4591_v48  ;;  %v7596_v50 = vld [vmem:[#allocation3 + $0x504] ss:$56 sps:$4 sm:$0xff]   ;;  %v8808_v15 = vld [vmem:[%s10253_s0 + $0xa8] ss:$16 sps:$4 sm:$0xff]  }
 0x196   :  { %v4631_v8 = vld [vmem:[#allocation2 + $0x68] ss:$3 sm:$0xff]  ;;  %v4592_v30 = vmax.f32 %v4572_v51, 0.0  ;;  %v4593_v36 = vmax.f32 %v4573_v60, 0.0  ;;  %v4594_v35 = vmax.f32 %v4574_v9, 0.0  ;;  %3313 = vmatmul.mubr.bf16.gmra.mrb[112].mxu1 %v8625_v6 }
 0x197   :  { %6804 = vst.msk [vmem:[%s10256_s3 + $0x70] sm:$0xff] %vm4622_vm4, %v4631_v8  ;;  %3322 = vmatprep.mubr.bf16.mxu1 %v8632_v62  ;;  %v8758_v6 = vld [vmem:[%s10253_s0 + $0x6c] ss:$16 sps:$4 sm:$0xff]   ;;  %v7561_v62 = vld [vmem:[#allocation3 + $0x260] ss:$56 sps:$4 sm:$0xff]  }
 0x198   :  { %4005 = vmatpush1.bf16.msra.mxu0 %v7552_v22  ;;  %4612 = vst [vmem:[#allocation2 + $0x88] sm:$0xff] %v4592_v30  ;;  %4613 = vst [vmem:[#allocation2 + $0x90] sm:$0xff] %v4593_v36  ;;  %v8814_v55 = vld [vmem:[%s10253_s0 + $0xcc] ss:$16 sps:$4 sm:$0xff]   ;;  %v7585_v41 = vld [vmem:[#allocation3 + $0x258] ss:$56 sps:$4 sm:$0xff]  }
 0x199   :  { %4614 = vst [vmem:[#allocation2 + $0x98] sm:$0xff] %v4594_v35  ;;  %4006 = vmatprep.subr.bf16.mxu0 %v7557_v32  ;;  %v7602_v34 = vld [vmem:[#allocation3 + $0x574] ss:$56 sps:$4 sm:$0xff]   ;;  %v7600_v5 = vld [vmem:[#allocation3 + $0x570] ss:$56 sps:$4 sm:$0xff]  }
 0x19a   :  { %v7593_v54 = vld [vmem:[#allocation3 + $0x2cc] ss:$56 sps:$4 sm:$0xff]   ;;  %v8824_v4 = vld [vmem:[%s10253_s0 + $0xc8] ss:$16 sps:$4 sm:$0xff]   ;;  %v7599_v39 = vld [vmem:[#allocation3 + $0x33c] ss:$56 sps:$4 sm:$0xff]  }
 0x19b   :  { %3652 = vmatmul.mubr.bf16.gmra.mrb[88].mxu0 %v8752_v19  ;;  %v7608_v27 = vld [vmem:[#allocation3 + $0x5e4] ss:$56 sps:$4 sm:$0xff]   ;;  %v7591_v21 = vld [vmem:[#allocation3 + $0x2c8] ss:$56 sps:$4 sm:$0xff]   ;;  %v7611_v52 = vld [vmem:[#allocation3 + $0x654] ss:$56 sps:$4 sm:$0xff]  }
 0x19c   :  { %6775 = vmatprep.mubr.msk.bf16.mxu0 %vm2371_vm0, %v8758_v6  ;;  %4007 = vmatpush1.bf16.msra.mxu0 %v7555_v18  ;;  %v8830_v7 = vld [vmem:[%s10253_s0 + $0xec] ss:$16 sps:$4 sm:$0xff]   ;;  %v7606_v45 = vld [vmem:[#allocation3 + $0x5e0] ss:$56 sps:$4 sm:$0xff]  }
 0x19d   :  { %4008 = vmatprep.subr.bf16.mxu0 %v7563_v37  ;;  %v7597_v26 = vld [vmem:[#allocation3 + $0x338] ss:$56 sps:$4 sm:$0xff]   ;;  %v7605_v3 = vld [vmem:[#allocation3 + $0x3ac] ss:$56 sps:$4 sm:$0xff]   ;;  %v7603_v51 = vld [vmem:[#allocation3 + $0x3a8] ss:$56 sps:$4 sm:$0xff]  }
 0x19e   :  { %3323 = vmatmul.mubr.bf16.gmra.mrb[116].mxu1 %v8665_v12  ;;  %v8776_v12 = vld [vmem:[%s10253_s0 + $0x68] ss:$16 sps:$4 sm:$0xff]   ;;  %v7617_v48 = vld [vmem:[#allocation3 + $0x6c4] ss:$56 sps:$4 sm:$0xff]   ;;  %v7641_v8 = vld [vmem:[#allocation3 + $0x734] ss:$56 sps:$4 sm:$0xff]  }
 0x19f   :  { %v4633_v42 = vld [vmem:[#allocation2 + $0x80] ss:$3 sm:$0xff]  ;;  %6762 = vmatprep.mubr.msk.bf16.mxu1 %vm2371_vm0, %v8672_v29 }
 0x1a0   :  { %4009 = vmatpush1.bf16.msra.mxu0 %v7561_v62  ;;  %6805 = vst.msk [vmem:[%s10256_s3 + $0x78] sm:$0xff] %vm4622_vm4, %v4633_v42  ;;  %v4635_v44 = vld [vmem:[#allocation2 + $0x98] ss:$3 sm:$0x1]  ;;  %v7549_v29 = vld [vmem:[#allocation3 + $0x28] ss:$56 sps:$4 sm:$0xff]  }
 0x1a1   :  { %4010 = vmatprep.subr.bf16.mxu0 %v7569_v31  ;;  %6806 = vst.msk [vmem:[%s10256_s3 + $0x80] sm:$0x1] %vm4626_vm5, %v4635_v44  ;;  %v8854_v22 = vld [vmem:[%s10253_s0 + $0x10c] ss:$16 sps:$4 sm:$0xff]   ;;  %v7615_v9 = vld [vmem:[#allocation3 + $0x6c0] ss:$56 sps:$4 sm:$0xff]  }
 0x1a2   :  { %v7614_v60 = vld [vmem:[#allocation3 + $0x41c] ss:$56 sps:$4 sm:$0xff]   ;;  %v7612_v37 = vld [vmem:[#allocation3 + $0x418] ss:$56 sps:$4 sm:$0xff]   ;;  %v7620_v31 = vld [vmem:[#allocation3 + $0x48c] ss:$56 sps:$4 sm:$0xff]  }
 0x1a3   :  { %3662 = vmatmul.mubr.bf16.gmra.mrb[92].mxu0 %v8776_v12  ;;  %v7618_v44 = vld [vmem:[#allocation3 + $0x488] ss:$56 sps:$4 sm:$0xff]  }
 0x1a4   :  { %6776 = vmatprep.mubr.msk.bf16.mxu0 %vm2371_vm0, %v8782_v28  ;;  %4011 = vmatpush1.bf16.msra.mxu0 %v7567_v59  ;;  %v8877_v59 = vld [vmem:[%s10253_s0 + $0x108] ss:$16 sps:$4 sm:$0xff]  }
 0x1a5   :  { %4012 = vmatprep.subr.bf16.mxu0 %v7575_v17  ;;  %v8883_v17 = vld [vmem:[%s10253_s0 + $0x12c] ss:$16 sps:$4 sm:$0xff]  }
 0x1a6   :  { %3366 = vmatmul.mubr.bf16.vlgmr.msra.gmra.mrb[80].mxu1 %v8699_v57  ;;  %v7564_v57 = vld [vmem:[#allocation3 + $0x108] ss:$56 sps:$4 sm:$0xff]  }
 0x1a7   :  { %3733 = vmatpush1.bf16.msra.mxu1 %v7549_v29  ;;  %6763 = vmatprep.mubr.msk.bf16.mxu1 %vm2371_vm0, %v8705_v38  ;;  %v7582_v38 = vld [vmem:[#allocation3 + $0x420] ss:$56 sps:$4 sm:$0xff]  }
 0x1a8   :  { %3734 = vmatprep.subr.bf16.mxu1 %v7560_v14  ;;  %4013 = vmatpush1.bf16.msra.mxu0 %v7573_v58 }
 0x1a9   :  { %4014 = vmatprep.subr.bf16.mxu0 %v7581_v40  ;;  %v7621_v40 = vld [vmem:[#allocation3 + $0x4f8] ss:$56 sps:$4 sm:$0xff]  }
 0x1ab   :  { %3672 = vmatmul.mubr.bf16.gmra.mrb[96].mxu0 %v8792_v0  ;;  %3735 = vmatpush1.bf16.msra.mxu1 %v7558_v25 }
 0x1ac   :  { %6777 = vmatprep.mubr.msk.bf16.mxu0 %vm2371_vm0, %v8798_v43  ;;  %3736 = vmatprep.subr.bf16.mxu1 %v7566_v2 }
 0x1ad   :  { %4015 = vmatpush1.bf16.msra.mxu0 %v7579_v11 }
 0x1ae   :  { %4016 = vmatprep.subr.bf16.mxu0 %v7584_v53  ;;  %3376 = vmatmul.mubr.bf16.gmra.mrb[84].mxu1 %v8733_v47  ;;  %v7609_v47 = vld [vmem:[#allocation3 + $0x650] ss:$56 sps:$4 sm:$0xff]   ;;  %v7626_v53 = vld [vmem:[#allocation3 + $0x56c] ss:$56 sps:$4 sm:$0xff]  }
 0x1af   :  { %3737 = vmatpush1.bf16.msra.mxu1 %v7564_v57  ;;  %6764 = vmatprep.mubr.msk.bf16.mxu1 %vm2371_vm0, %v8739_v63  ;;  %v8848_v63 = vld [vmem:[%s10253_s0 + $0xe8] ss:$16 sps:$4 sm:$0xff]  }
 0x1b0   :  { %3738 = vmatprep.subr.bf16.mxu1 %v7572_v20  ;;  %v8903_v57 = vld [vmem:[%s10253_s0 + $0x128] ss:$16 sps:$4 sm:$0xff]  }
 0x1b1   :  { %4017 = vmatpush1.bf16.msra.mxu0 %v7582_v38  ;;  %v7624_v20 = vld [vmem:[#allocation3 + $0x568] ss:$56 sps:$4 sm:$0xff]   ;;  %v7629_v38 = vld [vmem:[#allocation3 + $0x5dc] ss:$56 sps:$4 sm:$0xff]  }
 0x1b2   :  { %4018 = vmatprep.subr.bf16.mxu0 %v7590_v46 }
 0x1b3   :  { %3682 = vmatmul.mubr.bf16.gmra.mrb[100].mxu0 %v8808_v15  ;;  %3739 = vmatpush1.bf16.msra.mxu1 %v7570_v61 }
 0x1b4   :  { %6778 = vmatprep.mubr.msk.bf16.mxu0 %vm2371_vm0, %v8814_v55  ;;  %3740 = vmatprep.subr.bf16.mxu1 %v7578_v13 }
 0x1b5   :  { %4019 = vmatpush1.bf16.msra.mxu0 %v7588_v24 }
 0x1b6   :  { %4020 = vmatprep.subr.bf16.mxu0 %v7596_v50  ;;  %3386 = vmatmul.mubr.bf16.gmra.mrb[88].mxu1 %v8752_v19  ;;  %v7627_v50 = vld [vmem:[#allocation3 + $0x5d8] ss:$56 sps:$4 sm:$0xff]  }
 0x1b7   :  { %3741 = vmatpush1.bf16.msra.mxu1 %v7576_v56  ;;  %6765 = vmatprep.mubr.msk.bf16.mxu1 %vm2371_vm0, %v8758_v6 }
 0x1b8   :  { %3742 = vmatprep.subr.bf16.mxu1 %v7587_v49  ;;  %v7632_v49 = vld [vmem:[#allocation3 + $0x64c] ss:$56 sps:$4 sm:$0xff]  }
 0x1b9   :  { %4021 = vmatpush1.bf16.msra.mxu0 %v7594_v10  ;;  %v7639_v10 = vld [vmem:[#allocation3 + $0x730] ss:$56 sps:$4 sm:$0xff]  }
 0x1ba   :  { %4022 = vmatprep.subr.bf16.mxu0 %v7602_v34 }
 0x1bb   :  { %3692 = vmatmul.mubr.bf16.gmra.mrb[104].mxu0 %v8824_v4  ;;  %3743 = vmatpush1.bf16.msra.mxu1 %v7585_v41  ;;  %v7647_v41 = vld [vmem:[#allocation3 + $0x7a4] ss:$56 sps:$4 sm:$0xff]  }
 0x1bc   :  { %6779 = vmatprep.mubr.msk.bf16.mxu0 %vm2371_vm0, %v8830_v7  ;;  %3744 = vmatprep.subr.bf16.mxu1 %v7593_v54 }
 0x1bd   :  { %4023 = vmatpush1.bf16.msra.mxu0 %v7600_v5 }
 0x1be   :  { %v8834_v33 = vpop.f32.mrb[40].mxu0  ;;  %4024 = vmatprep.subr.bf16.mxu0 %v7608_v27  ;;  %3396 = vmatmul.mubr.bf16.gmra.mrb[92].mxu1 %v8776_v12  ;;  %v7623_v12 = vld [vmem:[#allocation3 + $0x4fc] ss:$56 sps:$4 sm:$0xff]   ;;  %v8930_v27 = vld [vmem:[%s10253_s0] ss:$16 sps:$4 sm:$0xff]  }
 0x1bf   :  { %v8836_v23 = vpop.f32.mrb[41].mxu0  ;;  %6766 = vmatprep.mubr.msk.bf16.mxu1 %vm2371_vm0, %v8782_v28  ;;  %3745 = vmatpush1.bf16.msra.mxu1 %v7591_v21  ;;  %v7630_v21 = vld [vmem:[#allocation3 + $0x648] ss:$56 sps:$4 sm:$0xff]  }
 0x1c0   :  { %v8839_v1 = vpop.f32.mrb[42].mxu0  ;;  %3746 = vmatprep.subr.bf16.mxu1 %v7599_v39 }
 0x1c1   :  { %v8843_v16 = vpop.f32.mrb[43].mxu0  ;;  %4025 = vmatpush1.bf16.msra.mxu0 %v7606_v45  ;;  %v4763_v30 = vrot.slane %v8839_v1, 2  ;;  %v7635_v45 = vld [vmem:[#allocation3 + $0x6bc] ss:$56 sps:$4 sm:$0xff]  }
 0x1c2   :  { %4026 = vmatprep.subr.bf16.mxu0 %v7611_v52  ;;  %v7645_v52 = vld [vmem:[#allocation3 + $0x7a0] ss:$56 sps:$4 sm:$0xff]  }
 0x1c3   :  { %3702 = vmatmul.mubr.bf16.gmra.mrb[108].mxu0 %v8848_v63  ;;  %3747 = vmatpush1.bf16.msra.mxu1 %v7597_v26 }
 0x1c4   :  { %6780 = vmatprep.mubr.msk.bf16.mxu0 %vm2371_vm0, %v8854_v22  ;;  %3748 = vmatprep.subr.bf16.mxu1 %v7605_v3 }
 0x1c5   :  { %4027 = vmatpush1.bf16.msra.mxu0 %v7609_v47 }
 0x1c6   :  { %v3111_v32 = vpop.f32.mrb[44].mxu0  ;;  %4028 = vmatprep.subr.bf16.mxu0 %v7617_v48  ;;  %3406 = vmatmul.mubr.bf16.gmra.mrb[96].mxu1 %v8792_v0  ;;  %v7653_v48 = vld [vmem:[#allocation3 + $0x814] ss:$56 sps:$4 sm:$0xff]  }
 0x1c7   :  { %v4765_v36 = vrot.slane %v3111_v32, 2  ;;  %v8859_v35 = vpop.f32.mrb[45].mxu0  ;;  %6767 = vmatprep.mubr.msk.bf16.mxu1 %vm2371_vm0, %v8798_v43  ;;  %3749 = vmatpush1.bf16.msra.mxu1 %v7603_v51  ;;  %v8909_v43 = vld [vmem:[%s10253_s0 + $0x4] ss:$16 sps:$4 sm:$0xff]  }
 0x1c8   :  { %v3115_v18 = vpop.f32.mrb[46].mxu0  ;;  %3750 = vmatprep.subr.bf16.mxu1 %v7614_v60 }
 0x1c9   :  { %v8867_v19 = vsel %vm4411_vm2, %v4763_v30, %v4765_v36  ;;  %v4767_v6 = vrot.slane %v3115_v18, 2  ;;  %v8869_v62 = vpop.f32.mrb[47].mxu0  ;;  %4029 = vmatpush1.bf16.msra.mxu0 %v7615_v9  ;;  %v10259_v9 = vrot.slane %v8834_v33, 2 }
 0x1ca   :  { %4131 = vmatprep.subr.bf16.mxu0 %v7641_v8 }
 0x1cb   :  { %v8872_v42 = vsel %vm4411_vm2, %v4765_v36, %v4767_v6  ;;  %3712 = vmatmul.mubr.bf16.gmra.mrb[112].mxu0 %v8877_v59  ;;  %3751 = vmatpush1.bf16.msra.mxu1 %v7612_v37  ;;  %v7633_v36 = vld [vmem:[#allocation3 + $0x6b8] ss:$56 sps:$4 sm:$0xff]  }
 0x1cc   :  { %6781 = vmatprep.mubr.msk.bf16.mxu0 %vm2371_vm0, %v8883_v17  ;;  %3752 = vmatprep.subr.bf16.mxu1 %v7620_v31 }
 0x1ce   :  { %v3121_v29 = vpop.f32.mrb[48].mxu0  ;;  %3416 = vmatmul.mubr.bf16.gmra.mrb[100].mxu1 %v8808_v15 }
 0x1cf   :  { %v4769_v28 = vrot.slane %v3121_v29, 2  ;;  %v8887_v14 = vpop.f32.mrb[49].mxu0  ;;  %6768 = vmatprep.mubr.msk.bf16.mxu1 %vm2371_vm0, %v8814_v55  ;;  %3753 = vmatpush1.bf16.msra.mxu1 %v7618_v44  ;;  %v7651_v44 = vld [vmem:[#allocation3 + $0x810] ss:$56 sps:$4 sm:$0xff]   ;;  %v7659_v29 = vld [vmem:[#allocation3 + $0x884] ss:$56 sps:$4 sm:$0xff]  }
 0x1d0   :  { %v3125_v58 = vpop.f32.mrb[50].mxu0  ;;  %3754 = vmatprep.subr.bf16.mxu1 %v7623_v12  ;;  %v4764_v12 = vsel %vm4411_vm2, %v10259_v9, %v4763_v30  ;;  %v8971_v30 = vld [vmem:[%s10253_s0 + $0x44] ss:$16 sps:$4 sm:$0xff]  }
 0x1d1   :  { %v8893_v25 = vsel %vm4411_vm2, %v4767_v6, %v4769_v28  ;;  %v4771_v2 = vrot.slane %v3125_v58, 2  ;;  %v8895_v11 = vpop.f32.mrb[51].mxu0 }
 0x1d3   :  { %v8898_v0 = vsel %vm4411_vm2, %v4769_v28, %v4771_v2  ;;  %3722 = vmatmul.mubr.bf16.gmra.mrb[116].mxu0 %v8903_v57  ;;  %3755 = vmatpush1.bf16.msra.mxu1 %v7621_v40 }
 0x1d4   :  { %4030 = vmatprep.mubr.bf16.mxu0 %v8909_v43  ;;  %3756 = vmatprep.subr.bf16.mxu1 %v7626_v53 }
 0x1d6   :  { %v3131_v46 = vpop.f32.mrb[52].mxu0  ;;  %3426 = vmatmul.mubr.bf16.gmra.mrb[104].mxu1 %v8824_v4 }
 0x1d7   :  { %v4773_v61 = vrot.slane %v3131_v46, 2  ;;  %v8912_v13 = vpop.f32.mrb[53].mxu0  ;;  %6769 = vmatprep.mubr.msk.bf16.mxu1 %vm2371_vm0, %v8830_v7  ;;  %3757 = vmatpush1.bf16.msra.mxu1 %v7624_v20  ;;  %v8936_v7 = vld [vmem:[%s10253_s0 + $0x24] ss:$16 sps:$4 sm:$0xff]   ;;  %v8974_v20 = vld [vmem:[#allocation5 + $0x1] ss:$0 sm:$0xff] }
 0x1d8   :  { %v3135_v24 = vpop.f32.mrb[54].mxu0  ;;  %3758 = vmatprep.subr.bf16.mxu1 %v7629_v38  ;;  %v7657_v46 = vld [vmem:[#allocation3 + $0x880] ss:$56 sps:$4 sm:$0xff]  }
 0x1d9   :  { %v8918_v15 = vsel %vm4411_vm2, %v4771_v2, %v4773_v61  ;;  %v4775_v55 = vrot.slane %v3135_v24, 2  ;;  %v8920_v56 = vpop.f32.mrb[55].mxu0  ;;  %v2835_v34 = vpop.f32.mrb[40].mxu1  ;;  %v8965_v2 = vld [vmem:[%s10253_s0 + $0x20] ss:$16 sps:$4 sm:$0xff]  }
 0x1da   :  { %v8925_v5 = vpop.f32.mrb[41].mxu1 }
 0x1db   :  { %v8923_v54 = vsel %vm4411_vm2, %v4773_v61, %v4775_v55  ;;  %4031 = vmatmul.mubr.bf16.vlgmr.msra.gmra.mrb[120].mxu0 %v8930_v27  ;;  %v2839_v4 = vpop.f32.mrb[42].mxu1  ;;  %3759 = vmatpush1.bf16.msra.mxu1 %v7627_v50  ;;  %v10260_v26 = vrot.slane %v8925_v5, 1 }
 0x1dc   :  { %4040 = vmatprep.mubr.bf16.mxu0 %v8936_v7  ;;  %v2841_v39 = vpop.f32.mrb[43].mxu1  ;;  %3760 = vmatprep.subr.bf16.mxu1 %v7632_v49 }
 0x1dd   :  { %4132 = vmatpush1.bf16.msra.mxu0 %v7639_v10  ;;  %v4662_v3 = vrot.slane %v2841_v39, 1 }
 0x1de   :  { %v3141_v47 = vpop.f32.mrb[56].mxu0  ;;  %4133 = vmatprep.subr.bf16.mxu0 %v7647_v41  ;;  %3436 = vmatmul.mubr.bf16.gmra.mrb[108].mxu1 %v8848_v63  ;;  %v7638_v63 = vld [vmem:[#allocation3 + $0x72c] ss:$56 sps:$4 sm:$0xff]  }
 0x1df   :  { %v4777_v51 = vrot.slane %v3141_v47, 2  ;;  %v8940_v60 = vpop.f32.mrb[57].mxu0  ;;  %v4663_v32 = vsel %vm4284_vm1, %v10260_v26, %v4662_v3  ;;  %6770 = vmatprep.mubr.msk.bf16.mxu1 %vm2371_vm0, %v8854_v22  ;;  %3761 = vmatpush1.bf16.msra.mxu1 %v7630_v21  ;;  %v7642_v26 = vld [vmem:[#allocation3 + $0x798] ss:$56 sps:$4 sm:$0xff]  }
 0x1e0   :  { %v3145_v8 = vpop.f32.mrb[58].mxu0  ;;  %v4722_v18 = vadd.f32 %v4663_v32, %v2835_v34  ;;  %3762 = vmatprep.subr.bf16.mxu1 %v7635_v45 }
 0x1e1   :  { %v8950_v37 = vsel %vm4411_vm2, %v4775_v55, %v4777_v51  ;;  %v4779_v6 = vrot.slane %v3145_v8, 2  ;;  %v8952_v31 = vpop.f32.mrb[59].mxu0  ;;  %4134 = vmatpush1.bf16.msra.mxu0 %v7645_v52  ;;  %v2845_v22 = vpop.f32.mrb[44].mxu1  ;;  %v7662_v55 = vld [vmem:[#allocation3 + $0x8f4] ss:$56 sps:$4 sm:$0xff]  }
 0x1e2   :  { %4135 = vmatprep.subr.bf16.mxu0 %v7653_v48  ;;  %v4823_v28 = vadd.f32 %v4764_v12, %v4722_v18  ;;  %v2847_v40 = vpop.f32.mrb[45].mxu1 }
 0x1e3   :  { %v8960_v58 = vsel %vm4411_vm2, %v4777_v51, %v4779_v6  ;;  %4041 = vmatmul.mubr.bf16.gmra.mrb[124].mxu0 %v8965_v2  ;;  %v4664_v1 = vrot.slane %v2847_v40, 1  ;;  %v2849_v53 = vpop.f32.mrb[46].mxu1  ;;  %3763 = vmatpush1.bf16.msra.mxu1 %v7633_v36  ;;  %v7668_v51 = vld [vmem:[#allocation3 + $0x964] ss:$56 sps:$4 sm:$0xff]   ;;  %v9000_v36 = vld [vmem:[%s10253_s0 + $0x40] ss:$16 sps:$4 sm:$0xff]  }
 0x1e4   :  { %4050 = vmatprep.mubr.bf16.mxu0 %v8971_v30  ;;  %v2851_v38 = vpop.f32.mrb[47].mxu1  ;;  %3865 = vmatprep.subr.bf16.mxu1 %v7638_v63  ;;  %v8981_v41 = vadd.f32 %v8974_v20, %v4823_v28  ;;  %v7666_v40 = vld [vmem:[#allocation3 + $0x960] ss:$56 sps:$4 sm:$0xff]  }
 0x1e5   :  { %4136 = vmatpush1.bf16.msra.mxu0 %v7651_v44  ;;  %v4665_v61 = vsel %vm4284_vm1, %v4662_v3, %v4664_v1  ;;  %v4666_v24 = vrot.slane %v2851_v38, 1 }
 0x1e6   :  { %v3151_v50 = vpop.f32.mrb[60].mxu0  ;;  %4137 = vmatprep.subr.bf16.mxu0 %v7659_v29  ;;  %v4723_v49 = vadd.f32 %v4665_v61, %v2839_v4  ;;  %3446 = vmatmul.mubr.bf16.gmra.mrb[112].mxu1 %v8877_v59  ;;  %v7660_v59 = vld [vmem:[#allocation3 + $0x8f0] ss:$56 sps:$4 sm:$0xff]   ;;  %v10258_v18 = vrot.slane %v8981_v41, 2  ;;  %v10257_v44 = vrot.slane %v8981_v41, 4 }
 0x1e7   :  { %v4781_v10 = vrot.slane %v3151_v50, 2  ;;  %v8977_v34 = vpop.f32.mrb[61].mxu0  ;;  %v4667_v21 = vsel %vm4284_vm1, %v4664_v1, %v4666_v24  ;;  %6771 = vmatprep.mubr.msk.bf16.mxu1 %vm2371_vm0, %v8883_v17  ;;  %v7671_v61 = vld [vmem:[#allocation3 + $0x9d4] ss:$56 sps:$4 sm:$0xff]  }
 0x1e8   :  { %v3155_v39 = vpop.f32.mrb[62].mxu0  ;;  %v4824_v45 = vadd.f32 %v8867_v19, %v4723_v49  ;;  %v4724_v52 = vadd.f32 %v4667_v21, %v2845_v22 }
 0x1e9   :  { %v8988_v3 = vsel %vm4411_vm2, %v4779_v6, %v4781_v10  ;;  %v4783_v4 = vrot.slane %v3155_v39, 2  ;;  %v8990_v47 = vpop.f32.mrb[63].mxu0  ;;  %4138 = vmatpush1.bf16.msra.mxu0 %v7657_v46  ;;  %v2855_v48 = vpop.f32.mrb[48].mxu1 }
 0x1ea   :  { %4139 = vmatprep.subr.bf16.mxu0 %v7662_v55  ;;  %v4849_v32 = vadd.f32 %v8974_v20, %v4824_v45  ;;  %v4825_v8 = vadd.f32 %v8872_v42, %v4724_v52  ;;  %v2857_v19 = vpop.f32.mrb[49].mxu1  ;;  %v9009_v42 = vld [vmem:[%s10253_s0 + $0x64] ss:$16 sps:$4 sm:$0xff]  }
 0x1eb   :  { %v8995_v17 = vsel %vm4411_vm2, %v4781_v10, %v4783_v4  ;;  %4051 = vmatmul.mubr.bf16.gmra.mrb[128].mxu0 %v9000_v36  ;;  %v4668_v6 = vrot.slane %v2857_v19, 1  ;;  %v9004_v63 = vpop.f32.mrb[50].mxu1 }
 0x1ec   :  { %4060 = vmatprep.mubr.bf16.mxu0 %v9009_v42  ;;  %v4889_v12 = vrot.slane %v4849_v32, 2  ;;  %v4950_v22 = vrot.slane %v4849_v32, 4  ;;  %v9014_v29 = vadd.f32 %v8974_v20, %v4825_v8  ;;  %v2861_v28 = vpop.f32.mrb[51].mxu1 }
 0x1ed   :  { %4140 = vmatpush1.bf16.msra.mxu0 %v7660_v59  ;;  %v4669_v1 = vsel %vm4284_vm1, %v4666_v24, %v4668_v6  ;;  %v4670_v38 = vrot.slane %v2861_v28, 1 }
 0x1ee   :  { %v3161_v46 = vpop.f32.mrb[64].mxu0  ;;  %4141 = vmatprep.subr.bf16.mxu0 %v7668_v51  ;;  %v4890_v50 = vsel %vm4411_vm2, %v10258_v18, %v4889_v12  ;;  %v4951_v55 = vsel %vm4473_vm3, %v10257_v44, %v4950_v22  ;;  %v4891_v49 = vrot.slane %v9014_v29, 2  ;;  %v4952_v10 = vrot.slane %v9014_v29, 4  ;;  %3456 = vmatmul.mubr.bf16.gmra.mrb[116].mxu1 %v8903_v57  ;;  %v7669_v57 = vld [vmem:[#allocation3 + $0x9d0] ss:$56 sps:$4 sm:$0xff]  }
 0x1ef   :  { %v9025_v21 = vpop.f32.mrb[65].mxu0  ;;  %v5010_v24 = vmax.f32 %v4890_v50, %v4951_v55  ;;  %v4725_v39 = vadd.f32 %v4669_v1, %v2849_v53  ;;  %v4671_v45 = vsel %vm4284_vm1, %v4668_v6, %v4670_v38  ;;  %v4785_v52 = vrot.slane %v3161_v46, 2  ;;  %3764 = vmatprep.mubr.bf16.mxu1 %v8909_v43 }
 0x1f0   :  { %v9029_v59 = vpop.f32.mrb[66].mxu0  ;;  %v4892_v51 = vsel %vm4411_vm2, %v4889_v12, %v4891_v49  ;;  %v4953_v8 = vsel %vm4473_vm3, %v4950_v22, %v4952_v10  ;;  %v4726_v19 = vadd.f32 %v4671_v45, %v2855_v48  ;;  %v7674_v12 = vld [vmem:[#allocation3 + $0xa44] ss:$56 sps:$4 sm:$0xff]  }
 0x1f1   :  { %v4787_v28 = vrot.slane %v9029_v59, 2  ;;  %v9035_v44 = vpop.f32.mrb[67].mxu0  ;;  %4142 = vmatpush1.bf16.msra.mxu0 %v7666_v40  ;;  %v5030_v53 = vmax.f32 %v8981_v41, %v5010_v24  ;;  %v5011_v1 = vmax.f32 %v4892_v51, %v4953_v8  ;;  %v4826_v6 = vadd.f32 %v8893_v25, %v4725_v39  ;;  %v2865_v43 = vpop.f32.mrb[52].mxu1  ;;  %v9049_v40 = vld [vmem:[%s10253_s0 + $0x60] ss:$16 sps:$4 sm:$0xff]  }
 0x1f2   :  { %10276 = vst [vmem:[#allocation9_spill] sm:$0xff] %v9035_v44  ;;  %v9040_v46 = vsel %vm4411_vm2, %v4783_v4, %v4785_v52  ;;  %4143 = vmatprep.subr.bf16.mxu0 %v7671_v61  ;;  %v4827_v22 = vadd.f32 %v8898_v0, %v4726_v19  ;;  %v2867_v50 = vpop.f32.mrb[53].mxu1  ;;  %v7636_v39 = vld [vmem:[#allocation3 + $0x728] ss:$56 sps:$4 sm:$0xff]   ;;  %v9058_v0 = vld [vmem:[%s10253_s0 + $0x84] ss:$16 sps:$4 sm:$0xff]  }
 0x1f3   :  { %v9044_v48 = vsel %vm4411_vm2, %v4785_v52, %v4787_v28  ;;  %4061 = vmatmul.mubr.bf16.gmra.mrb[132].mxu0 %v9049_v40  ;;  %v5050_v25 = vmax.f32 %v5030_v53, 0.0  ;;  %v5031_v55 = vmax.f32 %v4849_v32, %v5011_v1  ;;  %v4851_v4 = vadd.f32 %v8974_v20, %v4826_v6  ;;  %v9053_v61 = vpop.f32.mrb[54].mxu1  ;;  %v7644_v59 = vld [vmem:[#allocation3 + $0x79c] ss:$56 sps:$4 sm:$0xff]   ;;  %v7672_v1 = vld [vmem:[#allocation3 + $0xa40] ss:$56 sps:$4 sm:$0xff]  }
 0x1f4   :  { %v4672_v24 = vrot.slane %v2867_v50, 1  ;;  %4070 = vmatprep.mubr.bf16.mxu0 %v9058_v0  ;;  %v9062_v45 = vadd.f32 %v8974_v20, %v4827_v22  ;;  %v9064_v52 = vpop.f32.mrb[55].mxu1 }
 0x1f5   :  { %4144 = vmatpush1.bf16.msra.mxu0 %v7669_v57  ;;  %5070 = vst [vmem:[#allocation2] sm:$0xff] %v5050_v25  ;;  %v5051_v32 = vmax.f32 %v5031_v55, 0.0  ;;  %v4893_v51 = vrot.slane %v4851_v4, 2  ;;  %v4954_v8 = vrot.slane %v4851_v4, 4  ;;  %v4674_v18 = vrot.slane %v9064_v52, 1 }
 0x1f6   :  { %v4673_v19 = vsel %vm4284_vm1, %v4670_v38, %v4672_v24  ;;  %v3171_v53 = vpop.f32.mrb[68].mxu0  ;;  %4145 = vmatprep.subr.bf16.mxu0 %v7674_v12  ;;  %v4895_v6 = vrot.slane %v9062_v45, 2  ;;  %v4956_v50 = vrot.slane %v9062_v45, 4  ;;  %3765 = vmatmul.mubr.bf16.vlgmr.msra.gmra.mrb[120].mxu1 %v8930_v27  ;;  %v7680_v57 = vld [vmem:[#allocation3 + $0xab4] ss:$56 sps:$4 sm:$0xff]  }
 0x1f7   :  { %v4727_v22 = vadd.f32 %v4673_v19, %v9004_v63  ;;  %v9071_v9 = vpop.f32.mrb[69].mxu0  ;;  %5071 = vst [vmem:[#allocation2 + $0x8] sm:$0xff] %v5051_v32  ;;  %v4894_v25 = vsel %vm4411_vm2, %v4891_v49, %v4893_v51  ;;  %v4955_v38 = vsel %vm4473_vm3, %v4952_v10, %v4954_v8  ;;  %v4789_v55 = vrot.slane %v3171_v53, 2  ;;  %3866 = vmatpush1.bf16.msra.mxu1 %v7636_v39  ;;  %v7650_v49 = vld [vmem:[#allocation3 + $0x80c] ss:$56 sps:$4 sm:$0xff]  }
 0x1f8   :  { %10277 = vst [vmem:[#allocation10_spill] sm:$0xff] %v9071_v9  ;;  %v9076_v12 = vpop.f32.mrb[70].mxu0  ;;  %3774 = vmatprep.mubr.bf16.mxu1 %v8936_v7  ;;  %v5012_v63 = vmax.f32 %v4894_v25, %v4955_v38  ;;  %v4896_v52 = vsel %vm4411_vm2, %v4893_v51, %v4895_v6  ;;  %v4957_v19 = vsel %vm4473_vm3, %v4954_v8, %v4956_v50  ;;  %v7678_v25 = vld [vmem:[#allocation3 + $0xab0] ss:$56 sps:$4 sm:$0xff]  }
 0x1f9   :  { %v4828_v27 = vadd.f32 %v8918_v15, %v4727_v22  ;;  %v9082_v9 = vpop.f32.mrb[71].mxu0  ;;  %3867 = vmatprep.subr.bf16.mxu1 %v7644_v59  ;;  %v5013_v32 = vmax.f32 %v4896_v52, %v4957_v19  ;;  %v4675_v10 = vsel %vm4284_vm1, %v4672_v24, %v4674_v18  ;;  %v9086_v53 = vsel %vm4411_vm2, %v4787_v28, %v4789_v55  ;;  %v2875_v39 = vpop.f32.mrb[56].mxu1  ;;  %v9096_v59 = vld [vmem:[%s10253_s0 + $0x80] ss:$16 sps:$4 sm:$0xff]   ;;  %v7656_v52 = vld [vmem:[#allocation3 + $0x87c] ss:$56 sps:$4 sm:$0xff]  }
 0x1fa   :  { %10278 = vst [vmem:[#allocation11_spill] sm:$0xff] %v9082_v9  ;;  %v4791_v7 = vrot.slane %v9076_v12, 2  ;;  %4146 = vmatpush1.bf16.msra.mxu0 %v7672_v1  ;;  %v5032_v51 = vmax.f32 %v9014_v29, %v5012_v63  ;;  %v4728_v15 = vadd.f32 %v4675_v10, %v2865_v43  ;;  %v2877_v22 = vpop.f32.mrb[57].mxu1  ;;  %v9107_v29 = vld [vmem:[%s10253_s0 + $0xa4] ss:$16 sps:$4 sm:$0xff]  }
 0x1fb   :  { %v9091_v8 = vadd.f32 %v8974_v20, %v4828_v27  ;;  %4071 = vmatmul.mubr.bf16.gmra.mrb[136].mxu0 %v9096_v59  ;;  %4147 = vmatprep.subr.bf16.mxu0 %v7680_v57  ;;  %v5033_v28 = vmax.f32 %v4851_v4, %v5013_v32  ;;  %v4676_v1 = vrot.slane %v2877_v22, 1  ;;  %v9102_v38 = vpop.f32.mrb[58].mxu1  ;;  %v7648_v43 = vld [vmem:[#allocation3 + $0x808] ss:$56 sps:$4 sm:$0xff]  }
 0x1fc   :  { %v9100_v24 = vsel %vm4411_vm2, %v4789_v55, %v4791_v7  ;;  %3868 = vmatpush1.bf16.msra.mxu1 %v7642_v26  ;;  %4080 = vmatprep.mubr.bf16.mxu0 %v9107_v29  ;;  %v5052_v12 = vmax.f32 %v5032_v51, 0.0  ;;  %v4829_v57 = vadd.f32 %v8923_v54, %v4728_v15  ;;  %v2881_v55 = vpop.f32.mrb[59].mxu1 }
 0x1fd   :  { %v4897_v63 = vrot.slane %v9091_v8, 2  ;;  %v4958_v4 = vrot.slane %v9091_v8, 4  ;;  %3869 = vmatprep.subr.bf16.mxu1 %v7650_v49  ;;  %v5053_v19 = vmax.f32 %v5033_v28, 0.0  ;;  %v4677_v26 = vsel %vm4284_vm1, %v4674_v18, %v4676_v1 }
 0x1fe   :  { %v4678_v27 = vrot.slane %v2881_v55, 1  ;;  %v3181_v32 = vpop.f32.mrb[72].mxu0  ;;  %4148 = vmatpush1.bf16.msra.mxu0 %v7678_v25  ;;  %5072 = vst [vmem:[#allocation2 + $0x10] sm:$0xff] %v5052_v12  ;;  %v9117_v22 = vadd.f32 %v8974_v20, %v4829_v57  ;;  %v4729_v9 = vadd.f32 %v4677_v26, %v9053_v61  ;;  %3775 = vmatmul.mubr.bf16.gmra.mrb[124].mxu1 %v8965_v2  ;;  %v7665_v2 = vld [vmem:[#allocation3 + $0x8ec] ss:$56 sps:$4 sm:$0xff]  }
 0x1ff   :  { %v4898_v10 = vsel %vm4411_vm2, %v4895_v6, %v4897_v63  ;;  %v4959_v51 = vsel %vm4473_vm3, %v4956_v50, %v4958_v4  ;;  %v9120_v54 = vpop.f32.mrb[73].mxu0  ;;  %5073 = vst [vmem:[#allocation2 + $0x18] sm:$0xff] %v5053_v19  ;;  %v4793_v15 = vrot.slane %v3181_v32, 2  ;;  %3784 = vmatprep.mubr.bf16.mxu1 %v8971_v30  ;;  %v7654_v6 = vld [vmem:[#allocation3 + $0x878] ss:$56 sps:$4 sm:$0xff]  }
 0x200   :  { %10279 = vst [vmem:[#allocation12_spill] sm:$0xff] %v9120_v54  ;;  %v5014_v49 = vmax.f32 %v4898_v10, %v4959_v51  ;;  %v4679_v18 = vsel %vm4284_vm1, %v4676_v1, %v4678_v27  ;;  %v9124_v25 = vpop.f32.mrb[74].mxu0  ;;  %3870 = vmatpush1.bf16.msra.mxu1 %v7648_v43  ;;  %v4899_v50 = vrot.slane %v9117_v22, 2  ;;  %v4960_v28 = vrot.slane %v9117_v22, 4 }
 0x201   :  { %v4830_v61 = vadd.f32 %v8950_v37, %v4729_v9  ;;  %v4730_v12 = vadd.f32 %v4679_v18, %v2875_v39  ;;  %v9130_v57 = vpop.f32.mrb[75].mxu0  ;;  %3871 = vmatprep.subr.bf16.mxu1 %v7656_v52  ;;  %v9134_v55 = vsel %vm4411_vm2, %v4791_v7, %v4793_v15  ;;  %v4795_v30 = vrot.slane %v9124_v25, 2  ;;  %v2885_v43 = vpop.f32.mrb[60].mxu1  ;;  %v9144_v39 = vld [vmem:[%s10253_s0 + $0xa0] ss:$16 sps:$4 sm:$0xff]  }
 0x202   :  { %10280 = vst [vmem:[#allocation13_spill] sm:$0xff] %v9130_v57  ;;  %v5034_v1 = vmax.f32 %v9062_v45, %v5014_v49  ;;  %v4900_v19 = vsel %vm4411_vm2, %v4897_v63, %v4899_v50  ;;  %v4961_v26 = vsel %vm4473_vm3, %v4958_v4, %v4960_v28  ;;  %v2887_v37 = vpop.f32.mrb[61].mxu1  ;;  %v7663_v4 = vld [vmem:[#allocation3 + $0x8e8] ss:$56 sps:$4 sm:$0xff]  }
 0x203   :  { %v4855_v32 = vadd.f32 %v8974_v20, %v4830_v61  ;;  %v4831_v9 = vadd.f32 %v8960_v58, %v4730_v12  ;;  %4081 = vmatmul.mubr.bf16.gmra.mrb[140].mxu0 %v9144_v39  ;;  %v5015_v7 = vmax.f32 %v4900_v19, %v4961_v26  ;;  %v9148_v52 = vsel %vm4411_vm2, %v4793_v15, %v4795_v30  ;;  %v9150_v10 = vpop.f32.mrb[62].mxu1  ;;  %v9155_v58 = vld [vmem:[%s10253_s0 + $0xc4] ss:$16 sps:$4 sm:$0xff]  }
 0x204   :  { %v5054_v45 = vmax.f32 %v5034_v1, 0.0  ;;  %v4680_v63 = vrot.slane %v2887_v37, 1  ;;  %4090 = vmatprep.mubr.bf16.mxu0 %v9155_v58  ;;  %3872 = vmatpush1.bf16.msra.mxu1 %v7654_v6  ;;  %v9161_v25 = vpop.f32.mrb[63].mxu1  ;;  %v7677_v15 = vld [vmem:[#allocation3 + $0x95c] ss:$56 sps:$4 sm:$0xff]  }
 0x205   :  { %v4901_v51 = vrot.slane %v4855_v32, 2  ;;  %v4962_v49 = vrot.slane %v4855_v32, 4  ;;  %v9159_v18 = vadd.f32 %v8974_v20, %v4831_v9  ;;  %3873 = vmatprep.subr.bf16.mxu1 %v7665_v2  ;;  %v5035_v61 = vmax.f32 %v9091_v8, %v5015_v7  ;;  %v5090_v26 = vld [vmem:[#allocation2] ss:$3 sm:$0xff] }
 0x206   :  { %5074 = vst [vmem:[#allocation2 + $0x20] sm:$0xff] %v5054_v45  ;;  %v4681_v12 = vsel %vm4284_vm1, %v4678_v27, %v4680_v63  ;;  %v4682_v1 = vrot.slane %v9161_v25, 1  ;;  %v3191_v19 = vpop.f32.mrb[76].mxu0  ;;  %3785 = vmatmul.mubr.bf16.gmra.mrb[128].mxu1 %v9000_v36  ;;  %5094 = vst.msk [vmem:[%s10256_s3 + $0x19] sm:$0xff] %vm4622_vm4, %v5090_v26  ;;  %v7675_v45 = vld [vmem:[#allocation3 + $0x958] ss:$56 sps:$4 sm:$0xff]  }
 0x207   :  { %v4902_v6 = vsel %vm4411_vm2, %v4899_v50, %v4901_v51  ;;  %v4963_v37 = vsel %vm4473_vm3, %v4960_v28, %v4962_v49  ;;  %v4903_v9 = vrot.slane %v9159_v18, 2  ;;  %v4964_v57 = vrot.slane %v9159_v18, 4  ;;  %v9170_v54 = vpop.f32.mrb[77].mxu0  ;;  %3794 = vmatprep.mubr.bf16.mxu1 %v9009_v42 }
 0x208   :  { %10281 = vst [vmem:[#allocation14_spill] sm:$0xff] %v9170_v54  ;;  %v5055_v8 = vmax.f32 %v5035_v61, 0.0  ;;  %v5016_v27 = vmax.f32 %v4902_v6, %v4963_v37  ;;  %v4731_v2 = vadd.f32 %v4681_v12, %v9102_v38  ;;  %v4683_v50 = vsel %vm4284_vm1, %v4680_v63, %v4682_v1  ;;  %v9179_v28 = vpop.f32.mrb[78].mxu0  ;;  %3874 = vmatpush1.bf16.msra.mxu1 %v7663_v4  ;;  %v7683_v61 = vld [vmem:[#allocation3 + $0x9cc] ss:$56 sps:$4 sm:$0xff]  }
 0x209   :  { %v4904_v7 = vsel %vm4411_vm2, %v4901_v51, %v4903_v9  ;;  %v4965_v36 = vsel %vm4473_vm3, %v4962_v49, %v4964_v57  ;;  %v4732_v25 = vadd.f32 %v4683_v50, %v2885_v43  ;;  %v4797_v54 = vrot.slane %v3191_v19, 2  ;;  %v9184_v44 = vpop.f32.mrb[79].mxu0  ;;  %3875 = vmatprep.subr.bf16.mxu1 %v7677_v15  ;;  %v2895_v4 = vpop.f32.mrb[64].mxu1  ;;  %v9196_v49 = vld [vmem:[%s10253_s0 + $0xc0] ss:$16 sps:$4 sm:$0xff]  }
 0x20a   :  { %5075 = vst [vmem:[#allocation2 + $0x28] sm:$0xff] %v5055_v8  ;;  %v5036_v38 = vmax.f32 %v9117_v22, %v5016_v27  ;;  %v5017_v63 = vmax.f32 %v4904_v7, %v4965_v36  ;;  %v4832_v12 = vadd.f32 %v8988_v3, %v4731_v2  ;;  %v4799_v42 = vrot.slane %v9179_v28, 2  ;;  %v2897_v43 = vpop.f32.mrb[65].mxu1  ;;  %v7681_v8 = vld [vmem:[#allocation3 + $0x9c8] ss:$56 sps:$4 sm:$0xff]  }
 0x20b   :  { %v4833_v26 = vadd.f32 %v8995_v17, %v4732_v25  ;;  %v9191_v51 = vsel %vm4411_vm2, %v4795_v30, %v4797_v54  ;;  %4091 = vmatmul.mubr.bf16.gmra.mrb[144].mxu0 %v9196_v49  ;;  %v2899_v17 = vpop.f32.mrb[66].mxu1  ;;  %v9208_v30 = vld [vmem:[%s10253_s0 + $0xe4] ss:$16 sps:$4 sm:$0xff]  }
 0x20c   :  { %v5056_v22 = vmax.f32 %v5036_v38, 0.0  ;;  %v5037_v15 = vmax.f32 %v4855_v32, %v5017_v63  ;;  %v4857_v3 = vadd.f32 %v8974_v20, %v4832_v12  ;;  %v9203_v19 = vsel %vm4411_vm2, %v4797_v54, %v4799_v42  ;;  %4100 = vmatprep.mubr.bf16.mxu0 %v9208_v30  ;;  %3876 = vmatpush1.bf16.msra.mxu1 %v7675_v45  ;;  %v2901_v37 = vpop.f32.mrb[67].mxu1  ;;  %v7686_v7 = vld [vmem:[#allocation3 + $0xa3c] ss:$56 sps:$4 sm:$0xff]  }
 0x20d   :  { %v9212_v6 = vadd.f32 %v8974_v20, %v4833_v26  ;;  %v4684_v32 = vrot.slane %v2897_v43, 1  ;;  %3877 = vmatprep.subr.bf16.mxu1 %v7683_v61  ;;  %v4686_v50 = vrot.slane %v2901_v37, 1 }
 0x20e   :  { %5076 = vst [vmem:[#allocation2 + $0x30] sm:$0xff] %v5056_v22  ;;  %v5057_v27 = vmax.f32 %v5037_v15, 0.0  ;;  %v4905_v54 = vrot.slane %v4857_v3, 2  ;;  %v4966_v2 = vrot.slane %v4857_v3, 4  ;;  %3795 = vmatmul.mubr.bf16.gmra.mrb[132].mxu1 %v9049_v40 }
 0x20f   :  { %v4907_v36 = vrot.slane %v9212_v6, 2  ;;  %v4968_v25 = vrot.slane %v9212_v6, 4  ;;  %v4685_v38 = vsel %vm4284_vm1, %v4682_v1, %v4684_v32  ;;  %v4687_v12 = vsel %vm4284_vm1, %v4684_v32, %v4686_v50  ;;  %3804 = vmatprep.mubr.bf16.mxu1 %v9058_v0  ;;  %v7684_v1 = vld [vmem:[#allocation3 + $0xa38] ss:$56 sps:$4 sm:$0xff]  }
 0x210   :  { %5077 = vst [vmem:[#allocation2 + $0x38] sm:$0xff] %v5057_v27  ;;  %v4906_v45 = vsel %vm4411_vm2, %v4903_v9, %v4905_v54  ;;  %v4967_v63 = vsel %vm4473_vm3, %v4964_v57, %v4966_v2  ;;  %v4733_v61 = vadd.f32 %v4685_v38, %v9150_v10  ;;  %v4734_v15 = vadd.f32 %v4687_v12, %v2895_v4  ;;  %v7689_v57 = vld [vmem:[#allocation3 + $0xaac] ss:$56 sps:$4 sm:$0xff]   ;;  %v9235_v4 = vld [vmem:[%s10253_s0 + $0xe0] ss:$16 sps:$4 sm:$0xff]  }
 0x211   :  { %v5018_v26 = vmax.f32 %v4906_v45, %v4967_v63  ;;  %v4908_v43 = vsel %vm4411_vm2, %v4905_v54, %v4907_v36  ;;  %v4969_v22 = vsel %vm4473_vm3, %v4966_v2, %v4968_v25  ;;  %3878 = vmatpush1.bf16.msra.mxu1 %v7681_v8  ;;  %v5091_v40 = vld [vmem:[#allocation2 + $0x18] ss:$3 sm:$0xff]  ;;  %v2905_v27 = vpop.f32.mrb[68].mxu1 }
 0x212   :  { %v5019_v37 = vmax.f32 %v4908_v43, %v4969_v22  ;;  %v4834_v9 = vadd.f32 %v9040_v46, %v4733_v61  ;;  %3879 = vmatprep.subr.bf16.mxu1 %v7686_v7  ;;  %5095 = vst.msk [vmem:[%s10256_s3 + $0x21] sm:$0xff] %vm4622_vm4, %v5091_v40  ;;  %v4835_v10 = vadd.f32 %v9044_v48, %v4734_v15  ;;  %v2907_v32 = vpop.f32.mrb[69].mxu1  ;;  %v9242_v7 = vld [vmem:[%s10253_s0 + $0x104] ss:$16 sps:$4 sm:$0xff]   ;;  %v7687_v45 = vld [vmem:[#allocation3 + $0xaa8] ss:$56 sps:$4 sm:$0xff]  }
 0x213   :  { %v5038_v0 = vmax.f32 %v9159_v18, %v5018_v26  ;;  %4101 = vmatmul.mubr.bf16.gmra.mrb[148].mxu0 %v9235_v4  ;;  %v4688_v54 = vrot.slane %v2907_v32, 1  ;;  %v2909_v2 = vpop.f32.mrb[70].mxu1 }
 0x214   :  { %v5039_v46 = vmax.f32 %v4857_v3, %v5019_v37  ;;  %v4859_v8 = vadd.f32 %v8974_v20, %v4834_v9  ;;  %4110 = vmatprep.mubr.bf16.mxu0 %v9242_v7  ;;  %v9246_v18 = vadd.f32 %v8974_v20, %v4835_v10  ;;  %v2911_v38 = vpop.f32.mrb[71].mxu1 }
 0x215   :  { %v5058_v48 = vmax.f32 %v5038_v0, 0.0  ;;  %3880 = vmatpush1.bf16.msra.mxu1 %v7684_v1  ;;  %v4689_v12 = vsel %vm4284_vm1, %v4686_v50, %v4688_v54  ;;  %v4690_v15 = vrot.slane %v2911_v38, 1 }
 0x216   :  { %v5059_v63 = vmax.f32 %v5039_v46, 0.0  ;;  %v4909_v3 = vrot.slane %v4859_v8, 2  ;;  %v4970_v61 = vrot.slane %v4859_v8, 4  ;;  %3881 = vmatprep.subr.bf16.mxu1 %v7689_v57  ;;  %v4911_v26 = vrot.slane %v9246_v18, 2  ;;  %3805 = vmatmul.mubr.bf16.gmra.mrb[136].mxu1 %v9096_v59 }
 0x217   :  { %5078 = vst [vmem:[#allocation2 + $0x40] sm:$0xff] %v5058_v48  ;;  %v4972_v43 = vrot.slane %v9246_v18, 4  ;;  %v4735_v22 = vadd.f32 %v4689_v12, %v2899_v17  ;;  %3814 = vmatprep.mubr.bf16.mxu1 %v9107_v29  ;;  %v4691_v17 = vsel %vm4284_vm1, %v4688_v54, %v4690_v15  ;;  %v9264_v29 = vld [vmem:[%s10253_s0 + $0x100] ss:$16 sps:$4 sm:$0xff]   ;;  %v9270_v54 = vld [vmem:[%s10253_s0 + $0x124] ss:$16 sps:$4 sm:$0xff]  }
 0x218   :  { %5079 = vst [vmem:[#allocation2 + $0x48] sm:$0xff] %v5059_v63  ;;  %v4910_v40 = vsel %vm4411_vm2, %v4907_v36, %v4909_v3  ;;  %v4971_v1 = vsel %vm4473_vm3, %v4968_v25, %v4970_v61  ;;  %v4912_v50 = vsel %vm4411_vm2, %v4909_v3, %v4911_v26  ;;  %v4736_v32 = vadd.f32 %v4691_v17, %v2905_v27 }
 0x219   :  { %v5020_v37 = vmax.f32 %v4910_v40, %v4971_v1  ;;  %v4973_v9 = vsel %vm4473_vm3, %v4970_v61, %v4972_v43  ;;  %v4836_v57 = vadd.f32 %v9086_v53, %v4735_v22  ;;  %3882 = vmatpush1.bf16.msra.mxu1 %v7687_v45  ;;  %v2915_v10 = vpop.f32.mrb[72].mxu1 }
 0x21a   :  { %v5021_v0 = vmax.f32 %v4912_v50, %v4973_v9  ;;  %v2917_v25 = vpop.f32.mrb[73].mxu1  ;;  %v4837_v45 = vadd.f32 %v9100_v24, %v4736_v32 }
 0x21b   :  { %v5040_v59 = vmax.f32 %v9212_v6, %v5020_v37  ;;  %v4861_v36 = vadd.f32 %v8974_v20, %v4836_v57  ;;  %4111 = vmatmul.mubr.bf16.gmra.mrb[152].mxu0 %v9264_v29  ;;  %v4692_v53 = vrot.slane %v2917_v25, 1  ;;  %v2919_v48 = vpop.f32.mrb[74].mxu1  ;;  %v9298_v25 = vld [vmem:[%s10253_s0 + $0x120] ss:$16 sps:$4 sm:$0xff]  }
 0x21c   :  { %v5041_v46 = vmax.f32 %v4859_v8, %v5021_v0  ;;  %4120 = vmatprep.mubr.bf16.mxu0 %v9270_v54  ;;  %v2921_v63 = vpop.f32.mrb[75].mxu1  ;;  %v4862_v1 = vadd.f32 %v8974_v20, %v4837_v45 }
 0x21d   :  { %v5060_v6 = vmax.f32 %v5040_v59, 0.0  ;;  %v4913_v27 = vrot.slane %v4861_v36, 2  ;;  %v4974_v38 = vrot.slane %v4861_v36, 4  ;;  %v4693_v61 = vsel %vm4284_vm1, %v4690_v15, %v4692_v53 }
 0x21e   :  { %v5061_v3 = vmax.f32 %v5041_v46, 0.0  ;;  %v4694_v12 = vrot.slane %v2921_v63, 1  ;;  %v5092_v8 = vld [vmem:[#allocation2 + $0x30] ss:$3 sm:$0xff]  ;;  %v4737_v37 = vadd.f32 %v4693_v61, %v2909_v2  ;;  %3815 = vmatmul.mubr.bf16.gmra.mrb[140].mxu1 %v9144_v39  ;;  %v4915_v2 = vrot.slane %v4862_v1, 2 }
 0x21f   :  { %5080 = vst [vmem:[#allocation2 + $0x50] sm:$0xff] %v5060_v6  ;;  %v4914_v22 = vsel %vm4411_vm2, %v4911_v26, %v4913_v27  ;;  %v4975_v40 = vsel %vm4473_vm3, %v4972_v43, %v4974_v38  ;;  %5096 = vst.msk [vmem:[%s10256_s3 + $0x29] sm:$0xff] %vm4622_vm4, %v5092_v8  ;;  %v5093_v24 = vld [vmem:[#allocation2 + $0x48] ss:$3 sm:$0x1]  ;;  %3824 = vmatprep.mubr.bf16.mxu1 %v9155_v58  ;;  %v4976_v26 = vrot.slane %v4862_v1, 4 }
 0x220   :  { %5081 = vst [vmem:[#allocation2 + $0x58] sm:$0xff] %v5061_v3  ;;  %v5022_v15 = vmax.f32 %v4914_v22, %v4975_v40  ;;  %v4695_v50 = vsel %vm4284_vm1, %v4692_v53, %v4694_v12  ;;  %5097 = vst.msk [vmem:[%s10256_s3 + $0x31] sm:$0x1] %vm4626_vm5, %v5093_v24  ;;  %v4838_v39 = vadd.f32 %v9134_v55, %v4737_v37  ;;  %v9304_v53 = vld [vmem:[%s10253_s0 + $0xc] ss:$16 sps:$4 sm:$0xff]  }
 0x221   :  { %v4738_v43 = vadd.f32 %v4695_v50, %v2915_v10  ;;  %v2925_v57 = vpop.f32.mrb[76].mxu1  ;;  %v4916_v0 = vsel %vm4411_vm2, %v4913_v27, %v4915_v2  ;;  %v4977_v17 = vsel %vm4473_vm3, %v4974_v38, %v4976_v26 }
 0x222   :  { %v5042_v9 = vmax.f32 %v9246_v18, %v5022_v15  ;;  %v4863_v59 = vadd.f32 %v8974_v20, %v4838_v39  ;;  %v2927_v32 = vpop.f32.mrb[77].mxu1  ;;  %v5023_v10 = vmax.f32 %v4916_v0, %v4977_v17  ;;  %v10282_v39 = vrot.slane %v8925_v5, 1  ;;  %v9330_v5 = vld [vmem:[%s10253_s0 + $0x8] ss:$16 sps:$4 sm:$0xff]  }
 0x223   :  { %v4839_v58 = vadd.f32 %v9148_v52, %v4738_v43  ;;  %4121 = vmatmul.mubr.bf16.gmra.mrb[156].mxu0 %v9298_v25  ;;  %v4696_v18 = vrot.slane %v2927_v32, 1  ;;  %v2929_v46 = vpop.f32.mrb[78].mxu1 }
 0x224   :  { %v5062_v55 = vmax.f32 %v5042_v9, 0.0  ;;  %6792 = vmatprep.mubr.msk.bf16.mxu0 %vm2371_vm0, %v9304_v53  ;;  %v4917_v52 = vrot.slane %v4863_v59, 2  ;;  %v4978_v6 = vrot.slane %v4863_v59, 4  ;;  %v2931_v38 = vpop.f32.mrb[79].mxu1  ;;  %v5043_v45 = vmax.f32 %v4861_v36, %v5023_v10 }
 0x225   :  { %v4864_v27 = vadd.f32 %v8974_v20, %v4839_v58  ;;  %v4697_v63 = vsel %vm4284_vm1, %v4694_v12, %v4696_v18  ;;  %v4698_v3 = vrot.slane %v2931_v38, 1 }
 0x226   :  { %5082 = vst [vmem:[#allocation2 + $0x60] sm:$0xff] %v5062_v55  ;;  %v4918_v61 = vsel %vm4411_vm2, %v4915_v2, %v4917_v52  ;;  %v4979_v8 = vsel %vm4473_vm3, %v4976_v26, %v4978_v6  ;;  %3825 = vmatmul.mubr.bf16.gmra.mrb[144].mxu1 %v9196_v49  ;;  %v5063_v37 = vmax.f32 %v5043_v45, 0.0  ;;  %v4739_v15 = vadd.f32 %v4697_v63, %v2919_v48 }
 0x227   :  { %v4919_v22 = vrot.slane %v4864_v27, 2  ;;  %v4980_v40 = vrot.slane %v4864_v27, 4  ;;  %v5024_v24 = vmax.f32 %v4918_v61, %v4979_v8  ;;  %v4699_v50 = vsel %vm4284_vm1, %v4696_v18, %v4698_v3  ;;  %3834 = vmatprep.mubr.bf16.mxu1 %v9208_v30 }
 0x228   :  { %v4721_v2 = vsel %vm4284_vm1, %v4698_v3, %v10282_v39  ;;  %v4740_v26 = vadd.f32 %v4699_v50, %v2925_v57  ;;  %5083 = vst [vmem:[#allocation2 + $0x68] sm:$0xff] %v5063_v37  ;;  %v4840_v49 = vadd.f32 %v9191_v51, %v4739_v15  ;;  %v10283_v48 = vrot.slane %v8834_v33, 2  ;;  %v9337_v33 = vld [vmem:[%s10253_s0 + $0x2c] ss:$16 sps:$4 sm:$0xff]   ;;  %v7773_v50 = vld [vmem:[%s10253_s0 + $0x28] ss:$16 sps:$4 sm:$0xff]  }
 0x229   :  { %v4920_v36 = vsel %vm4411_vm2, %v4917_v52, %v4919_v22  ;;  %v4981_v12 = vsel %vm4473_vm3, %v4978_v6, %v4980_v40  ;;  %v5044_v43 = vmax.f32 %v4862_v1, %v5024_v24  ;;  %v4741_v0 = vadd.f32 %v4721_v2, %v2929_v46 }
 0x22a   :  { %v5025_v9 = vmax.f32 %v4920_v36, %v4981_v12  ;;  %v4822_v30 = vsel %vm4411_vm2, %v4799_v42, %v10283_v48  ;;  %v4841_v17 = vadd.f32 %v9203_v19, %v4740_v26  ;;  %v4865_v51 = vadd.f32 %v8974_v20, %v4840_v49  ;;  %v7774_v36 = vld [vmem:[%s10253_s0 + $0x4c] ss:$16 sps:$4 sm:$0xff]   ;;  %v7775_v49 = vld [vmem:[%s10253_s0 + $0x48] ss:$16 sps:$4 sm:$0xff]  }
 0x22b   :  { %4164 = vmatmul.mubr.bf16.vlgmr.msra.gmra.mrb[120].mxu0 %v9330_v5  ;;  %v5064_v1 = vmax.f32 %v5044_v43, 0.0  ;;  %v4842_v58 = vadd.f32 %v4822_v30, %v4741_v0  ;;  %v10284_v61 = vrot.slane %v8981_v41, 2  ;;  %v7777_v48 = vld [vmem:[%s10253_s0 + $0x68] ss:$16 sps:$4 sm:$0xff]   ;;  %v7780_v30 = vld [vmem:[%s10253_s0 + $0xac] ss:$16 sps:$4 sm:$0xff]  }
 0x22c   :  { %v5045_v57 = vmax.f32 %v4863_v59, %v5025_v9  ;;  %6793 = vmatprep.mubr.msk.bf16.mxu0 %vm2371_vm0, %v9337_v33  ;;  %v4866_v28 = vadd.f32 %v8974_v20, %v4841_v17  ;;  %v4921_v32 = vrot.slane %v4865_v51, 2  ;;  %v4982_v55 = vrot.slane %v4865_v51, 4  ;;  %v7781_v17 = vld [vmem:[%s10253_s0 + $0xa8] ss:$16 sps:$4 sm:$0xff]  }
 0x22d   :  { %v5098_v42 = vld [vmem:[#allocation2 + $0x50] ss:$3 sm:$0xff]  ;;  %5084 = vst [vmem:[#allocation2 + $0x70] sm:$0xff] %v5064_v1  ;;  %v4867_v59 = vadd.f32 %v8974_v20, %v4842_v58 }
 0x22e   :  { %v5065_v19 = vmax.f32 %v5045_v57, 0.0  ;;  %6808 = vst.msk [vmem:[%s10256_s3 + $0x81] sm:$0xff] %vm4622_vm4, %v5098_v42  ;;  %v4923_v10 = vrot.slane %v4866_v28, 2  ;;  %v4984_v18 = vrot.slane %v4866_v28, 4  ;;  %3835 = vmatmul.mubr.bf16.gmra.mrb[148].mxu1 %v9235_v4  ;;  %v4922_v46 = vsel %vm4411_vm2, %v4919_v22, %v4921_v32  ;;  %v7783_v1 = vld [vmem:[%s10253_s0 + $0xc8] ss:$16 sps:$4 sm:$0xff]  }
 0x22f   :  { %v4983_v52 = vsel %vm4473_vm3, %v4980_v40, %v4982_v55  ;;  %v4925_v6 = vrot.slane %v4867_v59, 2  ;;  %v4986_v38 = vrot.slane %v4867_v59, 4  ;;  %3844 = vmatprep.mubr.bf16.mxu1 %v9242_v7  ;;  %v10285_v22 = vrot.slane %v8981_v41, 4  ;;  %v7784_v57 = vld [vmem:[%s10253_s0 + $0xec] ss:$16 sps:$4 sm:$0xff]  }
 0x230   :  { %5085 = vst [vmem:[#allocation2 + $0x78] sm:$0xff] %v5065_v19  ;;  %v5026_v45 = vmax.f32 %v4922_v46, %v4983_v52  ;;  %v4924_v20 = vsel %vm4411_vm2, %v4921_v32, %v4923_v10  ;;  %v4985_v63 = vsel %vm4473_vm3, %v4982_v55, %v4984_v18  ;;  %v7785_v42 = vld [vmem:[%s10253_s0 + $0xe8] ss:$16 sps:$4 sm:$0xff]   ;;  %v7786_v19 = vld [vmem:[%s10253_s0 + $0x10c] ss:$16 sps:$4 sm:$0xff]  }
 0x231   :  { %v4926_v3 = vsel %vm4411_vm2, %v4923_v10, %v4925_v6  ;;  %v4948_v4 = vsel %vm4411_vm2, %v4925_v6, %v10284_v61  ;;  %v4987_v8 = vsel %vm4473_vm3, %v4984_v18, %v4986_v38  ;;  %v5009_v40 = vsel %vm4473_vm3, %v4986_v38, %v10285_v22 }
 0x232   :  { %v5046_v37 = vmax.f32 %v4864_v27, %v5026_v45  ;;  %v5027_v24 = vmax.f32 %v4924_v20, %v4985_v63  ;;  %v5028_v7 = vmax.f32 %v4926_v3, %v4987_v8  ;;  %v5029_v15 = vmax.f32 %v4948_v4, %v5009_v40  ;;  %v9456_v45 = vld [vmem:[%s10253_s0 + $0x108] ss:$16 sps:$4 sm:$0xff]   ;;  %v9462_v20 = vld [vmem:[%s10253_s0 + $0x12c] ss:$16 sps:$4 sm:$0xff]  }
 0x233   :  { %4174 = vmatmul.mubr.bf16.gmra.mrb[124].mxu0 %v7773_v50 }
 0x234   :  { %6794 = vmatprep.mubr.msk.bf16.mxu0 %vm2371_vm0, %v7774_v36  ;;  %v5066_v12 = vmax.f32 %v5046_v37, 0.0  ;;  %v5047_v39 = vmax.f32 %v4865_v51, %v5027_v24  ;;  %v5048_v41 = vmax.f32 %v4866_v28, %v5028_v7  ;;  %v5049_v2 = vmax.f32 %v4867_v59, %v5029_v15  ;;  %v9480_v24 = vld [vmem:[%s10253_s0 + $0x128] ss:$16 sps:$4 sm:$0xff]  }
 0x236   :  { %5086 = vst [vmem:[#allocation2 + $0x80] sm:$0xff] %v5066_v12  ;;  %v5067_v27 = vmax.f32 %v5047_v39, 0.0  ;;  %v5068_v26 = vmax.f32 %v5048_v41, 0.0  ;;  %v5069_v43 = vmax.f32 %v5049_v2, 0.0  ;;  %3845 = vmatmul.mubr.bf16.gmra.mrb[152].mxu1 %v9264_v29  ;;  %v7776_v29 = vld [vmem:[%s10253_s0 + $0x6c] ss:$16 sps:$4 sm:$0xff]  }
 0x237   :  { %v5099_v9 = vld [vmem:[#allocation2 + $0x68] ss:$3 sm:$0xff]  ;;  %3854 = vmatprep.mubr.bf16.mxu1 %v9270_v54 }
 0x238   :  { %6809 = vst.msk [vmem:[%s10256_s3 + $0x89] sm:$0xff] %vm4622_vm4, %v5099_v9  ;;  %5087 = vst [vmem:[#allocation2 + $0x88] sm:$0xff] %v5067_v27 }
 0x239   :  { %5088 = vst [vmem:[#allocation2 + $0x90] sm:$0xff] %v5068_v26  ;;  %5089 = vst [vmem:[#allocation2 + $0x98] sm:$0xff] %v5069_v43 }
 0x23b   :  { %4184 = vmatmul.mubr.bf16.gmra.mrb[128].mxu0 %v7775_v49 }
 0x23c   :  { %6795 = vmatprep.mubr.msk.bf16.mxu0 %vm2371_vm0, %v7776_v29 }
 0x23e   :  { %3855 = vmatmul.mubr.bf16.gmra.mrb[156].mxu1 %v9298_v25  ;;  %v7778_v25 = vld [vmem:[%s10253_s0 + $0x8c] ss:$16 sps:$4 sm:$0xff]  }
 0x23f   :  { %6782 = vmatprep.mubr.msk.bf16.mxu1 %vm2371_vm0, %v9304_v53  ;;  %v7779_v53 = vld [vmem:[%s10253_s0 + $0x88] ss:$16 sps:$4 sm:$0xff]  }
 0x240   :  { %v5100_v54 = vld [vmem:[#allocation2 + $0x80] ss:$3 sm:$0xff]  ;;  %v5101_v0 = vld [vmem:[#allocation2 + $0x98] ss:$3 sm:$0x1] }
 0x241   :  { %6810 = vst.msk [vmem:[%s10256_s3 + $0x91] sm:$0xff] %vm4622_vm4, %v5100_v54 }
 0x242   :  { %6811 = vst.msk [vmem:[%s10256_s3 + $0x99] sm:$0x1] %vm4626_vm5, %v5101_v0 }
 0x243   :  { %4194 = vmatmul.mubr.bf16.gmra.mrb[132].mxu0 %v7777_v48 }
 0x244   :  { %6796 = vmatprep.mubr.msk.bf16.mxu0 %vm2371_vm0, %v7778_v25 }
 0x246   :  { %3898 = vmatmul.mubr.bf16.vlgmr.msra.gmra.mrb[120].mxu1 %v9330_v5  ;;  %v7782_v5 = vld [vmem:[%s10253_s0 + $0xcc] ss:$16 sps:$4 sm:$0xff]  }
 0x247   :  { %6783 = vmatprep.mubr.msk.bf16.mxu1 %vm2371_vm0, %v9337_v33 }
 0x24b   :  { %4204 = vmatmul.mubr.bf16.gmra.mrb[136].mxu0 %v7779_v53 }
 0x24c   :  { %6797 = vmatprep.mubr.msk.bf16.mxu0 %vm2371_vm0, %v7780_v30 }
 0x24e   :  { %3908 = vmatmul.mubr.bf16.gmra.mrb[124].mxu1 %v7773_v50 }
 0x24f   :  { %6784 = vmatprep.mubr.msk.bf16.mxu1 %vm2371_vm0, %v7774_v36 }
 0x253   :  { %4214 = vmatmul.mubr.bf16.gmra.mrb[140].mxu0 %v7781_v17 }
 0x254   :  { %6798 = vmatprep.mubr.msk.bf16.mxu0 %vm2371_vm0, %v7782_v5 }
 0x256   :  { %3918 = vmatmul.mubr.bf16.gmra.mrb[128].mxu1 %v7775_v49 }
 0x257   :  { %6785 = vmatprep.mubr.msk.bf16.mxu1 %vm2371_vm0, %v7776_v29 }
 0x25b   :  { %4224 = vmatmul.mubr.bf16.gmra.mrb[144].mxu0 %v7783_v1 }
 0x25c   :  { %6799 = vmatprep.mubr.msk.bf16.mxu0 %vm2371_vm0, %v7784_v57 }
 0x25e   :  { %v9425_v51 = vpop.f32.mrb[80].mxu0  ;;  %3928 = vmatmul.mubr.bf16.gmra.mrb[132].mxu1 %v7777_v48 }
 0x25f   :  { %v9427_v58 = vpop.f32.mrb[81].mxu0  ;;  %6786 = vmatprep.mubr.msk.bf16.mxu1 %vm2371_vm0, %v7778_v25 }
 0x260   :  { %v9429_v33 = vpop.f32.mrb[82].mxu0 }
 0x261   :  { %v9432_v28 = vpop.f32.mrb[83].mxu0  ;;  %v5330_v55 = vrot.slane %v9429_v33, 3 }
 0x263   :  { %4234 = vmatmul.mubr.bf16.gmra.mrb[148].mxu0 %v7785_v42 }
 0x264   :  { %6800 = vmatprep.mubr.msk.bf16.mxu0 %vm2371_vm0, %v7786_v19 }
 0x266   :  { %v3643_v32 = vpop.f32.mrb[84].mxu0  ;;  %3938 = vmatmul.mubr.bf16.gmra.mrb[136].mxu1 %v7779_v53 }
 0x267   :  { %v5332_v59 = vrot.slane %v3643_v32, 3  ;;  %v9442_v10 = vpop.f32.mrb[85].mxu0  ;;  %6787 = vmatprep.mubr.msk.bf16.mxu1 %vm2371_vm0, %v7780_v30 }
 0x268   :  { %v3647_v18 = vpop.f32.mrb[86].mxu0 }
 0x269   :  { %v9446_v46 = vsel %vm5328_vm6, %v5330_v55, %v5332_v59  ;;  %v5334_v52 = vrot.slane %v3647_v18, 3  ;;  %v9448_v6 = vpop.f32.mrb[87].mxu0 }
 0x26b   :  { %v9451_v38 = vsel %vm5328_vm6, %v5332_v59, %v5334_v52  ;;  %4244 = vmatmul.mubr.bf16.gmra.mrb[152].mxu0 %v9456_v45 }
 0x26c   :  { %6801 = vmatprep.mubr.msk.bf16.mxu0 %vm2371_vm0, %v9462_v20 }
 0x26e   :  { %v3653_v63 = vpop.f32.mrb[88].mxu0  ;;  %3948 = vmatmul.mubr.bf16.gmra.mrb[140].mxu1 %v7781_v17 }
 0x26f   :  { %v5336_v3 = vrot.slane %v3653_v63, 3  ;;  %v9466_v61 = vpop.f32.mrb[89].mxu0  ;;  %6788 = vmatprep.mubr.msk.bf16.mxu1 %vm2371_vm0, %v7782_v5 }
 0x270   :  { %v3657_v4 = vpop.f32.mrb[90].mxu0 }
 0x271   :  { %v9470_v8 = vsel %vm5328_vm6, %v5334_v52, %v5336_v3  ;;  %v5338_v22 = vrot.slane %v3657_v4, 3  ;;  %v9472_v40 = vpop.f32.mrb[91].mxu0 }
 0x273   :  { %v9475_v37 = vsel %vm5328_vm6, %v5336_v3, %v5338_v22  ;;  %4254 = vmatmul.mubr.bf16.gmra.mrb[156].mxu0 %v9480_v24 }
 0x276   :  { %v3663_v7 = vpop.f32.mrb[92].mxu0  ;;  %3958 = vmatmul.mubr.bf16.gmra.mrb[144].mxu1 %v7783_v1 }
 0x277   :  { %v5340_v15 = vrot.slane %v3663_v7, 3  ;;  %v9483_v50 = vpop.f32.mrb[93].mxu0  ;;  %6789 = vmatprep.mubr.msk.bf16.mxu1 %vm2371_vm0, %v7784_v57  ;;  %v10262_v57 = vrot.slane %v9425_v51, 3 }
 0x278   :  { %v3667_v36 = vpop.f32.mrb[94].mxu0 }
 0x279   :  { %v9487_v12 = vsel %vm5328_vm6, %v5338_v22, %v5340_v15  ;;  %v5342_v39 = vrot.slane %v3667_v36, 3  ;;  %v9489_v41 = vpop.f32.mrb[95].mxu0  ;;  %v9491_v2 = vpop.f32.mrb[80].mxu1 }
 0x27a   :  { %v9496_v26 = vpop.f32.mrb[81].mxu1  ;;  %v10265_v9 = vrot.slane %v9491_v2, 1 }
 0x27b   :  { %v9494_v27 = vsel %vm5328_vm6, %v5340_v15, %v5342_v39  ;;  %v3371_v43 = vpop.f32.mrb[82].mxu1  ;;  %v10264_v54 = vrot.slane %v9496_v26, 2 }
 0x27c   :  { %v5127_v49 = vrot.slane %v3371_v43, 1  ;;  %v3373_v29 = vpop.f32.mrb[83].mxu1 }
 0x27d   :  { %v5228_v0 = vrot.slane %v3373_v29, 2 }
 0x27e   :  { %v3673_v48 = vpop.f32.mrb[96].mxu0  ;;  %v5128_v25 = vsel %vm4284_vm1, %v10265_v9, %v5127_v49  ;;  %3968 = vmatmul.mubr.bf16.gmra.mrb[148].mxu1 %v7785_v42 }
 0x27f   :  { %v5344_v53 = vrot.slane %v3673_v48, 3  ;;  %v9503_v30 = vpop.f32.mrb[97].mxu0  ;;  %v5187_v17 = vadd.f32 %v5128_v25, %v8836_v23  ;;  %v5229_v5 = vsel %vm4411_vm2, %v10264_v54, %v5228_v0  ;;  %6790 = vmatprep.mubr.msk.bf16.mxu1 %vm2371_vm0, %v7786_v19  ;;  %v5331_v23 = vsel %vm5328_vm6, %v10262_v57, %v5330_v55 }
 0x280   :  { %v3677_v1 = vpop.f32.mrb[98].mxu0 }
 0x281   :  { %v9512_v33 = vsel %vm5328_vm6, %v5342_v39, %v5344_v53  ;;  %v5346_v32 = vrot.slane %v3677_v1, 3  ;;  %v9514_v59 = vpop.f32.mrb[99].mxu0  ;;  %v5288_v18 = vadd.f32 %v5229_v5, %v5187_v17  ;;  %v3377_v52 = vpop.f32.mrb[84].mxu1  ;;  %v9523_v39 = vld [vmem:[#allocation5 + $0x2] ss:$0 sm:$0xff] }
 0x282   :  { %v5129_v63 = vrot.slane %v3377_v52, 1  ;;  %v3379_v3 = vpop.f32.mrb[85].mxu1 }
 0x283   :  { %v9520_v42 = vsel %vm5328_vm6, %v5344_v53, %v5346_v32  ;;  %v5390_v19 = vadd.f32 %v5331_v23, %v5288_v18  ;;  %v5230_v4 = vrot.slane %v3379_v3, 2  ;;  %v3381_v22 = vpop.f32.mrb[86].mxu1 }
 0x284   :  { %v5130_v7 = vsel %vm4284_vm1, %v5127_v49, %v5129_v63  ;;  %v5131_v15 = vrot.slane %v3381_v22, 1  ;;  %v3383_v36 = vpop.f32.mrb[87].mxu1 }
 0x285   :  { %v5188_v43 = vadd.f32 %v5130_v7, %v8843_v16  ;;  %v5231_v29 = vsel %vm4411_vm2, %v5228_v0, %v5230_v4  ;;  %v5232_v48 = vrot.slane %v3383_v36, 2  ;;  %v9535_v16 = vadd.f32 %v9523_v39, %v5390_v19 }
 0x286   :  { %v3683_v55 = vpop.f32.mrb[100].mxu0  ;;  %v5132_v25 = vsel %vm4284_vm1, %v5129_v63, %v5131_v15  ;;  %3978 = vmatmul.mubr.bf16.gmra.mrb[152].mxu1 %v9456_v45 }
 0x287   :  { %v5348_v53 = vrot.slane %v3683_v55, 3  ;;  %v9528_v17 = vpop.f32.mrb[101].mxu0  ;;  %v5289_v5 = vadd.f32 %v5231_v29, %v5188_v43  ;;  %v5189_v49 = vadd.f32 %v5132_v25, %v8859_v35  ;;  %6791 = vmatprep.mubr.msk.bf16.mxu1 %vm2371_vm0, %v9462_v20  ;;  %v5233_v0 = vsel %vm4411_vm2, %v5230_v4, %v5232_v48 }
 0x288   :  { %v3687_v1 = vpop.f32.mrb[102].mxu0  ;;  %v10263_v43 = vrot.slane %v9535_v16, 4 }
 0x289   :  { %v9539_v18 = vsel %vm5328_vm6, %v5346_v32, %v5348_v53  ;;  %v5350_v52 = vrot.slane %v3687_v1, 3  ;;  %v9541_v23 = vpop.f32.mrb[103].mxu0  ;;  %v5391_v45 = vadd.f32 %v9446_v46, %v5289_v5  ;;  %v5290_v63 = vadd.f32 %v5233_v0, %v5189_v49  ;;  %v3387_v3 = vpop.f32.mrb[88].mxu1 }
 0x28a   :  { %v5133_v22 = vrot.slane %v3387_v3, 1  ;;  %v3389_v20 = vpop.f32.mrb[89].mxu1  ;;  %v10261_v32 = vrot.slane %v9535_v16, 2 }
 0x28b   :  { %v9545_v35 = vsel %vm5328_vm6, %v5348_v53, %v5350_v52  ;;  %v5416_v19 = vadd.f32 %v9523_v39, %v5391_v45  ;;  %v5392_v7 = vadd.f32 %v9451_v38, %v5290_v63  ;;  %v5234_v4 = vrot.slane %v3389_v20, 2  ;;  %v3391_v36 = vpop.f32.mrb[90].mxu1 }
 0x28c   :  { %v5134_v29 = vsel %vm4284_vm1, %v5131_v15, %v5133_v22  ;;  %v5135_v46 = vrot.slane %v3391_v36, 1  ;;  %v3393_v55 = vpop.f32.mrb[91].mxu1 }
 0x28d   :  { %v5456_v25 = vrot.slane %v5416_v19, 2  ;;  %v5517_v5 = vrot.slane %v5416_v19, 4  ;;  %v9553_v53 = vadd.f32 %v9523_v39, %v5392_v7  ;;  %v5190_v49 = vadd.f32 %v5134_v29, %v8869_v62 }
 0x28e   :  { %v3693_v1 = vpop.f32.mrb[104].mxu0  ;;  %v5235_v38 = vsel %vm4411_vm2, %v5232_v48, %v5234_v4  ;;  %v5136_v0 = vsel %vm4284_vm1, %v5133_v22, %v5135_v46  ;;  %v5236_v45 = vrot.slane %v3393_v55, 2  ;;  %3988 = vmatmul.mubr.bf16.gmra.mrb[156].mxu1 %v9480_v24 }
 0x28f   :  { %v5352_v63 = vrot.slane %v3693_v1, 3  ;;  %v9558_v3 = vpop.f32.mrb[105].mxu0  ;;  %v5457_v15 = vsel %vm4411_vm2, %v10261_v32, %v5456_v25  ;;  %v5518_v20 = vsel %vm4473_vm3, %v10263_v43, %v5517_v5  ;;  %v5458_v62 = vrot.slane %v9553_v53, 2 }
 0x290   :  { %10286 = vst [vmem:[#allocation15_spill] sm:$0xff] %v9558_v3  ;;  %v5519_v48 = vrot.slane %v9553_v53, 4  ;;  %v3697_v7 = vpop.f32.mrb[106].mxu0  ;;  %v5577_v22 = vmax.f32 %v5457_v15, %v5518_v20  ;;  %v5291_v36 = vadd.f32 %v5235_v38, %v5190_v49  ;;  %v5191_v29 = vadd.f32 %v5136_v0, %v8887_v14 }
 0x291   :  { %v5237_v55 = vsel %vm4411_vm2, %v5234_v4, %v5236_v45  ;;  %v9571_v24 = vpop.f32.mrb[107].mxu0  ;;  %v5459_v1 = vsel %vm4411_vm2, %v5456_v25, %v5458_v62  ;;  %v9576_v57 = vsel %vm5328_vm6, %v5350_v52, %v5352_v63  ;;  %v5354_v43 = vrot.slane %v3697_v7, 3  ;;  %v3397_v54 = vpop.f32.mrb[92].mxu1 }
 0x292   :  { %10287 = vst [vmem:[#allocation16_spill] sm:$0xff] %v9571_v24  ;;  %v5520_v32 = vsel %vm4473_vm3, %v5517_v5, %v5519_v48  ;;  %v5597_v9 = vmax.f32 %v9535_v16, %v5577_v22  ;;  %v5393_v49 = vadd.f32 %v9470_v8, %v5291_v36  ;;  %v5292_v38 = vadd.f32 %v5237_v55, %v5191_v29  ;;  %v3399_v14 = vpop.f32.mrb[93].mxu1 }
 0x293   :  { %v5578_v3 = vmax.f32 %v5459_v1, %v5520_v32  ;;  %v9581_v4 = vsel %vm5328_vm6, %v5352_v63, %v5354_v43  ;;  %v5137_v0 = vrot.slane %v3397_v54, 1  ;;  %v5238_v15 = vrot.slane %v3399_v14, 2  ;;  %v3401_v25 = vpop.f32.mrb[94].mxu1 }
 0x294   :  { %v5617_v20 = vmax.f32 %v5597_v9, 0.0  ;;  %v5418_v52 = vadd.f32 %v9523_v39, %v5393_v49  ;;  %v5394_v7 = vadd.f32 %v9475_v37, %v5292_v38  ;;  %v3403_v24 = vpop.f32.mrb[95].mxu1  ;;  %v5139_v8 = vrot.slane %v3401_v25, 1 }
 0x295   :  { %v5598_v5 = vmax.f32 %v5416_v19, %v5578_v3  ;;  %v5138_v22 = vsel %vm4284_vm1, %v5135_v46, %v5137_v0  ;;  %v5239_v32 = vsel %vm4411_vm2, %v5236_v45, %v5238_v15  ;;  %v5240_v36 = vrot.slane %v3403_v24, 2 }
 0x296   :  { %v3703_v29 = vpop.f32.mrb[108].mxu0  ;;  %5637 = vst [vmem:[#allocation2] sm:$0xff] %v5617_v20  ;;  %v5460_v55 = vrot.slane %v5418_v52, 2  ;;  %v5521_v54 = vrot.slane %v5418_v52, 4  ;;  %v9588_v1 = vadd.f32 %v9523_v39, %v5394_v7  ;;  %v5192_v19 = vadd.f32 %v5138_v22, %v8895_v11 }
 0x297   :  { %v5618_v63 = vmax.f32 %v5598_v5, 0.0  ;;  %v9590_v9 = vpop.f32.mrb[109].mxu0  ;;  %v5140_v37 = vsel %vm4284_vm1, %v5137_v0, %v5139_v8  ;;  %v5241_v46 = vsel %vm4411_vm2, %v5238_v15, %v5240_v36  ;;  %v5356_v3 = vrot.slane %v3703_v29, 3 }
 0x298   :  { %10288 = vst [vmem:[#allocation17_spill] sm:$0xff] %v9590_v9  ;;  %v3707_v45 = vpop.f32.mrb[110].mxu0  ;;  %v5461_v24 = vsel %vm4411_vm2, %v5458_v62, %v5460_v55  ;;  %v5522_v49 = vsel %vm4473_vm3, %v5519_v48, %v5521_v54  ;;  %v5462_v38 = vrot.slane %v9588_v1, 2  ;;  %v5523_v14 = vrot.slane %v9588_v1, 4 }
 0x299   :  { %5638 = vst [vmem:[#allocation2 + $0x8] sm:$0xff] %v5618_v63  ;;  %v9599_v25 = vpop.f32.mrb[111].mxu0  ;;  %v5579_v20 = vmax.f32 %v5461_v24, %v5522_v49  ;;  %v5293_v5 = vadd.f32 %v5239_v32, %v5192_v19  ;;  %v5193_v11 = vadd.f32 %v5140_v37, %v8912_v13  ;;  %v9603_v0 = vsel %vm5328_vm6, %v5354_v43, %v5356_v3  ;;  %v3407_v15 = vpop.f32.mrb[96].mxu1 }
 0x29a   :  { %10289 = vst [vmem:[#allocation18_spill] sm:$0xff] %v9599_v25  ;;  %v5463_v7 = vsel %vm4411_vm2, %v5460_v55, %v5462_v38  ;;  %v5524_v62 = vsel %vm4473_vm3, %v5521_v54, %v5523_v14  ;;  %v5358_v22 = vrot.slane %v3707_v45, 3  ;;  %v5141_v48 = vrot.slane %v3407_v15, 1  ;;  %v3409_v29 = vpop.f32.mrb[97].mxu1 }
 0x29b   :  { %v5599_v63 = vmax.f32 %v9553_v53, %v5579_v20  ;;  %v5580_v9 = vmax.f32 %v5463_v7, %v5524_v62  ;;  %v5395_v25 = vadd.f32 %v9487_v12, %v5293_v5  ;;  %v5294_v24 = vadd.f32 %v5241_v46, %v5193_v11  ;;  %v3411_v32 = vpop.f32.mrb[98].mxu1 }
 0x29c   :  { %v9610_v13 = vsel %vm5328_vm6, %v5356_v3, %v5358_v22  ;;  %v5142_v43 = vsel %vm4284_vm1, %v5139_v8, %v5141_v48  ;;  %v5242_v19 = vrot.slane %v3409_v29, 2  ;;  %v5143_v37 = vrot.slane %v3411_v32, 1  ;;  %v3413_v55 = vpop.f32.mrb[99].mxu1 }
 0x29d   :  { %v5619_v49 = vmax.f32 %v5599_v63, 0.0  ;;  %v5600_v54 = vmax.f32 %v5418_v52, %v5580_v9  ;;  %v5420_v45 = vadd.f32 %v9523_v39, %v5395_v25  ;;  %v5396_v15 = vadd.f32 %v9494_v27, %v5294_v24 }
 0x29e   :  { %v3713_v53 = vpop.f32.mrb[112].mxu0  ;;  %v5194_v20 = vadd.f32 %v5142_v43, %v8920_v56  ;;  %v5243_v12 = vsel %vm4411_vm2, %v5240_v36, %v5242_v19  ;;  %v5144_v46 = vsel %vm4284_vm1, %v5141_v48, %v5143_v37  ;;  %v5244_v3 = vrot.slane %v3413_v55, 2 }
 0x29f   :  { %v9618_v5 = vpop.f32.mrb[113].mxu0  ;;  %5639 = vst [vmem:[#allocation2 + $0x10] sm:$0xff] %v5619_v49  ;;  %v5620_v8 = vmax.f32 %v5600_v54, 0.0  ;;  %v5464_v11 = vrot.slane %v5420_v45, 2  ;;  %v5525_v7 = vrot.slane %v5420_v45, 4  ;;  %v5421_v52 = vadd.f32 %v9523_v39, %v5396_v15 }
 0x2a0   :  { %v9621_v9 = vpop.f32.mrb[114].mxu0  ;;  %v5295_v25 = vadd.f32 %v5243_v12, %v5194_v20  ;;  %v5195_v27 = vadd.f32 %v5144_v46, %v8940_v60  ;;  %v5245_v56 = vsel %vm4411_vm2, %v5242_v19, %v5244_v3  ;;  %v5360_v62 = vrot.slane %v3713_v53, 3 }
 0x2a1   :  { %v9625_v36 = vpop.f32.mrb[115].mxu0  ;;  %5640 = vst [vmem:[#allocation2 + $0x18] sm:$0xff] %v5620_v8  ;;  %v5465_v48 = vsel %vm4411_vm2, %v5462_v38, %v5464_v11  ;;  %v5526_v29 = vsel %vm4473_vm3, %v5523_v14, %v5525_v7  ;;  %v5466_v63 = vrot.slane %v5421_v52, 2  ;;  %v5527_v24 = vrot.slane %v5421_v52, 4  ;;  %v3417_v32 = vpop.f32.mrb[100].mxu1 }
 0x2a2   :  { %v5581_v43 = vmax.f32 %v5465_v48, %v5526_v29  ;;  %v5397_v55 = vadd.f32 %v9512_v33, %v5295_v25  ;;  %v5296_v49 = vadd.f32 %v5245_v56, %v5195_v27  ;;  %v9631_v54 = vsel %vm5328_vm6, %v5358_v22, %v5360_v62  ;;  %v3419_v60 = vpop.f32.mrb[101].mxu1 }
 0x2a3   :  { %v5467_v19 = vsel %vm4411_vm2, %v5464_v11, %v5466_v63  ;;  %v5528_v15 = vsel %vm4473_vm3, %v5525_v7, %v5527_v24  ;;  %v5362_v53 = vrot.slane %v9621_v9, 3  ;;  %v5145_v38 = vrot.slane %v3417_v32, 1  ;;  %v3421_v20 = vpop.f32.mrb[102].mxu1 }
 0x2a4   :  { %v5601_v14 = vmax.f32 %v9588_v1, %v5581_v43  ;;  %v5582_v12 = vmax.f32 %v5467_v19, %v5528_v15  ;;  %v5422_v46 = vadd.f32 %v9523_v39, %v5397_v55  ;;  %v5398_v33 = vadd.f32 %v9520_v42, %v5296_v49  ;;  %v3423_v8 = vpop.f32.mrb[103].mxu1 }
 0x2a5   :  { %v9640_v22 = vsel %vm5328_vm6, %v5360_v62, %v5362_v53  ;;  %v5146_v25 = vsel %vm4284_vm1, %v5143_v37, %v5145_v38  ;;  %v5246_v11 = vrot.slane %v3419_v60, 2  ;;  %v5147_v27 = vrot.slane %v3421_v20, 1 }
 0x2a6   :  { %v3723_v7 = vpop.f32.mrb[116].mxu0  ;;  %v5621_v56 = vmax.f32 %v5601_v14, 0.0  ;;  %v5602_v9 = vmax.f32 %v5420_v45, %v5582_v12  ;;  %v5468_v48 = vrot.slane %v5422_v46, 2  ;;  %v5529_v29 = vrot.slane %v5422_v46, 4  ;;  %v5657_v1 = vld [vmem:[#allocation2] ss:$3 sm:$0xff] }
 0x2a7   :  { %v9643_v32 = vpop.f32.mrb[117].mxu0  ;;  %v9646_v43 = vadd.f32 %v9523_v39, %v5398_v33  ;;  %v5196_v42 = vadd.f32 %v5146_v25, %v8952_v31  ;;  %v5247_v62 = vsel %vm4411_vm2, %v5244_v3, %v5246_v11  ;;  %v5148_v55 = vsel %vm4284_vm1, %v5145_v38, %v5147_v27  ;;  %5661 = vst.msk [vmem:[%s10256_s3 + $0x32] sm:$0xff] %vm4622_vm4, %v5657_v1 }
 0x2a8   :  { %v9651_v37 = vpop.f32.mrb[118].mxu0  ;;  %5641 = vst [vmem:[#allocation2 + $0x20] sm:$0xff] %v5621_v56  ;;  %v5622_v45 = vmax.f32 %v5602_v9, 0.0  ;;  %v5469_v49 = vsel %vm4411_vm2, %v5466_v63, %v5468_v48  ;;  %v5530_v60 = vsel %vm4473_vm3, %v5527_v24, %v5529_v29  ;;  %v5197_v19 = vadd.f32 %v5148_v55, %v8977_v34 }
 0x2a9   :  { %v9660_v31 = vpop.f32.mrb[119].mxu0  ;;  %v5583_v3 = vmax.f32 %v5469_v49, %v5530_v60  ;;  %v5470_v15 = vrot.slane %v9646_v43, 2  ;;  %v5531_v38 = vrot.slane %v9646_v43, 4  ;;  %v5297_v20 = vadd.f32 %v5247_v62, %v5196_v42  ;;  %v3427_v14 = vpop.f32.mrb[104].mxu1 }
 0x2aa   :  { %5642 = vst [vmem:[#allocation2 + $0x28] sm:$0xff] %v5622_v45  ;;  %v5248_v12 = vrot.slane %v3423_v8, 2  ;;  %v5364_v33 = vrot.slane %v3723_v7, 3  ;;  %v5366_v25 = vrot.slane %v9651_v37, 3  ;;  %v5149_v56 = vrot.slane %v3427_v14, 1  ;;  %v3429_v63 = vpop.f32.mrb[105].mxu1 }
 0x2ab   :  { %v5603_v9 = vmax.f32 %v5421_v52, %v5583_v3  ;;  %v5471_v24 = vsel %vm4411_vm2, %v5468_v48, %v5470_v15  ;;  %v5532_v34 = vsel %vm4473_vm3, %v5529_v29, %v5531_v38  ;;  %v5399_v1 = vadd.f32 %v9539_v18, %v5297_v20  ;;  %v3431_v55 = vpop.f32.mrb[106].mxu1 }
 0x2ac   :  { %v5584_v49 = vmax.f32 %v5471_v24, %v5532_v34  ;;  %v5249_v60 = vsel %vm4411_vm2, %v5246_v11, %v5248_v12  ;;  %v9670_v42 = vsel %vm5328_vm6, %v5362_v53, %v5364_v33  ;;  %v9675_v8 = vsel %vm5328_vm6, %v5364_v33, %v5366_v25  ;;  %v3433_v7 = vpop.f32.mrb[107].mxu1 }
 0x2ad   :  { %v5623_v52 = vmax.f32 %v5603_v9, 0.0  ;;  %v5424_v48 = vadd.f32 %v9523_v39, %v5399_v1  ;;  %v5298_v62 = vadd.f32 %v5249_v60, %v5197_v19  ;;  %v5150_v18 = vsel %vm4284_vm1, %v5147_v27, %v5149_v56 }
 0x2ae   :  { %v5604_v29 = vmax.f32 %v5422_v46, %v5584_v49  ;;  %v5250_v45 = vrot.slane %v3429_v63, 2  ;;  %v5151_v3 = vrot.slane %v3431_v55, 1  ;;  %v5198_v14 = vadd.f32 %v5150_v18, %v8990_v47 }
 0x2af   :  { %5643 = vst [vmem:[#allocation2 + $0x30] sm:$0xff] %v5623_v52  ;;  %v5472_v11 = vrot.slane %v5424_v48, 2  ;;  %v5533_v20 = vrot.slane %v5424_v48, 4  ;;  %v5400_v53 = vadd.f32 %v9545_v35, %v5298_v62  ;;  %v5252_v34 = vrot.slane %v3433_v7, 2 }
 0x2b0   :  { %v5624_v24 = vmax.f32 %v5604_v29, 0.0  ;;  %v5251_v33 = vsel %vm4411_vm2, %v5248_v12, %v5250_v45  ;;  %v5152_v9 = vsel %vm4284_vm1, %v5149_v56, %v5151_v3 }
 0x2b1   :  { %v5473_v19 = vsel %vm4411_vm2, %v5470_v15, %v5472_v11  ;;  %v5534_v46 = vsel %vm4473_vm3, %v5531_v38, %v5533_v20  ;;  %v5425_v27 = vadd.f32 %v9523_v39, %v5400_v53  ;;  %v5299_v63 = vadd.f32 %v5251_v33, %v5198_v14  ;;  %v3437_v1 = vpop.f32.mrb[108].mxu1  ;;  %v5658_v55 = vld [vmem:[#allocation2 + $0x18] ss:$3 sm:$0xff] }
 0x2b2   :  { %5644 = vst [vmem:[#allocation2 + $0x38] sm:$0xff] %v5624_v24  ;;  %v5585_v49 = vmax.f32 %v5473_v19, %v5534_v46  ;;  %v5199_v35 = vadd.f32 %v5152_v9, %v9025_v21  ;;  %v5253_v47 = vsel %vm4411_vm2, %v5250_v45, %v5252_v34  ;;  %v5153_v60 = vrot.slane %v3437_v1, 1  ;;  %v3439_v12 = vpop.f32.mrb[109].mxu1  ;;  %5662 = vst.msk [vmem:[%s10256_s3 + $0x3a] sm:$0xff] %vm4622_vm4, %v5658_v55  ;;  %v10290_v33 = vld [vmem:[#allocation9_spill] sm:$0xff] }
 0x2b3   :  { %v5474_v15 = vrot.slane %v5425_v27, 2  ;;  %v5535_v38 = vrot.slane %v5425_v27, 4  ;;  %v5401_v56 = vadd.f32 %v9576_v57, %v5299_v63  ;;  %v5254_v7 = vrot.slane %v3439_v12, 2  ;;  %v3441_v52 = vpop.f32.mrb[110].mxu1 }
 0x2b4   :  { %v5605_v62 = vmax.f32 %v9646_v43, %v5585_v49  ;;  %v5300_v29 = vadd.f32 %v5253_v47, %v5199_v35  ;;  %v5154_v21 = vsel %vm4284_vm1, %v5151_v3, %v5153_v60  ;;  %v5155_v18 = vrot.slane %v3441_v52, 1  ;;  %v3443_v45 = vpop.f32.mrb[111].mxu1 }
 0x2b5   :  { %v5475_v53 = vsel %vm4411_vm2, %v5472_v11, %v5474_v15  ;;  %v5536_v14 = vsel %vm4473_vm3, %v5533_v20, %v5535_v38  ;;  %v5426_v24 = vadd.f32 %v9523_v39, %v5401_v56  ;;  %v5200_v9 = vadd.f32 %v5154_v21, %v10290_v33  ;;  %v10291_v20 = vld [vmem:[#allocation10_spill] sm:$0xff] }
 0x2b6   :  { %v5625_v19 = vmax.f32 %v5605_v62, 0.0  ;;  %v5586_v46 = vmax.f32 %v5475_v53, %v5536_v14  ;;  %v5402_v57 = vadd.f32 %v9581_v4, %v5300_v29  ;;  %v5255_v63 = vsel %vm4411_vm2, %v5252_v34, %v5254_v7 }
 0x2b7   :  { %v5476_v43 = vrot.slane %v5426_v24, 2  ;;  %v5537_v1 = vrot.slane %v5426_v24, 4  ;;  %v5301_v55 = vadd.f32 %v5255_v63, %v5200_v9  ;;  %v5156_v3 = vsel %vm4284_vm1, %v5153_v60, %v5155_v18 }
 0x2b8   :  { %5645 = vst [vmem:[#allocation2 + $0x40] sm:$0xff] %v5625_v19  ;;  %v5606_v49 = vmax.f32 %v5424_v48, %v5586_v46  ;;  %v5427_v11 = vadd.f32 %v9523_v39, %v5402_v57  ;;  %v5201_v35 = vadd.f32 %v5156_v3, %v10291_v20  ;;  %v5256_v47 = vrot.slane %v3443_v45, 2 }
 0x2b9   :  { %v5477_v12 = vsel %vm4411_vm2, %v5474_v15, %v5476_v43  ;;  %v5538_v56 = vsel %vm4473_vm3, %v5535_v38, %v5537_v1  ;;  %v5403_v4 = vadd.f32 %v9603_v0, %v5301_v55  ;;  %v3447_v52 = vpop.f32.mrb[112].mxu1 }
 0x2ba   :  { %v5626_v34 = vmax.f32 %v5606_v49, 0.0  ;;  %v5587_v62 = vmax.f32 %v5477_v12, %v5538_v56  ;;  %v5478_v29 = vrot.slane %v5427_v11, 2  ;;  %v5539_v21 = vrot.slane %v5427_v11, 4  ;;  %v3449_v53 = vpop.f32.mrb[113].mxu1 }
 0x2bb   :  { %v5428_v60 = vadd.f32 %v9523_v39, %v5403_v4  ;;  %v5257_v48 = vsel %vm4411_vm2, %v5254_v7, %v5256_v47  ;;  %v5157_v14 = vrot.slane %v3447_v52, 1  ;;  %v5258_v33 = vrot.slane %v3449_v53, 2  ;;  %v3451_v9 = vpop.f32.mrb[114].mxu1  ;;  %v10292_v7 = vld [vmem:[#allocation11_spill] sm:$0xff] }
 0x2bc   :  { %5646 = vst [vmem:[#allocation2 + $0x48] sm:$0xff] %v5626_v34  ;;  %v5607_v45 = vmax.f32 %v5425_v27, %v5587_v62  ;;  %v5479_v15 = vsel %vm4411_vm2, %v5476_v43, %v5478_v29  ;;  %v5540_v38 = vsel %vm4473_vm3, %v5537_v1, %v5539_v21  ;;  %v5302_v0 = vadd.f32 %v5257_v48, %v5201_v35  ;;  %v3453_v19 = vpop.f32.mrb[115].mxu1 }
 0x2bd   :  { %v5588_v46 = vmax.f32 %v5479_v15, %v5540_v38  ;;  %v5480_v57 = vrot.slane %v5428_v60, 2  ;;  %v5541_v63 = vrot.slane %v5428_v60, 4  ;;  %v5158_v55 = vsel %vm4284_vm1, %v5155_v18, %v5157_v14 }
 0x2be   :  { %v5627_v3 = vmax.f32 %v5607_v45, 0.0  ;;  %v5404_v49 = vadd.f32 %v9610_v13, %v5302_v0  ;;  %v5202_v20 = vadd.f32 %v5158_v55, %v10292_v7  ;;  %v5259_v12 = vsel %vm4411_vm2, %v5256_v47, %v5258_v33 }
 0x2bf   :  { %v5608_v56 = vmax.f32 %v5426_v24, %v5588_v46  ;;  %v5481_v27 = vsel %vm4411_vm2, %v5478_v29, %v5480_v57  ;;  %v5542_v43 = vsel %vm4473_vm3, %v5539_v21, %v5541_v63  ;;  %v5159_v1 = vrot.slane %v3451_v9, 1  ;;  %v5659_v35 = vld [vmem:[#allocation2 + $0x30] ss:$3 sm:$0xff] }
 0x2c0   :  { %5647 = vst [vmem:[#allocation2 + $0x50] sm:$0xff] %v5627_v3  ;;  %v5589_v4 = vmax.f32 %v5481_v27, %v5542_v43  ;;  %v5429_v52 = vadd.f32 %v9523_v39, %v5404_v49  ;;  %v5303_v34 = vadd.f32 %v5259_v12, %v5202_v20  ;;  %v5260_v18 = vrot.slane %v3453_v19, 2  ;;  %5663 = vst.msk [vmem:[%s10256_s3 + $0x42] sm:$0xff] %vm4622_vm4, %v5659_v35  ;;  %v10293_v9 = vld [vmem:[#allocation12_spill] sm:$0xff] }
 0x2c1   :  { %v5628_v13 = vmax.f32 %v5608_v56, 0.0  ;;  %v5160_v24 = vsel %vm4284_vm1, %v5157_v14, %v5159_v1  ;;  %v3457_v47 = vpop.f32.mrb[116].mxu1 }
 0x2c2   :  { %v5609_v62 = vmax.f32 %v5427_v11, %v5589_v4  ;;  %v5482_v29 = vrot.slane %v5429_v52, 2  ;;  %v5543_v21 = vrot.slane %v5429_v52, 4  ;;  %v5405_v53 = vadd.f32 %v9631_v54, %v5303_v34  ;;  %v3459_v48 = vpop.f32.mrb[117].mxu1 }
 0x2c3   :  { %5648 = vst [vmem:[#allocation2 + $0x58] sm:$0xff] %v5628_v13  ;;  %v5203_v45 = vadd.f32 %v5160_v24, %v10293_v9  ;;  %v5261_v15 = vsel %vm4411_vm2, %v5258_v33, %v5260_v18  ;;  %v5161_v38 = vrot.slane %v3457_v47, 1  ;;  %v5262_v0 = vrot.slane %v3459_v48, 2  ;;  %v3461_v19 = vpop.f32.mrb[118].mxu1  ;;  %v10296_v9 = vld [vmem:[#allocation14_spill] sm:$0xff] }
 0x2c4   :  { %v5660_v46 = vld [vmem:[#allocation2 + $0x48] ss:$3 sm:$0x1]  ;;  %v5629_v55 = vmax.f32 %v5609_v62, 0.0  ;;  %v5483_v3 = vsel %vm4411_vm2, %v5480_v57, %v5482_v29  ;;  %v5544_v14 = vsel %vm4473_vm3, %v5541_v63, %v5543_v21  ;;  %v5430_v11 = vadd.f32 %v9523_v39, %v5405_v53  ;;  %v3463_v49 = vpop.f32.mrb[119].mxu1  ;;  %v10294_v57 = vld [vmem:[#allocation13_spill] sm:$0xff] }
 0x2c5   :  { %5664 = vst.msk [vmem:[%s10256_s3 + $0x4a] sm:$0x1] %vm4626_vm5, %v5660_v46  ;;  %v5590_v54 = vmax.f32 %v5483_v3, %v5544_v14  ;;  %v5304_v7 = vadd.f32 %v5261_v15, %v5203_v45  ;;  %v5162_v33 = vsel %vm4284_vm1, %v5159_v1, %v5161_v38  ;;  %v5263_v20 = vsel %vm4411_vm2, %v5260_v18, %v5262_v0 }
 0x2c6   :  { %5649 = vst [vmem:[#allocation2 + $0x60] sm:$0xff] %v5629_v55  ;;  %v5484_v12 = vrot.slane %v5430_v11, 2  ;;  %v5545_v56 = vrot.slane %v5430_v11, 4  ;;  %v5204_v27 = vadd.f32 %v5162_v33, %v10294_v57  ;;  %v5163_v63 = vrot.slane %v3461_v19, 1 }
 0x2c7   :  { %v5610_v43 = vmax.f32 %v5428_v60, %v5590_v54  ;;  %v5406_v35 = vadd.f32 %v9640_v22, %v5304_v7  ;;  %v5264_v4 = vrot.slane %v3463_v49, 2  ;;  %v10295_v53 = vrot.slane %v9491_v2, 1 }
 0x2c8   :  { %v5485_v34 = vsel %vm4411_vm2, %v5482_v29, %v5484_v12  ;;  %v5546_v13 = vsel %vm4473_vm3, %v5543_v21, %v5545_v56  ;;  %v5305_v24 = vadd.f32 %v5263_v20, %v5204_v27  ;;  %v5164_v47 = vsel %vm4284_vm1, %v5161_v38, %v5163_v63 }
 0x2c9   :  { %v5630_v1 = vmax.f32 %v5610_v43, 0.0  ;;  %v5591_v62 = vmax.f32 %v5485_v34, %v5546_v13  ;;  %v5431_v18 = vadd.f32 %v9523_v39, %v5406_v35  ;;  %v5186_v48 = vsel %vm4284_vm1, %v5163_v63, %v10295_v53 }
 0x2ca   :  { %v5407_v60 = vadd.f32 %v9670_v42, %v5305_v24  ;;  %v5205_v22 = vadd.f32 %v5164_v47, %v10296_v9  ;;  %v5206_v45 = vadd.f32 %v5186_v48, %v9184_v44  ;;  %v5265_v29 = vsel %vm4411_vm2, %v5262_v0, %v5264_v4 }
 0x2cb   :  { %5650 = vst [vmem:[#allocation2 + $0x68] sm:$0xff] %v5630_v1  ;;  %v5611_v21 = vmax.f32 %v5429_v52, %v5591_v62  ;;  %v5486_v15 = vrot.slane %v5431_v18, 2  ;;  %v5547_v38 = vrot.slane %v5431_v18, 4  ;;  %v10297_v19 = vrot.slane %v9496_v26, 2 }
 0x2cc   :  { %v5432_v2 = vadd.f32 %v9523_v39, %v5407_v60  ;;  %v5306_v55 = vadd.f32 %v5265_v29, %v5205_v22  ;;  %v10298_v42 = vrot.slane %v9425_v51, 3  ;;  %v10299_v47 = vrot.slane %v9535_v16, 2 }
 0x2cd   :  { %v5287_v46 = vsel %vm4411_vm2, %v5264_v4, %v10297_v19  ;;  %v5631_v14 = vmax.f32 %v5611_v21, 0.0  ;;  %v5487_v0 = vsel %vm4411_vm2, %v5484_v12, %v5486_v15  ;;  %v5548_v52 = vsel %vm4473_vm3, %v5545_v56, %v5547_v38  ;;  %v5665_v49 = vld [vmem:[#allocation2 + $0x50] ss:$3 sm:$0xff] }
 0x2ce   :  { %v5307_v3 = vadd.f32 %v5287_v46, %v5206_v45  ;;  %v5389_v44 = vsel %vm5328_vm6, %v5366_v25, %v10298_v42  ;;  %v5592_v54 = vmax.f32 %v5487_v0, %v5548_v52  ;;  %v5488_v26 = vrot.slane %v5432_v2, 2  ;;  %6813 = vst.msk [vmem:[%s10256_s3 + $0x9a] sm:$0xff] %vm4622_vm4, %v5665_v49 }
 0x2cf   :  { %v5549_v7 = vrot.slane %v5432_v2, 4  ;;  %v5408_v33 = vadd.f32 %v9675_v8, %v5306_v55  ;;  %5651 = vst [vmem:[#allocation2 + $0x70] sm:$0xff] %v5631_v14  ;;  %v10300_v62 = vrot.slane %v9535_v16, 4 }
 0x2d0   :  { %v5409_v51 = vadd.f32 %v5389_v44, %v5307_v3  ;;  %v5612_v37 = vmax.f32 %v5430_v11, %v5592_v54  ;;  %v5489_v25 = vsel %vm4411_vm2, %v5486_v15, %v5488_v26 }
 0x2d1   :  { %v5550_v20 = vsel %vm4473_vm3, %v5547_v38, %v5549_v7  ;;  %v5433_v12 = vadd.f32 %v9523_v39, %v5408_v33 }
 0x2d2   :  { %v5593_v56 = vmax.f32 %v5489_v25, %v5550_v20  ;;  %v5434_v57 = vadd.f32 %v9523_v39, %v5409_v51  ;;  %v5632_v27 = vmax.f32 %v5612_v37, 0.0 }
 0x2d3   :  { %v5490_v63 = vrot.slane %v5433_v12, 2  ;;  %v5551_v8 = vrot.slane %v5433_v12, 4 }
 0x2d4   :  { %v5613_v43 = vmax.f32 %v5431_v18, %v5593_v56  ;;  %v5492_v35 = vrot.slane %v5434_v57, 2  ;;  %v5553_v4 = vrot.slane %v5434_v57, 4  ;;  %5652 = vst [vmem:[#allocation2 + $0x78] sm:$0xff] %v5632_v27 }
 0x2d5   :  { %v5491_v34 = vsel %vm4411_vm2, %v5488_v26, %v5490_v63  ;;  %v5552_v11 = vsel %vm4473_vm3, %v5549_v7, %v5551_v8 }
 0x2d6   :  { %v5633_v13 = vmax.f32 %v5613_v43, 0.0  ;;  %v5493_v24 = vsel %vm4411_vm2, %v5490_v63, %v5492_v35  ;;  %v5515_v1 = vsel %vm4411_vm2, %v5492_v35, %v10299_v47  ;;  %v5554_v39 = vsel %vm4473_vm3, %v5551_v8, %v5553_v4 }
 0x2d7   :  { %v5576_v18 = vsel %vm4473_vm3, %v5553_v4, %v10300_v62  ;;  %v5594_v53 = vmax.f32 %v5491_v34, %v5552_v11  ;;  %v5595_v48 = vmax.f32 %v5493_v24, %v5554_v39 }
 0x2d8   :  { %5653 = vst [vmem:[#allocation2 + $0x80] sm:$0xff] %v5633_v13  ;;  %v5596_v60 = vmax.f32 %v5515_v1, %v5576_v18 }
 0x2d9   :  { %v5614_v9 = vmax.f32 %v5432_v2, %v5594_v53  ;;  %v5615_v22 = vmax.f32 %v5433_v12, %v5595_v48 }
 0x2da   :  { %v5616_v45 = vmax.f32 %v5434_v57, %v5596_v60 }
 0x2db   :  { %v5634_v29 = vmax.f32 %v5614_v9, 0.0  ;;  %v5635_v21 = vmax.f32 %v5615_v22, 0.0  ;;  %v5666_v38 = vld [vmem:[#allocation2 + $0x68] ss:$3 sm:$0xff] }
 0x2dc   :  { %v5636_v15 = vmax.f32 %v5616_v45, 0.0  ;;  %6814 = vst.msk [vmem:[%s10256_s3 + $0xa2] sm:$0xff] %vm4622_vm4, %v5666_v38 }
 0x2dd   :  { %5654 = vst [vmem:[#allocation2 + $0x88] sm:$0xff] %v5634_v29  ;;  %5655 = vst [vmem:[#allocation2 + $0x90] sm:$0xff] %v5635_v21 }
 0x2de   :  { %5656 = vst [vmem:[#allocation2 + $0x98] sm:$0xff] %v5636_v15 }
 0x2e4   :  { %v5667_v16 = vld [vmem:[#allocation2 + $0x80] ss:$3 sm:$0xff] }
 0x2e5   :  { %6815 = vst.msk [vmem:[%s10256_s3 + $0xaa] sm:$0xff] %vm4622_vm4, %v5667_v16  ;;  %v5668_v19 = vld [vmem:[#allocation2 + $0x98] ss:$3 sm:$0x1] }
 0x2e6   :  { %6816 = vst.msk [vmem:[%s10256_s3 + $0xb2] sm:$0x1] %vm4626_vm5, %v5668_v19 }
 0x2fe   :  { %v9790_v46 = vpop.f32.mrb[120].mxu0 }
 0x2ff   :  { %10301 = vst [vmem:[#allocation9_spill] sm:$0xff] %v9790_v46  ;;  %v9792_v2 = vpop.f32.mrb[121].mxu0 }
 0x300   :  { %10302 = vst [vmem:[#allocation10_spill] sm:$0xff] %v9792_v2  ;;  %v9794_v55 = vpop.f32.mrb[122].mxu0 }
 0x301   :  { %v9796_v3 = vpop.f32.mrb[123].mxu0  ;;  %v5896_v44 = vrot.slane %v9794_v55, 3 }
 0x302   :  { %v5997_v52 = vrot.slane %v9796_v3, 4 }
 0x306   :  { %v4175_v42 = vpop.f32.mrb[124].mxu0 }
 0x307   :  { %v5898_v14 = vrot.slane %v4175_v42, 3  ;;  %v4177_v0 = vpop.f32.mrb[125].mxu0 }
 0x308   :  { %v5999_v49 = vrot.slane %v4177_v0, 4  ;;  %v4179_v54 = vpop.f32.mrb[126].mxu0 }
 0x309   :  { %v9803_v26 = vsel %vm5328_vm6, %v5896_v44, %v5898_v14  ;;  %v5900_v7 = vrot.slane %v4179_v54, 3  ;;  %v4181_v33 = vpop.f32.mrb[127].mxu0 }
 0x30a   :  { %v9808_v51 = vsel %vm4473_vm3, %v5997_v52, %v5999_v49  ;;  %v6001_v37 = vrot.slane %v4181_v33, 4 }
 0x30b   :  { %v9811_v25 = vsel %vm5328_vm6, %v5898_v14, %v5900_v7 }
 0x30c   :  { %v9814_v20 = vsel %vm4473_vm3, %v5999_v49, %v6001_v37 }
 0x30e   :  { %v4185_v12 = vpop.f32.mrb[128].mxu0 }
 0x30f   :  { %v5902_v56 = vrot.slane %v4185_v12, 3  ;;  %v4187_v57 = vpop.f32.mrb[129].mxu0 }
 0x310   :  { %v6003_v27 = vrot.slane %v4187_v57, 4  ;;  %v4189_v63 = vpop.f32.mrb[130].mxu0  ;;  %v10268_v57 = vrot.slane %v9790_v46, 3 }
 0x311   :  { %v9817_v8 = vsel %vm5328_vm6, %v5900_v7, %v5902_v56  ;;  %v5904_v43 = vrot.slane %v4189_v63, 3  ;;  %v4191_v35 = vpop.f32.mrb[131].mxu0 }
 0x312   :  { %v9820_v4 = vsel %vm4473_vm3, %v6001_v37, %v6003_v27  ;;  %v6005_v34 = vrot.slane %v4191_v35, 4 }
 0x313   :  { %v9823_v11 = vsel %vm5328_vm6, %v5902_v56, %v5904_v43 }
 0x314   :  { %v9826_v13 = vsel %vm4473_vm3, %v6003_v27, %v6005_v34 }
 0x316   :  { %v4195_v24 = vpop.f32.mrb[132].mxu0 }
 0x317   :  { %v5906_v47 = vrot.slane %v4195_v24, 3  ;;  %v4197_v1 = vpop.f32.mrb[133].mxu0 }
 0x318   :  { %v6007_v39 = vrot.slane %v4197_v1, 4  ;;  %v4199_v62 = vpop.f32.mrb[134].mxu0  ;;  %v5897_v1 = vsel %vm5328_vm6, %v10268_v57, %v5896_v44 }
 0x319   :  { %v9829_v18 = vsel %vm5328_vm6, %v5904_v43, %v5906_v47  ;;  %v5908_v53 = vrot.slane %v4199_v62, 3  ;;  %v4201_v48 = vpop.f32.mrb[135].mxu0  ;;  %v9834_v22 = vpop.f32.mrb[120].mxu1 }
 0x31a   :  { %v9832_v60 = vsel %vm4473_vm3, %v6005_v34, %v6007_v39  ;;  %v6009_v9 = vrot.slane %v4201_v48, 4  ;;  %v9839_v29 = vpop.f32.mrb[121].mxu1  ;;  %v10271_v38 = vrot.slane %v9834_v22, 1 }
 0x31b   :  { %v9837_v45 = vsel %vm5328_vm6, %v5906_v47, %v5908_v53  ;;  %v3903_v15 = vpop.f32.mrb[122].mxu1  ;;  %v10270_v42 = vrot.slane %v9839_v29, 2 }
 0x31c   :  { %v9842_v21 = vsel %vm4473_vm3, %v6007_v39, %v6009_v9  ;;  %v5694_v16 = vrot.slane %v3903_v15, 1  ;;  %v3905_v19 = vpop.f32.mrb[123].mxu1 }
 0x31d   :  { %v5795_v14 = vrot.slane %v3905_v19, 2 }
 0x31e   :  { %v4205_v0 = vpop.f32.mrb[136].mxu0  ;;  %v5695_v49 = vsel %vm4284_vm1, %v10271_v38, %v5694_v16 }
 0x31f   :  { %v5910_v54 = vrot.slane %v4205_v0, 3  ;;  %v4207_v7 = vpop.f32.mrb[137].mxu0  ;;  %v5754_v33 = vadd.f32 %v5695_v49, %v9427_v58  ;;  %v5796_v37 = vsel %vm4411_vm2, %v10270_v42, %v5795_v14  ;;  %v10266_v58 = vrot.slane %v9792_v2, 4 }
 0x320   :  { %v6011_v12 = vrot.slane %v4207_v7, 4  ;;  %v4209_v56 = vpop.f32.mrb[138].mxu0  ;;  %v9878_v7 = vld [vmem:[#allocation5 + $0x3] ss:$0 sm:$0xff] }
 0x321   :  { %v9855_v27 = vsel %vm5328_vm6, %v5908_v53, %v5910_v54  ;;  %v5912_v63 = vrot.slane %v4209_v56, 3  ;;  %v4211_v43 = vpop.f32.mrb[139].mxu0  ;;  %v5855_v35 = vadd.f32 %v5796_v37, %v5754_v33  ;;  %v3909_v47 = vpop.f32.mrb[124].mxu1  ;;  %v5998_v55 = vsel %vm4473_vm3, %v10266_v58, %v5997_v52 }
 0x322   :  { %v9858_v34 = vsel %vm4473_vm3, %v6009_v9, %v6011_v12  ;;  %v6013_v24 = vrot.slane %v4211_v43, 4  ;;  %v5696_v62 = vrot.slane %v3909_v47, 1  ;;  %v3911_v53 = vpop.f32.mrb[125].mxu1 }
 0x323   :  { %v9867_v39 = vsel %vm5328_vm6, %v5910_v54, %v5912_v63  ;;  %v5956_v48 = vadd.f32 %v5897_v1, %v5855_v35  ;;  %v5797_v9 = vrot.slane %v3911_v53, 2  ;;  %v3913_v19 = vpop.f32.mrb[126].mxu1 }
 0x324   :  { %v9870_v15 = vsel %vm4473_vm3, %v6011_v12, %v6013_v24  ;;  %v5697_v0 = vsel %vm4284_vm1, %v5694_v16, %v5696_v62  ;;  %v5698_v44 = vrot.slane %v3913_v19, 1  ;;  %v3915_v49 = vpop.f32.mrb[127].mxu1 }
 0x325   :  { %v6057_v54 = vadd.f32 %v5998_v55, %v5956_v48  ;;  %v5755_v33 = vadd.f32 %v5697_v0, %v9432_v28  ;;  %v5798_v37 = vsel %vm4411_vm2, %v5795_v14, %v5797_v9  ;;  %v5799_v12 = vrot.slane %v3915_v49, 2 }
 0x326   :  { %v4215_v56 = vpop.f32.mrb[140].mxu0  ;;  %v5699_v43 = vsel %vm4284_vm1, %v5696_v62, %v5698_v44 }
 0x327   :  { %v5914_v3 = vrot.slane %v4215_v56, 3  ;;  %v4217_v35 = vpop.f32.mrb[141].mxu0  ;;  %v5856_v47 = vadd.f32 %v5798_v37, %v5755_v33  ;;  %v5756_v52 = vadd.f32 %v5699_v43, %v9442_v10  ;;  %v5800_v16 = vsel %vm4411_vm2, %v5797_v9, %v5799_v12 }
 0x328   :  { %v4219_v1 = vpop.f32.mrb[142].mxu0  ;;  %v9886_v53 = vadd.f32 %v9878_v7, %v6057_v54  ;;  %v6015_v28 = vrot.slane %v4217_v35, 4 }
 0x329   :  { %v9889_v48 = vsel %vm5328_vm6, %v5912_v63, %v5914_v3  ;;  %v5916_v14 = vrot.slane %v4219_v1, 3  ;;  %v4221_v19 = vpop.f32.mrb[143].mxu0  ;;  %v5957_v55 = vadd.f32 %v9803_v26, %v5856_v47  ;;  %v5857_v62 = vadd.f32 %v5800_v16, %v5756_v52  ;;  %v3919_v0 = vpop.f32.mrb[128].mxu1 }
 0x32a   :  { %10303 = vst [vmem:[#allocation11_spill] sm:$0xff] %v9886_v53  ;;  %v9893_v49 = vsel %vm4473_vm3, %v6013_v24, %v6015_v28  ;;  %v6017_v9 = vrot.slane %v4221_v19, 4  ;;  %v5700_v33 = vrot.slane %v3919_v0, 1  ;;  %v3921_v54 = vpop.f32.mrb[129].mxu1  ;;  %v10267_v35 = vrot.slane %v9886_v53, 2 }
 0x32b   :  { %v9896_v10 = vsel %vm5328_vm6, %v5914_v3, %v5916_v14  ;;  %v6058_v37 = vadd.f32 %v9808_v51, %v5957_v55  ;;  %v5958_v63 = vadd.f32 %v9811_v25, %v5857_v62  ;;  %v5801_v56 = vrot.slane %v3921_v54, 2  ;;  %v3923_v43 = vpop.f32.mrb[130].mxu1 }
 0x32c   :  { %v9902_v26 = vsel %vm4473_vm3, %v6015_v28, %v6017_v9  ;;  %v5701_v24 = vsel %vm4284_vm1, %v5698_v44, %v5700_v33  ;;  %v5702_v47 = vrot.slane %v3923_v43, 1  ;;  %v3925_v52 = vpop.f32.mrb[131].mxu1  ;;  %v10269_v19 = vrot.slane %v9886_v53, 4 }
 0x32d   :  { %v6083_v3 = vadd.f32 %v9878_v7, %v6058_v37  ;;  %v6059_v16 = vadd.f32 %v9814_v20, %v5958_v63  ;;  %v5757_v1 = vadd.f32 %v5701_v24, %v9448_v6  ;;  %v5802_v51 = vsel %vm4411_vm2, %v5799_v12, %v5801_v56 }
 0x32e   :  { %v4225_v25 = vpop.f32.mrb[144].mxu0  ;;  %v5703_v55 = vsel %vm4284_vm1, %v5700_v33, %v5702_v47  ;;  %v5803_v62 = vrot.slane %v3925_v52, 2 }
 0x32f   :  { %v5918_v28 = vrot.slane %v4225_v25, 3  ;;  %v4227_v0 = vpop.f32.mrb[145].mxu0  ;;  %v6123_v54 = vrot.slane %v6083_v3, 2  ;;  %v6184_v44 = vrot.slane %v6083_v3, 4  ;;  %v9912_v43 = vadd.f32 %v9878_v7, %v6059_v16 }
 0x330   :  { %v5858_v37 = vadd.f32 %v5802_v51, %v5757_v1  ;;  %v9914_v58 = vpop.f32.mrb[146].mxu0  ;;  %v5758_v6 = vadd.f32 %v5703_v55, %v9466_v61  ;;  %v5804_v20 = vsel %vm4411_vm2, %v5801_v56, %v5803_v62  ;;  %v6019_v63 = vrot.slane %v4227_v0, 4 }
 0x331   :  { %v9919_v12 = vsel %vm5328_vm6, %v5916_v14, %v5918_v28  ;;  %v9921_v33 = vpop.f32.mrb[147].mxu0  ;;  %v6124_v24 = vsel %vm4411_vm2, %v10267_v35, %v6123_v54  ;;  %v6185_v52 = vsel %vm4473_vm3, %v10269_v19, %v6184_v44  ;;  %v6125_v16 = vrot.slane %v9912_v43, 2  ;;  %v3929_v1 = vpop.f32.mrb[132].mxu1 }
 0x332   :  { %v6186_v61 = vrot.slane %v9912_v43, 4  ;;  %v6244_v56 = vmax.f32 %v6124_v24, %v6185_v52  ;;  %v5959_v14 = vadd.f32 %v9817_v8, %v5858_v37  ;;  %v5859_v51 = vadd.f32 %v5804_v20, %v5758_v6  ;;  %v3931_v55 = vpop.f32.mrb[133].mxu1 }
 0x333   :  { %v9933_v25 = vsel %vm4473_vm3, %v6017_v9, %v6019_v63  ;;  %v6126_v0 = vsel %vm4411_vm2, %v6123_v54, %v6125_v16  ;;  %v5920_v57 = vrot.slane %v9914_v58, 3  ;;  %v6021_v19 = vrot.slane %v9921_v33, 4  ;;  %v9939_v42 = vpop.f32.mrb[134].mxu1 }
 0x334   :  { %v6187_v35 = vsel %vm4473_vm3, %v6184_v44, %v6186_v61  ;;  %v6264_v38 = vmax.f32 %v9886_v53, %v6244_v56  ;;  %v6060_v8 = vadd.f32 %v9820_v4, %v5959_v14  ;;  %v5960_v37 = vadd.f32 %v9823_v11, %v5859_v51  ;;  %v9944_v9 = vpop.f32.mrb[135].mxu1 }
 0x335   :  { %v6245_v24 = vmax.f32 %v6126_v0, %v6187_v35  ;;  %v9947_v6 = vsel %vm5328_vm6, %v5918_v28, %v5920_v57  ;;  %v9950_v54 = vsel %vm4473_vm3, %v6019_v63, %v6021_v19  ;;  %v5704_v58 = vrot.slane %v3929_v1, 1 }
 0x336   :  { %v5805_v44 = vrot.slane %v3931_v55, 2  ;;  %v4235_v20 = vpop.f32.mrb[148].mxu0  ;;  %v6284_v33 = vmax.f32 %v6264_v38, 0.0  ;;  %v6085_v56 = vadd.f32 %v9878_v7, %v6060_v8  ;;  %v6061_v35 = vadd.f32 %v9826_v13, %v5960_v37 }
 0x337   :  { %v6265_v52 = vmax.f32 %v6083_v3, %v6245_v24  ;;  %v4237_v4 = vpop.f32.mrb[149].mxu0  ;;  %v5705_v11 = vsel %vm4284_vm1, %v5702_v47, %v5704_v58  ;;  %v5706_v28 = vrot.slane %v9939_v42, 1  ;;  %v5807_v51 = vrot.slane %v9944_v9, 2 }
 0x338   :  { %v5806_v14 = vsel %vm4411_vm2, %v5803_v62, %v5805_v44  ;;  %v9958_v63 = vpop.f32.mrb[150].mxu0  ;;  %6304 = vst [vmem:[#allocation2] sm:$0xff] %v6284_v33  ;;  %v6127_v55 = vrot.slane %v6085_v56, 2  ;;  %v6188_v38 = vrot.slane %v6085_v56, 4  ;;  %v9961_v3 = vadd.f32 %v9878_v7, %v6061_v35 }
 0x339   :  { %v6285_v1 = vmax.f32 %v6265_v52, 0.0  ;;  %v9963_v0 = vpop.f32.mrb[151].mxu0  ;;  %v5759_v13 = vadd.f32 %v5705_v11, %v9472_v40  ;;  %v5707_v47 = vsel %vm4284_vm1, %v5704_v58, %v5706_v28  ;;  %v5808_v62 = vsel %vm4411_vm2, %v5805_v44, %v5807_v51  ;;  %v3939_v24 = vpop.f32.mrb[136].mxu1 }
 0x33a   :  { %v5922_v42 = vrot.slane %v4235_v20, 3  ;;  %v6128_v8 = vsel %vm4411_vm2, %v6125_v16, %v6127_v55  ;;  %v6189_v37 = vsel %vm4473_vm3, %v6186_v61, %v6188_v38  ;;  %v6129_v9 = vrot.slane %v9961_v3, 2  ;;  %v3941_v52 = vpop.f32.mrb[137].mxu1 }
 0x33b   :  { %6305 = vst [vmem:[#allocation2 + $0x8] sm:$0xff] %v6285_v1  ;;  %v6190_v33 = vrot.slane %v9961_v3, 4  ;;  %v6246_v35 = vmax.f32 %v6128_v8, %v6189_v37  ;;  %v5860_v53 = vadd.f32 %v5806_v14, %v5759_v13  ;;  %v5760_v40 = vadd.f32 %v5707_v47, %v9483_v50  ;;  %v9976_v44 = vpop.f32.mrb[138].mxu1 }
 0x33c   :  { %v9974_v58 = vsel %vm5328_vm6, %v5920_v57, %v5922_v42  ;;  %v6130_v20 = vsel %vm4411_vm2, %v6127_v55, %v6129_v9  ;;  %v6023_v11 = vrot.slane %v4237_v4, 4  ;;  %v5924_v61 = vrot.slane %v9958_v63, 3  ;;  %v9981_v1 = vpop.f32.mrb[139].mxu1 }
 0x33d   :  { %v6191_v16 = vsel %vm4473_vm3, %v6188_v38, %v6190_v33  ;;  %v6266_v2 = vmax.f32 %v9912_v43, %v6246_v35  ;;  %v5961_v14 = vadd.f32 %v9829_v18, %v5860_v53  ;;  %v5861_v50 = vadd.f32 %v5808_v62, %v5760_v40 }
 0x33e   :  { %v6247_v8 = vmax.f32 %v6130_v20, %v6191_v16  ;;  %v4245_v13 = vpop.f32.mrb[152].mxu0  ;;  %v9986_v57 = vsel %vm4473_vm3, %v6021_v19, %v6023_v11  ;;  %v9989_v47 = vsel %vm5328_vm6, %v5922_v42, %v5924_v61  ;;  %v6025_v55 = vrot.slane %v9963_v0, 4 }
 0x33f   :  { %v5708_v4 = vrot.slane %v3939_v24, 1  ;;  %v4247_v38 = vpop.f32.mrb[153].mxu0  ;;  %v6286_v63 = vmax.f32 %v6266_v2, 0.0  ;;  %v6062_v46 = vadd.f32 %v9832_v60, %v5961_v14  ;;  %v5962_v43 = vadd.f32 %v9837_v45, %v5861_v50 }
 0x340   :  { %v6267_v37 = vmax.f32 %v6085_v56, %v6247_v8  ;;  %v9994_v35 = vpop.f32.mrb[154].mxu0  ;;  %v9997_v18 = vsel %vm4473_vm3, %v6023_v11, %v6025_v55  ;;  %v5809_v19 = vrot.slane %v3941_v52, 2  ;;  %v5710_v62 = vrot.slane %v9976_v44, 1 }
 0x341   :  { %v5709_v53 = vsel %vm4284_vm1, %v5706_v28, %v5708_v4  ;;  %v10001_v42 = vpop.f32.mrb[155].mxu0  ;;  %6306 = vst [vmem:[#allocation2 + $0x10] sm:$0xff] %v6286_v63  ;;  %v6087_v2 = vadd.f32 %v9878_v7, %v6062_v46  ;;  %v6063_v60 = vadd.f32 %v9842_v21, %v5962_v43  ;;  %v10006_v56 = vpop.f32.mrb[140].mxu1  ;;  %v5811_v28 = vrot.slane %v9981_v1, 2 }
 0x342   :  { %v6287_v0 = vmax.f32 %v6267_v37, 0.0  ;;  %v5761_v45 = vadd.f32 %v5709_v53, %v9489_v41  ;;  %v5810_v24 = vsel %vm4411_vm2, %v5807_v51, %v5809_v19  ;;  %v5711_v40 = vsel %vm4284_vm1, %v5708_v4, %v5710_v62  ;;  %v3951_v44 = vpop.f32.mrb[141].mxu1 }
 0x343   :  { %v5926_v52 = vrot.slane %v4245_v13, 3  ;;  %v6131_v20 = vrot.slane %v6087_v2, 2  ;;  %v6192_v16 = vrot.slane %v6087_v2, 4  ;;  %v10012_v11 = vadd.f32 %v9878_v7, %v6063_v60  ;;  %v10014_v21 = vpop.f32.mrb[142].mxu1 }
 0x344   :  { %6307 = vst [vmem:[#allocation2 + $0x18] sm:$0xff] %v6287_v0  ;;  %v5862_v46 = vadd.f32 %v5810_v24, %v5761_v45  ;;  %v5762_v41 = vadd.f32 %v5711_v40, %v9503_v30  ;;  %v5812_v8 = vsel %vm4411_vm2, %v5809_v19, %v5811_v28  ;;  %v6027_v14 = vrot.slane %v4247_v38, 4  ;;  %v10021_v1 = vpop.f32.mrb[143].mxu1 }
 0x345   :  { %v10019_v51 = vsel %vm5328_vm6, %v5924_v61, %v5926_v52  ;;  %v6132_v50 = vsel %vm4411_vm2, %v6129_v9, %v6131_v20  ;;  %v6193_v13 = vsel %vm4473_vm3, %v6190_v33, %v6192_v16  ;;  %v6133_v4 = vrot.slane %v10012_v11, 2 }
 0x346   :  { %v6194_v63 = vrot.slane %v10012_v11, 4  ;;  %v10027_v37 = vpop.f32.mrb[156].mxu0  ;;  %v6248_v43 = vmax.f32 %v6132_v50, %v6193_v13  ;;  %v5963_v30 = vadd.f32 %v9855_v27, %v5862_v46  ;;  %v5863_v53 = vadd.f32 %v5812_v8, %v5762_v41 }
 0x347   :  { %v10031_v61 = vsel %vm4473_vm3, %v6025_v55, %v6027_v14  ;;  %v10033_v38 = vpop.f32.mrb[157].mxu0  ;;  %v6134_v19 = vsel %vm4411_vm2, %v6131_v20, %v6133_v4  ;;  %v5928_v33 = vrot.slane %v9994_v35, 3  ;;  %v6029_v0 = vrot.slane %v10001_v42, 4 }
 0x348   :  { %v6195_v9 = vsel %vm4473_vm3, %v6192_v16, %v6194_v63  ;;  %v10039_v60 = vpop.f32.mrb[158].mxu0  ;;  %v6324_v45 = vld [vmem:[#allocation2] ss:$3 sm:$0xff]  ;;  %v6268_v24 = vmax.f32 %v9961_v3, %v6248_v43  ;;  %v6064_v40 = vadd.f32 %v9858_v34, %v5963_v30  ;;  %v5964_v55 = vadd.f32 %v9867_v39, %v5863_v53 }
 0x349   :  { %v6249_v27 = vmax.f32 %v6134_v19, %v6195_v9  ;;  %v10044_v46 = vpop.f32.mrb[159].mxu0  ;;  %6327 = vst.msk [vmem:[%s10256_s3 + $0x4b] sm:$0xff] %vm4622_vm4, %v6324_v45  ;;  %v10051_v35 = vsel %vm5328_vm6, %v5926_v52, %v5928_v33  ;;  %v10054_v42 = vsel %vm4473_vm3, %v6027_v14, %v6029_v0  ;;  %v5712_v3 = vrot.slane %v10006_v56, 1  ;;  %v10057_v16 = vpop.f32.mrb[144].mxu1 }
 0x34a   :  { %v5813_v20 = vrot.slane %v3951_v44, 2  ;;  %v6288_v34 = vmax.f32 %v6268_v24, 0.0  ;;  %v6089_v41 = vadd.f32 %v9878_v7, %v6064_v40  ;;  %v6065_v8 = vadd.f32 %v9870_v15, %v5964_v55  ;;  %v10061_v50 = vpop.f32.mrb[145].mxu1 }
 0x34b   :  { %v6269_v39 = vmax.f32 %v6087_v2, %v6249_v27  ;;  %v5713_v13 = vsel %vm4284_vm1, %v5710_v62, %v5712_v3  ;;  %v5714_v14 = vrot.slane %v10014_v21, 1  ;;  %v5815_v43 = vrot.slane %v10021_v1, 2  ;;  %v3963_v56 = vpop.f32.mrb[146].mxu1 }
 0x34c   :  { %v5814_v52 = vsel %vm4411_vm2, %v5811_v28, %v5813_v20  ;;  %6308 = vst [vmem:[#allocation2 + $0x20] sm:$0xff] %v6288_v34  ;;  %v6135_v30 = vrot.slane %v6089_v41, 2  ;;  %v6196_v53 = vrot.slane %v6089_v41, 4  ;;  %v10068_v2 = vadd.f32 %v9878_v7, %v6065_v8  ;;  %v10070_v19 = vpop.f32.mrb[147].mxu1 }
 0x34d   :  { %v6289_v44 = vmax.f32 %v6269_v39, 0.0  ;;  %v5763_v15 = vadd.f32 %v5713_v13, %v9514_v59  ;;  %v5715_v62 = vsel %vm4284_vm1, %v5712_v3, %v5714_v14  ;;  %v5816_v28 = vsel %vm4411_vm2, %v5813_v20, %v5815_v43 }
 0x34e   :  { %v5930_v21 = vrot.slane %v10027_v37, 3  ;;  %v6136_v1 = vsel %vm4411_vm2, %v6133_v4, %v6135_v30  ;;  %v6197_v9 = vsel %vm4473_vm3, %v6194_v63, %v6196_v53  ;;  %v6137_v45 = vrot.slane %v10068_v2, 2 }
 0x34f   :  { %6309 = vst [vmem:[#allocation2 + $0x28] sm:$0xff] %v6289_v44  ;;  %v6198_v24 = vrot.slane %v10068_v2, 4  ;;  %v6250_v27 = vmax.f32 %v6136_v1, %v6197_v9  ;;  %v5864_v40 = vadd.f32 %v5814_v52, %v5763_v15  ;;  %v5764_v55 = vadd.f32 %v5715_v62, %v9528_v17 }
 0x350   :  { %v10082_v59 = vsel %vm5328_vm6, %v5928_v33, %v5930_v21  ;;  %v6138_v3 = vsel %vm4411_vm2, %v6135_v30, %v6137_v45  ;;  %v6031_v20 = vrot.slane %v10033_v38, 4  ;;  %v5932_v4 = vrot.slane %v10039_v60, 3 }
 0x351   :  { %v6199_v37 = vsel %vm4473_vm3, %v6196_v53, %v6198_v24  ;;  %v6270_v63 = vmax.f32 %v10012_v11, %v6250_v27  ;;  %v5965_v39 = vadd.f32 %v9889_v48, %v5864_v40  ;;  %v5865_v8 = vadd.f32 %v5816_v28, %v5764_v55  ;;  %v3969_v13 = vpop.f32.mrb[148].mxu1 }
 0x352   :  { %v6251_v34 = vmax.f32 %v6138_v3, %v6199_v37  ;;  %v10091_v17 = vsel %vm4473_vm3, %v6029_v0, %v6031_v20  ;;  %v10096_v33 = vsel %vm5328_vm6, %v5930_v21, %v5932_v4  ;;  %v6033_v52 = vrot.slane %v10044_v46, 4  ;;  %v3971_v38 = vpop.f32.mrb[149].mxu1 }
 0x353   :  { %v6290_v44 = vmax.f32 %v6270_v63, 0.0  ;;  %v6066_v11 = vadd.f32 %v9893_v49, %v5965_v39  ;;  %v5966_v53 = vadd.f32 %v9896_v10, %v5865_v8  ;;  %v3973_v48 = vpop.f32.mrb[150].mxu1  ;;  %v5716_v15 = vrot.slane %v10057_v16, 1 }
 0x354   :  { %v6271_v30 = vmax.f32 %v6089_v41, %v6251_v34  ;;  %v10104_v0 = vsel %vm4473_vm3, %v6031_v20, %v6033_v52  ;;  %v5817_v62 = vrot.slane %v10061_v50, 2  ;;  %v10108_v28 = vpop.f32.mrb[151].mxu1  ;;  %v5718_v10 = vrot.slane %v3963_v56, 1 }
 0x355   :  { %6310 = vst [vmem:[#allocation2 + $0x30] sm:$0xff] %v6290_v44  ;;  %v6091_v41 = vadd.f32 %v9878_v7, %v6066_v11  ;;  %v6067_v49 = vadd.f32 %v9902_v26, %v5966_v53  ;;  %v5717_v9 = vsel %vm4284_vm1, %v5714_v14, %v5716_v15  ;;  %v5819_v50 = vrot.slane %v10070_v19, 2  ;;  %v10304_v44 = vld [vmem:[#allocation15_spill] sm:$0xff] }
 0x356   :  { %v6325_v21 = vld [vmem:[#allocation2 + $0x18] ss:$3 sm:$0xff]  ;;  %v6291_v1 = vmax.f32 %v6271_v30, 0.0  ;;  %v5818_v16 = vsel %vm4411_vm2, %v5815_v43, %v5817_v62  ;;  %v5720_v27 = vrot.slane %v3969_v13, 1  ;;  %v5765_v26 = vadd.f32 %v5717_v9, %v9541_v23 }
 0x357   :  { %6328 = vst.msk [vmem:[%s10256_s3 + $0x53] sm:$0xff] %vm4622_vm4, %v6325_v21  ;;  %v6139_v40 = vrot.slane %v6091_v41, 2  ;;  %v6200_v55 = vrot.slane %v6091_v41, 4  ;;  %v10120_v3 = vadd.f32 %v9878_v7, %v6067_v49  ;;  %v5719_v56 = vsel %vm4284_vm1, %v5716_v15, %v5718_v10  ;;  %v10305_v30 = vld [vmem:[#allocation16_spill] sm:$0xff] }
 0x358   :  { %6311 = vst [vmem:[#allocation2 + $0x38] sm:$0xff] %v6291_v1  ;;  %v5820_v37 = vsel %vm4411_vm2, %v5817_v62, %v5819_v50  ;;  %v5721_v20 = vsel %vm4284_vm1, %v5718_v10, %v5720_v27  ;;  %v5821_v14 = vrot.slane %v3971_v38, 2  ;;  %v5866_v13 = vadd.f32 %v5818_v16, %v5765_v26 }
 0x359   :  { %v6140_v43 = vsel %vm4411_vm2, %v6137_v45, %v6139_v40  ;;  %v6201_v19 = vsel %vm4473_vm3, %v6198_v24, %v6200_v55  ;;  %v6141_v63 = vrot.slane %v10120_v3, 2  ;;  %v6202_v34 = vrot.slane %v10120_v3, 4  ;;  %v3979_v39 = vpop.f32.mrb[152].mxu1 }
 0x35a   :  { %v6252_v8 = vmax.f32 %v6140_v43, %v6201_v19  ;;  %v5766_v23 = vadd.f32 %v5719_v56, %v10304_v44  ;;  %v5767_v11 = vadd.f32 %v5721_v20, %v10305_v30  ;;  %v10132_v53 = vpop.f32.mrb[153].mxu1  ;;  %v5822_v45 = vsel %vm4411_vm2, %v5819_v50, %v5821_v14  ;;  %v10306_v43 = vld [vmem:[#allocation17_spill] sm:$0xff] }
 0x35b   :  { %v6142_v15 = vsel %vm4411_vm2, %v6139_v40, %v6141_v63  ;;  %v6203_v38 = vsel %vm4473_vm3, %v6200_v55, %v6202_v34  ;;  %v5722_v24 = vrot.slane %v3973_v48, 1  ;;  %v10137_v62 = vpop.f32.mrb[154].mxu1  ;;  %v5967_v49 = vadd.f32 %v9919_v12, %v5866_v13 }
 0x35c   :  { %v6272_v21 = vmax.f32 %v10068_v2, %v6252_v8  ;;  %v6253_v1 = vmax.f32 %v6142_v15, %v6203_v38  ;;  %v5867_v10 = vadd.f32 %v5820_v37, %v5766_v23  ;;  %v10141_v9 = vpop.f32.mrb[155].mxu1  ;;  %v5868_v16 = vadd.f32 %v5822_v45, %v5767_v11 }
 0x35d   :  { %v5723_v26 = vsel %vm4284_vm1, %v5720_v27, %v5722_v24  ;;  %v5823_v40 = vrot.slane %v10108_v28, 2  ;;  %v5724_v56 = vrot.slane %v3979_v39, 1  ;;  %v6068_v48 = vadd.f32 %v9933_v25, %v5967_v49  ;;  %v10307_v39 = vld [vmem:[#allocation18_spill] sm:$0xff] }
 0x35e   :  { %v6292_v55 = vmax.f32 %v6272_v21, 0.0  ;;  %v6273_v20 = vmax.f32 %v6091_v41, %v6253_v1  ;;  %v5968_v50 = vadd.f32 %v9947_v6, %v5867_v10  ;;  %v5969_v2 = vadd.f32 %v9974_v58, %v5868_v16 }
 0x35f   :  { %v5768_v19 = vadd.f32 %v5723_v26, %v10306_v43  ;;  %v5824_v12 = vsel %vm4411_vm2, %v5821_v14, %v5823_v40  ;;  %v5725_v37 = vsel %vm4284_vm1, %v5722_v24, %v5724_v56  ;;  %v6093_v27 = vadd.f32 %v9878_v7, %v6068_v48 }
 0x360   :  { %6312 = vst [vmem:[#allocation2 + $0x40] sm:$0xff] %v6292_v55  ;;  %v6293_v8 = vmax.f32 %v6273_v20, 0.0  ;;  %v6069_v28 = vadd.f32 %v9950_v54, %v5968_v50  ;;  %v5769_v41 = vadd.f32 %v5725_v37, %v10307_v39  ;;  %v6070_v25 = vadd.f32 %v9986_v57, %v5969_v2 }
 0x361   :  { %v5869_v13 = vadd.f32 %v5824_v12, %v5768_v19  ;;  %v5825_v6 = vrot.slane %v10132_v53, 2  ;;  %v5726_v58 = vrot.slane %v10137_v62, 1  ;;  %v10157_v44 = vpop.f32.mrb[156].mxu1  ;;  %v6143_v14 = vrot.slane %v6093_v27, 2 }
 0x362   :  { %6313 = vst [vmem:[#allocation2 + $0x48] sm:$0xff] %v6293_v8  ;;  %v6204_v23 = vrot.slane %v6093_v27, 4  ;;  %v6094_v30 = vadd.f32 %v9878_v7, %v6069_v28  ;;  %v5827_v11 = vrot.slane %v10141_v9, 2  ;;  %v10161_v15 = vpop.f32.mrb[157].mxu1  ;;  %v6095_v54 = vadd.f32 %v9878_v7, %v6070_v25 }
 0x363   :  { %v5970_v57 = vadd.f32 %v9989_v47, %v5869_v13  ;;  %v5826_v38 = vsel %vm4411_vm2, %v5823_v40, %v5825_v6  ;;  %v5727_v53 = vsel %vm4284_vm1, %v5724_v56, %v5726_v58  ;;  %v3993_v45 = vpop.f32.mrb[158].mxu1  ;;  %v6144_v24 = vsel %vm4411_vm2, %v6141_v63, %v6143_v14 }
 0x364   :  { %v6205_v62 = vsel %vm4473_vm3, %v6202_v34, %v6204_v23  ;;  %v6145_v21 = vrot.slane %v6094_v30, 2  ;;  %v6206_v1 = vrot.slane %v6094_v30, 4  ;;  %v10169_v49 = vpop.f32.mrb[159].mxu1  ;;  %v6147_v9 = vrot.slane %v6095_v54, 2 }
 0x365   :  { %v6254_v10 = vmax.f32 %v6144_v24, %v6205_v62  ;;  %v6208_v16 = vrot.slane %v6095_v54, 4  ;;  %v6071_v26 = vadd.f32 %v9997_v18, %v5970_v57  ;;  %v5870_v55 = vadd.f32 %v5826_v38, %v5769_v41 }
 0x366   :  { %v6146_v47 = vsel %vm4411_vm2, %v6143_v14, %v6145_v21  ;;  %v6207_v40 = vsel %vm4473_vm3, %v6204_v23, %v6206_v1  ;;  %v5770_v56 = vadd.f32 %v5727_v53, %v9618_v5  ;;  %v6148_v48 = vsel %vm4411_vm2, %v6145_v21, %v6147_v9 }
 0x367   :  { %v6326_v20 = vld [vmem:[#allocation2 + $0x30] ss:$3 sm:$0xff]  ;;  %v6274_v63 = vmax.f32 %v10120_v3, %v6254_v10  ;;  %v6255_v34 = vmax.f32 %v6146_v47, %v6207_v40  ;;  %v6209_v50 = vsel %vm4473_vm3, %v6206_v1, %v6208_v16  ;;  %v6096_v2 = vadd.f32 %v9878_v7, %v6071_v26 }
 0x368   :  { %6329 = vst.msk [vmem:[%s10256_s3 + $0x5b] sm:$0xff] %vm4622_vm4, %v6326_v20  ;;  %v6256_v18 = vmax.f32 %v6148_v48, %v6209_v50  ;;  %v5971_v43 = vadd.f32 %v10019_v51, %v5870_v55  ;;  %v5828_v5 = vsel %vm4411_vm2, %v5825_v6, %v5827_v11  ;;  %v5728_v37 = vrot.slane %v10157_v44, 1 }
 0x369   :  { %v6294_v19 = vmax.f32 %v6274_v63, 0.0  ;;  %v6275_v12 = vmax.f32 %v6093_v27, %v6255_v34  ;;  %v5871_v3 = vadd.f32 %v5828_v5, %v5770_v56  ;;  %v6149_v28 = vrot.slane %v6096_v2, 2 }
 0x36a   :  { %v6276_v8 = vmax.f32 %v6094_v30, %v6256_v18  ;;  %v6210_v39 = vrot.slane %v6096_v2, 4  ;;  %v6072_v41 = vadd.f32 %v10031_v61, %v5971_v43  ;;  %v5729_v14 = vsel %vm4284_vm1, %v5726_v58, %v5728_v37 }
 0x36b   :  { %6314 = vst [vmem:[#allocation2 + $0x50] sm:$0xff] %v6294_v19  ;;  %v6295_v25 = vmax.f32 %v6275_v12, 0.0  ;;  %v5972_v13 = vadd.f32 %v10051_v35, %v5871_v3  ;;  %v5829_v51 = vrot.slane %v10161_v15, 2  ;;  %v6150_v6 = vsel %vm4411_vm2, %v6147_v9, %v6149_v28  ;;  %v10312_v12 = vld [vmem:[#allocation10_spill] sm:$0xff] }
 0x36c   :  { %v6296_v23 = vmax.f32 %v6276_v8, 0.0  ;;  %v6211_v27 = vsel %vm4473_vm3, %v6208_v16, %v6210_v39  ;;  %v6097_v44 = vadd.f32 %v9878_v7, %v6072_v41  ;;  %v5771_v61 = vadd.f32 %v5729_v14, %v9625_v36 }
 0x36d   :  { %6315 = vst [vmem:[#allocation2 + $0x58] sm:$0xff] %v6295_v25  ;;  %v6257_v30 = vmax.f32 %v6150_v6, %v6211_v27  ;;  %v6073_v57 = vadd.f32 %v10054_v42, %v5972_v13  ;;  %v5830_v38 = vsel %vm4411_vm2, %v5827_v11, %v5829_v51  ;;  %v5730_v53 = vrot.slane %v3993_v45, 1 }
 0x36e   :  { %6316 = vst [vmem:[#allocation2 + $0x60] sm:$0xff] %v6296_v23  ;;  %v6151_v35 = vrot.slane %v6097_v44, 2  ;;  %v6212_v58 = vrot.slane %v6097_v44, 4  ;;  %v5831_v15 = vrot.slane %v10169_v49, 2  ;;  %v5872_v21 = vadd.f32 %v5830_v38, %v5771_v61 }
 0x36f   :  { %v6277_v24 = vmax.f32 %v6095_v54, %v6257_v30  ;;  %v6098_v62 = vadd.f32 %v9878_v7, %v6073_v57  ;;  %v5731_v42 = vsel %vm4284_vm1, %v5728_v37, %v5730_v53  ;;  %v10308_v36 = vrot.slane %v9834_v22, 1  ;;  %v10314_v57 = vld [vmem:[#allocation11_spill] sm:$0xff] }
 0x370   :  { %v6152_v1 = vsel %vm4411_vm2, %v6149_v28, %v6151_v35  ;;  %v6213_v10 = vsel %vm4473_vm3, %v6210_v39, %v6212_v58  ;;  %v5973_v49 = vadd.f32 %v10082_v59, %v5872_v21  ;;  %v5772_v54 = vadd.f32 %v5731_v42, %v9643_v32  ;;  %v10310_v32 = vld [vmem:[#allocation9_spill] sm:$0xff] }
 0x371   :  { %v5753_v11 = vsel %vm4284_vm1, %v5730_v53, %v10308_v36  ;;  %v6297_v9 = vmax.f32 %v6277_v24, 0.0  ;;  %v6258_v16 = vmax.f32 %v6152_v1, %v6213_v10  ;;  %v6153_v26 = vrot.slane %v6098_v62, 2 }
 0x372   :  { %v6214_v45 = vrot.slane %v6098_v62, 4  ;;  %v5773_v47 = vadd.f32 %v5753_v11, %v9660_v31  ;;  %v5832_v40 = vsel %vm4411_vm2, %v5829_v51, %v5831_v15  ;;  %v10309_v20 = vrot.slane %v9839_v29, 2 }
 0x373   :  { %6317 = vst [vmem:[#allocation2 + $0x68] sm:$0xff] %v6297_v9  ;;  %v6278_v55 = vmax.f32 %v6096_v2, %v6258_v16  ;;  %v6154_v56 = vsel %vm4411_vm2, %v6151_v35, %v6153_v26  ;;  %v6074_v48 = vadd.f32 %v10091_v17, %v5973_v49  ;;  %v5873_v59 = vadd.f32 %v5832_v40, %v5772_v54 }
 0x374   :  { %v6215_v22 = vsel %vm4473_vm3, %v6212_v58, %v6214_v45  ;;  %v5854_v63 = vsel %vm4411_vm2, %v5831_v15, %v10309_v20  ;;  %v10311_v18 = vrot.slane %v10310_v32, 3  ;;  %v10313_v3 = vrot.slane %v10312_v12, 4 }
 0x375   :  { %v6259_v34 = vmax.f32 %v6154_v56, %v6215_v22  ;;  %v5874_v50 = vadd.f32 %v5854_v63, %v5773_v47  ;;  %v6330_v2 = vld [vmem:[#allocation2 + $0x50] ss:$3 sm:$0xff]  ;;  %v6298_v43 = vmax.f32 %v6278_v55, 0.0  ;;  %v6099_v5 = vadd.f32 %v9878_v7, %v6074_v48 }
 0x376   :  { %v5955_v31 = vsel %vm5328_vm6, %v5932_v4, %v10311_v18  ;;  %6818 = vst.msk [vmem:[%s10256_s3 + $0xb3] sm:$0xff] %vm4622_vm4, %v6330_v2  ;;  %v5974_v17 = vadd.f32 %v10096_v33, %v5873_v59  ;;  %v6056_v60 = vsel %vm4473_vm3, %v6033_v52, %v10313_v3  ;;  %v10315_v61 = vrot.slane %v10314_v57, 2 }
 0x377   :  { %v6279_v29 = vmax.f32 %v6097_v44, %v6259_v34  ;;  %v5975_v19 = vadd.f32 %v5955_v31, %v5874_v50  ;;  %6318 = vst [vmem:[#allocation2 + $0x70] sm:$0xff] %v6298_v43  ;;  %v6155_v37 = vrot.slane %v6099_v5, 2  ;;  %v6216_v8 = vrot.slane %v6099_v5, 4 }
 0x378   :  { %v6075_v28 = vadd.f32 %v10104_v0, %v5974_v17 }
 0x379   :  { %v6299_v4 = vmax.f32 %v6279_v29, 0.0  ;;  %v6076_v39 = vadd.f32 %v6056_v60, %v5975_v19  ;;  %v6156_v41 = vsel %vm4411_vm2, %v6153_v26, %v6155_v37  ;;  %v6217_v25 = vsel %vm4473_vm3, %v6214_v45, %v6216_v8 }
 0x37a   :  { %v6100_v33 = vadd.f32 %v9878_v7, %v6075_v28  ;;  %v6260_v13 = vmax.f32 %v6156_v41, %v6217_v25 }
 0x37b   :  { %6319 = vst [vmem:[#allocation2 + $0x78] sm:$0xff] %v6299_v4  ;;  %v6101_v14 = vadd.f32 %v9878_v7, %v6076_v39  ;;  %v10316_v7 = vrot.slane %v10314_v57, 4 }
 0x37c   :  { %v6157_v46 = vrot.slane %v6100_v33, 2  ;;  %v6218_v51 = vrot.slane %v6100_v33, 4  ;;  %v6280_v52 = vmax.f32 %v6098_v62, %v6260_v13 }
 0x37d   :  { %v6159_v23 = vrot.slane %v6101_v14, 2  ;;  %v6220_v6 = vrot.slane %v6101_v14, 4 }
 0x37e   :  { %v6158_v27 = vsel %vm4411_vm2, %v6155_v37, %v6157_v46  ;;  %v6219_v0 = vsel %vm4473_vm3, %v6216_v8, %v6218_v51  ;;  %v6300_v44 = vmax.f32 %v6280_v52, 0.0 }
 0x37f   :  { %v6160_v30 = vsel %vm4411_vm2, %v6157_v46, %v6159_v23  ;;  %v6182_v38 = vsel %vm4411_vm2, %v6159_v23, %v10315_v61  ;;  %v6221_v35 = vsel %vm4473_vm3, %v6218_v51, %v6220_v6  ;;  %v6243_v58 = vsel %vm4473_vm3, %v6220_v6, %v10316_v7 }
 0x380   :  { %v6261_v53 = vmax.f32 %v6158_v27, %v6219_v0  ;;  %v6262_v15 = vmax.f32 %v6160_v30, %v6221_v35  ;;  %6320 = vst [vmem:[#allocation2 + $0x80] sm:$0xff] %v6300_v44  ;;  %v6263_v62 = vmax.f32 %v6182_v38, %v6243_v58 }
 0x382   :  { %v6331_v24 = vld [vmem:[#allocation2 + $0x68] ss:$3 sm:$0xff]  ;;  %v6281_v21 = vmax.f32 %v6099_v5, %v6261_v53  ;;  %v6282_v1 = vmax.f32 %v6100_v33, %v6262_v15  ;;  %v6283_v10 = vmax.f32 %v6101_v14, %v6263_v62 }
 0x383   :  { %6819 = vst.msk [vmem:[%s10256_s3 + $0xbb] sm:$0xff] %vm4622_vm4, %v6331_v24 }
 0x384   :  { %v6301_v42 = vmax.f32 %v6281_v21, 0.0  ;;  %v6302_v36 = vmax.f32 %v6282_v1, 0.0  ;;  %v6303_v11 = vmax.f32 %v6283_v10, 0.0 }
 0x386   :  { %6321 = vst [vmem:[#allocation2 + $0x88] sm:$0xff] %v6301_v42  ;;  %6322 = vst [vmem:[#allocation2 + $0x90] sm:$0xff] %v6302_v36 }
 0x387   :  { %6323 = vst [vmem:[#allocation2 + $0x98] sm:$0xff] %v6303_v11 }
 0x38d   :  { %v6332_v9 = vld [vmem:[#allocation2 + $0x80] ss:$3 sm:$0xff] }
 0x38e   :  { %6820 = vst.msk [vmem:[%s10256_s3 + $0xc3] sm:$0xff] %vm4622_vm4, %v6332_v9 }
 0x38f   :  { %6340 = vsyncpa [#allocation4], 1 }
 0x390   :  { %6341 = vsyncpa [#allocation6], 1 }

// kernel: forward.3
= control target key start
LH: loop header
LB: loop body
LE: loop exit
PB: predicated region body
PF: predicated region fallthrough
CT: control target
= control target key end

     0   :  { %14 = vsyncpa [#allocation4], 0  ;;  %s7817_s30 = smov 0   ;;  %s8845_s0 = inlined_call_operand.vmem [shape: f32[2,4992], index: 0, kind: input, shape index: {}]   ;;  %s8846_s1 = inlined_call_operand.vmem [shape: bf16[4992,700], index: 1, kind: input, shape index: {}]   ;;  %s8847_s2 = inlined_call_operand.vmem [shape: f32[1,700], index: 2, kind: input, shape index: {}]   ;;  %s8848_s3 = inlined_call_operand.vmem [shape: f32[2,700], index: 3, kind: input, shape index: {}]   ;;  %s8849_s4 = inlined_call_operand.vmem [shape: bf16[700,120], index: 4, kind: input, shape index: {}]   ;;  %s8850_s5 = inlined_call_operand.vmem [shape: f32[1,120], index: 5, kind: input, shape index: {}]   ;;  %s8851_s6 = inlined_call_operand.vmem [shape: f32[2,120], index: 6, kind: input, shape index: {}]   ;;  %s8852_s7 = inlined_call_operand.vmem [shape: f32[120,15], index: 7, kind: input, shape index: {}]   ;;  %s8853_s8 = inlined_call_operand.vmem [shape: f32[1,15], index: 8, kind: input, shape index: {}]   ;;  %s8854_s9 = inlined_call_operand.hbm [shape: f32[2,15], index: 9, kind: output, shape index: {}]  }
   0x1 LB: > { %s7823_s10 = sadd.s32 4294967295, %s7757_s30   ;;  %p5849_p0 = scmp.ge.s32.totalorder %s7757_s30, 1  ;;  %s7757_s30 = sphi %s7817_s30, %s20_s30  }
   0x2   : > { %p296_p1 = scmp.lt.s32.totalorder %s7757_s30, 4 }
   0x4   : > { %p297_p2 = pnand %p5849_p0, %p296_p1 }
   0x5   : > { %s333_s11 = smul.u32 (!%p297_p2), 13, %s7823_s10  ;;  %p5852_p5 = scmp.ne.s32.totalorder (!%p297_p2), %s7823_s10, 0 }
   0x6   : > { %300 = sbr.rel (%p297_p2) target bundleno = 1394 (0x572), region = 56 }
   0x7   : > { %s339_s12 = smul.u32 (!%p297_p2), 208, %s7823_s10  ;;  %p334_p3 = scmp.lt.s32.totalorder (!%p297_p2), %s333_s11, 38 }
   0x9   : > { %p340_p4 = scmp.lt.s32.totalorder (!%p297_p2), %s339_s12, 623 }
   0xd   : > { %s8856_s11 = smov (!%p334_p3, %s333_s11), 38  ;;  %s8858_s12 = smov (!%p340_p4, %s339_s12), 623 }
   0xe   : > { %s5850_s13 = sshll.u32 %s8856_s11, 1  ;;  %s6715_s17 = smul.u32 24, %s8858_s12  ;;  %vm352_vm0 = vcmask (!%p5852_p5), 1041408   ;;  %vm353_vm1 = vcmask (!%p5852_p5), 486402   ;;  %v7759_v0 = vmov (!%p5852_p5), 0.0  }
   0xf   : > { %s7832_s16 = scalar_lea.vmem %s8845_s0, %s5850_s13  ;;  %350 = sbr.rel (%p5852_p5) target bundleno = 22 (0x16), region = 60  ;;  %351 = vst [vmem:[#allocation2] sm:$0xff] (!%p5852_p5), %v7759_v0  ;;  %vm354_vm2 = vmor (!%p5852_p5), %vm353_vm1, %vm352_vm0 }
  0x10   : > { %s7837_s20 = scalar_lea.vmem %s8846_s1, %s6715_s17  ;;  %355 = vst.msk [vmem:[#allocation2 + $0x8] sm:$0xf] (!%p5852_p5), %vm354_vm2, %v7759_v0 }
  0x16 PF: > { %v6738_v1 = vld [vmem:[%s7837_s20 + $0x4] ss:$24 sps:$4 sm:$0xff]   ;;  %v6742_v3 = vld [vmem:[%s7837_s20] ss:$24 sps:$4 sm:$0xff]   ;;  %v6744_v5 = vld [vmem:[%s7837_s20 + $0x34] ss:$24 sps:$4 sm:$0xff]   ;;  %v370_v39 = vlaneseq }
  0x17   : > { %v6740_v2 = vld [vmem:[%s7837_s20 + $0x904] ss:$24 sps:$4 sm:$0xff]   ;;  %4194 = vmatprep.subr.bf16.mxu1 %v6738_v1  ;;  %v6743_v4 = vld [vmem:[%s7837_s20 + $0x900] ss:$24 sps:$4 sm:$0xff]   ;;  %v6746_v6 = vld [vmem:[%s7837_s20 + $0x934] ss:$24 sps:$4 sm:$0xff]  }
  0x18   : > { %4317 = vmatprep.subr.bf16.mxu0 %v6740_v2  ;;  %4195 = vmatpush1.bf16.msra.mxu1 %v6742_v3  ;;  %v6748_v7 = vld [vmem:[%s7837_s20 + $0x30] ss:$24 sps:$4 sm:$0xff]   ;;  %v6750_v9 = vld [vmem:[%s7837_s20 + $0x64] ss:$24 sps:$4 sm:$0xff]   ;;  %v6754_v11 = vld [vmem:[%s7837_s20 + $0x60] ss:$24 sps:$4 sm:$0xff]  }
  0x19   : > { %4318 = vmatpush1.bf16.msra.mxu0 %v6743_v4  ;;  %4196 = vmatprep.subr.bf16.mxu1 %v6744_v5  ;;  %v6749_v8 = vld [vmem:[%s7837_s20 + $0x930] ss:$24 sps:$4 sm:$0xff]   ;;  %v6752_v10 = vld [vmem:[%s7837_s20 + $0x964] ss:$24 sps:$4 sm:$0xff]   ;;  %v6755_v12 = vld [vmem:[%s7837_s20 + $0x960] ss:$24 sps:$4 sm:$0xff]  }
  0x1a   : > { %4319 = vmatprep.subr.bf16.mxu0 %v6746_v6  ;;  %v6756_v13 = vld [vmem:[%s7837_s20 + $0x94] ss:$24 sps:$4 sm:$0xff]   ;;  %v6760_v15 = vld [vmem:[%s7837_s20 + $0x90] ss:$24 sps:$4 sm:$0xff]   ;;  %v6762_v17 = vld [vmem:[%s7837_s20 + $0xc4] ss:$24 sps:$4 sm:$0xff]  }
  0x1b   : > { %v6758_v14 = vld [vmem:[%s7837_s20 + $0x994] ss:$24 sps:$4 sm:$0xff]   ;;  %v6761_v16 = vld [vmem:[%s7837_s20 + $0x990] ss:$24 sps:$4 sm:$0xff]   ;;  %v6764_v18 = vld [vmem:[%s7837_s20 + $0x9c4] ss:$24 sps:$4 sm:$0xff]  }
  0x1c   : > { %4197 = vmatpush1.bf16.msra.mxu1 %v6748_v7  ;;  %v6766_v19 = vld [vmem:[%s7837_s20 + $0xc0] ss:$24 sps:$4 sm:$0xff]   ;;  %v6768_v21 = vld [vmem:[%s7837_s20 + $0xf4] ss:$24 sps:$4 sm:$0xff]   ;;  %v6772_v23 = vld [vmem:[%s7837_s20 + $0xf0] ss:$24 sps:$4 sm:$0xff]  }
  0x1d   : > { %4320 = vmatpush1.bf16.msra.mxu0 %v6749_v8  ;;  %4198 = vmatprep.subr.bf16.mxu1 %v6750_v9  ;;  %v6767_v20 = vld [vmem:[%s7837_s20 + $0x9c0] ss:$24 sps:$4 sm:$0xff]   ;;  %v6770_v22 = vld [vmem:[%s7837_s20 + $0x9f4] ss:$24 sps:$4 sm:$0xff]   ;;  %v6773_v24 = vld [vmem:[%s7837_s20 + $0x9f0] ss:$24 sps:$4 sm:$0xff]  }
  0x1e   : > { %4321 = vmatprep.subr.bf16.mxu0 %v6752_v10  ;;  %v6774_v25 = vld [vmem:[%s7837_s20 + $0x124] ss:$24 sps:$4 sm:$0xff]   ;;  %v6778_v27 = vld [vmem:[%s7837_s20 + $0x120] ss:$24 sps:$4 sm:$0xff]   ;;  %v6780_v29 = vld [vmem:[%s7837_s20 + $0x154] ss:$24 sps:$4 sm:$0xff]  }
  0x1f   : > { %v6776_v26 = vld [vmem:[%s7837_s20 + $0xa24] ss:$24 sps:$4 sm:$0xff]   ;;  %v6779_v28 = vld [vmem:[%s7837_s20 + $0xa20] ss:$24 sps:$4 sm:$0xff]   ;;  %v6782_v30 = vld [vmem:[%s7837_s20 + $0xa54] ss:$24 sps:$4 sm:$0xff]  }
  0x20   : > { %4199 = vmatpush1.bf16.msra.mxu1 %v6754_v11  ;;  %v6784_v31 = vld [vmem:[%s7837_s20 + $0x150] ss:$24 sps:$4 sm:$0xff]   ;;  %v6786_v33 = vld [vmem:[%s7837_s20 + $0x184] ss:$24 sps:$4 sm:$0xff]   ;;  %v6790_v35 = vld [vmem:[%s7837_s20 + $0x180] ss:$24 sps:$4 sm:$0xff]  }
  0x21   : > { %4322 = vmatpush1.bf16.msra.mxu0 %v6755_v12  ;;  %4200 = vmatprep.subr.bf16.mxu1 %v6756_v13  ;;  %v6785_v32 = vld [vmem:[%s7837_s20 + $0xa50] ss:$24 sps:$4 sm:$0xff]   ;;  %v6788_v34 = vld [vmem:[%s7837_s20 + $0xa84] ss:$24 sps:$4 sm:$0xff]   ;;  %v6791_v36 = vld [vmem:[%s7837_s20 + $0xa80] ss:$24 sps:$4 sm:$0xff]  }
  0x22   : > { %4323 = vmatprep.subr.bf16.mxu0 %v6758_v14  ;;  %v7760_v37 = vmov 1983009808   ;;  %v6792_v40 = vld [vmem:[%s7837_s20 + $0x1b4] ss:$24 sps:$4 sm:$0xff]   ;;  %v6796_v42 = vld [vmem:[%s7837_s20 + $0x1b0] ss:$24 sps:$4 sm:$0xff]  }
  0x23   : > { %v368_v38 = vunpack.c.l.s4 %v7760_v37  ;;  %v6794_v41 = vld [vmem:[%s7837_s20 + $0xab4] ss:$24 sps:$4 sm:$0xff]   ;;  %v7879_v44 = vshrl.u32 %v370_v39, 7  ;;  %v6797_v45 = vld [vmem:[%s7837_s20 + $0xab0] ss:$24 sps:$4 sm:$0xff]   ;;  %v358_v53 = vld [vmem:[%s7832_s16] sm:$0xff] }
  0x24   : > { %4201 = vmatpush1.bf16.msra.mxu1 %v6760_v15  ;;  %v6798_v46 = vld [vmem:[%s7837_s20 + $0x1e4] ss:$24 sps:$4 sm:$0xff]   ;;  %v6802_v48 = vld [vmem:[%s7837_s20 + $0x1e0] ss:$24 sps:$4 sm:$0xff]   ;;  %v6804_v51 = vld [vmem:[%s7837_s20 + $0x214] ss:$24 sps:$4 sm:$0xff]   ;;  %v366_v10 = vcombine.high %v358_v53, %v358_v53 }
  0x25   : > { %4324 = vmatpush1.bf16.msra.mxu0 %v6761_v16  ;;  %4202 = vmatprep.subr.bf16.mxu1 %v6762_v17  ;;  %v369_v43 = vunpack.c.0.s8 %v368_v38  ;;  %v6800_v47 = vld [vmem:[%s7837_s20 + $0xae4] ss:$24 sps:$4 sm:$0xff]   ;;  %v6803_v49 = vld [vmem:[%s7837_s20 + $0xae0] ss:$24 sps:$4 sm:$0xff]   ;;  %v6806_v52 = vld [vmem:[%s7837_s20 + $0xb14] ss:$24 sps:$4 sm:$0xff]  }
  0x26   : > { %4325 = vmatprep.subr.bf16.mxu0 %v6764_v18  ;;  %v6808_v54 = vld [vmem:[%s7837_s20 + $0x210] ss:$24 sps:$4 sm:$0xff]   ;;  %v6810_v58 = vld [vmem:[%s7837_s20 + $0x244] ss:$24 sps:$4 sm:$0xff]   ;;  %v6814_v0 = vld [vmem:[%s7837_s20 + $0x240] ss:$24 sps:$4 sm:$0xff]  }
  0x27   : > { %v7887_v50 = vsub.s32 %v369_v43, %v7879_v44  ;;  %v6809_v56 = vld [vmem:[%s7837_s20 + $0xb10] ss:$24 sps:$4 sm:$0xff]   ;;  %v6812_v59 = vld [vmem:[%s7837_s20 + $0xb44] ss:$24 sps:$4 sm:$0xff]   ;;  %v6815_v1 = vld [vmem:[%s7837_s20 + $0xb40] ss:$24 sps:$4 sm:$0xff]  }
  0x28   : > { %4203 = vmatpush1.bf16.msra.mxu1 %v6766_v19  ;;  %v7896_v57 = vld [vmem:[%s7832_s16 + $0x8] sm:$0xff]  ;;  %v6822_v8 = vld [vmem:[%s7837_s20 + $0x2a4] ss:$24 sps:$4 sm:$0xff]   ;;  %v6826_v11 = vld [vmem:[%s7837_s20 + $0x2a0] ss:$24 sps:$4 sm:$0xff]   ;;  %vm5091_vm3 = vcmask 1041408  }
  0x29   : > { %4326 = vmatpush1.bf16.msra.mxu0 %v6767_v20  ;;  %4204 = vmatprep.subr.bf16.mxu1 %v6768_v21  ;;  %v373_v55 = vrot.slane %v358_v53, %v7887_v50  ;;  %v383_v61 = vcombine.high %v7896_v57, %v7896_v57  ;;  %v6816_v2 = vld [vmem:[%s7837_s20 + $0x274] ss:$24 sps:$4 sm:$0xff]   ;;  %v6820_v6 = vld [vmem:[%s7837_s20 + $0x270] ss:$24 sps:$4 sm:$0xff]   ;;  %v6824_v9 = vld [vmem:[%s7837_s20 + $0xba4] ss:$24 sps:$4 sm:$0xff]   ;;  %v7922_v15 = vrot.slane %v366_v10, %v7887_v50 }
  0x2a   : > { %4327 = vmatprep.subr.bf16.mxu0 %v6770_v22  ;;  %v6818_v3 = vld [vmem:[%s7837_s20 + $0xb74] ss:$24 sps:$4 sm:$0xff]   ;;  %v6821_v7 = vld [vmem:[%s7837_s20 + $0xb70] ss:$24 sps:$4 sm:$0xff]   ;;  %v6827_v12 = vld [vmem:[%s7837_s20 + $0xba0] ss:$24 sps:$4 sm:$0xff]  }
  0x2b   : > { %v381_v60 = vcombine.high %v373_v55, %v373_v55  ;;  %v397_v63 = vrot.slane %v383_v61, %v7887_v50  ;;  %v6828_v13 = vld [vmem:[%s7837_s20 + $0x2d4] ss:$24 sps:$4 sm:$0xff]   ;;  %v6832_v16 = vld [vmem:[%s7837_s20 + $0x2d0] ss:$24 sps:$4 sm:$0xff]   ;;  %v6836_v18 = vld [vmem:[%s7837_s20 + $0x304] ss:$24 sps:$4 sm:$0xff]   ;;  %v382_v20 = vcombine.high %v7922_v15, %v7922_v15  ;;  %v7930_v21 = vpack.c.bf16 %v373_v55, %v373_v55 }
  0x2c   : > { %4205 = vmatpush1.bf16.msra.mxu1 %v6772_v23  ;;  %v6830_v14 = vld [vmem:[%s7837_s20 + $0xbd4] ss:$24 sps:$4 sm:$0xff]   ;;  %v6833_v17 = vld [vmem:[%s7837_s20 + $0xbd0] ss:$24 sps:$4 sm:$0xff]   ;;  %v6840_v19 = vld [vmem:[%s7837_s20 + $0xc04] ss:$24 sps:$4 sm:$0xff]  }
  0x2d   : > { %4328 = vmatpush1.bf16.msra.mxu0 %v6773_v24  ;;  %4206 = vmatprep.subr.bf16.mxu1 %v6774_v25  ;;  %v7902_v62 = vpack.c.bf16 %v381_v60, %v381_v60  ;;  %v399_v4 = vcombine.high %v397_v63, %v397_v63  ;;  %v7932_v22 = vpack.c.bf16 %v397_v63, %v397_v63  ;;  %v6834_v23 = vld [vmem:[%s7837_s20 + $0x300] ss:$24 sps:$4 sm:$0xff]   ;;  %v6843_v25 = vld [vmem:[%s7837_s20 + $0x334] ss:$24 sps:$4 sm:$0xff]   ;;  %v6856_v37 = vld [vmem:[%s7837_s20 + $0xc90] ss:$24 sps:$4 sm:$0xff]  }
  0x2e   : > { %4329 = vmatprep.subr.bf16.mxu0 %v6776_v26  ;;  %v6838_v24 = vld [vmem:[%s7837_s20 + $0xc00] ss:$24 sps:$4 sm:$0xff]   ;;  %v6846_v26 = vld [vmem:[%s7837_s20 + $0xc34] ss:$24 sps:$4 sm:$0xff]   ;;  %v6861_v38 = vld [vmem:[%s7837_s20 + $0x3c4] ss:$24 sps:$4 sm:$0xff]  }
  0x2f   : > { %4226 = vmatprep.mubr.bf16.mxu1 %v7902_v62  ;;  %v7910_v5 = vpack.c.bf16 %v399_v4, %v399_v4  ;;  %v6864_v39 = vld [vmem:[%s7837_s20 + $0xcc4] ss:$24 sps:$4 sm:$0xff]   ;;  %v6870_v43 = vld [vmem:[%s7837_s20 + $0xcf4] ss:$24 sps:$4 sm:$0xff]   ;;  %v6889_v4 = vld [vmem:[%s7837_s20 + $0x4b0] ss:$24 sps:$4 sm:$0xff]  }
  0x30   : > { %4207 = vmatpush1.bf16.msra.mxu1 %v6778_v27  ;;  %v7938_v27 = vpack.c.bf16 %v382_v20, %v382_v20  ;;  %v6879_v53 = vld [vmem:[%s7837_s20 + $0x454] ss:$24 sps:$4 sm:$0xff]   ;;  %v6885_v60 = vld [vmem:[%s7837_s20 + $0x484] ss:$24 sps:$4 sm:$0xff]   ;;  %v6898_v10 = vld [vmem:[%s7837_s20 + $0xde0] ss:$24 sps:$4 sm:$0xff]  }
  0x31   : > { %4330 = vmatpush1.bf16.msra.mxu0 %v6779_v28  ;;  %4208 = vmatprep.subr.bf16.mxu1 %v6780_v29  ;;  %v6841_v28 = vld [vmem:[%s7837_s20 + $0x330] ss:$24 sps:$4 sm:$0xff]   ;;  %v6882_v55 = vld [vmem:[%s7837_s20 + $0xd54] ss:$24 sps:$4 sm:$0xff]   ;;  %v6888_v63 = vld [vmem:[%s7837_s20 + $0xd84] ss:$24 sps:$4 sm:$0xff]  }
  0x32   : > { %4331 = vmatprep.subr.bf16.mxu0 %v6782_v30  ;;  %4349 = vmatprep.mubr.bf16.mxu0 %v7910_v5  ;;  %v6844_v29 = vld [vmem:[%s7837_s20 + $0xc30] ss:$24 sps:$4 sm:$0xff]   ;;  %v6849_v30 = vld [vmem:[%s7837_s20 + $0x364] ss:$24 sps:$4 sm:$0xff]   ;;  %v6915_v20 = vld [vmem:[%s7837_s20 + $0x574] ss:$24 sps:$4 sm:$0xff]  }
  0x33   : > { %vm5092_vm4 = vcmask 486402   ;;  %p6478_p6 = scmp.ne.s32.totalorder %s7823_s10, 2 }
  0x34   : > { %4209 = vmatpush1.bf16.msra.mxu1 %v6784_v31  ;;  %v6852_v31 = vld [vmem:[%s7837_s20 + $0xc64] ss:$24 sps:$4 sm:$0xff]   ;;  %vm5093_vm5 = vmor %vm5092_vm4, %vm5091_vm3  ;;  %vm5559_vm6 = vcmask (!%p6478_p6), 490496   ;;  %vm5563_vm7 = vcmask (!%p6478_p6), 1045504   ;;  %vm7765_vm8 = vmmov (!%p6478_p6), 0   ;;  %vm5712_vm9 = vcmask (!%p6478_p6), 982016  }
  0x35   : > { %4332 = vmatpush1.bf16.msra.mxu0 %v6785_v32  ;;  %4210 = vmatprep.subr.bf16.mxu1 %v6786_v33  ;;  %v6847_v32 = vld [vmem:[%s7837_s20 + $0x360] ss:$24 sps:$4 sm:$0xff]   ;;  %vm5786_vm10 = vcmask (!%p6478_p6), 115712  }
  0x36   : > { %4333 = vmatprep.subr.bf16.mxu0 %v6788_v34  ;;  %v6850_v33 = vld [vmem:[%s7837_s20 + $0xc60] ss:$24 sps:$4 sm:$0xff]   ;;  %v6855_v34 = vld [vmem:[%s7837_s20 + $0x394] ss:$24 sps:$4 sm:$0xff]  }
  0x38   : > { %4211 = vmatpush1.bf16.msra.mxu1 %v6790_v35  ;;  %v6858_v35 = vld [vmem:[%s7837_s20 + $0xc94] ss:$24 sps:$4 sm:$0xff]  }
  0x39   : > { %4334 = vmatpush1.bf16.msra.mxu0 %v6791_v36  ;;  %4212 = vmatprep.subr.bf16.mxu1 %v6792_v40  ;;  %v6853_v36 = vld [vmem:[%s7837_s20 + $0x390] ss:$24 sps:$4 sm:$0xff]   ;;  %v6859_v40 = vld [vmem:[%s7837_s20 + $0x3c0] ss:$24 sps:$4 sm:$0xff]  }
  0x3a   : > { %4335 = vmatprep.subr.bf16.mxu0 %v6794_v41  ;;  %v6862_v41 = vld [vmem:[%s7837_s20 + $0xcc0] ss:$24 sps:$4 sm:$0xff]  }
  0x3c   : > { %4213 = vmatpush1.bf16.msra.mxu1 %v6796_v42  ;;  %v6867_v42 = vld [vmem:[%s7837_s20 + $0x3f4] ss:$24 sps:$4 sm:$0xff]  }
  0x3d   : > { %4336 = vmatpush1.bf16.msra.mxu0 %v6797_v45  ;;  %4214 = vmatprep.subr.bf16.mxu1 %v6798_v46  ;;  %v6865_v45 = vld [vmem:[%s7837_s20 + $0x3f0] ss:$24 sps:$4 sm:$0xff]  }
  0x3e   : > { %4337 = vmatprep.subr.bf16.mxu0 %v6800_v47  ;;  %v6868_v46 = vld [vmem:[%s7837_s20 + $0xcf0] ss:$24 sps:$4 sm:$0xff]   ;;  %v6873_v47 = vld [vmem:[%s7837_s20 + $0x424] ss:$24 sps:$4 sm:$0xff]  }
  0x40   : > { %4215 = vmatpush1.bf16.msra.mxu1 %v6802_v48  ;;  %v6876_v48 = vld [vmem:[%s7837_s20 + $0xd24] ss:$24 sps:$4 sm:$0xff]  }
  0x41   : > { %4338 = vmatpush1.bf16.msra.mxu0 %v6803_v49  ;;  %4216 = vmatprep.subr.bf16.mxu1 %v6804_v51  ;;  %v6871_v49 = vld [vmem:[%s7837_s20 + $0x420] ss:$24 sps:$4 sm:$0xff]   ;;  %v7965_v51 = vld [vmem:[%s7832_s16 + $0x10] sm:$0xff] }
  0x42   : > { %4339 = vmatprep.subr.bf16.mxu0 %v6806_v52  ;;  %v6874_v52 = vld [vmem:[%s7837_s20 + $0xd20] ss:$24 sps:$4 sm:$0xff]  }
  0x44   : > { %4217 = vmatpush1.bf16.msra.mxu1 %v6808_v54  ;;  %v7971_v54 = vrot.slane %v7965_v51, %v7887_v50 }
  0x45   : > { %4340 = vmatpush1.bf16.msra.mxu0 %v6809_v56  ;;  %4218 = vmatprep.subr.bf16.mxu1 %v6810_v58  ;;  %v6877_v58 = vld [vmem:[%s7837_s20 + $0x450] ss:$24 sps:$4 sm:$0xff]  }
  0x46   : > { %4341 = vmatprep.subr.bf16.mxu0 %v6812_v59  ;;  %v415_v56 = vcombine.high %v7971_v54, %v7971_v54  ;;  %v6880_v59 = vld [vmem:[%s7837_s20 + $0xd50] ss:$24 sps:$4 sm:$0xff]  }
  0x48   : > { %4219 = vmatpush1.bf16.msra.mxu1 %v6814_v0  ;;  %v7979_v61 = vpack.c.bf16 %v415_v56, %v415_v56  ;;  %v6883_v0 = vld [vmem:[%s7837_s20 + $0x480] ss:$24 sps:$4 sm:$0xff]   ;;  %v6952_v56 = vld [vmem:[%s7837_s20 + $0x694] ss:$24 sps:$4 sm:$0xff]  }
  0x49   : > { %4342 = vmatpush1.bf16.msra.mxu0 %v6815_v1  ;;  %4220 = vmatprep.subr.bf16.mxu1 %v6816_v2  ;;  %v6886_v1 = vld [vmem:[%s7837_s20 + $0xd80] ss:$24 sps:$4 sm:$0xff]   ;;  %v6891_v2 = vld [vmem:[%s7837_s20 + $0x4b4] ss:$24 sps:$4 sm:$0xff]  }
  0x4a   : > { %4343 = vmatprep.subr.bf16.mxu0 %v6818_v3  ;;  %v6894_v3 = vld [vmem:[%s7837_s20 + $0xdb4] ss:$24 sps:$4 sm:$0xff]  }
  0x4c   : > { %4221 = vmatpush1.bf16.msra.mxu1 %v6820_v6  ;;  %v6892_v6 = vld [vmem:[%s7837_s20 + $0xdb0] ss:$24 sps:$4 sm:$0xff]  }
  0x4d   : > { %4344 = vmatpush1.bf16.msra.mxu0 %v6821_v7  ;;  %4222 = vmatprep.subr.bf16.mxu1 %v6822_v8  ;;  %v6897_v7 = vld [vmem:[%s7837_s20 + $0x4e4] ss:$24 sps:$4 sm:$0xff]  }
  0x4e   : > { %4345 = vmatprep.subr.bf16.mxu0 %v6824_v9  ;;  %v6900_v8 = vld [vmem:[%s7837_s20 + $0xde4] ss:$24 sps:$4 sm:$0xff]   ;;  %v6895_v9 = vld [vmem:[%s7837_s20 + $0x4e0] ss:$24 sps:$4 sm:$0xff]  }
  0x50   : > { %4223 = vmatpush1.bf16.msra.mxu1 %v6826_v11  ;;  %v6903_v11 = vld [vmem:[%s7837_s20 + $0x514] ss:$24 sps:$4 sm:$0xff]  }
  0x51   : > { %4346 = vmatpush1.bf16.msra.mxu0 %v6827_v12  ;;  %4224 = vmatprep.subr.bf16.mxu1 %v6828_v13  ;;  %v6906_v12 = vld [vmem:[%s7837_s20 + $0xe14] ss:$24 sps:$4 sm:$0xff]   ;;  %v6901_v13 = vld [vmem:[%s7837_s20 + $0x510] ss:$24 sps:$4 sm:$0xff]  }
  0x52   : > { %4347 = vmatprep.subr.bf16.mxu0 %v6830_v14  ;;  %v6904_v14 = vld [vmem:[%s7837_s20 + $0xe10] ss:$24 sps:$4 sm:$0xff]  }
  0x54   : > { %4225 = vmatpush1.bf16.msra.mxu1 %v6832_v16  ;;  %v6909_v16 = vld [vmem:[%s7837_s20 + $0x544] ss:$24 sps:$4 sm:$0xff]  }
  0x55   : > { %4348 = vmatpush1.bf16.msra.mxu0 %v6833_v17  ;;  %4235 = vmatprep.subr.bf16.mxu1 %v6836_v18  ;;  %v6912_v17 = vld [vmem:[%s7837_s20 + $0xe44] ss:$24 sps:$4 sm:$0xff]   ;;  %v6907_v18 = vld [vmem:[%s7837_s20 + $0x540] ss:$24 sps:$4 sm:$0xff]  }
  0x56   : > { %4358 = vmatprep.subr.bf16.mxu0 %v6840_v19  ;;  %v6910_v19 = vld [vmem:[%s7837_s20 + $0xe40] ss:$24 sps:$4 sm:$0xff]  }
  0x57   : > { %4227 = vmatmul.mubr.bf16.vlgmr.msra.gmra.mrb[0].mxu1 %v7930_v21 }
  0x58   : > { %4350 = vmatmul.mubr.bf16.vlgmr.msra.gmra.mrb[0].mxu0 %v7932_v22  ;;  %4236 = vmatpush1.bf16.msra.mxu1 %v6834_v23  ;;  %v6918_v23 = vld [vmem:[%s7837_s20 + $0xe74] ss:$24 sps:$4 sm:$0xff]  }
  0x59   : > { %4359 = vmatpush1.bf16.msra.mxu0 %v6838_v24  ;;  %4237 = vmatprep.subr.bf16.mxu1 %v6843_v25  ;;  %v6913_v24 = vld [vmem:[%s7837_s20 + $0x570] ss:$24 sps:$4 sm:$0xff]  }
  0x5a   : > { %4360 = vmatprep.subr.bf16.mxu0 %v6846_v26  ;;  %4267 = vmatprep.mubr.bf16.mxu1 %v7938_v27  ;;  %v6916_v25 = vld [vmem:[%s7837_s20 + $0xe70] ss:$24 sps:$4 sm:$0xff]   ;;  %v6921_v26 = vld [vmem:[%s7837_s20 + $0x5a4] ss:$24 sps:$4 sm:$0xff]  }
  0x5b   : > { %4390 = vmatprep.mubr.bf16.mxu0 %v7979_v61 }
  0x5c   : > { %4238 = vmatpush1.bf16.msra.mxu1 %v6841_v28  ;;  %v6924_v28 = vld [vmem:[%s7837_s20 + $0xea4] ss:$24 sps:$4 sm:$0xff]  }
  0x5d   : > { %4361 = vmatpush1.bf16.msra.mxu0 %v6844_v29  ;;  %4239 = vmatprep.subr.bf16.mxu1 %v6849_v30  ;;  %v400_v29 = vcombine.high %v7965_v51, %v7965_v51  ;;  %v6919_v30 = vld [vmem:[%s7837_s20 + $0x5a0] ss:$24 sps:$4 sm:$0xff]   ;;  %v6941_v51 = vld [vmem:[%s7837_s20 + $0xf30] ss:$24 sps:$4 sm:$0xff]  }
  0x5e   : > { %4362 = vmatprep.subr.bf16.mxu0 %v6852_v31  ;;  %v6922_v31 = vld [vmem:[%s7837_s20 + $0xea0] ss:$24 sps:$4 sm:$0xff]  }
  0x60   : > { %4240 = vmatpush1.bf16.msra.mxu1 %v6847_v32  ;;  %v6927_v32 = vld [vmem:[%s7837_s20 + $0x5d4] ss:$24 sps:$4 sm:$0xff]  }
  0x61   : > { %4363 = vmatpush1.bf16.msra.mxu0 %v6850_v33  ;;  %4241 = vmatprep.subr.bf16.mxu1 %v6855_v34  ;;  %v6930_v33 = vld [vmem:[%s7837_s20 + $0xed4] ss:$24 sps:$4 sm:$0xff]   ;;  %v8015_v34 = vrot.slane %v7896_v57, %v7887_v50 }
  0x62   : > { %4364 = vmatprep.subr.bf16.mxu0 %v6858_v35  ;;  %v8018_v35 = vrot.slane %v400_v29, %v7887_v50  ;;  %v6997_v29 = vld [vmem:[%s7837_s20 + $0x10e4] ss:$24 sps:$4 sm:$0xff]  }
  0x64   : > { %4242 = vmatpush1.bf16.msra.mxu1 %v6853_v36  ;;  %v6925_v36 = vld [vmem:[%s7837_s20 + $0x5d0] ss:$24 sps:$4 sm:$0xff]   ;;  %v416_v57 = vcombine.high %v8018_v35, %v8018_v35 }
  0x65   : > { %4365 = vmatpush1.bf16.msra.mxu0 %v6856_v37  ;;  %4243 = vmatprep.subr.bf16.mxu1 %v6861_v38  ;;  %v6928_v37 = vld [vmem:[%s7837_s20 + $0xed0] ss:$24 sps:$4 sm:$0xff]   ;;  %v6934_v38 = vld [vmem:[%s7837_s20 + $0x604] ss:$24 sps:$4 sm:$0xff]  }
  0x66   : > { %4366 = vmatprep.subr.bf16.mxu0 %v6864_v39  ;;  %v6937_v39 = vld [vmem:[%s7837_s20 + $0xf04] ss:$24 sps:$4 sm:$0xff]  }
  0x68   : > { %4244 = vmatpush1.bf16.msra.mxu1 %v6859_v40  ;;  %v398_v40 = vcombine.high %v8015_v34, %v8015_v34 }
  0x69   : > { %4367 = vmatpush1.bf16.msra.mxu0 %v6862_v41  ;;  %4245 = vmatprep.subr.bf16.mxu1 %v6867_v42  ;;  %v6932_v41 = vld [vmem:[%s7837_s20 + $0x600] ss:$24 sps:$4 sm:$0xff]   ;;  %v8031_v42 = vpack.c.bf16 %v7922_v15, %v7922_v15  ;;  %v6938_v15 = vld [vmem:[%s7837_s20 + $0x630] ss:$24 sps:$4 sm:$0xff]  }
  0x6a   : > { %4368 = vmatprep.subr.bf16.mxu0 %v6870_v43  ;;  %v8035_v43 = vpack.c.bf16 %v7971_v54, %v7971_v54  ;;  %v6944_v54 = vld [vmem:[%s7837_s20 + $0x660] ss:$24 sps:$4 sm:$0xff]  }
  0x6c   : > { %4246 = vmatpush1.bf16.msra.mxu1 %v6865_v45  ;;  %v6935_v45 = vld [vmem:[%s7837_s20 + $0xf00] ss:$24 sps:$4 sm:$0xff]  }
  0x6d   : > { %4369 = vmatpush1.bf16.msra.mxu0 %v6868_v46  ;;  %4247 = vmatprep.subr.bf16.mxu1 %v6873_v47  ;;  %v6940_v46 = vld [vmem:[%s7837_s20 + $0x634] ss:$24 sps:$4 sm:$0xff]  }
  0x6e   : > { %4370 = vmatprep.subr.bf16.mxu0 %v6876_v48  ;;  %v6943_v47 = vld [vmem:[%s7837_s20 + $0xf34] ss:$24 sps:$4 sm:$0xff]   ;;  %v8040_v48 = vpack.c.bf16 %v398_v40, %v398_v40  ;;  %v7004_v40 = vld [vmem:[%s7837_s20 + $0x840] ss:$24 sps:$4 sm:$0xff]  }
  0x70   : > { %4248 = vmatpush1.bf16.msra.mxu1 %v6871_v49  ;;  %v8042_v49 = vpack.c.bf16 %v416_v57, %v416_v57  ;;  %v7007_v57 = vld [vmem:[%s7837_s20 + $0x1140] ss:$24 sps:$4 sm:$0xff]  }
  0x71   : > { %4371 = vmatpush1.bf16.msra.mxu0 %v6874_v52  ;;  %4249 = vmatprep.subr.bf16.mxu1 %v6879_v53  ;;  %v6946_v52 = vld [vmem:[%s7837_s20 + $0x664] ss:$24 sps:$4 sm:$0xff]  }
  0x72   : > { %4372 = vmatprep.subr.bf16.mxu0 %v6882_v55  ;;  %v6949_v53 = vld [vmem:[%s7837_s20 + $0xf64] ss:$24 sps:$4 sm:$0xff]   ;;  %v6947_v55 = vld [vmem:[%s7837_s20 + $0xf60] ss:$24 sps:$4 sm:$0xff]  }
  0x74   : > { %4250 = vmatpush1.bf16.msra.mxu1 %v6877_v58  ;;  %v6955_v58 = vld [vmem:[%s7837_s20 + $0xf94] ss:$24 sps:$4 sm:$0xff]  }
  0x75   : > { %4373 = vmatpush1.bf16.msra.mxu0 %v6880_v59  ;;  %4251 = vmatprep.subr.bf16.mxu1 %v6885_v60  ;;  %v6950_v59 = vld [vmem:[%s7837_s20 + $0x690] ss:$24 sps:$4 sm:$0xff]  }
  0x76   : > { %4374 = vmatprep.subr.bf16.mxu0 %v6888_v63  ;;  %v6953_v60 = vld [vmem:[%s7837_s20 + $0xf90] ss:$24 sps:$4 sm:$0xff]   ;;  %v6958_v63 = vld [vmem:[%s7837_s20 + $0x6c4] ss:$24 sps:$4 sm:$0xff]  }
  0x78   : > { %4252 = vmatpush1.bf16.msra.mxu1 %v6883_v0  ;;  %v6961_v0 = vld [vmem:[%s7837_s20 + $0xfc4] ss:$24 sps:$4 sm:$0xff]  }
  0x79   : > { %4375 = vmatpush1.bf16.msra.mxu0 %v6886_v1  ;;  %4253 = vmatprep.subr.bf16.mxu1 %v6891_v2  ;;  %v6956_v1 = vld [vmem:[%s7837_s20 + $0x6c0] ss:$24 sps:$4 sm:$0xff]  }
  0x7a   : > { %4376 = vmatprep.subr.bf16.mxu0 %v6894_v3  ;;  %v6959_v2 = vld [vmem:[%s7837_s20 + $0xfc0] ss:$24 sps:$4 sm:$0xff]   ;;  %v6964_v3 = vld [vmem:[%s7837_s20 + $0x6f4] ss:$24 sps:$4 sm:$0xff]  }
  0x7c   : > { %4254 = vmatpush1.bf16.msra.mxu1 %v6889_v4  ;;  %v6967_v4 = vld [vmem:[%s7837_s20 + $0xff4] ss:$24 sps:$4 sm:$0xff]  }
  0x7d   : > { %4377 = vmatpush1.bf16.msra.mxu0 %v6892_v6  ;;  %4255 = vmatprep.subr.bf16.mxu1 %v6897_v7  ;;  %v6962_v6 = vld [vmem:[%s7837_s20 + $0x6f0] ss:$24 sps:$4 sm:$0xff]  }
  0x7e   : > { %4378 = vmatprep.subr.bf16.mxu0 %v6900_v8  ;;  %v6965_v7 = vld [vmem:[%s7837_s20 + $0xff0] ss:$24 sps:$4 sm:$0xff]   ;;  %v6970_v8 = vld [vmem:[%s7837_s20 + $0x724] ss:$24 sps:$4 sm:$0xff]  }
  0x80   : > { %4256 = vmatpush1.bf16.msra.mxu1 %v6895_v9  ;;  %v6973_v9 = vld [vmem:[%s7837_s20 + $0x1024] ss:$24 sps:$4 sm:$0xff]  }
  0x81   : > { %4379 = vmatpush1.bf16.msra.mxu0 %v6898_v10  ;;  %4257 = vmatprep.subr.bf16.mxu1 %v6903_v11  ;;  %v6968_v10 = vld [vmem:[%s7837_s20 + $0x720] ss:$24 sps:$4 sm:$0xff]  }
  0x82   : > { %4380 = vmatprep.subr.bf16.mxu0 %v6906_v12  ;;  %v6971_v11 = vld [vmem:[%s7837_s20 + $0x1020] ss:$24 sps:$4 sm:$0xff]   ;;  %v6976_v12 = vld [vmem:[%s7837_s20 + $0x754] ss:$24 sps:$4 sm:$0xff]  }
  0x84   : > { %4258 = vmatpush1.bf16.msra.mxu1 %v6901_v13  ;;  %v6979_v13 = vld [vmem:[%s7837_s20 + $0x1054] ss:$24 sps:$4 sm:$0xff]  }
  0x85   : > { %4381 = vmatpush1.bf16.msra.mxu0 %v6904_v14  ;;  %4259 = vmatprep.subr.bf16.mxu1 %v6909_v16  ;;  %v6974_v14 = vld [vmem:[%s7837_s20 + $0x750] ss:$24 sps:$4 sm:$0xff]  }
  0x86   : > { %4382 = vmatprep.subr.bf16.mxu0 %v6912_v17  ;;  %v6977_v16 = vld [vmem:[%s7837_s20 + $0x1050] ss:$24 sps:$4 sm:$0xff]   ;;  %v6982_v17 = vld [vmem:[%s7837_s20 + $0x784] ss:$24 sps:$4 sm:$0xff]  }
  0x88   : > { %4260 = vmatpush1.bf16.msra.mxu1 %v6907_v18  ;;  %v6985_v18 = vld [vmem:[%s7837_s20 + $0x1084] ss:$24 sps:$4 sm:$0xff]  }
  0x89   : > { %4383 = vmatpush1.bf16.msra.mxu0 %v6910_v19  ;;  %4261 = vmatprep.subr.bf16.mxu1 %v6915_v20  ;;  %v6980_v19 = vld [vmem:[%s7837_s20 + $0x780] ss:$24 sps:$4 sm:$0xff]  }
  0x8a   : > { %4384 = vmatprep.subr.bf16.mxu0 %v6918_v23  ;;  %v6983_v20 = vld [vmem:[%s7837_s20 + $0x1080] ss:$24 sps:$4 sm:$0xff]   ;;  %v6988_v23 = vld [vmem:[%s7837_s20 + $0x7b4] ss:$24 sps:$4 sm:$0xff]  }
  0x8c   : > { %4262 = vmatpush1.bf16.msra.mxu1 %v6913_v24  ;;  %v6991_v24 = vld [vmem:[%s7837_s20 + $0x10b4] ss:$24 sps:$4 sm:$0xff]  }
  0x8d   : > { %4385 = vmatpush1.bf16.msra.mxu0 %v6916_v25  ;;  %4263 = vmatprep.subr.bf16.mxu1 %v6921_v26  ;;  %v6986_v25 = vld [vmem:[%s7837_s20 + $0x7b0] ss:$24 sps:$4 sm:$0xff]  }
  0x8e   : > { %4386 = vmatprep.subr.bf16.mxu0 %v6924_v28  ;;  %v6989_v26 = vld [vmem:[%s7837_s20 + $0x10b0] ss:$24 sps:$4 sm:$0xff]   ;;  %v6994_v28 = vld [vmem:[%s7837_s20 + $0x7e4] ss:$24 sps:$4 sm:$0xff]  }
  0x90   : > { %4264 = vmatpush1.bf16.msra.mxu1 %v6919_v30  ;;  %v6992_v30 = vld [vmem:[%s7837_s20 + $0x7e0] ss:$24 sps:$4 sm:$0xff]  }
  0x91   : > { %4387 = vmatpush1.bf16.msra.mxu0 %v6922_v31  ;;  %4265 = vmatprep.subr.bf16.mxu1 %v6927_v32  ;;  %v6995_v31 = vld [vmem:[%s7837_s20 + $0x10e0] ss:$24 sps:$4 sm:$0xff]   ;;  %v7000_v32 = vld [vmem:[%s7837_s20 + $0x814] ss:$24 sps:$4 sm:$0xff]  }
  0x92   : > { %4388 = vmatprep.subr.bf16.mxu0 %v6930_v33  ;;  %v7003_v33 = vld [vmem:[%s7837_s20 + $0x1114] ss:$24 sps:$4 sm:$0xff]  }
  0x94   : > { %4266 = vmatpush1.bf16.msra.mxu1 %v6925_v36  ;;  %v6998_v36 = vld [vmem:[%s7837_s20 + $0x810] ss:$24 sps:$4 sm:$0xff]  }
  0x95   : > { %4389 = vmatpush1.bf16.msra.mxu0 %v6928_v37  ;;  %4276 = vmatprep.subr.bf16.mxu1 %v6934_v38  ;;  %v7001_v37 = vld [vmem:[%s7837_s20 + $0x1110] ss:$24 sps:$4 sm:$0xff]   ;;  %v7006_v38 = vld [vmem:[%s7837_s20 + $0x844] ss:$24 sps:$4 sm:$0xff]  }
  0x96   : > { %4399 = vmatprep.subr.bf16.mxu0 %v6937_v39  ;;  %v7009_v39 = vld [vmem:[%s7837_s20 + $0x1144] ss:$24 sps:$4 sm:$0xff]  }
  0x97   : > { %4268 = vmatmul.mubr.bf16.vlgmr.msra.gmra.mrb[0].mxu1 %v8031_v42 }
  0x98   : > { %4391 = vmatmul.mubr.bf16.vlgmr.msra.gmra.mrb[0].mxu0 %v8035_v43  ;;  %4277 = vmatpush1.bf16.msra.mxu1 %v6932_v41  ;;  %v7012_v41 = vld [vmem:[%s7837_s20 + $0x874] ss:$24 sps:$4 sm:$0xff]  }
  0x99   : > { %4400 = vmatpush1.bf16.msra.mxu0 %v6935_v45  ;;  %4278 = vmatprep.subr.bf16.mxu1 %v6940_v46  ;;  %v7015_v45 = vld [vmem:[%s7837_s20 + $0x1174] ss:$24 sps:$4 sm:$0xff]   ;;  %v7010_v46 = vld [vmem:[%s7837_s20 + $0x870] ss:$24 sps:$4 sm:$0xff]  }
  0x9a   : > { %4401 = vmatprep.subr.bf16.mxu0 %v6943_v47  ;;  %4308 = vmatprep.mubr.bf16.mxu1 %v8040_v48  ;;  %v7013_v47 = vld [vmem:[%s7837_s20 + $0x1170] ss:$24 sps:$4 sm:$0xff]  }
  0x9b   : > { %4431 = vmatprep.mubr.bf16.mxu0 %v8042_v49 }
  0x9c   : > { %4279 = vmatpush1.bf16.msra.mxu1 %v6938_v15  ;;  %v7018_v15 = vld [vmem:[%s7837_s20 + $0x8a4] ss:$24 sps:$4 sm:$0xff]  }
  0x9d   : > { %4402 = vmatpush1.bf16.msra.mxu0 %v6941_v51  ;;  %4280 = vmatprep.subr.bf16.mxu1 %v6946_v52  ;;  %v7021_v51 = vld [vmem:[%s7837_s20 + $0x11a4] ss:$24 sps:$4 sm:$0xff]   ;;  %v7016_v52 = vld [vmem:[%s7837_s20 + $0x8a0] ss:$24 sps:$4 sm:$0xff]  }
  0x9e   : > { %4403 = vmatprep.subr.bf16.mxu0 %v6949_v53  ;;  %v7019_v53 = vld [vmem:[%s7837_s20 + $0x11a0] ss:$24 sps:$4 sm:$0xff]  }
  0xa0   : > { %4281 = vmatpush1.bf16.msra.mxu1 %v6944_v54  ;;  %v7024_v54 = vld [vmem:[%s7837_s20 + $0x8d4] ss:$24 sps:$4 sm:$0xff]  }
  0xa1   : > { %4404 = vmatpush1.bf16.msra.mxu0 %v6947_v55  ;;  %4282 = vmatprep.subr.bf16.mxu1 %v6952_v56  ;;  %v7027_v55 = vld [vmem:[%s7837_s20 + $0x11d4] ss:$24 sps:$4 sm:$0xff]   ;;  %v7022_v56 = vld [vmem:[%s7837_s20 + $0x8d0] ss:$24 sps:$4 sm:$0xff]  }
  0xa2   : > { %4405 = vmatprep.subr.bf16.mxu0 %v6955_v58  ;;  %v7025_v58 = vld [vmem:[%s7837_s20 + $0x11d0] ss:$24 sps:$4 sm:$0xff]  }
  0xa4   : > { %4283 = vmatpush1.bf16.msra.mxu1 %v6950_v59  ;;  %v7031_v59 = vld [vmem:[%s7837_s20 + $0x1204] ss:$24 sps:$4 sm:$0xff]  }
  0xa5   : > { %4406 = vmatpush1.bf16.msra.mxu0 %v6953_v60  ;;  %4284 = vmatprep.subr.bf16.mxu1 %v6958_v63  ;;  %v7034_v60 = vld [vmem:[%s7837_s20 + $0xc] ss:$24 sps:$4 sm:$0xff]   ;;  %v8110_v63 = vpack.c.bf16 %v8015_v34, %v8015_v34  ;;  %v7035_v34 = vld [vmem:[%s7837_s20 + $0x1230] ss:$24 sps:$4 sm:$0xff]  }
  0xa6   : > { %4407 = vmatprep.subr.bf16.mxu0 %v6961_v0  ;;  %v7029_v0 = vld [vmem:[%s7837_s20 + $0x1200] ss:$24 sps:$4 sm:$0xff]  }
  0xa8   : > { %4285 = vmatpush1.bf16.msra.mxu1 %v6956_v1  ;;  %v8115_v1 = vpack.c.bf16 %v8018_v35, %v8018_v35  ;;  %v7038_v35 = vld [vmem:[%s7837_s20 + $0x38] ss:$24 sps:$4 sm:$0xff]  }
  0xa9   : > { %4408 = vmatpush1.bf16.msra.mxu0 %v6959_v2  ;;  %4286 = vmatprep.subr.bf16.mxu1 %v6964_v3  ;;  %v7032_v2 = vld [vmem:[%s7837_s20 + $0x8] ss:$24 sps:$4 sm:$0xff]   ;;  %v7037_v3 = vld [vmem:[%s7837_s20 + $0x1234] ss:$24 sps:$4 sm:$0xff]  }
  0xaa   : > { %4409 = vmatprep.subr.bf16.mxu0 %v6967_v4  ;;  %v7040_v4 = vld [vmem:[%s7837_s20 + $0x3c] ss:$24 sps:$4 sm:$0xff]  }
  0xac   : > { %4287 = vmatpush1.bf16.msra.mxu1 %v6962_v6  ;;  %v7043_v6 = vld [vmem:[%s7837_s20 + $0x1264] ss:$24 sps:$4 sm:$0xff]  }
  0xad   : > { %4410 = vmatpush1.bf16.msra.mxu0 %v6965_v7  ;;  %4288 = vmatprep.subr.bf16.mxu1 %v6970_v8  ;;  %v7046_v7 = vld [vmem:[%s7837_s20 + $0x6c] ss:$24 sps:$4 sm:$0xff]   ;;  %v7761_v8 = vmov 0  }
  0xae   : > { %4411 = vmatprep.subr.bf16.mxu0 %v6973_v9  ;;  %v7041_v9 = vld [vmem:[%s7837_s20 + $0x1260] ss:$24 sps:$4 sm:$0xff]  }
  0xb0   : > { %4289 = vmatpush1.bf16.msra.mxu1 %v6968_v10  ;;  %v7044_v10 = vld [vmem:[%s7837_s20 + $0x68] ss:$24 sps:$4 sm:$0xff]  }
  0xb1   : > { %4412 = vmatpush1.bf16.msra.mxu0 %v6971_v11  ;;  %4290 = vmatprep.subr.bf16.mxu1 %v6976_v12  ;;  %v7049_v11 = vld [vmem:[%s7837_s20 + $0x1294] ss:$24 sps:$4 sm:$0xff]  }
  0xb2   : > { %4413 = vmatprep.subr.bf16.mxu0 %v6979_v13  ;;  %v7052_v12 = vld [vmem:[%s7837_s20 + $0x9c] ss:$24 sps:$4 sm:$0xff]   ;;  %v7047_v13 = vld [vmem:[%s7837_s20 + $0x1290] ss:$24 sps:$4 sm:$0xff]  }
  0xb4   : > { %4291 = vmatpush1.bf16.msra.mxu1 %v6974_v14  ;;  %v7050_v14 = vld [vmem:[%s7837_s20 + $0x98] ss:$24 sps:$4 sm:$0xff]  }
  0xb5   : > { %4414 = vmatpush1.bf16.msra.mxu0 %v6977_v16  ;;  %4292 = vmatprep.subr.bf16.mxu1 %v6982_v17  ;;  %v7055_v16 = vld [vmem:[%s7837_s20 + $0x12c4] ss:$24 sps:$4 sm:$0xff]  }
  0xb6   : > { %4415 = vmatprep.subr.bf16.mxu0 %v6985_v18  ;;  %v7058_v17 = vld [vmem:[%s7837_s20 + $0xcc] ss:$24 sps:$4 sm:$0xff]   ;;  %v7053_v18 = vld [vmem:[%s7837_s20 + $0x12c0] ss:$24 sps:$4 sm:$0xff]  }
  0xb8   : > { %4293 = vmatpush1.bf16.msra.mxu1 %v6980_v19  ;;  %v7056_v19 = vld [vmem:[%s7837_s20 + $0xc8] ss:$24 sps:$4 sm:$0xff]  }
  0xb9   : > { %4416 = vmatpush1.bf16.msra.mxu0 %v6983_v20  ;;  %4294 = vmatprep.subr.bf16.mxu1 %v6988_v23  ;;  %v7061_v20 = vld [vmem:[%s7837_s20 + $0x12f4] ss:$24 sps:$4 sm:$0xff]  }
  0xba   : > { %4417 = vmatprep.subr.bf16.mxu0 %v6991_v24  ;;  %v7064_v23 = vld [vmem:[%s7837_s20 + $0xfc] ss:$24 sps:$4 sm:$0xff]   ;;  %v7059_v24 = vld [vmem:[%s7837_s20 + $0x12f0] ss:$24 sps:$4 sm:$0xff]  }
  0xbc   : > { %4295 = vmatpush1.bf16.msra.mxu1 %v6986_v25  ;;  %v7062_v25 = vld [vmem:[%s7837_s20 + $0xf8] ss:$24 sps:$4 sm:$0xff]  }
  0xbd   : > { %4418 = vmatpush1.bf16.msra.mxu0 %v6989_v26  ;;  %4296 = vmatprep.subr.bf16.mxu1 %v6994_v28  ;;  %v7067_v26 = vld [vmem:[%s7837_s20 + $0x1324] ss:$24 sps:$4 sm:$0xff]  }
  0xbe   : > { %4419 = vmatprep.subr.bf16.mxu0 %v6997_v29  ;;  %v7070_v28 = vld [vmem:[%s7837_s20 + $0x12c] ss:$24 sps:$4 sm:$0xff]   ;;  %v7065_v29 = vld [vmem:[%s7837_s20 + $0x1320] ss:$24 sps:$4 sm:$0xff]  }
  0xc0   : > { %4297 = vmatpush1.bf16.msra.mxu1 %v6992_v30  ;;  %v7068_v30 = vld [vmem:[%s7837_s20 + $0x128] ss:$24 sps:$4 sm:$0xff]  }
  0xc1   : > { %4420 = vmatpush1.bf16.msra.mxu0 %v6995_v31  ;;  %4298 = vmatprep.subr.bf16.mxu1 %v7000_v32  ;;  %v7073_v31 = vld [vmem:[%s7837_s20 + $0x1354] ss:$24 sps:$4 sm:$0xff]  }
  0xc2   : > { %4421 = vmatprep.subr.bf16.mxu0 %v7003_v33  ;;  %v7076_v32 = vld [vmem:[%s7837_s20 + $0x15c] ss:$24 sps:$4 sm:$0xff]   ;;  %v7071_v33 = vld [vmem:[%s7837_s20 + $0x1350] ss:$24 sps:$4 sm:$0xff]  }
  0xc4   : > { %4299 = vmatpush1.bf16.msra.mxu1 %v6998_v36  ;;  %v7074_v36 = vld [vmem:[%s7837_s20 + $0x158] ss:$24 sps:$4 sm:$0xff]  }
  0xc5   : > { %4422 = vmatpush1.bf16.msra.mxu0 %v7001_v37  ;;  %4300 = vmatprep.subr.bf16.mxu1 %v7006_v38  ;;  %v5853_v37 = vld.sshfl [vmem:[%s7832_s16 + $0x18] sm:$0x3 pattern:$0x76325410]  ;;  %v7079_v38 = vld [vmem:[%s7837_s20 + $0x18c] ss:$24 sps:$4 sm:$0xff]  }
  0xc6   : > { %4423 = vmatprep.subr.bf16.mxu0 %v7009_v39  ;;  %v7082_v39 = vld [vmem:[%s7837_s20 + $0x14] ss:$24 sps:$4 sm:$0xff]  }
  0xc8   : > { %4301 = vmatpush1.bf16.msra.mxu1 %v7004_v40  ;;  %v8153_v40 = vpack.c.bf16 %v5853_v37, %v5853_v37  ;;  %v7151_v37 = vld [vmem:[%s7837_s20 + $0x3cc] ss:$24 sps:$4 sm:$0xff]  }
  0xc9   : > { %4424 = vmatpush1.bf16.msra.mxu0 %v7007_v57  ;;  %4302 = vmatprep.subr.bf16.mxu1 %v7012_v41  ;;  %v7077_v57 = vld [vmem:[%s7837_s20 + $0x188] ss:$24 sps:$4 sm:$0xff]  }
  0xca   : > { %4425 = vmatprep.subr.bf16.mxu0 %v7015_v45  ;;  %v7080_v41 = vld [vmem:[%s7837_s20 + $0x10] ss:$24 sps:$4 sm:$0xff]   ;;  %v7085_v45 = vld [vmem:[%s7837_s20 + $0x1bc] ss:$24 sps:$4 sm:$0xff]  }
  0xcc   : > { %4303 = vmatpush1.bf16.msra.mxu1 %v7010_v46  ;;  %v7088_v46 = vld [vmem:[%s7837_s20 + $0x44] ss:$24 sps:$4 sm:$0xff]  }
  0xcd   : > { %4426 = vmatpush1.bf16.msra.mxu0 %v7013_v47  ;;  %4304 = vmatprep.subr.bf16.mxu1 %v7018_v15  ;;  %v7083_v47 = vld [vmem:[%s7837_s20 + $0x1b8] ss:$24 sps:$4 sm:$0xff]  }
  0xce   : > { %4427 = vmatprep.subr.bf16.mxu0 %v7021_v51  ;;  %v7086_v15 = vld [vmem:[%s7837_s20 + $0x40] ss:$24 sps:$4 sm:$0xff]   ;;  %v7091_v51 = vld [vmem:[%s7837_s20 + $0x1ec] ss:$24 sps:$4 sm:$0xff]  }
  0xd0   : > { %4305 = vmatpush1.bf16.msra.mxu1 %v7016_v52  ;;  %v7094_v52 = vld [vmem:[%s7837_s20 + $0x74] ss:$24 sps:$4 sm:$0xff]  }
  0xd1   : > { %4428 = vmatpush1.bf16.msra.mxu0 %v7019_v53  ;;  %4306 = vmatprep.subr.bf16.mxu1 %v7024_v54  ;;  %v7089_v53 = vld [vmem:[%s7837_s20 + $0x1e8] ss:$24 sps:$4 sm:$0xff]  }
  0xd2   : > { %4429 = vmatprep.subr.bf16.mxu0 %v7027_v55  ;;  %v7092_v54 = vld [vmem:[%s7837_s20 + $0x70] ss:$24 sps:$4 sm:$0xff]   ;;  %v7097_v55 = vld [vmem:[%s7837_s20 + $0x21c] ss:$24 sps:$4 sm:$0xff]  }
  0xd4   : > { %4307 = vmatpush1.bf16.msra.mxu1 %v7022_v56  ;;  %v7100_v56 = vld [vmem:[%s7837_s20 + $0xa4] ss:$24 sps:$4 sm:$0xff]  }
  0xd5   : > { %4430 = vmatpush1.bf16.msra.mxu0 %v7025_v58  ;;  %4481 = vmatprep.subr.bf16.mxu1 %v7034_v60  ;;  %v7095_v58 = vld [vmem:[%s7837_s20 + $0x218] ss:$24 sps:$4 sm:$0xff]   ;;  %v7106_v60 = vld [vmem:[%s7837_s20 + $0xd4] ss:$24 sps:$4 sm:$0xff]  }
  0xd6   : > { %4440 = vmatprep.subr.bf16.mxu0 %v7031_v59  ;;  %v7098_v59 = vld [vmem:[%s7837_s20 + $0xa0] ss:$24 sps:$4 sm:$0xff]  }
  0xd7   : > { %4309 = vmatmul.mubr.bf16.vlgmr.msra.gmra.mrb[0].mxu1 %v8110_v63 }
  0xd8   : > { %4432 = vmatmul.mubr.bf16.vlgmr.msra.gmra.mrb[0].mxu0 %v8115_v1  ;;  %4482 = vmatpush1.bf16.msra.mxu1 %v7032_v2  ;;  %v7104_v2 = vld [vmem:[%s7837_s20 + $0xd0] ss:$24 sps:$4 sm:$0xff]  }
  0xd9   : > { %4441 = vmatpush1.bf16.msra.mxu0 %v7029_v0  ;;  %4483 = vmatprep.subr.bf16.mxu1 %v7040_v4  ;;  %v7101_v0 = vld [vmem:[%s7837_s20 + $0x248] ss:$24 sps:$4 sm:$0xff]   ;;  %v7112_v4 = vld [vmem:[%s7837_s20 + $0x104] ss:$24 sps:$4 sm:$0xff]  }
  0xda   : > { %4442 = vmatprep.subr.bf16.mxu0 %v7037_v3  ;;  %4472 = vmatprep.mubr.bf16.mxu0 %v7761_v8  ;;  %v7109_v3 = vld [vmem:[%s7837_s20 + $0x27c] ss:$24 sps:$4 sm:$0xff]  }
  0xdb   : > { %4513 = vmatprep.mubr.bf16.mxu1 %v7902_v62 }
  0xdc   : > { %4484 = vmatpush1.bf16.msra.mxu1 %v7038_v35  ;;  %v7110_v35 = vld [vmem:[%s7837_s20 + $0x100] ss:$24 sps:$4 sm:$0xff]  }
  0xdd   : > { %4443 = vmatpush1.bf16.msra.mxu0 %v7035_v34  ;;  %4485 = vmatprep.subr.bf16.mxu1 %v7046_v7  ;;  %v7107_v34 = vld [vmem:[%s7837_s20 + $0x278] ss:$24 sps:$4 sm:$0xff]   ;;  %v7118_v7 = vld [vmem:[%s7837_s20 + $0x134] ss:$24 sps:$4 sm:$0xff]  }
  0xde   : > { %4444 = vmatprep.subr.bf16.mxu0 %v7043_v6  ;;  %v7115_v6 = vld [vmem:[%s7837_s20 + $0x2ac] ss:$24 sps:$4 sm:$0xff]  }
  0xe0   : > { %4486 = vmatpush1.bf16.msra.mxu1 %v7044_v10  ;;  %v7116_v10 = vld [vmem:[%s7837_s20 + $0x130] ss:$24 sps:$4 sm:$0xff]  }
  0xe1   : > { %4445 = vmatpush1.bf16.msra.mxu0 %v7041_v9  ;;  %4487 = vmatprep.subr.bf16.mxu1 %v7052_v12  ;;  %v7113_v9 = vld [vmem:[%s7837_s20 + $0x2a8] ss:$24 sps:$4 sm:$0xff]   ;;  %v7124_v12 = vld [vmem:[%s7837_s20 + $0x164] ss:$24 sps:$4 sm:$0xff]  }
  0xe2   : > { %4446 = vmatprep.subr.bf16.mxu0 %v7049_v11  ;;  %v7121_v11 = vld [vmem:[%s7837_s20 + $0x2dc] ss:$24 sps:$4 sm:$0xff]  }
  0xe4   : > { %4488 = vmatpush1.bf16.msra.mxu1 %v7050_v14  ;;  %v7122_v14 = vld [vmem:[%s7837_s20 + $0x160] ss:$24 sps:$4 sm:$0xff]  }
  0xe5   : > { %4447 = vmatpush1.bf16.msra.mxu0 %v7047_v13  ;;  %4489 = vmatprep.subr.bf16.mxu1 %v7058_v17  ;;  %v7119_v13 = vld [vmem:[%s7837_s20 + $0x2d8] ss:$24 sps:$4 sm:$0xff]   ;;  %v7130_v17 = vld [vmem:[%s7837_s20 + $0x194] ss:$24 sps:$4 sm:$0xff]  }
  0xe6   : > { %4448 = vmatprep.subr.bf16.mxu0 %v7055_v16  ;;  %v7127_v16 = vld [vmem:[%s7837_s20 + $0x30c] ss:$24 sps:$4 sm:$0xff]  }
  0xe8   : > { %4490 = vmatpush1.bf16.msra.mxu1 %v7056_v19  ;;  %v7128_v19 = vld [vmem:[%s7837_s20 + $0x190] ss:$24 sps:$4 sm:$0xff]  }
  0xe9   : > { %4449 = vmatpush1.bf16.msra.mxu0 %v7053_v18  ;;  %4491 = vmatprep.subr.bf16.mxu1 %v7064_v23  ;;  %v7125_v18 = vld [vmem:[%s7837_s20 + $0x308] ss:$24 sps:$4 sm:$0xff]   ;;  %v7136_v23 = vld [vmem:[%s7837_s20 + $0x1c4] ss:$24 sps:$4 sm:$0xff]  }
  0xea   : > { %4450 = vmatprep.subr.bf16.mxu0 %v7061_v20  ;;  %v7133_v20 = vld [vmem:[%s7837_s20 + $0x33c] ss:$24 sps:$4 sm:$0xff]  }
  0xec   : > { %4492 = vmatpush1.bf16.msra.mxu1 %v7062_v25  ;;  %v7134_v25 = vld [vmem:[%s7837_s20 + $0x1c0] ss:$24 sps:$4 sm:$0xff]  }
  0xed   : > { %4451 = vmatpush1.bf16.msra.mxu0 %v7059_v24  ;;  %4493 = vmatprep.subr.bf16.mxu1 %v7070_v28  ;;  %v7131_v24 = vld [vmem:[%s7837_s20 + $0x338] ss:$24 sps:$4 sm:$0xff]   ;;  %v7142_v28 = vld [vmem:[%s7837_s20 + $0x1f4] ss:$24 sps:$4 sm:$0xff]  }
  0xee   : > { %4452 = vmatprep.subr.bf16.mxu0 %v7067_v26  ;;  %v7139_v26 = vld [vmem:[%s7837_s20 + $0x36c] ss:$24 sps:$4 sm:$0xff]  }
  0xf0   : > { %4494 = vmatpush1.bf16.msra.mxu1 %v7068_v30  ;;  %v7140_v30 = vld [vmem:[%s7837_s20 + $0x1f0] ss:$24 sps:$4 sm:$0xff]  }
  0xf1   : > { %4453 = vmatpush1.bf16.msra.mxu0 %v7065_v29  ;;  %4495 = vmatprep.subr.bf16.mxu1 %v7076_v32  ;;  %v7137_v29 = vld [vmem:[%s7837_s20 + $0x368] ss:$24 sps:$4 sm:$0xff]   ;;  %v7148_v32 = vld [vmem:[%s7837_s20 + $0x224] ss:$24 sps:$4 sm:$0xff]  }
  0xf2   : > { %4454 = vmatprep.subr.bf16.mxu0 %v7073_v31  ;;  %v7145_v31 = vld [vmem:[%s7837_s20 + $0x39c] ss:$24 sps:$4 sm:$0xff]  }
  0xf4   : > { %4496 = vmatpush1.bf16.msra.mxu1 %v7074_v36  ;;  %v7146_v36 = vld [vmem:[%s7837_s20 + $0x220] ss:$24 sps:$4 sm:$0xff]  }
  0xf5   : > { %4455 = vmatpush1.bf16.msra.mxu0 %v7071_v33  ;;  %4497 = vmatprep.subr.bf16.mxu1 %v7079_v38  ;;  %v7143_v33 = vld [vmem:[%s7837_s20 + $0x398] ss:$24 sps:$4 sm:$0xff]   ;;  %v7154_v38 = vld [vmem:[%s7837_s20 + $0x254] ss:$24 sps:$4 sm:$0xff]  }
  0xf6   : > { %4768 = vmatprep.subr.bf16.mxu0 %v7082_v39  ;;  %v7149_v39 = vld [vmem:[%s7837_s20 + $0x3c8] ss:$24 sps:$4 sm:$0xff]  }
  0xf8   : > { %4473 = vmatmul.mubr.bf16.vlgmr.msra.gmra.mrb[0].mxu0 %v8153_v40  ;;  %4498 = vmatpush1.bf16.msra.mxu1 %v7077_v57  ;;  %v7152_v57 = vld [vmem:[%s7837_s20 + $0x250] ss:$24 sps:$4 sm:$0xff]  }
  0xf9   : > { %4769 = vmatpush1.bf16.msra.mxu0 %v7080_v41  ;;  %4499 = vmatprep.subr.bf16.mxu1 %v7085_v45  ;;  %v7157_v41 = vld [vmem:[%s7837_s20 + $0x3fc] ss:$24 sps:$4 sm:$0xff]  }
  0xfa   : > { %4770 = vmatprep.subr.bf16.mxu0 %v7088_v46  ;;  %4800 = vmatprep.mubr.bf16.mxu0 %v7902_v62  ;;  %v7103_v62 = vld [vmem:[%s7837_s20 + $0x24c] ss:$24 sps:$4 sm:$0xff]   ;;  %v7155_v46 = vld [vmem:[%s7837_s20 + $0x3f8] ss:$24 sps:$4 sm:$0xff]  }
  0xfb   : > { %v7160_v45 = vld [vmem:[%s7837_s20 + $0x284] ss:$24 sps:$4 sm:$0xff]  }
  0xfc   : > { %4500 = vmatpush1.bf16.msra.mxu1 %v7083_v47  ;;  %v7158_v47 = vld [vmem:[%s7837_s20 + $0x280] ss:$24 sps:$4 sm:$0xff]  }
  0xfd   : > { %4771 = vmatpush1.bf16.msra.mxu0 %v7086_v15  ;;  %4501 = vmatprep.subr.bf16.mxu1 %v7091_v51  ;;  %v7163_v15 = vld [vmem:[%s7837_s20 + $0x42c] ss:$24 sps:$4 sm:$0xff]  }
  0xfe   : > { %4772 = vmatprep.subr.bf16.mxu0 %v7094_v52  ;;  %v7166_v51 = vld [vmem:[%s7837_s20 + $0x2b4] ss:$24 sps:$4 sm:$0xff]   ;;  %v7161_v52 = vld [vmem:[%s7837_s20 + $0x428] ss:$24 sps:$4 sm:$0xff]  }
 0x100   : > { %4502 = vmatpush1.bf16.msra.mxu1 %v7089_v53  ;;  %v7164_v53 = vld [vmem:[%s7837_s20 + $0x2b0] ss:$24 sps:$4 sm:$0xff]  }
 0x101   : > { %4773 = vmatpush1.bf16.msra.mxu0 %v7092_v54  ;;  %4503 = vmatprep.subr.bf16.mxu1 %v7097_v55  ;;  %v7169_v54 = vld [vmem:[%s7837_s20 + $0x45c] ss:$24 sps:$4 sm:$0xff]  }
 0x102   : > { %4774 = vmatprep.subr.bf16.mxu0 %v7100_v56  ;;  %v7172_v55 = vld [vmem:[%s7837_s20 + $0x2e4] ss:$24 sps:$4 sm:$0xff]   ;;  %v7167_v56 = vld [vmem:[%s7837_s20 + $0x458] ss:$24 sps:$4 sm:$0xff]  }
 0x104   : > { %4504 = vmatpush1.bf16.msra.mxu1 %v7095_v58  ;;  %v7170_v58 = vld [vmem:[%s7837_s20 + $0x2e0] ss:$24 sps:$4 sm:$0xff]  }
 0x105   : > { %4775 = vmatpush1.bf16.msra.mxu0 %v7098_v59  ;;  %4505 = vmatprep.subr.bf16.mxu1 %v7103_v62  ;;  %v7175_v59 = vld [vmem:[%s7837_s20 + $0x48c] ss:$24 sps:$4 sm:$0xff]  }
 0x106   : > { %4776 = vmatprep.subr.bf16.mxu0 %v7106_v60  ;;  %v7178_v62 = vld [vmem:[%s7837_s20 + $0x314] ss:$24 sps:$4 sm:$0xff]   ;;  %v7173_v60 = vld [vmem:[%s7837_s20 + $0x488] ss:$24 sps:$4 sm:$0xff]  }
 0x108   : > { %4506 = vmatpush1.bf16.msra.mxu1 %v7101_v0  ;;  %v7176_v0 = vld [vmem:[%s7837_s20 + $0x310] ss:$24 sps:$4 sm:$0xff]  }
 0x109   : > { %4777 = vmatpush1.bf16.msra.mxu0 %v7104_v2  ;;  %4507 = vmatprep.subr.bf16.mxu1 %v7109_v3  ;;  %v7181_v2 = vld [vmem:[%s7837_s20 + $0x4bc] ss:$24 sps:$4 sm:$0xff]  }
 0x10a   : > { %4778 = vmatprep.subr.bf16.mxu0 %v7112_v4  ;;  %v7184_v3 = vld [vmem:[%s7837_s20 + $0x344] ss:$24 sps:$4 sm:$0xff]   ;;  %v7179_v4 = vld [vmem:[%s7837_s20 + $0x4b8] ss:$24 sps:$4 sm:$0xff]  }
 0x10c   : > { %4508 = vmatpush1.bf16.msra.mxu1 %v7107_v34  ;;  %v7182_v34 = vld [vmem:[%s7837_s20 + $0x340] ss:$24 sps:$4 sm:$0xff]  }
 0x10d   : > { %4779 = vmatpush1.bf16.msra.mxu0 %v7110_v35  ;;  %4509 = vmatprep.subr.bf16.mxu1 %v7115_v6  ;;  %v7187_v35 = vld [vmem:[%s7837_s20 + $0x4ec] ss:$24 sps:$4 sm:$0xff]  }
 0x10e   : > { %4780 = vmatprep.subr.bf16.mxu0 %v7118_v7  ;;  %v7190_v6 = vld [vmem:[%s7837_s20 + $0x374] ss:$24 sps:$4 sm:$0xff]   ;;  %v7185_v7 = vld [vmem:[%s7837_s20 + $0x4e8] ss:$24 sps:$4 sm:$0xff]  }
 0x110   : > { %4510 = vmatpush1.bf16.msra.mxu1 %v7113_v9  ;;  %v7193_v9 = vld [vmem:[%s7837_s20 + $0x51c] ss:$24 sps:$4 sm:$0xff]  }
 0x111   : > { %4781 = vmatpush1.bf16.msra.mxu0 %v7116_v10  ;;  %4511 = vmatprep.subr.bf16.mxu1 %v7121_v11  ;;  %v7196_v10 = vld [vmem:[%s7837_s20 + $0x3a4] ss:$24 sps:$4 sm:$0xff]   ;;  %v7191_v11 = vld [vmem:[%s7837_s20 + $0x518] ss:$24 sps:$4 sm:$0xff]  }
 0x112   : > { %4782 = vmatprep.subr.bf16.mxu0 %v7124_v12  ;;  %v7194_v12 = vld [vmem:[%s7837_s20 + $0x3a0] ss:$24 sps:$4 sm:$0xff]  }
 0x114   : > { %4512 = vmatpush1.bf16.msra.mxu1 %v7119_v13  ;;  %v7202_v13 = vld [vmem:[%s7837_s20 + $0x3d4] ss:$24 sps:$4 sm:$0xff]  }
 0x115   : > { %4783 = vmatpush1.bf16.msra.mxu0 %v7122_v14  ;;  %4522 = vmatprep.subr.bf16.mxu1 %v7127_v16  ;;  %v7197_v14 = vld [vmem:[%s7837_s20 + $0x548] ss:$24 sps:$4 sm:$0xff]  }
 0x116   : > { %4784 = vmatprep.subr.bf16.mxu0 %v7130_v17  ;;  %v7200_v16 = vld [vmem:[%s7837_s20 + $0x3d0] ss:$24 sps:$4 sm:$0xff]   ;;  %v7205_v17 = vld [vmem:[%s7837_s20 + $0x57c] ss:$24 sps:$4 sm:$0xff]  }
 0x117   : > { %4514 = vmatmul.mubr.bf16.vlgmr.msra.gmra.mrb[4].mxu1 %v7930_v21 }
 0x118   : > { %4523 = vmatpush1.bf16.msra.mxu1 %v7125_v18  ;;  %4554 = vmatprep.mubr.bf16.mxu1 %v7938_v27  ;;  %v7208_v18 = vld [vmem:[%s7837_s20 + $0x404] ss:$24 sps:$4 sm:$0xff]  }
 0x119   : > { %4785 = vmatpush1.bf16.msra.mxu0 %v7128_v19  ;;  %4524 = vmatprep.subr.bf16.mxu1 %v7133_v20  ;;  %v7203_v19 = vld [vmem:[%s7837_s20 + $0x578] ss:$24 sps:$4 sm:$0xff]  }
 0x11a   : > { %4786 = vmatprep.subr.bf16.mxu0 %v7136_v23  ;;  %v7206_v20 = vld [vmem:[%s7837_s20 + $0x400] ss:$24 sps:$4 sm:$0xff]   ;;  %v7211_v23 = vld [vmem:[%s7837_s20 + $0x5ac] ss:$24 sps:$4 sm:$0xff]  }
 0x11c   : > { %4525 = vmatpush1.bf16.msra.mxu1 %v7131_v24  ;;  %v7214_v24 = vld [vmem:[%s7837_s20 + $0x434] ss:$24 sps:$4 sm:$0xff]  }
 0x11d   : > { %4787 = vmatpush1.bf16.msra.mxu0 %v7134_v25  ;;  %4526 = vmatprep.subr.bf16.mxu1 %v7139_v26  ;;  %v7209_v25 = vld [vmem:[%s7837_s20 + $0x5a8] ss:$24 sps:$4 sm:$0xff]  }
 0x11e   : > { %4788 = vmatprep.subr.bf16.mxu0 %v7142_v28  ;;  %v7212_v26 = vld [vmem:[%s7837_s20 + $0x430] ss:$24 sps:$4 sm:$0xff]   ;;  %v7217_v28 = vld [vmem:[%s7837_s20 + $0x5dc] ss:$24 sps:$4 sm:$0xff]  }
 0x120   : > { %4527 = vmatpush1.bf16.msra.mxu1 %v7137_v29  ;;  %v7220_v29 = vld [vmem:[%s7837_s20 + $0x464] ss:$24 sps:$4 sm:$0xff]  }
 0x121   : > { %4789 = vmatpush1.bf16.msra.mxu0 %v7140_v30  ;;  %4528 = vmatprep.subr.bf16.mxu1 %v7145_v31  ;;  %v7215_v30 = vld [vmem:[%s7837_s20 + $0x5d8] ss:$24 sps:$4 sm:$0xff]  }
 0x122   : > { %4790 = vmatprep.subr.bf16.mxu0 %v7148_v32  ;;  %v7218_v31 = vld [vmem:[%s7837_s20 + $0x460] ss:$24 sps:$4 sm:$0xff]   ;;  %v7223_v32 = vld [vmem:[%s7837_s20 + $0x60c] ss:$24 sps:$4 sm:$0xff]  }
 0x124   : > { %4529 = vmatpush1.bf16.msra.mxu1 %v7143_v33  ;;  %v7226_v33 = vld [vmem:[%s7837_s20 + $0x494] ss:$24 sps:$4 sm:$0xff]  }
 0x125   : > { %4791 = vmatpush1.bf16.msra.mxu0 %v7146_v36  ;;  %4530 = vmatprep.subr.bf16.mxu1 %v7151_v37  ;;  %v7221_v36 = vld [vmem:[%s7837_s20 + $0x608] ss:$24 sps:$4 sm:$0xff]  }
 0x126   : > { %4792 = vmatprep.subr.bf16.mxu0 %v7154_v38  ;;  %v7224_v37 = vld [vmem:[%s7837_s20 + $0x490] ss:$24 sps:$4 sm:$0xff]   ;;  %v7229_v38 = vld [vmem:[%s7837_s20 + $0x63c] ss:$24 sps:$4 sm:$0xff]  }
 0x128   : > { %4531 = vmatpush1.bf16.msra.mxu1 %v7149_v39  ;;  %v7232_v39 = vld [vmem:[%s7837_s20 + $0x4c4] ss:$24 sps:$4 sm:$0xff]  }
 0x129   : > { %4793 = vmatpush1.bf16.msra.mxu0 %v7152_v57  ;;  %4532 = vmatprep.subr.bf16.mxu1 %v7157_v41  ;;  %v7227_v57 = vld [vmem:[%s7837_s20 + $0x638] ss:$24 sps:$4 sm:$0xff]  }
 0x12a   : > { %4794 = vmatprep.subr.bf16.mxu0 %v7160_v45  ;;  %v7230_v41 = vld [vmem:[%s7837_s20 + $0x4c0] ss:$24 sps:$4 sm:$0xff]   ;;  %v7235_v45 = vld [vmem:[%s7837_s20 + $0x66c] ss:$24 sps:$4 sm:$0xff]  }
 0x12c   : > { %4533 = vmatpush1.bf16.msra.mxu1 %v7155_v46  ;;  %v7238_v46 = vld [vmem:[%s7837_s20 + $0x4f4] ss:$24 sps:$4 sm:$0xff]  }
 0x12d   : > { %4795 = vmatpush1.bf16.msra.mxu0 %v7158_v47  ;;  %4534 = vmatprep.subr.bf16.mxu1 %v7163_v15  ;;  %v7233_v47 = vld [vmem:[%s7837_s20 + $0x668] ss:$24 sps:$4 sm:$0xff]  }
 0x12e   : > { %4796 = vmatprep.subr.bf16.mxu0 %v7166_v51  ;;  %v7236_v15 = vld [vmem:[%s7837_s20 + $0x4f0] ss:$24 sps:$4 sm:$0xff]   ;;  %v7241_v51 = vld [vmem:[%s7837_s20 + $0x69c] ss:$24 sps:$4 sm:$0xff]  }
 0x130   : > { %4535 = vmatpush1.bf16.msra.mxu1 %v7161_v52  ;;  %v7244_v52 = vld [vmem:[%s7837_s20 + $0x524] ss:$24 sps:$4 sm:$0xff]  }
 0x131   : > { %4797 = vmatpush1.bf16.msra.mxu0 %v7164_v53  ;;  %4536 = vmatprep.subr.bf16.mxu1 %v7169_v54  ;;  %v7239_v53 = vld [vmem:[%s7837_s20 + $0x698] ss:$24 sps:$4 sm:$0xff]  }
 0x132   : > { %4798 = vmatprep.subr.bf16.mxu0 %v7172_v55  ;;  %v7242_v54 = vld [vmem:[%s7837_s20 + $0x520] ss:$24 sps:$4 sm:$0xff]   ;;  %v7247_v55 = vld [vmem:[%s7837_s20 + $0x6cc] ss:$24 sps:$4 sm:$0xff]  }
 0x134   : > { %4537 = vmatpush1.bf16.msra.mxu1 %v7167_v56  ;;  %v7250_v56 = vld [vmem:[%s7837_s20 + $0x554] ss:$24 sps:$4 sm:$0xff]  }
 0x135   : > { %4799 = vmatpush1.bf16.msra.mxu0 %v7170_v58  ;;  %4538 = vmatprep.subr.bf16.mxu1 %v7175_v59  ;;  %v7245_v58 = vld [vmem:[%s7837_s20 + $0x6c8] ss:$24 sps:$4 sm:$0xff]  }
 0x136   : > { %4809 = vmatprep.subr.bf16.mxu0 %v7178_v62  ;;  %v7248_v59 = vld [vmem:[%s7837_s20 + $0x550] ss:$24 sps:$4 sm:$0xff]   ;;  %v7253_v62 = vld [vmem:[%s7837_s20 + $0x6fc] ss:$24 sps:$4 sm:$0xff]  }
 0x138   : > { %4801 = vmatmul.mubr.bf16.vlgmr.msra.gmra.mrb[4].mxu0 %v7930_v21  ;;  %4539 = vmatpush1.bf16.msra.mxu1 %v7173_v60  ;;  %v7188_v21 = vld [vmem:[%s7837_s20 + $0x370] ss:$24 sps:$4 sm:$0xff]   ;;  %v7256_v60 = vld [vmem:[%s7837_s20 + $0x584] ss:$24 sps:$4 sm:$0xff]  }
 0x139   : > { %4810 = vmatpush1.bf16.msra.mxu0 %v7176_v0  ;;  %4540 = vmatprep.subr.bf16.mxu1 %v7181_v2  ;;  %v7251_v0 = vld [vmem:[%s7837_s20 + $0x6f8] ss:$24 sps:$4 sm:$0xff]  }
 0x13a   : > { %4811 = vmatprep.subr.bf16.mxu0 %v7184_v3  ;;  %4841 = vmatprep.mubr.bf16.mxu0 %v7938_v27  ;;  %v7199_v27 = vld [vmem:[%s7837_s20 + $0x54c] ss:$24 sps:$4 sm:$0xff]   ;;  %v7254_v2 = vld [vmem:[%s7837_s20 + $0x580] ss:$24 sps:$4 sm:$0xff]  }
 0x13b   : > { %v7259_v3 = vld [vmem:[%s7837_s20 + $0x72c] ss:$24 sps:$4 sm:$0xff]  }
 0x13c   : > { %4541 = vmatpush1.bf16.msra.mxu1 %v7179_v4  ;;  %v7262_v4 = vld [vmem:[%s7837_s20 + $0x5b4] ss:$24 sps:$4 sm:$0xff]  }
 0x13d   : > { %4812 = vmatpush1.bf16.msra.mxu0 %v7182_v34  ;;  %4542 = vmatprep.subr.bf16.mxu1 %v7187_v35  ;;  %v7257_v34 = vld [vmem:[%s7837_s20 + $0x728] ss:$24 sps:$4 sm:$0xff]  }
 0x13e   : > { %4813 = vmatprep.subr.bf16.mxu0 %v7190_v6  ;;  %v7260_v35 = vld [vmem:[%s7837_s20 + $0x5b0] ss:$24 sps:$4 sm:$0xff]   ;;  %v7265_v6 = vld [vmem:[%s7837_s20 + $0x75c] ss:$24 sps:$4 sm:$0xff]  }
 0x140   : > { %4543 = vmatpush1.bf16.msra.mxu1 %v7185_v7  ;;  %v7268_v7 = vld [vmem:[%s7837_s20 + $0x5e4] ss:$24 sps:$4 sm:$0xff]  }
 0x141   : > { %4814 = vmatpush1.bf16.msra.mxu0 %v7188_v21  ;;  %4544 = vmatprep.subr.bf16.mxu1 %v7193_v9  ;;  %v7263_v21 = vld [vmem:[%s7837_s20 + $0x758] ss:$24 sps:$4 sm:$0xff]  }
 0x142   : > { %4815 = vmatprep.subr.bf16.mxu0 %v7196_v10  ;;  %v7266_v9 = vld [vmem:[%s7837_s20 + $0x5e0] ss:$24 sps:$4 sm:$0xff]   ;;  %v7271_v10 = vld [vmem:[%s7837_s20 + $0x78c] ss:$24 sps:$4 sm:$0xff]  }
 0x144   : > { %4545 = vmatpush1.bf16.msra.mxu1 %v7191_v11  ;;  %v7274_v11 = vld [vmem:[%s7837_s20 + $0x614] ss:$24 sps:$4 sm:$0xff]  }
 0x145   : > { %4816 = vmatpush1.bf16.msra.mxu0 %v7194_v12  ;;  %4546 = vmatprep.subr.bf16.mxu1 %v7199_v27  ;;  %v7269_v12 = vld [vmem:[%s7837_s20 + $0x788] ss:$24 sps:$4 sm:$0xff]  }
 0x146   : > { %4817 = vmatprep.subr.bf16.mxu0 %v7202_v13  ;;  %v7272_v27 = vld [vmem:[%s7837_s20 + $0x610] ss:$24 sps:$4 sm:$0xff]   ;;  %v7277_v13 = vld [vmem:[%s7837_s20 + $0x7bc] ss:$24 sps:$4 sm:$0xff]  }
 0x148   : > { %4547 = vmatpush1.bf16.msra.mxu1 %v7197_v14  ;;  %v7280_v14 = vld [vmem:[%s7837_s20 + $0x644] ss:$24 sps:$4 sm:$0xff]  }
 0x149   : > { %4818 = vmatpush1.bf16.msra.mxu0 %v7200_v16  ;;  %4548 = vmatprep.subr.bf16.mxu1 %v7205_v17  ;;  %v7275_v16 = vld [vmem:[%s7837_s20 + $0x7b8] ss:$24 sps:$4 sm:$0xff]  }
 0x14a   : > { %4819 = vmatprep.subr.bf16.mxu0 %v7208_v18  ;;  %v7278_v17 = vld [vmem:[%s7837_s20 + $0x640] ss:$24 sps:$4 sm:$0xff]   ;;  %v7283_v18 = vld [vmem:[%s7837_s20 + $0x7ec] ss:$24 sps:$4 sm:$0xff]  }
 0x14c   : > { %4549 = vmatpush1.bf16.msra.mxu1 %v7203_v19  ;;  %v7286_v19 = vld [vmem:[%s7837_s20 + $0x674] ss:$24 sps:$4 sm:$0xff]  }
 0x14d   : > { %4820 = vmatpush1.bf16.msra.mxu0 %v7206_v20  ;;  %4550 = vmatprep.subr.bf16.mxu1 %v7211_v23  ;;  %v7281_v20 = vld [vmem:[%s7837_s20 + $0x7e8] ss:$24 sps:$4 sm:$0xff]   ;;  %v7289_v23 = vld [vmem:[%s7837_s20 + $0x81c] ss:$24 sps:$4 sm:$0xff]  }
 0x14e   : > { %4821 = vmatprep.subr.bf16.mxu0 %v7214_v24  ;;  %v7292_v24 = vld [vmem:[%s7837_s20 + $0x6a4] ss:$24 sps:$4 sm:$0xff]  }
 0x150   : > { %4551 = vmatpush1.bf16.msra.mxu1 %v7209_v25  ;;  %v7287_v25 = vld [vmem:[%s7837_s20 + $0x818] ss:$24 sps:$4 sm:$0xff]  }
 0x151   : > { %4822 = vmatpush1.bf16.msra.mxu0 %v7212_v26  ;;  %4552 = vmatprep.subr.bf16.mxu1 %v7217_v28  ;;  %v7290_v26 = vld [vmem:[%s7837_s20 + $0x6a0] ss:$24 sps:$4 sm:$0xff]   ;;  %v7298_v28 = vld [vmem:[%s7837_s20 + $0x6d4] ss:$24 sps:$4 sm:$0xff]  }
 0x152   : > { %4823 = vmatprep.subr.bf16.mxu0 %v7220_v29  ;;  %v7293_v29 = vld [vmem:[%s7837_s20 + $0x848] ss:$24 sps:$4 sm:$0xff]  }
 0x154   : > { %4553 = vmatpush1.bf16.msra.mxu1 %v7215_v30  ;;  %v7296_v30 = vld [vmem:[%s7837_s20 + $0x6d0] ss:$24 sps:$4 sm:$0xff]  }
 0x155   : > { %4824 = vmatpush1.bf16.msra.mxu0 %v7218_v31  ;;  %4563 = vmatprep.subr.bf16.mxu1 %v7223_v32  ;;  %v7301_v31 = vld [vmem:[%s7837_s20 + $0x87c] ss:$24 sps:$4 sm:$0xff]  }
 0x156   : > { %4825 = vmatprep.subr.bf16.mxu0 %v7226_v33  ;;  %v7304_v32 = vld [vmem:[%s7837_s20 + $0x704] ss:$24 sps:$4 sm:$0xff]   ;;  %v7299_v33 = vld [vmem:[%s7837_s20 + $0x878] ss:$24 sps:$4 sm:$0xff]  }
 0x157   : > { %4555 = vmatmul.mubr.bf16.vlgmr.msra.gmra.mrb[4].mxu1 %v8031_v42 }
 0x158   : > { %4564 = vmatpush1.bf16.msra.mxu1 %v7221_v36  ;;  %4595 = vmatprep.mubr.bf16.mxu1 %v8040_v48  ;;  %v7302_v36 = vld [vmem:[%s7837_s20 + $0x700] ss:$24 sps:$4 sm:$0xff]  }
 0x159   : > { %4826 = vmatpush1.bf16.msra.mxu0 %v7224_v37  ;;  %4565 = vmatprep.subr.bf16.mxu1 %v7229_v38  ;;  %v7307_v37 = vld [vmem:[%s7837_s20 + $0x8ac] ss:$24 sps:$4 sm:$0xff]  }
 0x15a   : > { %4827 = vmatprep.subr.bf16.mxu0 %v7232_v39  ;;  %v7310_v38 = vld [vmem:[%s7837_s20 + $0x734] ss:$24 sps:$4 sm:$0xff]   ;;  %v7305_v39 = vld [vmem:[%s7837_s20 + $0x8a8] ss:$24 sps:$4 sm:$0xff]  }
 0x15c   : > { %4566 = vmatpush1.bf16.msra.mxu1 %v7227_v57  ;;  %v7308_v57 = vld [vmem:[%s7837_s20 + $0x730] ss:$24 sps:$4 sm:$0xff]  }
 0x15d   : > { %4828 = vmatpush1.bf16.msra.mxu0 %v7230_v41  ;;  %4567 = vmatprep.subr.bf16.mxu1 %v7235_v45  ;;  %v7313_v41 = vld [vmem:[%s7837_s20 + $0x8dc] ss:$24 sps:$4 sm:$0xff]  }
 0x15e   : > { %4829 = vmatprep.subr.bf16.mxu0 %v7238_v46  ;;  %v7316_v45 = vld [vmem:[%s7837_s20 + $0x764] ss:$24 sps:$4 sm:$0xff]   ;;  %v7311_v46 = vld [vmem:[%s7837_s20 + $0x8d8] ss:$24 sps:$4 sm:$0xff]  }
 0x160   : > { %4568 = vmatpush1.bf16.msra.mxu1 %v7233_v47  ;;  %v7314_v47 = vld [vmem:[%s7837_s20 + $0x760] ss:$24 sps:$4 sm:$0xff]  }
 0x161   : > { %4830 = vmatpush1.bf16.msra.mxu0 %v7236_v15  ;;  %4569 = vmatprep.subr.bf16.mxu1 %v7241_v51  ;;  %v7319_v15 = vld [vmem:[%s7837_s20 + $0x90c] ss:$24 sps:$4 sm:$0xff]  }
 0x162   : > { %4831 = vmatprep.subr.bf16.mxu0 %v7244_v52  ;;  %v7322_v51 = vld [vmem:[%s7837_s20 + $0x794] ss:$24 sps:$4 sm:$0xff]   ;;  %v7317_v52 = vld [vmem:[%s7837_s20 + $0x908] ss:$24 sps:$4 sm:$0xff]  }
 0x164   : > { %4570 = vmatpush1.bf16.msra.mxu1 %v7239_v53  ;;  %v7320_v53 = vld [vmem:[%s7837_s20 + $0x790] ss:$24 sps:$4 sm:$0xff]  }
 0x165   : > { %4832 = vmatpush1.bf16.msra.mxu0 %v7242_v54  ;;  %4571 = vmatprep.subr.bf16.mxu1 %v7247_v55  ;;  %v7325_v54 = vld [vmem:[%s7837_s20 + $0x93c] ss:$24 sps:$4 sm:$0xff]  }
 0x166   : > { %4833 = vmatprep.subr.bf16.mxu0 %v7250_v56  ;;  %v7328_v55 = vld [vmem:[%s7837_s20 + $0x7c4] ss:$24 sps:$4 sm:$0xff]   ;;  %v7323_v56 = vld [vmem:[%s7837_s20 + $0x938] ss:$24 sps:$4 sm:$0xff]  }
 0x168   : > { %4572 = vmatpush1.bf16.msra.mxu1 %v7245_v58  ;;  %v7326_v58 = vld [vmem:[%s7837_s20 + $0x7c0] ss:$24 sps:$4 sm:$0xff]  }
 0x169   : > { %4834 = vmatpush1.bf16.msra.mxu0 %v7248_v59  ;;  %4573 = vmatprep.subr.bf16.mxu1 %v7253_v62  ;;  %v7331_v59 = vld [vmem:[%s7837_s20 + $0x96c] ss:$24 sps:$4 sm:$0xff]  }
 0x16a   : > { %4835 = vmatprep.subr.bf16.mxu0 %v7256_v60  ;;  %v7334_v62 = vld [vmem:[%s7837_s20 + $0x7f4] ss:$24 sps:$4 sm:$0xff]   ;;  %v7329_v60 = vld [vmem:[%s7837_s20 + $0x968] ss:$24 sps:$4 sm:$0xff]  }
 0x16c   : > { %4574 = vmatpush1.bf16.msra.mxu1 %v7251_v0  ;;  %v7332_v0 = vld [vmem:[%s7837_s20 + $0x7f0] ss:$24 sps:$4 sm:$0xff]  }
 0x16d   : > { %4836 = vmatpush1.bf16.msra.mxu0 %v7254_v2  ;;  %4575 = vmatprep.subr.bf16.mxu1 %v7259_v3  ;;  %v7337_v2 = vld [vmem:[%s7837_s20 + $0x99c] ss:$24 sps:$4 sm:$0xff]  }
 0x16e   : > { %4837 = vmatprep.subr.bf16.mxu0 %v7262_v4  ;;  %v7340_v3 = vld [vmem:[%s7837_s20 + $0x824] ss:$24 sps:$4 sm:$0xff]   ;;  %v7335_v4 = vld [vmem:[%s7837_s20 + $0x998] ss:$24 sps:$4 sm:$0xff]  }
 0x170   : > { %4576 = vmatpush1.bf16.msra.mxu1 %v7257_v34  ;;  %v7338_v34 = vld [vmem:[%s7837_s20 + $0x820] ss:$24 sps:$4 sm:$0xff]  }
 0x171   : > { %4838 = vmatpush1.bf16.msra.mxu0 %v7260_v35  ;;  %4577 = vmatprep.subr.bf16.mxu1 %v7265_v6  ;;  %v7343_v35 = vld [vmem:[%s7837_s20 + $0x9cc] ss:$24 sps:$4 sm:$0xff]  }
 0x172   : > { %4839 = vmatprep.subr.bf16.mxu0 %v7268_v7  ;;  %v7346_v6 = vld [vmem:[%s7837_s20 + $0x854] ss:$24 sps:$4 sm:$0xff]   ;;  %v7341_v7 = vld [vmem:[%s7837_s20 + $0x9c8] ss:$24 sps:$4 sm:$0xff]  }
 0x174   : > { %4578 = vmatpush1.bf16.msra.mxu1 %v7263_v21  ;;  %v7344_v21 = vld [vmem:[%s7837_s20 + $0x850] ss:$24 sps:$4 sm:$0xff]  }
 0x175   : > { %4840 = vmatpush1.bf16.msra.mxu0 %v7266_v9  ;;  %4579 = vmatprep.subr.bf16.mxu1 %v7271_v10  ;;  %v7349_v9 = vld [vmem:[%s7837_s20 + $0x9fc] ss:$24 sps:$4 sm:$0xff]  }
 0x176   : > { %4850 = vmatprep.subr.bf16.mxu0 %v7274_v11  ;;  %v7352_v10 = vld [vmem:[%s7837_s20 + $0x884] ss:$24 sps:$4 sm:$0xff]   ;;  %v7347_v11 = vld [vmem:[%s7837_s20 + $0x9f8] ss:$24 sps:$4 sm:$0xff]  }
 0x178   : > { %4842 = vmatmul.mubr.bf16.vlgmr.msra.gmra.mrb[4].mxu0 %v8031_v42  ;;  %4580 = vmatpush1.bf16.msra.mxu1 %v7269_v12  ;;  %v7284_v42 = vld [vmem:[%s7837_s20 + $0x670] ss:$24 sps:$4 sm:$0xff]   ;;  %v7350_v12 = vld [vmem:[%s7837_s20 + $0x880] ss:$24 sps:$4 sm:$0xff]  }
 0x179   : > { %4851 = vmatpush1.bf16.msra.mxu0 %v7272_v27  ;;  %4581 = vmatprep.subr.bf16.mxu1 %v7277_v13  ;;  %v7355_v27 = vld [vmem:[%s7837_s20 + $0xa2c] ss:$24 sps:$4 sm:$0xff]  }
 0x17a   : > { %4852 = vmatprep.subr.bf16.mxu0 %v7280_v14  ;;  %4882 = vmatprep.mubr.bf16.mxu0 %v8040_v48  ;;  %v7295_v48 = vld [vmem:[%s7837_s20 + $0x84c] ss:$24 sps:$4 sm:$0xff]  }
 0x17b   : > { %v7358_v13 = vld [vmem:[%s7837_s20 + $0x8b4] ss:$24 sps:$4 sm:$0xff]  }
 0x17c   : > { %4582 = vmatpush1.bf16.msra.mxu1 %v7275_v16 }
 0x17d   : > { %4853 = vmatpush1.bf16.msra.mxu0 %v7278_v17  ;;  %4583 = vmatprep.subr.bf16.mxu1 %v7283_v18  ;;  %v7353_v18 = vld [vmem:[%s7837_s20 + $0xa28] ss:$24 sps:$4 sm:$0xff]  }
 0x17e   : > { %4854 = vmatprep.subr.bf16.mxu0 %v7286_v19  ;;  %v7356_v19 = vld [vmem:[%s7837_s20 + $0x8b0] ss:$24 sps:$4 sm:$0xff]  }
 0x180   : > { %4584 = vmatpush1.bf16.msra.mxu1 %v7281_v20 }
 0x181   : > { %4855 = vmatpush1.bf16.msra.mxu0 %v7284_v42  ;;  %4585 = vmatprep.subr.bf16.mxu1 %v7289_v23  ;;  %v7361_v42 = vld [vmem:[%s7837_s20 + $0xa5c] ss:$24 sps:$4 sm:$0xff]  }
 0x182   : > { %4856 = vmatprep.subr.bf16.mxu0 %v7292_v24  ;;  %v7364_v23 = vld [vmem:[%s7837_s20 + $0x8e4] ss:$24 sps:$4 sm:$0xff]   ;;  %v7359_v24 = vld [vmem:[%s7837_s20 + $0xa58] ss:$24 sps:$4 sm:$0xff]  }
 0x184   : > { %4586 = vmatpush1.bf16.msra.mxu1 %v7287_v25  ;;  %v7362_v25 = vld [vmem:[%s7837_s20 + $0x8e0] ss:$24 sps:$4 sm:$0xff]  }
 0x185   : > { %4857 = vmatpush1.bf16.msra.mxu0 %v7290_v26  ;;  %4587 = vmatprep.subr.bf16.mxu1 %v7295_v48  ;;  %v7367_v26 = vld [vmem:[%s7837_s20 + $0xa8c] ss:$24 sps:$4 sm:$0xff]  }
 0x186   : > { %4858 = vmatprep.subr.bf16.mxu0 %v7298_v28  ;;  %v7370_v48 = vld [vmem:[%s7837_s20 + $0x914] ss:$24 sps:$4 sm:$0xff]   ;;  %v7365_v28 = vld [vmem:[%s7837_s20 + $0xa88] ss:$24 sps:$4 sm:$0xff]  }
 0x188   : > { %4588 = vmatpush1.bf16.msra.mxu1 %v7293_v29  ;;  %v7368_v29 = vld [vmem:[%s7837_s20 + $0x910] ss:$24 sps:$4 sm:$0xff]  }
 0x189   : > { %4859 = vmatpush1.bf16.msra.mxu0 %v7296_v30  ;;  %4589 = vmatprep.subr.bf16.mxu1 %v7301_v31  ;;  %v7373_v30 = vld [vmem:[%s7837_s20 + $0xabc] ss:$24 sps:$4 sm:$0xff]  }
 0x18a   : > { %4860 = vmatprep.subr.bf16.mxu0 %v7304_v32  ;;  %v7376_v31 = vld [vmem:[%s7837_s20 + $0x944] ss:$24 sps:$4 sm:$0xff]   ;;  %v7371_v32 = vld [vmem:[%s7837_s20 + $0xab8] ss:$24 sps:$4 sm:$0xff]  }
 0x18c   : > { %4590 = vmatpush1.bf16.msra.mxu1 %v7299_v33  ;;  %v7374_v33 = vld [vmem:[%s7837_s20 + $0x940] ss:$24 sps:$4 sm:$0xff]  }
 0x18d   : > { %4861 = vmatpush1.bf16.msra.mxu0 %v7302_v36  ;;  %4591 = vmatprep.subr.bf16.mxu1 %v7307_v37  ;;  %v7379_v36 = vld [vmem:[%s7837_s20 + $0xaec] ss:$24 sps:$4 sm:$0xff]  }
 0x18e   : > { %4862 = vmatprep.subr.bf16.mxu0 %v7310_v38  ;;  %v7382_v37 = vld [vmem:[%s7837_s20 + $0x974] ss:$24 sps:$4 sm:$0xff]   ;;  %v7377_v38 = vld [vmem:[%s7837_s20 + $0xae8] ss:$24 sps:$4 sm:$0xff]  }
 0x190   : > { %4592 = vmatpush1.bf16.msra.mxu1 %v7305_v39  ;;  %v7385_v39 = vld [vmem:[%s7837_s20 + $0xb1c] ss:$24 sps:$4 sm:$0xff]  }
 0x191   : > { %4863 = vmatpush1.bf16.msra.mxu0 %v7308_v57  ;;  %4593 = vmatprep.subr.bf16.mxu1 %v7313_v41  ;;  %v7388_v57 = vld [vmem:[%s7837_s20 + $0x9a4] ss:$24 sps:$4 sm:$0xff]   ;;  %v7383_v41 = vld [vmem:[%s7837_s20 + $0xb18] ss:$24 sps:$4 sm:$0xff]  }
 0x192   : > { %4864 = vmatprep.subr.bf16.mxu0 %v7316_v45  ;;  %v7386_v45 = vld [vmem:[%s7837_s20 + $0x9a0] ss:$24 sps:$4 sm:$0xff]  }
 0x194   : > { %4594 = vmatpush1.bf16.msra.mxu1 %v7311_v46  ;;  %v7394_v46 = vld [vmem:[%s7837_s20 + $0x9d4] ss:$24 sps:$4 sm:$0xff]  }
 0x195   : > { %4865 = vmatpush1.bf16.msra.mxu0 %v7314_v47  ;;  %4604 = vmatprep.subr.bf16.mxu1 %v7319_v15  ;;  %v7389_v47 = vld [vmem:[%s7837_s20 + $0xb48] ss:$24 sps:$4 sm:$0xff]  }
 0x196   : > { %4866 = vmatprep.subr.bf16.mxu0 %v7322_v51  ;;  %v7392_v15 = vld [vmem:[%s7837_s20 + $0x9d0] ss:$24 sps:$4 sm:$0xff]   ;;  %v7397_v51 = vld [vmem:[%s7837_s20 + $0xb7c] ss:$24 sps:$4 sm:$0xff]  }
 0x197   : > { %4596 = vmatmul.mubr.bf16.vlgmr.msra.gmra.mrb[4].mxu1 %v8110_v63 }
 0x198   : > { %4605 = vmatpush1.bf16.msra.mxu1 %v7317_v52  ;;  %4636 = vmatprep.mubr.bf16.mxu1 %v7910_v5  ;;  %v7400_v52 = vld [vmem:[%s7837_s20 + $0xa04] ss:$24 sps:$4 sm:$0xff]  }
 0x199   : > { %4867 = vmatpush1.bf16.msra.mxu0 %v7320_v53  ;;  %4606 = vmatprep.subr.bf16.mxu1 %v7325_v54  ;;  %v7395_v53 = vld [vmem:[%s7837_s20 + $0xb78] ss:$24 sps:$4 sm:$0xff]  }
 0x19a   : > { %4868 = vmatprep.subr.bf16.mxu0 %v7328_v55  ;;  %v7398_v54 = vld [vmem:[%s7837_s20 + $0xa00] ss:$24 sps:$4 sm:$0xff]   ;;  %v7403_v55 = vld [vmem:[%s7837_s20 + $0xbac] ss:$24 sps:$4 sm:$0xff]  }
 0x19c   : > { %4607 = vmatpush1.bf16.msra.mxu1 %v7323_v56  ;;  %v7406_v56 = vld [vmem:[%s7837_s20 + $0xa34] ss:$24 sps:$4 sm:$0xff]  }
 0x19d   : > { %4869 = vmatpush1.bf16.msra.mxu0 %v7326_v58  ;;  %4608 = vmatprep.subr.bf16.mxu1 %v7331_v59 }
 0x19e   : > { %4870 = vmatprep.subr.bf16.mxu0 %v7334_v62 }
 0x1a0   : > { %4609 = vmatpush1.bf16.msra.mxu1 %v7329_v60 }
 0x1a1   : > { %4871 = vmatpush1.bf16.msra.mxu0 %v7332_v0  ;;  %4610 = vmatprep.subr.bf16.mxu1 %v7337_v2  ;;  %v7401_v2 = vld [vmem:[%s7837_s20 + $0xba8] ss:$24 sps:$4 sm:$0xff]  }
 0x1a2   : > { %4872 = vmatprep.subr.bf16.mxu0 %v7340_v3  ;;  %v7404_v3 = vld [vmem:[%s7837_s20 + $0xa30] ss:$24 sps:$4 sm:$0xff]  }
 0x1a4   : > { %4611 = vmatpush1.bf16.msra.mxu1 %v7335_v4 }
 0x1a5   : > { %4873 = vmatpush1.bf16.msra.mxu0 %v7338_v34  ;;  %4612 = vmatprep.subr.bf16.mxu1 %v7343_v35  ;;  %v7409_v34 = vld [vmem:[%s7837_s20 + $0xbdc] ss:$24 sps:$4 sm:$0xff]  }
 0x1a6   : > { %4874 = vmatprep.subr.bf16.mxu0 %v7346_v6  ;;  %v7412_v35 = vld [vmem:[%s7837_s20 + $0xa64] ss:$24 sps:$4 sm:$0xff]  }
 0x1a8   : > { %4613 = vmatpush1.bf16.msra.mxu1 %v7341_v7  ;;  %v7407_v7 = vld [vmem:[%s7837_s20 + $0xbd8] ss:$24 sps:$4 sm:$0xff]  }
 0x1a9   : > { %4875 = vmatpush1.bf16.msra.mxu0 %v7344_v21  ;;  %4614 = vmatprep.subr.bf16.mxu1 %v7349_v9  ;;  %v7410_v21 = vld [vmem:[%s7837_s20 + $0xa60] ss:$24 sps:$4 sm:$0xff]   ;;  %v7415_v9 = vld [vmem:[%s7837_s20 + $0xc0c] ss:$24 sps:$4 sm:$0xff]  }
 0x1aa   : > { %4876 = vmatprep.subr.bf16.mxu0 %v7352_v10  ;;  %v8351_v14 = vpop.f32.mrb[0].mxu1  ;;  %v7418_v10 = vld [vmem:[%s7837_s20 + $0xa94] ss:$24 sps:$4 sm:$0xff]  }
 0x1ab   : > { %v8353_v16 = vpop.f32.mrb[1].mxu1 }
 0x1ac   : > { %v4314_v17 = vpop.f32.mrb[2].mxu1  ;;  %4615 = vmatpush1.bf16.msra.mxu1 %v7347_v11  ;;  %v7413_v11 = vld [vmem:[%s7837_s20 + $0xc08] ss:$24 sps:$4 sm:$0xff]  }
 0x1ad   : > { %4877 = vmatpush1.bf16.msra.mxu0 %v7350_v12  ;;  %v4315_v20 = vpop.f32.mrb[3].mxu1  ;;  %4616 = vmatprep.subr.bf16.mxu1 %v7355_v27  ;;  %v7416_v12 = vld [vmem:[%s7837_s20 + $0xa90] ss:$24 sps:$4 sm:$0xff]   ;;  %v7421_v27 = vld [vmem:[%s7837_s20 + $0xc3c] ss:$24 sps:$4 sm:$0xff]  }
 0x1ae   : > { %4878 = vmatprep.subr.bf16.mxu0 %v7358_v13  ;;  %v7424_v13 = vld [vmem:[%s7837_s20 + $0xac4] ss:$24 sps:$4 sm:$0xff]   ;;  %v7428_v20 = vld [vmem:[%s7837_s20 + $0xaf0] ss:$24 sps:$4 sm:$0xff]  }
 0x1af   : > { %v7427_v17 = vld [vmem:[%s7837_s20 + $0xc6c] ss:$24 sps:$4 sm:$0xff]  }
 0x1b0   : > { %4617 = vmatpush1.bf16.msra.mxu1 %v7353_v18  ;;  %v7430_v18 = vld [vmem:[%s7837_s20 + $0xaf4] ss:$24 sps:$4 sm:$0xff]  }
 0x1b1   : > { %4879 = vmatpush1.bf16.msra.mxu0 %v7356_v19  ;;  %4618 = vmatprep.subr.bf16.mxu1 %v7361_v42  ;;  %v7425_v19 = vld [vmem:[%s7837_s20 + $0xc68] ss:$24 sps:$4 sm:$0xff]   ;;  %v7433_v42 = vld [vmem:[%s7837_s20 + $0xc9c] ss:$24 sps:$4 sm:$0xff]  }
 0x1b2   : > { %4880 = vmatprep.subr.bf16.mxu0 %v7364_v23  ;;  %v7436_v23 = vld [vmem:[%s7837_s20 + $0xb24] ss:$24 sps:$4 sm:$0xff]  }
 0x1b4   : > { %4619 = vmatpush1.bf16.msra.mxu1 %v7359_v24  ;;  %v7431_v24 = vld [vmem:[%s7837_s20 + $0xc98] ss:$24 sps:$4 sm:$0xff]  }
 0x1b5   : > { %4881 = vmatpush1.bf16.msra.mxu0 %v7362_v25  ;;  %4620 = vmatprep.subr.bf16.mxu1 %v7367_v26  ;;  %v7434_v25 = vld [vmem:[%s7837_s20 + $0xb20] ss:$24 sps:$4 sm:$0xff]   ;;  %v7439_v26 = vld [vmem:[%s7837_s20 + $0xccc] ss:$24 sps:$4 sm:$0xff]  }
 0x1b6   : > { %4891 = vmatprep.subr.bf16.mxu0 %v7370_v48  ;;  %v7442_v48 = vld [vmem:[%s7837_s20 + $0xb54] ss:$24 sps:$4 sm:$0xff]  }
 0x1b8   : > { %4883 = vmatmul.mubr.bf16.vlgmr.msra.gmra.mrb[4].mxu0 %v8110_v63  ;;  %4621 = vmatpush1.bf16.msra.mxu1 %v7365_v28  ;;  %v7380_v63 = vld [vmem:[%s7837_s20 + $0x970] ss:$24 sps:$4 sm:$0xff]  }
 0x1b9   : > { %4892 = vmatpush1.bf16.msra.mxu0 %v7368_v29  ;;  %4622 = vmatprep.subr.bf16.mxu1 %v7373_v30  ;;  %v7437_v28 = vld [vmem:[%s7837_s20 + $0xcc8] ss:$24 sps:$4 sm:$0xff]   ;;  %v7445_v30 = vld [vmem:[%s7837_s20 + $0xcfc] ss:$24 sps:$4 sm:$0xff]  }
 0x1ba   : > { %4893 = vmatprep.subr.bf16.mxu0 %v7376_v31  ;;  %4923 = vmatprep.mubr.bf16.mxu0 %v7910_v5  ;;  %v7391_v5 = vld [vmem:[%s7837_s20 + $0xb4c] ss:$24 sps:$4 sm:$0xff]   ;;  %v7440_v29 = vld [vmem:[%s7837_s20 + $0xb50] ss:$24 sps:$4 sm:$0xff]  }
 0x1bb   : > { %v7448_v31 = vld [vmem:[%s7837_s20 + $0xb84] ss:$24 sps:$4 sm:$0xff]  }
 0x1bc   : > { %4623 = vmatpush1.bf16.msra.mxu1 %v7371_v32  ;;  %v7443_v32 = vld [vmem:[%s7837_s20 + $0xcf8] ss:$24 sps:$4 sm:$0xff]  }
 0x1bd   : > { %4894 = vmatpush1.bf16.msra.mxu0 %v7374_v33  ;;  %4624 = vmatprep.subr.bf16.mxu1 %v7379_v36  ;;  %v7446_v33 = vld [vmem:[%s7837_s20 + $0xb80] ss:$24 sps:$4 sm:$0xff]   ;;  %v7451_v36 = vld [vmem:[%s7837_s20 + $0xd2c] ss:$24 sps:$4 sm:$0xff]  }
 0x1be   : > { %4895 = vmatprep.subr.bf16.mxu0 %v7382_v37  ;;  %v7454_v37 = vld [vmem:[%s7837_s20 + $0xbb4] ss:$24 sps:$4 sm:$0xff]  }
 0x1c0   : > { %4625 = vmatpush1.bf16.msra.mxu1 %v7377_v38  ;;  %v7449_v38 = vld [vmem:[%s7837_s20 + $0xd28] ss:$24 sps:$4 sm:$0xff]  }
 0x1c1   : > { %4896 = vmatpush1.bf16.msra.mxu0 %v7380_v63  ;;  %4626 = vmatprep.subr.bf16.mxu1 %v7385_v39  ;;  %v7452_v63 = vld [vmem:[%s7837_s20 + $0xbb0] ss:$24 sps:$4 sm:$0xff]   ;;  %v7457_v39 = vld [vmem:[%s7837_s20 + $0xd5c] ss:$24 sps:$4 sm:$0xff]  }
 0x1c2   : > { %4897 = vmatprep.subr.bf16.mxu0 %v7388_v57  ;;  %v7460_v57 = vld [vmem:[%s7837_s20 + $0xbe4] ss:$24 sps:$4 sm:$0xff]  }
 0x1c4   : > { %4627 = vmatpush1.bf16.msra.mxu1 %v7383_v41  ;;  %v7455_v41 = vld [vmem:[%s7837_s20 + $0xd58] ss:$24 sps:$4 sm:$0xff]  }
 0x1c5   : > { %4898 = vmatpush1.bf16.msra.mxu0 %v7386_v45  ;;  %4628 = vmatprep.subr.bf16.mxu1 %v7391_v5  ;;  %v7458_v45 = vld [vmem:[%s7837_s20 + $0xbe0] ss:$24 sps:$4 sm:$0xff]   ;;  %v7463_v5 = vld [vmem:[%s7837_s20 + $0xd8c] ss:$24 sps:$4 sm:$0xff]  }
 0x1c6   : > { %4899 = vmatprep.subr.bf16.mxu0 %v7394_v46  ;;  %v7466_v46 = vld [vmem:[%s7837_s20 + $0xc14] ss:$24 sps:$4 sm:$0xff]  }
 0x1c8   : > { %4629 = vmatpush1.bf16.msra.mxu1 %v7389_v47  ;;  %v7461_v47 = vld [vmem:[%s7837_s20 + $0xd88] ss:$24 sps:$4 sm:$0xff]  }
 0x1c9   : > { %4900 = vmatpush1.bf16.msra.mxu0 %v7392_v15  ;;  %4630 = vmatprep.subr.bf16.mxu1 %v7397_v51  ;;  %v7464_v15 = vld [vmem:[%s7837_s20 + $0xc10] ss:$24 sps:$4 sm:$0xff]   ;;  %v7469_v51 = vld [vmem:[%s7837_s20 + $0xdbc] ss:$24 sps:$4 sm:$0xff]  }
 0x1ca   : > { %4901 = vmatprep.subr.bf16.mxu0 %v7400_v52  ;;  %v7472_v52 = vld [vmem:[%s7837_s20 + $0xc44] ss:$24 sps:$4 sm:$0xff]  }
 0x1cb   : > { %v4474_v58 = vpop.f32.mrb[0].mxu0 }
 0x1cc   : > { %v8390_v59 = vadd.f32 %v4474_v58, %v8351_v14  ;;  %v4476_v62 = vpop.f32.mrb[1].mxu0  ;;  %4631 = vmatpush1.bf16.msra.mxu1 %v7395_v53  ;;  %v7419_v14 = vld [vmem:[%s7837_s20 + $0xc38] ss:$24 sps:$4 sm:$0xff]   ;;  %v7473_v58 = vld [vmem:[%s7837_s20 + $0xde8] ss:$24 sps:$4 sm:$0xff]  }
 0x1cd   : > { %v8393_v60 = vadd.f32 %v4476_v62, %v8353_v16  ;;  %v4478_v0 = vpop.f32.mrb[2].mxu0  ;;  %4902 = vmatpush1.bf16.msra.mxu0 %v7398_v54  ;;  %4632 = vmatprep.subr.bf16.mxu1 %v7403_v55  ;;  %v7422_v16 = vld [vmem:[%s7837_s20 + $0xac0] ss:$24 sps:$4 sm:$0xff]   ;;  %v7475_v55 = vld [vmem:[%s7837_s20 + $0xdec] ss:$24 sps:$4 sm:$0xff]  }
 0x1ce   : > { %v4479_v4 = vpop.f32.mrb[3].mxu0  ;;  %4903 = vmatprep.subr.bf16.mxu0 %v7406_v56  ;;  %v7467_v53 = vld [vmem:[%s7837_s20 + $0xdb8] ss:$24 sps:$4 sm:$0xff]   ;;  %v7478_v56 = vld [vmem:[%s7837_s20 + $0xc74] ss:$24 sps:$4 sm:$0xff]  }
 0x1cf   : > { %v5061_v6 = vcombine.low %v8390_v59, %v8393_v60  ;;  %v7470_v54 = vld [vmem:[%s7837_s20 + $0xc40] ss:$24 sps:$4 sm:$0xff]   ;;  %v7481_v62 = vld [vmem:[%s7837_s20 + $0xe1c] ss:$24 sps:$4 sm:$0xff]  }
 0x1d0   : > { %4633 = vmatpush1.bf16.msra.mxu1 %v7401_v2  ;;  %v7484_v0 = vld [vmem:[%s7837_s20 + $0xca4] ss:$24 sps:$4 sm:$0xff]   ;;  %v7479_v2 = vld [vmem:[%s7837_s20 + $0xe18] ss:$24 sps:$4 sm:$0xff]   ;;  %v7490_v4 = vld [vmem:[%s7837_s20 + $0xcd4] ss:$24 sps:$4 sm:$0xff]  }
 0x1d1   : > { %4904 = vmatpush1.bf16.msra.mxu0 %v7404_v3  ;;  %4634 = vmatprep.subr.bf16.mxu1 %v7409_v34  ;;  %v7482_v3 = vld [vmem:[%s7837_s20 + $0xca0] ss:$24 sps:$4 sm:$0xff]  }
 0x1d2   : > { %4905 = vmatprep.subr.bf16.mxu0 %v7412_v35  ;;  %v7485_v34 = vld [vmem:[%s7837_s20 + $0xe48] ss:$24 sps:$4 sm:$0xff]  }
 0x1d3   : > { %v7488_v35 = vld [vmem:[%s7837_s20 + $0xcd0] ss:$24 sps:$4 sm:$0xff]   ;;  %v7677_v59 = vld [vmem:[%s8849_s4 + $0x40] sm:$0xff] (!%p6478_p6)  }
 0x1d4   : > { %4635 = vmatpush1.bf16.msra.mxu1 %v7407_v7  ;;  %v7493_v7 = vld [vmem:[%s7837_s20 + $0xe7c] ss:$24 sps:$4 sm:$0xff]   ;;  %v7678_v60 = vld [vmem:[%s8849_s4] sm:$0xff] (!%p6478_p6)  }
 0x1d5   : > { %4906 = vmatpush1.bf16.msra.mxu0 %v7410_v21  ;;  %4645 = vmatprep.subr.bf16.mxu1 %v7415_v9  ;;  %v7496_v21 = vld [vmem:[%s7837_s20 + $0xd04] ss:$24 sps:$4 sm:$0xff]   ;;  %v7491_v9 = vld [vmem:[%s7837_s20 + $0xe78] ss:$24 sps:$4 sm:$0xff]  }
 0x1d6   : > { %4907 = vmatprep.subr.bf16.mxu0 %v7418_v10  ;;  %v7494_v10 = vld [vmem:[%s7837_s20 + $0xd00] ss:$24 sps:$4 sm:$0xff]  }
 0x1d7   : > { %4637 = vmatmul.mubr.bf16.vlgmr.msra.gmra.mrb[4].mxu1 %v7932_v22 }
 0x1d8   : > { %4646 = vmatpush1.bf16.msra.mxu1 %v7413_v11  ;;  %4677 = vmatprep.mubr.bf16.mxu1 %v7979_v61  ;;  %v7499_v11 = vld [vmem:[%s7837_s20 + $0xeac] ss:$24 sps:$4 sm:$0xff]  }
 0x1d9   : > { %4908 = vmatpush1.bf16.msra.mxu0 %v7416_v12  ;;  %4647 = vmatprep.subr.bf16.mxu1 %v7421_v27  ;;  %v7502_v12 = vld [vmem:[%s7837_s20 + $0xd34] ss:$24 sps:$4 sm:$0xff]   ;;  %v7497_v27 = vld [vmem:[%s7837_s20 + $0xea8] ss:$24 sps:$4 sm:$0xff]  }
 0x1da   : > { %4909 = vmatprep.subr.bf16.mxu0 %v7424_v13  ;;  %v7500_v13 = vld [vmem:[%s7837_s20 + $0xd30] ss:$24 sps:$4 sm:$0xff]  }
 0x1dc   : > { %4648 = vmatpush1.bf16.msra.mxu1 %v7419_v14  ;;  %v7505_v14 = vld [vmem:[%s7837_s20 + $0xedc] ss:$24 sps:$4 sm:$0xff]  }
 0x1dd   : > { %4910 = vmatpush1.bf16.msra.mxu0 %v7422_v16  ;;  %4649 = vmatprep.subr.bf16.mxu1 %v7427_v17  ;;  %v7508_v16 = vld [vmem:[%s7837_s20 + $0xd64] ss:$24 sps:$4 sm:$0xff]   ;;  %v7503_v17 = vld [vmem:[%s7837_s20 + $0xed8] ss:$24 sps:$4 sm:$0xff]  }
 0x1de   : > { %4911 = vmatprep.subr.bf16.mxu0 %v7430_v18  ;;  %v7506_v18 = vld [vmem:[%s7837_s20 + $0xd60] ss:$24 sps:$4 sm:$0xff]  }
 0x1e0   : > { %4650 = vmatpush1.bf16.msra.mxu1 %v7425_v19  ;;  %v7511_v19 = vld [vmem:[%s7837_s20 + $0xf0c] ss:$24 sps:$4 sm:$0xff]  }
 0x1e1   : > { %4912 = vmatpush1.bf16.msra.mxu0 %v7428_v20  ;;  %4651 = vmatprep.subr.bf16.mxu1 %v7433_v42  ;;  %v7514_v20 = vld [vmem:[%s7837_s20 + $0xd94] ss:$24 sps:$4 sm:$0xff]   ;;  %v7509_v42 = vld [vmem:[%s7837_s20 + $0xf08] ss:$24 sps:$4 sm:$0xff]  }
 0x1e2   : > { %4913 = vmatprep.subr.bf16.mxu0 %v7436_v23  ;;  %v7512_v23 = vld [vmem:[%s7837_s20 + $0xd90] ss:$24 sps:$4 sm:$0xff]  }
 0x1e4   : > { %4652 = vmatpush1.bf16.msra.mxu1 %v7431_v24  ;;  %v7517_v24 = vld [vmem:[%s7837_s20 + $0xf3c] ss:$24 sps:$4 sm:$0xff]  }
 0x1e5   : > { %4914 = vmatpush1.bf16.msra.mxu0 %v7434_v25  ;;  %4653 = vmatprep.subr.bf16.mxu1 %v7439_v26  ;;  %v7520_v25 = vld [vmem:[%s7837_s20 + $0xdc4] ss:$24 sps:$4 sm:$0xff]   ;;  %v7515_v26 = vld [vmem:[%s7837_s20 + $0xf38] ss:$24 sps:$4 sm:$0xff]  }
 0x1e6   : > { %4915 = vmatprep.subr.bf16.mxu0 %v7442_v48  ;;  %v7518_v48 = vld [vmem:[%s7837_s20 + $0xdc0] ss:$24 sps:$4 sm:$0xff]  }
 0x1e8   : > { %4654 = vmatpush1.bf16.msra.mxu1 %v7437_v28  ;;  %v7523_v28 = vld [vmem:[%s7837_s20 + $0xf6c] ss:$24 sps:$4 sm:$0xff]  }
 0x1e9   : > { %4916 = vmatpush1.bf16.msra.mxu0 %v7440_v29  ;;  %4655 = vmatprep.subr.bf16.mxu1 %v7445_v30  ;;  %v7526_v29 = vld [vmem:[%s7837_s20 + $0xdf4] ss:$24 sps:$4 sm:$0xff]   ;;  %v7521_v30 = vld [vmem:[%s7837_s20 + $0xf68] ss:$24 sps:$4 sm:$0xff]  }
 0x1ea   : > { %4917 = vmatprep.subr.bf16.mxu0 %v7448_v31  ;;  %v7524_v31 = vld [vmem:[%s7837_s20 + $0xdf0] ss:$24 sps:$4 sm:$0xff]  }
 0x1ec   : > { %4656 = vmatpush1.bf16.msra.mxu1 %v7443_v32  ;;  %v7529_v32 = vld [vmem:[%s7837_s20 + $0xf9c] ss:$24 sps:$4 sm:$0xff]  }
 0x1ed   : > { %4918 = vmatpush1.bf16.msra.mxu0 %v7446_v33  ;;  %4657 = vmatprep.subr.bf16.mxu1 %v7451_v36  ;;  %v7532_v33 = vld [vmem:[%s7837_s20 + $0xe24] ss:$24 sps:$4 sm:$0xff]   ;;  %v7527_v36 = vld [vmem:[%s7837_s20 + $0xf98] ss:$24 sps:$4 sm:$0xff]  }
 0x1ee   : > { %4919 = vmatprep.subr.bf16.mxu0 %v7454_v37  ;;  %v7530_v37 = vld [vmem:[%s7837_s20 + $0xe20] ss:$24 sps:$4 sm:$0xff]  }
 0x1f0   : > { %4658 = vmatpush1.bf16.msra.mxu1 %v7449_v38  ;;  %v7535_v38 = vld [vmem:[%s7837_s20 + $0xfcc] ss:$24 sps:$4 sm:$0xff]  }
 0x1f1   : > { %4920 = vmatpush1.bf16.msra.mxu0 %v7452_v63  ;;  %4659 = vmatprep.subr.bf16.mxu1 %v7457_v39  ;;  %v7538_v63 = vld [vmem:[%s7837_s20 + $0xe54] ss:$24 sps:$4 sm:$0xff]   ;;  %v7533_v39 = vld [vmem:[%s7837_s20 + $0xfc8] ss:$24 sps:$4 sm:$0xff]  }
 0x1f2   : > { %4921 = vmatprep.subr.bf16.mxu0 %v7460_v57  ;;  %v7536_v57 = vld [vmem:[%s7837_s20 + $0xe50] ss:$24 sps:$4 sm:$0xff]  }
 0x1f4   : > { %4660 = vmatpush1.bf16.msra.mxu1 %v7455_v41  ;;  %v7541_v41 = vld [vmem:[%s7837_s20 + $0xffc] ss:$24 sps:$4 sm:$0xff]  }
 0x1f5   : > { %4922 = vmatpush1.bf16.msra.mxu0 %v7458_v45  ;;  %4661 = vmatprep.subr.bf16.mxu1 %v7463_v5  ;;  %v7544_v45 = vld [vmem:[%s7837_s20 + $0xe84] ss:$24 sps:$4 sm:$0xff]   ;;  %v7539_v5 = vld [vmem:[%s7837_s20 + $0xff8] ss:$24 sps:$4 sm:$0xff]  }
 0x1f6   : > { %4932 = vmatprep.subr.bf16.mxu0 %v7466_v46  ;;  %v7542_v46 = vld [vmem:[%s7837_s20 + $0xe80] ss:$24 sps:$4 sm:$0xff]  }
 0x1f8   : > { %4924 = vmatmul.mubr.bf16.vlgmr.msra.gmra.mrb[4].mxu0 %v7932_v22  ;;  %4662 = vmatpush1.bf16.msra.mxu1 %v7461_v47  ;;  %v7476_v22 = vld [vmem:[%s7837_s20 + $0xc70] ss:$24 sps:$4 sm:$0xff]   ;;  %v7547_v47 = vld [vmem:[%s7837_s20 + $0x102c] ss:$24 sps:$4 sm:$0xff]  }
 0x1f9   : > { %4933 = vmatpush1.bf16.msra.mxu0 %v7464_v15  ;;  %4663 = vmatprep.subr.bf16.mxu1 %v7469_v51  ;;  %v7550_v15 = vld [vmem:[%s7837_s20 + $0xeb4] ss:$24 sps:$4 sm:$0xff]   ;;  %v7545_v51 = vld [vmem:[%s7837_s20 + $0x1028] ss:$24 sps:$4 sm:$0xff]  }
 0x1fa   : > { %4934 = vmatprep.subr.bf16.mxu0 %v7472_v52  ;;  %4964 = vmatprep.mubr.bf16.mxu0 %v7979_v61  ;;  %v7487_v61 = vld [vmem:[%s7837_s20 + $0xe4c] ss:$24 sps:$4 sm:$0xff]   ;;  %v7548_v52 = vld [vmem:[%s7837_s20 + $0xeb0] ss:$24 sps:$4 sm:$0xff]  }
 0x1fc   : > { %4664 = vmatpush1.bf16.msra.mxu1 %v7467_v53  ;;  %v7553_v53 = vld [vmem:[%s7837_s20 + $0x105c] ss:$24 sps:$4 sm:$0xff]  }
 0x1fd   : > { %4935 = vmatpush1.bf16.msra.mxu0 %v7470_v54  ;;  %4665 = vmatprep.subr.bf16.mxu1 %v7475_v55  ;;  %v7556_v54 = vld [vmem:[%s7837_s20 + $0xee4] ss:$24 sps:$4 sm:$0xff]   ;;  %v7551_v55 = vld [vmem:[%s7837_s20 + $0x1058] ss:$24 sps:$4 sm:$0xff]  }
 0x1fe   : > { %4936 = vmatprep.subr.bf16.mxu0 %v7478_v56  ;;  %v7554_v56 = vld [vmem:[%s7837_s20 + $0xee0] ss:$24 sps:$4 sm:$0xff]  }
 0x200   : > { %4666 = vmatpush1.bf16.msra.mxu1 %v7473_v58  ;;  %v7559_v58 = vld [vmem:[%s7837_s20 + $0x108c] ss:$24 sps:$4 sm:$0xff]  }
 0x201   : > { %4937 = vmatpush1.bf16.msra.mxu0 %v7476_v22  ;;  %4667 = vmatprep.subr.bf16.mxu1 %v7481_v62  ;;  %v7562_v22 = vld [vmem:[%s7837_s20 + $0xf14] ss:$24 sps:$4 sm:$0xff]   ;;  %v7557_v62 = vld [vmem:[%s7837_s20 + $0x1088] ss:$24 sps:$4 sm:$0xff]  }
 0x202   : > { %4938 = vmatprep.subr.bf16.mxu0 %v7484_v0  ;;  %v7560_v0 = vld [vmem:[%s7837_s20 + $0xf10] ss:$24 sps:$4 sm:$0xff]  }
 0x204   : > { %4668 = vmatpush1.bf16.msra.mxu1 %v7479_v2  ;;  %v7565_v2 = vld [vmem:[%s7837_s20 + $0x10bc] ss:$24 sps:$4 sm:$0xff]  }
 0x205   : > { %4939 = vmatpush1.bf16.msra.mxu0 %v7482_v3  ;;  %4669 = vmatprep.subr.bf16.mxu1 %v7487_v61  ;;  %v7568_v3 = vld [vmem:[%s7837_s20 + $0xf44] ss:$24 sps:$4 sm:$0xff]   ;;  %v7563_v61 = vld [vmem:[%s7837_s20 + $0x10b8] ss:$24 sps:$4 sm:$0xff]  }
 0x206   : > { %4940 = vmatprep.subr.bf16.mxu0 %v7490_v4  ;;  %v7566_v4 = vld [vmem:[%s7837_s20 + $0xf40] ss:$24 sps:$4 sm:$0xff]  }
 0x208   : > { %4670 = vmatpush1.bf16.msra.mxu1 %v7485_v34  ;;  %v7571_v34 = vld [vmem:[%s7837_s20 + $0x10ec] ss:$24 sps:$4 sm:$0xff]  }
 0x209   : > { %4941 = vmatpush1.bf16.msra.mxu0 %v7488_v35  ;;  %4671 = vmatprep.subr.bf16.mxu1 %v7493_v7  ;;  %v7574_v35 = vld [vmem:[%s7837_s20 + $0xf74] ss:$24 sps:$4 sm:$0xff]   ;;  %v7569_v7 = vld [vmem:[%s7837_s20 + $0x10e8] ss:$24 sps:$4 sm:$0xff]  }
 0x20a   : > { %4942 = vmatprep.subr.bf16.mxu0 %v7496_v21  ;;  %v7577_v21 = vld [vmem:[%s7837_s20 + $0x111c] ss:$24 sps:$4 sm:$0xff]  }
 0x20c   : > { %4672 = vmatpush1.bf16.msra.mxu1 %v7491_v9  ;;  %v7580_v9 = vld [vmem:[%s7837_s20 + $0xfa4] ss:$24 sps:$4 sm:$0xff]  }
 0x20d   : > { %4943 = vmatpush1.bf16.msra.mxu0 %v7494_v10  ;;  %4673 = vmatprep.subr.bf16.mxu1 %v7499_v11  ;;  %v7575_v10 = vld [vmem:[%s7837_s20 + $0x1118] ss:$24 sps:$4 sm:$0xff]  }
 0x20e   : > { %4944 = vmatprep.subr.bf16.mxu0 %v7502_v12  ;;  %v7578_v11 = vld [vmem:[%s7837_s20 + $0xfa0] ss:$24 sps:$4 sm:$0xff]   ;;  %v7586_v12 = vld [vmem:[%s7837_s20 + $0xfd4] ss:$24 sps:$4 sm:$0xff]  }
 0x210   : > { %4674 = vmatpush1.bf16.msra.mxu1 %v7497_v27  ;;  %v7581_v27 = vld [vmem:[%s7837_s20 + $0x1148] ss:$24 sps:$4 sm:$0xff]  }
 0x211   : > { %4945 = vmatpush1.bf16.msra.mxu0 %v7500_v13  ;;  %4675 = vmatprep.subr.bf16.mxu1 %v7505_v14  ;;  %v7584_v13 = vld [vmem:[%s7837_s20 + $0xfd0] ss:$24 sps:$4 sm:$0xff]   ;;  %v7589_v14 = vld [vmem:[%s7837_s20 + $0x117c] ss:$24 sps:$4 sm:$0xff]  }
 0x212   : > { %4946 = vmatprep.subr.bf16.mxu0 %v7508_v16  ;;  %v7592_v16 = vld [vmem:[%s7837_s20 + $0x1004] ss:$24 sps:$4 sm:$0xff]  }
 0x214   : > { %4676 = vmatpush1.bf16.msra.mxu1 %v7503_v17  ;;  %v7587_v17 = vld [vmem:[%s7837_s20 + $0x1178] ss:$24 sps:$4 sm:$0xff]  }
 0x215   : > { %4947 = vmatpush1.bf16.msra.mxu0 %v7506_v18  ;;  %4686 = vmatprep.subr.bf16.mxu1 %v7511_v19  ;;  %v7590_v18 = vld [vmem:[%s7837_s20 + $0x1000] ss:$24 sps:$4 sm:$0xff]   ;;  %v7595_v19 = vld [vmem:[%s7837_s20 + $0x11ac] ss:$24 sps:$4 sm:$0xff]  }
 0x216   : > { %4948 = vmatprep.subr.bf16.mxu0 %v7514_v20  ;;  %v7598_v20 = vld [vmem:[%s7837_s20 + $0x1034] ss:$24 sps:$4 sm:$0xff]  }
 0x217   : > { %4678 = vmatmul.mubr.bf16.vlgmr.msra.gmra.mrb[4].mxu1 %v8035_v43 }
 0x218   : > { %4687 = vmatpush1.bf16.msra.mxu1 %v7509_v42  ;;  %4718 = vmatprep.mubr.bf16.mxu1 %v8042_v49  ;;  %v7593_v42 = vld [vmem:[%s7837_s20 + $0x11a8] ss:$24 sps:$4 sm:$0xff]  }
 0x219   : > { %4949 = vmatpush1.bf16.msra.mxu0 %v7512_v23  ;;  %4688 = vmatprep.subr.bf16.mxu1 %v7517_v24  ;;  %v7596_v23 = vld [vmem:[%s7837_s20 + $0x1030] ss:$24 sps:$4 sm:$0xff]   ;;  %v7601_v24 = vld [vmem:[%s7837_s20 + $0x11dc] ss:$24 sps:$4 sm:$0xff]  }
 0x21a   : > { %4950 = vmatprep.subr.bf16.mxu0 %v7520_v25  ;;  %v7604_v25 = vld [vmem:[%s7837_s20 + $0x1064] ss:$24 sps:$4 sm:$0xff]  }
 0x21c   : > { %4689 = vmatpush1.bf16.msra.mxu1 %v7515_v26  ;;  %v7599_v26 = vld [vmem:[%s7837_s20 + $0x11d8] ss:$24 sps:$4 sm:$0xff]  }
 0x21d   : > { %4951 = vmatpush1.bf16.msra.mxu0 %v7518_v48  ;;  %4690 = vmatprep.subr.bf16.mxu1 %v7523_v28  ;;  %v7602_v48 = vld [vmem:[%s7837_s20 + $0x1060] ss:$24 sps:$4 sm:$0xff]   ;;  %v7607_v28 = vld [vmem:[%s7837_s20 + $0x120c] ss:$24 sps:$4 sm:$0xff]  }
 0x21e   : > { %4952 = vmatprep.subr.bf16.mxu0 %v7526_v29  ;;  %v7610_v29 = vld [vmem:[%s7837_s20 + $0x1094] ss:$24 sps:$4 sm:$0xff]  }
 0x220   : > { %4691 = vmatpush1.bf16.msra.mxu1 %v7521_v30  ;;  %v7605_v30 = vld [vmem:[%s7837_s20 + $0x1208] ss:$24 sps:$4 sm:$0xff]  }
 0x221   : > { %4953 = vmatpush1.bf16.msra.mxu0 %v7524_v31  ;;  %4692 = vmatprep.subr.bf16.mxu1 %v7529_v32  ;;  %v7608_v31 = vld [vmem:[%s7837_s20 + $0x1090] ss:$24 sps:$4 sm:$0xff]   ;;  %v7613_v32 = vld [vmem:[%s7837_s20 + $0x123c] ss:$24 sps:$4 sm:$0xff]  }
 0x222   : > { %4954 = vmatprep.subr.bf16.mxu0 %v7532_v33  ;;  %v7616_v33 = vld [vmem:[%s7837_s20 + $0x10c4] ss:$24 sps:$4 sm:$0xff]  }
 0x224   : > { %4693 = vmatpush1.bf16.msra.mxu1 %v7527_v36  ;;  %v7611_v36 = vld [vmem:[%s7837_s20 + $0x1238] ss:$24 sps:$4 sm:$0xff]  }
 0x225   : > { %4955 = vmatpush1.bf16.msra.mxu0 %v7530_v37  ;;  %4694 = vmatprep.subr.bf16.mxu1 %v7535_v38  ;;  %v7614_v37 = vld [vmem:[%s7837_s20 + $0x10c0] ss:$24 sps:$4 sm:$0xff]   ;;  %v7619_v38 = vld [vmem:[%s7837_s20 + $0x126c] ss:$24 sps:$4 sm:$0xff]  }
 0x226   : > { %4956 = vmatprep.subr.bf16.mxu0 %v7538_v63  ;;  %v7622_v63 = vld [vmem:[%s7837_s20 + $0x10f4] ss:$24 sps:$4 sm:$0xff]  }
 0x228   : > { %4695 = vmatpush1.bf16.msra.mxu1 %v7533_v39  ;;  %v7617_v39 = vld [vmem:[%s7837_s20 + $0x1268] ss:$24 sps:$4 sm:$0xff]  }
 0x229   : > { %4957 = vmatpush1.bf16.msra.mxu0 %v7536_v57  ;;  %4696 = vmatprep.subr.bf16.mxu1 %v7541_v41  ;;  %v7620_v57 = vld [vmem:[%s7837_s20 + $0x10f0] ss:$24 sps:$4 sm:$0xff]   ;;  %v7625_v41 = vld [vmem:[%s7837_s20 + $0x129c] ss:$24 sps:$4 sm:$0xff]  }
 0x22a   : > { %4958 = vmatprep.subr.bf16.mxu0 %v7544_v45  ;;  %v7628_v45 = vld [vmem:[%s7837_s20 + $0x1124] ss:$24 sps:$4 sm:$0xff]  }
 0x22c   : > { %4697 = vmatpush1.bf16.msra.mxu1 %v7539_v5  ;;  %v7623_v5 = vld [vmem:[%s7837_s20 + $0x1298] ss:$24 sps:$4 sm:$0xff]  }
 0x22d   : > { %4959 = vmatpush1.bf16.msra.mxu0 %v7542_v46  ;;  %4698 = vmatprep.subr.bf16.mxu1 %v7547_v47  ;;  %v7626_v46 = vld [vmem:[%s7837_s20 + $0x1120] ss:$24 sps:$4 sm:$0xff]   ;;  %v7631_v47 = vld [vmem:[%s7837_s20 + $0x12cc] ss:$24 sps:$4 sm:$0xff]  }
 0x22e   : > { %4960 = vmatprep.subr.bf16.mxu0 %v7550_v15  ;;  %v7634_v15 = vld [vmem:[%s7837_s20 + $0x1154] ss:$24 sps:$4 sm:$0xff]  }
 0x230   : > { %4699 = vmatpush1.bf16.msra.mxu1 %v7545_v51  ;;  %v7629_v51 = vld [vmem:[%s7837_s20 + $0x12c8] ss:$24 sps:$4 sm:$0xff]  }
 0x231   : > { %4961 = vmatpush1.bf16.msra.mxu0 %v7548_v52  ;;  %4700 = vmatprep.subr.bf16.mxu1 %v7553_v53  ;;  %v7632_v52 = vld [vmem:[%s7837_s20 + $0x1150] ss:$24 sps:$4 sm:$0xff]   ;;  %v7637_v53 = vld [vmem:[%s7837_s20 + $0x12fc] ss:$24 sps:$4 sm:$0xff]  }
 0x232   : > { %4962 = vmatprep.subr.bf16.mxu0 %v7556_v54  ;;  %v7640_v54 = vld [vmem:[%s7837_s20 + $0x1184] ss:$24 sps:$4 sm:$0xff]  }
 0x234   : > { %4701 = vmatpush1.bf16.msra.mxu1 %v7551_v55  ;;  %v7635_v55 = vld [vmem:[%s7837_s20 + $0x12f8] ss:$24 sps:$4 sm:$0xff]  }
 0x235   : > { %4963 = vmatpush1.bf16.msra.mxu0 %v7554_v56  ;;  %4702 = vmatprep.subr.bf16.mxu1 %v7559_v58  ;;  %v7638_v56 = vld [vmem:[%s7837_s20 + $0x1180] ss:$24 sps:$4 sm:$0xff]   ;;  %v7643_v58 = vld [vmem:[%s7837_s20 + $0x132c] ss:$24 sps:$4 sm:$0xff]  }
 0x236   : > { %4973 = vmatprep.subr.bf16.mxu0 %v7562_v22  ;;  %v7646_v22 = vld [vmem:[%s7837_s20 + $0x11b4] ss:$24 sps:$4 sm:$0xff]  }
 0x238   : > { %4965 = vmatmul.mubr.bf16.vlgmr.msra.gmra.mrb[4].mxu0 %v8035_v43  ;;  %4703 = vmatpush1.bf16.msra.mxu1 %v7557_v62  ;;  %v7572_v43 = vld [vmem:[%s7837_s20 + $0xf70] ss:$24 sps:$4 sm:$0xff]  }
 0x239   : > { %4974 = vmatpush1.bf16.msra.mxu0 %v7560_v0  ;;  %4704 = vmatprep.subr.bf16.mxu1 %v7565_v2  ;;  %v7641_v62 = vld [vmem:[%s7837_s20 + $0x1328] ss:$24 sps:$4 sm:$0xff]   ;;  %v7649_v2 = vld [vmem:[%s7837_s20 + $0x135c] ss:$24 sps:$4 sm:$0xff]  }
 0x23a   : > { %4975 = vmatprep.subr.bf16.mxu0 %v7568_v3  ;;  %5005 = vmatprep.mubr.bf16.mxu0 %v8042_v49  ;;  %v7583_v49 = vld [vmem:[%s7837_s20 + $0x114c] ss:$24 sps:$4 sm:$0xff]   ;;  %v7644_v0 = vld [vmem:[%s7837_s20 + $0x11b0] ss:$24 sps:$4 sm:$0xff]  }
 0x23b   : > { %v7652_v3 = vld [vmem:[%s7837_s20 + $0x11e4] ss:$24 sps:$4 sm:$0xff]  }
 0x23c   : > { %4705 = vmatpush1.bf16.msra.mxu1 %v7563_v61  ;;  %v7647_v61 = vld [vmem:[%s7837_s20 + $0x1358] ss:$24 sps:$4 sm:$0xff]  }
 0x23d   : > { %4976 = vmatpush1.bf16.msra.mxu0 %v7566_v4  ;;  %4706 = vmatprep.subr.bf16.mxu1 %v7571_v34  ;;  %v7650_v4 = vld [vmem:[%s7837_s20 + $0x11e0] ss:$24 sps:$4 sm:$0xff]   ;;  %v7655_v34 = vld [vmem:[%s7837_s20 + $0x1214] ss:$24 sps:$4 sm:$0xff]  }
 0x23e   : > { %4977 = vmatprep.subr.bf16.mxu0 %v7574_v35  ;;  %v7653_v35 = vld [vmem:[%s7837_s20 + $0x1210] ss:$24 sps:$4 sm:$0xff]  }
 0x240   : > { %4707 = vmatpush1.bf16.msra.mxu1 %v7569_v7  ;;  %v7658_v7 = vld [vmem:[%s7837_s20 + $0x1244] ss:$24 sps:$4 sm:$0xff]  }
 0x241   : > { %4978 = vmatpush1.bf16.msra.mxu0 %v7572_v43  ;;  %4708 = vmatprep.subr.bf16.mxu1 %v7577_v21  ;;  %v7656_v43 = vld [vmem:[%s7837_s20 + $0x1240] ss:$24 sps:$4 sm:$0xff]   ;;  %v7661_v21 = vld [vmem:[%s7837_s20 + $0x1274] ss:$24 sps:$4 sm:$0xff]  }
 0x242   : > { %4979 = vmatprep.subr.bf16.mxu0 %v7580_v9  ;;  %v7659_v9 = vld [vmem:[%s7837_s20 + $0x1270] ss:$24 sps:$4 sm:$0xff]  }
 0x244   : > { %4709 = vmatpush1.bf16.msra.mxu1 %v7575_v10  ;;  %v7664_v10 = vld [vmem:[%s7837_s20 + $0x12a4] ss:$24 sps:$4 sm:$0xff]  }
 0x245   : > { %4980 = vmatpush1.bf16.msra.mxu0 %v7578_v11  ;;  %4710 = vmatprep.subr.bf16.mxu1 %v7583_v49  ;;  %v7662_v11 = vld [vmem:[%s7837_s20 + $0x12a0] ss:$24 sps:$4 sm:$0xff]   ;;  %v7665_v49 = vld [vmem:[%s7837_s20 + $0x12d0] ss:$24 sps:$4 sm:$0xff]  }
 0x246   : > { %4981 = vmatprep.subr.bf16.mxu0 %v7586_v12  ;;  %v7670_v12 = vld [vmem:[%s7837_s20 + $0x1304] ss:$24 sps:$4 sm:$0xff]  }
 0x248   : > { %4711 = vmatpush1.bf16.msra.mxu1 %v7581_v27  ;;  %v7673_v27 = vld [vmem:[%s7837_s20 + $0x1334] ss:$24 sps:$4 sm:$0xff]  }
 0x249   : > { %4982 = vmatpush1.bf16.msra.mxu0 %v7584_v13  ;;  %4712 = vmatprep.subr.bf16.mxu1 %v7589_v14  ;;  %v7671_v13 = vld [vmem:[%s7837_s20 + $0x1330] ss:$24 sps:$4 sm:$0xff]   ;;  %v7676_v14 = vld [vmem:[%s7837_s20 + $0x1364] ss:$24 sps:$4 sm:$0xff]  }
 0x24a   : > { %4983 = vmatprep.subr.bf16.mxu0 %v7592_v16  ;;  %v7674_v16 = vld [vmem:[%s7837_s20 + $0x1360] ss:$24 sps:$4 sm:$0xff]  }
 0x24c   : > { %4713 = vmatpush1.bf16.msra.mxu1 %v7587_v17 }
 0x24d   : > { %4984 = vmatpush1.bf16.msra.mxu0 %v7590_v18  ;;  %4714 = vmatprep.subr.bf16.mxu1 %v7595_v19 }
 0x24e   : > { %4985 = vmatprep.subr.bf16.mxu0 %v7598_v20 }
 0x250   : > { %4715 = vmatpush1.bf16.msra.mxu1 %v7593_v42 }
 0x251   : > { %4986 = vmatpush1.bf16.msra.mxu0 %v7596_v23  ;;  %4716 = vmatprep.subr.bf16.mxu1 %v7601_v24  ;;  %v5069_v23 = vrot.slane %v5061_v6, %v7887_v50  ;;  %v7679_v6 = vld [vmem:[%s8849_s4 + $0xc0] sm:$0xff] (!%p6478_p6)  }
 0x252   : > { %4987 = vmatprep.subr.bf16.mxu0 %v7604_v25  ;;  %v356_v25 = vld [vmem:[#allocation2] sm:$0xff] }
 0x254   : > { %4717 = vmatpush1.bf16.msra.mxu1 %v7599_v26 }
 0x255   : > { %4988 = vmatpush1.bf16.msra.mxu0 %v7602_v48  ;;  %4727 = vmatprep.subr.bf16.mxu1 %v7607_v28 }
 0x256   : > { %4989 = vmatprep.subr.bf16.mxu0 %v7610_v29 }
 0x257   : > { %4719 = vmatmul.mubr.bf16.vlgmr.msra.gmra.mrb[4].mxu1 %v8115_v1 }
 0x258   : > { %4728 = vmatpush1.bf16.msra.mxu1 %v7605_v30  ;;  %4759 = vmatprep.mubr.bf16.mxu1 %v7761_v8 }
 0x259   : > { %4990 = vmatpush1.bf16.msra.mxu0 %v7608_v31  ;;  %4729 = vmatprep.subr.bf16.mxu1 %v7613_v32  ;;  %v357_v31 = vld [vmem:[#allocation2 + $0x8] sm:$0xf] }
 0x25a   : > { %4991 = vmatprep.subr.bf16.mxu0 %v7616_v33 }
 0x25c   : > { %4730 = vmatpush1.bf16.msra.mxu1 %v7611_v36 }
 0x25d   : > { %4992 = vmatpush1.bf16.msra.mxu0 %v7614_v37  ;;  %4731 = vmatprep.subr.bf16.mxu1 %v7619_v38  ;;  %v7680_v37 = vld [vmem:[%s8849_s4 + $0x80] sm:$0xff] (!%p6478_p6)   ;;  %v7681_v38 = vld [vmem:[%s8849_s4 + $0x48] sm:$0xff] (!%p6478_p6)  }
 0x25e   : > { %4993 = vmatprep.subr.bf16.mxu0 %v7622_v63  ;;  %v7682_v63 = vld [vmem:[%s8849_s4 + $0x8] sm:$0xff] (!%p6478_p6)  }
 0x260   : > { %4732 = vmatpush1.bf16.msra.mxu1 %v7617_v39  ;;  %v7683_v39 = vld [vmem:[%s8849_s4 + $0xc8] sm:$0xff] (!%p6478_p6)  }
 0x261   : > { %4994 = vmatpush1.bf16.msra.mxu0 %v7620_v57  ;;  %4733 = vmatprep.subr.bf16.mxu1 %v7625_v41  ;;  %v7684_v57 = vld [vmem:[%s8849_s4 + $0x88] sm:$0xff] (!%p6478_p6)   ;;  %v7685_v41 = vld [vmem:[%s8849_s4 + $0x50] sm:$0xff] (!%p6478_p6)  }
 0x262   : > { %4995 = vmatprep.subr.bf16.mxu0 %v7628_v45  ;;  %v7686_v45 = vld [vmem:[%s8849_s4 + $0x10] sm:$0xff] (!%p6478_p6)  }
 0x264   : > { %4734 = vmatpush1.bf16.msra.mxu1 %v7623_v5  ;;  %v7687_v5 = vld [vmem:[%s8849_s4 + $0xd0] sm:$0xff] (!%p6478_p6)  }
 0x265   : > { %4996 = vmatpush1.bf16.msra.mxu0 %v7626_v46  ;;  %4735 = vmatprep.subr.bf16.mxu1 %v7631_v47  ;;  %v7688_v46 = vld [vmem:[%s8849_s4 + $0x90] sm:$0xff] (!%p6478_p6)   ;;  %v7689_v47 = vld [vmem:[%s8849_s4 + $0x58] sm:$0xff] (!%p6478_p6)  }
 0x266   : > { %4997 = vmatprep.subr.bf16.mxu0 %v7634_v15  ;;  %v7690_v15 = vld [vmem:[%s8849_s4 + $0x18] sm:$0xff] (!%p6478_p6)  }
 0x268   : > { %4736 = vmatpush1.bf16.msra.mxu1 %v7629_v51  ;;  %v7691_v51 = vld [vmem:[%s8849_s4 + $0xd8] sm:$0xff] (!%p6478_p6)  }
 0x269   : > { %4998 = vmatpush1.bf16.msra.mxu0 %v7632_v52  ;;  %4737 = vmatprep.subr.bf16.mxu1 %v7637_v53  ;;  %v7692_v52 = vld [vmem:[%s8849_s4 + $0x98] sm:$0xff] (!%p6478_p6)   ;;  %v7693_v53 = vld [vmem:[%s8849_s4 + $0x60] sm:$0xff] (!%p6478_p6)  }
 0x26a   : > { %4999 = vmatprep.subr.bf16.mxu0 %v7640_v54  ;;  %v7694_v54 = vld [vmem:[%s8849_s4 + $0x20] sm:$0xff] (!%p6478_p6)  }
 0x26c   : > { %4738 = vmatpush1.bf16.msra.mxu1 %v7635_v55  ;;  %v7695_v55 = vld [vmem:[%s8849_s4 + $0xe0] sm:$0xff] (!%p6478_p6)  }
 0x26d   : > { %5000 = vmatpush1.bf16.msra.mxu0 %v7638_v56  ;;  %4739 = vmatprep.subr.bf16.mxu1 %v7643_v58  ;;  %v7696_v56 = vld [vmem:[%s8849_s4 + $0xa0] sm:$0xff] (!%p6478_p6)   ;;  %v7697_v58 = vld [vmem:[%s8849_s4 + $0x68] sm:$0xff] (!%p6478_p6)  }
 0x26e   : > { %5001 = vmatprep.subr.bf16.mxu0 %v7646_v22  ;;  %v7698_v22 = vld [vmem:[%s8849_s4 + $0x28] sm:$0xff] (!%p6478_p6)  }
 0x270   : > { %4740 = vmatpush1.bf16.msra.mxu1 %v7641_v62  ;;  %v7699_v62 = vld [vmem:[%s8849_s4 + $0xe8] sm:$0xff] (!%p6478_p6)  }
 0x271   : > { %5002 = vmatpush1.bf16.msra.mxu0 %v7644_v0  ;;  %4741 = vmatprep.subr.bf16.mxu1 %v7649_v2  ;;  %v7700_v0 = vld [vmem:[%s8849_s4 + $0xa8] sm:$0xff] (!%p6478_p6)   ;;  %v7701_v2 = vld [vmem:[%s8849_s4 + $0x70] sm:$0xff] (!%p6478_p6)  }
 0x272   : > { %5003 = vmatprep.subr.bf16.mxu0 %v7652_v3  ;;  %v5105_v3 = vsub.s32 (!%p6478_p6), 0, %v7879_v44 }
 0x274   : > { %4742 = vmatpush1.bf16.msra.mxu1 %v7647_v61  ;;  %v7702_v61 = vld [vmem:[%s8849_s4 + $0x30] sm:$0xff] (!%p6478_p6)  }
 0x275   : > { %5004 = vmatpush1.bf16.msra.mxu0 %v7650_v4  ;;  %6553 = vmatprep.subr.bf16.mxu1 (!%p6478_p6), %v7679_v6  ;;  %v5109_v4 = vsub.s32 (!%p6478_p6), 1, %v7879_v44 }
 0x276   : > { %5014 = vmatprep.subr.bf16.mxu0 %v7655_v34  ;;  %v7703_v34 = vld [vmem:[%s8849_s4 + $0xf0] sm:$0xff] (!%p6478_p6)  }
 0x277   : > { %4760 = vmatmul.mubr.bf16.vlgmr.msra.gmra.mrb[4].mxu1 %v8153_v40 }
 0x278   : > { %5006 = vmatmul.mubr.bf16.vlgmr.msra.gmra.mrb[4].mxu0 %v8115_v1  ;;  %v7667_v1 = vld [vmem:[%s7837_s20 + $0x12d4] ss:$24 sps:$4 sm:$0xff]   ;;  %6554 = vmatpush3.bf16.msra.mxu1 (!%p6478_p6), %v7680_v37 }
 0x279   : > { %5015 = vmatpush1.bf16.msra.mxu0 %v7653_v35  ;;  %5046 = vmatprep.mubr.bf16.mxu0 %v7761_v8  ;;  %v7668_v8 = vld [vmem:[%s7837_s20 + $0x1300] ss:$24 sps:$4 sm:$0xff]   ;;  %v5113_v35 = vsub.s32 (!%p6478_p6), 2, %v7879_v44 }
 0x27a   : > { %5016 = vmatprep.subr.bf16.mxu0 %v7658_v7  ;;  %6555 = vmatprep.subr.bf16.mxu1 (!%p6478_p6), %v7683_v39  ;;  %v7704_v7 = vld [vmem:[%s8849_s4 + $0xb0] sm:$0xff] (!%p6478_p6)   ;;  %v7709_v39 = vld [vmem:[%s8849_s4 + $0x100] sm:$0xff] (!%p6478_p6)  }
 0x27c   : > { %6556 = vmatpush3.bf16.msra.mxu1 (!%p6478_p6), %v7684_v57 }
 0x27d   : > { %5017 = vmatpush1.bf16.msra.mxu0 %v7656_v43  ;;  %6557 = vmatprep.subr.bf16.mxu1 (!%p6478_p6), %v7687_v5  ;;  %v5117_v43 = vsub.s32 (!%p6478_p6), 3, %v7879_v44 }
 0x27e   : > { %5018 = vmatprep.subr.bf16.mxu0 %v7661_v21  ;;  %v7705_v21 = vld [vmem:[%s8849_s4 + $0x78] sm:$0xff] (!%p6478_p6)  }
 0x280   : > { %6558 = vmatpush3.bf16.msra.mxu1 (!%p6478_p6), %v7688_v46  ;;  %v7710_v46 = vld [vmem:[%s8849_s4 + $0x108] sm:$0xff] (!%p6478_p6)  }
 0x281   : > { %5019 = vmatpush1.bf16.msra.mxu0 %v7659_v9  ;;  %6559 = vmatprep.subr.bf16.mxu1 (!%p6478_p6), %v7691_v51  ;;  %v7706_v9 = vld [vmem:[%s8849_s4 + $0x38] sm:$0xff] (!%p6478_p6)   ;;  %v7711_v51 = vld [vmem:[%s8849_s4 + $0x110] sm:$0xff] (!%p6478_p6)  }
 0x282   : > { %5020 = vmatprep.subr.bf16.mxu0 %v7664_v10  ;;  %v5121_v10 = vsub.s32 (!%p6478_p6), 4, %v7879_v44 }
 0x284   : > { %6560 = vmatpush3.bf16.msra.mxu1 (!%p6478_p6), %v7692_v52  ;;  %v7713_v52 = vld [vmem:[%s8849_s4 + $0x120] sm:$0xff] (!%p6478_p6)  }
 0x285   : > { %5021 = vmatpush1.bf16.msra.mxu0 %v7662_v11  ;;  %6561 = vmatprep.subr.bf16.mxu1 (!%p6478_p6), %v7695_v55  ;;  %v7707_v11 = vld [vmem:[%s8849_s4 + $0xf8] sm:$0xff] (!%p6478_p6)  }
 0x286   : > { %5022 = vmatprep.subr.bf16.mxu0 %v7667_v1  ;;  %v5125_v1 = vsub.s32 (!%p6478_p6), 5, %v7879_v44  ;;  %v7716_v55 = vld [vmem:[%s8849_s4 + $0x138] sm:$0xff] (!%p6478_p6)  }
 0x288   : > { %6562 = vmatpush3.bf16.msra.mxu1 (!%p6478_p6), %v7696_v56  ;;  %v7717_v56 = vld [vmem:[%s8849_s4 + $0x140] sm:$0xff] (!%p6478_p6)  }
 0x289   : > { %5023 = vmatpush1.bf16.msra.mxu0 %v7665_v49  ;;  %6563 = vmatprep.subr.bf16.mxu1 (!%p6478_p6), %v7699_v62  ;;  %v5101_v49 = vld [vmem:[%s8847_s2] sm:$0x3f] (!%p6478_p6)  ;;  %v7720_v62 = vld [vmem:[%s8849_s4 + $0x158] sm:$0x3f] (!%p6478_p6)  }
 0x28a   : > { %5024 = vmatprep.subr.bf16.mxu0 %v7670_v12  ;;  %v5106_v12 = vrot.slane (!%p6478_p6), %v5101_v49, %v5105_v3  ;;  %v5122_v44 = vrot.slane (!%p6478_p6), %v5101_v49, %v5121_v10  ;;  %v5690_v3 = vld [vmem:[%s8852_s7] sm:$0xff] (!%p6478_p6) }
 0x28c   : > { %6564 = vmatpush3.bf16.msra.mxu1 (!%p6478_p6), %v7700_v0  ;;  %v5565_v0 = vsel (!%p6478_p6), %vm5563_vm7, %v7720_v62, 0 }
 0x28d   : > { %5025 = vmatpush1.bf16.msra.mxu0 %v7668_v8  ;;  %6565 = vmatprep.subr.bf16.mxu1 (!%p6478_p6), %v7703_v34  ;;  %v5110_v8 = vrot.slane (!%p6478_p6), %v5101_v49, %v5109_v4  ;;  %v5692_v4 = vld [vmem:[%s8852_s7 + $0x10] sm:$0xff] (!%p6478_p6)  ;;  %v7763_v34 = vmov (!%p6478_p6), 0.0|0.0  }
 0x28e   : > { %5026 = vmatprep.subr.bf16.mxu0 %v7673_v27  ;;  %v5114_v27 = vrot.slane (!%p6478_p6), %v5101_v49, %v5113_v35 }
 0x290   : > { %6566 = vmatpush3.bf16.msra.mxu1 (!%p6478_p6), %v7704_v7  ;;  %v5693_v7 = vld [vmem:[%s8852_s7 + $0x18] sm:$0xff] (!%p6478_p6) }
 0x291   : > { %5027 = vmatpush1.bf16.msra.mxu0 %v7671_v13  ;;  %6567 = vmatprep.subr.bf16.mxu1 (!%p6478_p6), %v7707_v11  ;;  %v5118_v13 = vrot.slane (!%p6478_p6), %v5101_v49, %v5117_v43  ;;  %v6628_v43 = vpack.c.bf16 (!%p6478_p6), %v5693_v7, %v5692_v4  ;;  %v5696_v11 = vld [vmem:[%s8852_s7 + $0x30] sm:$0xff] (!%p6478_p6) }
 0x292   : > { %5028 = vmatprep.subr.bf16.mxu0 %v7676_v14  ;;  %v7708_v14 = vld [vmem:[%s8849_s4 + $0xb8] sm:$0xff] (!%p6478_p6)  }
 0x294   : > { %6568 = vmatpush3.bf16.msra.mxu1 (!%p6478_p6), %v7708_v14  ;;  %v5701_v14 = vld [vmem:[%s8852_s7 + $0x58] sm:$0xff] (!%p6478_p6) }
 0x295   : > { %5029 = vmatpush1.bf16.msra.mxu0 %v7674_v16  ;;  %v7762_v16 = vmov (!%p6478_p6), 0   ;;  %6624 = vmatprep.subr.bf16.mxu1 (!%p6478_p6), %v7763_v34 }
 0x296   : > { %6531 = vmatprep.subr.bf16.mxu0 (!%p6478_p6), %v7677_v59 }
 0x298   : > { %5047 = vmatmul.mubr.bf16.vlgmr.msra.gmra.mrb[4].mxu0 %v8153_v40 }
 0x299   : > { %6532 = vmatpush3.bf16.msra.mxu0 (!%p6478_p6), %v7678_v60 }
 0x29a   : > { %6533 = vmatprep.subr.bf16.mxu0 (!%p6478_p6), %v7681_v38 }
 0x29d   : > { %6534 = vmatpush3.bf16.msra.mxu0 (!%p6478_p6), %v7682_v63 }
 0x29e   : > { %6535 = vmatprep.subr.bf16.mxu0 (!%p6478_p6), %v7685_v41 }
 0x2a1   : > { %6536 = vmatpush3.bf16.msra.mxu0 (!%p6478_p6), %v7686_v45 }
 0x2a2   : > { %6537 = vmatprep.subr.bf16.mxu0 (!%p6478_p6), %v7689_v47 }
 0x2a5   : > { %6538 = vmatpush3.bf16.msra.mxu0 (!%p6478_p6), %v7690_v15 }
 0x2a6   : > { %6539 = vmatprep.subr.bf16.mxu0 (!%p6478_p6), %v7693_v53  ;;  %v7714_v53 = vld [vmem:[%s8849_s4 + $0x128] sm:$0xff] (!%p6478_p6)  }
 0x2a9   : > { %6540 = vmatpush3.bf16.msra.mxu0 (!%p6478_p6), %v7694_v54  ;;  %v7715_v54 = vld [vmem:[%s8849_s4 + $0x130] sm:$0xff] (!%p6478_p6)  }
 0x2aa   : > { %6541 = vmatprep.subr.bf16.mxu0 (!%p6478_p6), %v7697_v58  ;;  %v7718_v58 = vld [vmem:[%s8849_s4 + $0x148] sm:$0xff] (!%p6478_p6)  }
 0x2ad   : > { %6542 = vmatpush3.bf16.msra.mxu0 (!%p6478_p6), %v7698_v22  ;;  %v7719_v22 = vld [vmem:[%s8849_s4 + $0x150] sm:$0xff] (!%p6478_p6)  }
 0x2ae   : > { %6543 = vmatprep.subr.bf16.mxu0 (!%p6478_p6), %v7701_v2 }
 0x2b1   : > { %6544 = vmatpush3.bf16.msra.mxu0 (!%p6478_p6), %v7702_v61  ;;  %v5691_v61 = vld [vmem:[%s8852_s7 + $0x8] sm:$0xff] (!%p6478_p6) }
 0x2b2   : > { %6545 = vmatprep.subr.bf16.mxu0 (!%p6478_p6), %v7705_v21  ;;  %v6625_v35 = vpack.c.bf16 (!%p6478_p6), %v5691_v61, %v5690_v3  ;;  %v5694_v21 = vld [vmem:[%s8852_s7 + $0x20] sm:$0xff] (!%p6478_p6) }
 0x2b5   : > { %6546 = vmatpush3.bf16.msra.mxu0 (!%p6478_p6), %v7706_v9  ;;  %v5695_v9 = vld [vmem:[%s8852_s7 + $0x28] sm:$0xff] (!%p6478_p6) }
 0x2b6   : > { %5647 = vmatprep.subr.bf16.mxu0 (!%p6478_p6), %v7762_v16  ;;  %v6631_v10 = vpack.c.bf16 (!%p6478_p6), %v5695_v9, %v5694_v21 }
 0x34a   : > { %v4761_v17 = vpop.f32.mrb[4].mxu1 }
 0x34b   : > { %v4763_v18 = vpop.f32.mrb[5].mxu1 }
 0x34c   : > { %v5062_v19 = vcombine.low %v4761_v17, %v4763_v18  ;;  %v4765_v20 = vpop.f32.mrb[6].mxu1  ;;  %v5127_v17 = vcombine.low (!%p6478_p6), %v5106_v12, %v5110_v8  ;;  %v5128_v18 = vcombine.low (!%p6478_p6), %v5114_v27, %v5118_v13  ;;  %v5698_v12 = vld [vmem:[%s8852_s7 + $0x40] sm:$0xff] (!%p6478_p6)  ;;  %v5699_v8 = vld [vmem:[%s8852_s7 + $0x48] sm:$0xff] (!%p6478_p6)  ;;  %v5700_v13 = vld [vmem:[%s8852_s7 + $0x50] sm:$0xff] (!%p6478_p6) }
 0x34d   : > { %v4766_v42 = vpop.f32.mrb[7].mxu1  ;;  %v6637_v27 = vpack.c.bf16 (!%p6478_p6), %v5699_v8, %v5698_v12 }
 0x34e   : > { %v5076_v24 = vrot.slane %v5062_v19, %v7887_v50  ;;  %v5126_v19 = vrot.slane (!%p6478_p6), %v5101_v49, %v5125_v1  ;;  %v5135_v20 = vrot.slane (!%p6478_p6), %v5127_v17, %v7887_v50  ;;  %v5142_v42 = vrot.slane (!%p6478_p6), %v5128_v18, %v7887_v50  ;;  %v5697_v1 = vld [vmem:[%s8852_s7 + $0x38] sm:$0xff] (!%p6478_p6)  ;;  %v5702_v17 = vld [vmem:[%s8852_s7 + $0x60] sm:$0xff] (!%p6478_p6)  ;;  %v5703_v18 = vld [vmem:[%s8852_s7 + $0x68] sm:$0xff] (!%p6478_p6) }
 0x34f   : > { %v6634_v49 = vpack.c.bf16 (!%p6478_p6), %v5697_v1, %v5696_v11 }
 0x350   : > { %v5077_v26 = vcombine.low %v5069_v23, %v5076_v24  ;;  %v5143_v24 = vcombine.low (!%p6478_p6), %v5135_v20, %v5142_v42  ;;  %v5704_v20 = vld [vmem:[%s8852_s7 + $0x70] sm:$0xff] (!%p6478_p6) }
 0x352   : > { %v5088_v48 = vadd.f32 %v5077_v26, %v356_v25  ;;  %v5144_v25 = vcombine.low (!%p6478_p6), %v5122_v44, %v5126_v19  ;;  %v6643_v44 = vpack.c.bf16 (!%p6478_p6), %v5703_v18, %v5702_v17  ;;  %v7764_v19 = vmov (!%p6478_p6), 0.0  }
 0x354   : > { %5090 = vst [vmem:[#allocation2] sm:$0xff] %v5088_v48  ;;  %v5158_v48 = vld [vmem:[%s8848_s3] sm:$0xff] (!%p6478_p6) }
 0x35b   : > { %v5099_v23 = vld [vmem:[#allocation2] sm:$0xff] (!%p6478_p6) }
 0x35c   : > { %v5154_v26 = vadd.f32 (!%p6478_p6), %v5143_v24, %v5099_v23  ;;  %v6479_v23 = vld [vmem:[%s8850_s5] ss:$0 sm:$0xff] (!%p6478_p6) }
 0x36b   : > { %v5048_v28 = vpop.f32.mrb[4].mxu0 }
 0x36c   : > { %v5050_v29 = vpop.f32.mrb[5].mxu0 }
 0x36d   : > { %v5078_v30 = vcombine.low %v5048_v28, %v5050_v29  ;;  %v5052_v40 = vpop.f32.mrb[6].mxu0  ;;  %5098 = sbr.rel (%p6478_p6) target bundleno = 1369 (0x559), region = 64  ;;  %v5156_v28 = vmax.f32 (!%p6478_p6), %v5154_v26, 0.0  ;;  %v5151_v29 = vrot.slane (!%p6478_p6), %v5144_v25, %v7887_v50 }
 0x36e   : > { %v5053_v32 = vpop.f32.mrb[7].mxu0 }
 0x36f   : > { %v5085_v33 = vrot.slane %v5078_v30, %v7887_v50  ;;  %v5160_v30 = vmul.f32 (!%p6478_p6), %v5158_v48, %v5156_v28 }
 0x371   : > { %v5089_v36 = vadd.f32 %v5085_v33, %v357_v31  ;;  %v5171_v31 = vrot.slane (!%p6478_p6), %v5160_v30, %v7887_v50  ;;  %v5164_v32 = vcombine.high (!%p6478_p6), %v5160_v30, %v5160_v30 }
 0x373   : > { %5094 = vst.msk [vmem:[#allocation2 + $0x8] sm:$0xf] %vm5093_vm5, %v5089_v36  ;;  %v5159_v36 = vld [vmem:[%s8848_s3 + $0x8] sm:$0xf] (!%p6478_p6)  ;;  %v5179_v59 = vcombine.high (!%p6478_p6), %v5171_v31, %v5171_v31  ;;  %v5178_v60 = vrot.slane (!%p6478_p6), %v5164_v32, %v7887_v50  ;;  %v5195_v37 = vpack.c.bf16 (!%p6478_p6), %v5171_v31, %v5171_v31 }
 0x375   : > { %v5196_v38 = vpack.c.bf16 %v5179_v59, %v5179_v59  ;;  %v5180_v63 = vcombine.high %v5178_v60, %v5178_v60  ;;  %v5197_v41 = vpack.c.bf16 %v5178_v60, %v5178_v60 }
 0x377   : > { %5599 = vmatprep.mubr.bf16.mxu0 %v5196_v38  ;;  %v5198_v45 = vpack.c.bf16 %v5180_v63, %v5180_v63 }
 0x378   : > { %5600 = vmatmul.mubr.bf16.vlgmr.msra.gmra.mrb[0].mxu0 %v5195_v37 }
 0x379   : > { %5639 = vmatprep.mubr.bf16.mxu1 %v5198_v45  ;;  %5648 = vmatpush1.bf16.msra.mxu0 %v7709_v39 }
 0x37a   : > { %v5100_v40 = vld [vmem:[#allocation2 + $0x8] sm:$0xf]  ;;  %5640 = vmatmul.mubr.bf16.vlgmr.msra.gmra.mrb[0].mxu1 %v5197_v41  ;;  %5649 = vmatprep.subr.bf16.mxu0 %v7762_v16 }
 0x37b   : > { %v5155_v33 = vadd.f32 %v5151_v29, %v5100_v40  ;;  %6626 = vmatpush3.bf16.msra.mxu1 %v6625_v35  ;;  %6621 = vmatprep.mubr.msk.f32.mxu1 %vm7765_vm8, %v7764_v19 }
 0x37c   : > { %6627 = vmatprep.subr.bf16.mxu1 %v7763_v34 }
 0x37d   : > { %v5157_v6 = vmax.f32 %v5155_v33, 0.0  ;;  %5650 = vmatpush1.bf16.msra.mxu0 %v7710_v46 }
 0x37e   : > { %5651 = vmatprep.subr.bf16.mxu0 %v7762_v16 }
 0x37f   : > { %v5161_v57 = vmul.f32 %v5159_v36, %v5157_v6  ;;  %6629 = vmatpush3.bf16.msra.mxu1 %v6628_v43  ;;  %v5688_v6 = vld [vmem:[%s8851_s6] sm:$0x3] }
 0x380   : > { %6630 = vmatprep.subr.bf16.mxu1 %v7763_v34 }
 0x381   : > { %v5187_v5 = vrot.slane %v5161_v57, %v7887_v50  ;;  %5652 = vmatpush1.bf16.msra.mxu0 %v7711_v51  ;;  %v7712_v50 = vld [vmem:[%s8849_s4 + $0x118] sm:$0xff]   ;;  %v6525_v57 = vld [vmem:[%s8853_s8] ss:$0 sm:$0xff] }
 0x382   : > { %5653 = vmatprep.subr.bf16.mxu0 %v7762_v16 }
 0x383   : > { %v5188_v47 = vcombine.high %v5187_v5, %v5187_v5  ;;  %v5199_v2 = vpack.c.bf16 %v5187_v5, %v5187_v5  ;;  %6632 = vmatpush3.bf16.msra.mxu1 %v6631_v10 }
 0x384   : > { %6633 = vmatprep.subr.bf16.mxu1 %v7763_v34 }
 0x385   : > { %v5200_v15 = vpack.c.bf16 %v5188_v47, %v5188_v47  ;;  %5654 = vmatpush1.bf16.msra.mxu0 %v7712_v50 }
 0x386   : > { %5655 = vmatprep.subr.bf16.mxu0 %v7762_v16 }
 0x387   : > { %6524 = vmatprep.mubr.msk.bf16.mxu0 %vm5559_vm6, %v5200_v15  ;;  %6635 = vmatpush3.bf16.msra.mxu1 %v6634_v49 }
 0x388   : > { %6636 = vmatprep.subr.bf16.mxu1 %v7763_v34 }
 0x389   : > { %5656 = vmatpush1.bf16.msra.mxu0 %v7713_v52 }
 0x38a   : > { %5657 = vmatprep.subr.bf16.mxu0 %v7762_v16 }
 0x38b   : > { %6638 = vmatpush3.bf16.msra.mxu1 %v6637_v27 }
 0x38c   : > { %6639 = vmatprep.subr.bf16.mxu1 %v7763_v34 }
 0x38d   : > { %5658 = vmatpush1.bf16.msra.mxu0 %v7714_v53 }
 0x38e   : > { %5659 = vmatprep.subr.bf16.mxu0 %v7762_v16 }
 0x391   : > { %5660 = vmatpush1.bf16.msra.mxu0 %v7715_v54 }
 0x392   : > { %5661 = vmatprep.subr.bf16.mxu0 %v7762_v16 }
 0x395   : > { %5662 = vmatpush1.bf16.msra.mxu0 %v7716_v55 }
 0x396   : > { %5663 = vmatprep.subr.bf16.mxu0 %v7762_v16 }
 0x399   : > { %5664 = vmatpush1.bf16.msra.mxu0 %v7717_v56 }
 0x39a   : > { %5665 = vmatprep.subr.bf16.mxu0 %v7762_v16 }
 0x39d   : > { %5666 = vmatpush1.bf16.msra.mxu0 %v7718_v58 }
 0x39e   : > { %5667 = vmatprep.subr.bf16.mxu0 %v7762_v16 }
 0x3a1   : > { %5668 = vmatpush1.bf16.msra.mxu0 %v7719_v22 }
 0x3a2   : > { %5669 = vmatprep.subr.bf16.mxu0 %v7762_v16  ;;  %v6640_v16 = vpack.c.bf16 %v5701_v14, %v5700_v13 }
 0x3a4   : > { %6641 = vmatpush3.bf16.msra.mxu1 %v6640_v16 }
 0x3a5   : > { %5670 = vmatpush1.bf16.msra.mxu0 %v5565_v0  ;;  %6642 = vmatprep.subr.bf16.mxu1 %v7763_v34 }
 0x3a8   : > { %5680 = vmatmul.mubr.bf16.vlgmr.msra.gmra.mrb[4].mxu0 %v5199_v2  ;;  %6644 = vmatpush3.bf16.msra.mxu1 %v6643_v44 }
 0x3a9   : > { %6619 = vmatprep.subr.mxu1 %v7764_v19 }
 0x3ac   : > { %6620 = vmatpush3.msra.mxu1 %v5704_v20 }
 0x44b   : > { %v6547_v42 = vpop.f32.mrb[0].mxu0 }
 0x44c   : > { %v6548_v24 = vpop.f32.mrb[1].mxu0 }
 0x44d   : > { %v6549_v25 = vadd.f32 %v6548_v24, %v6547_v42  ;;  %v6550_v26 = vpop.f32.mrb[2].mxu0  ;;  %v6569_v48 = vpop.f32.mrb[0].mxu1 }
 0x44e   : > { %v6551_v28 = vpop.f32.mrb[3].mxu0  ;;  %v6570_v29 = vpop.f32.mrb[1].mxu1 }
 0x44f   : > { %v5602_v30 = vadd.f32 %v6549_v25, %v6479_v23  ;;  %v6571_v40 = vadd.f32 %v6570_v29, %v6569_v48  ;;  %v6572_v31 = vpop.f32.mrb[2].mxu1 }
 0x450   : > { %v6573_v32 = vpop.f32.mrb[3].mxu1 }
 0x451   : > { %v5642_v33 = vadd.f32 %v6571_v40, %v5602_v30 }
 0x47b   : > { %v5681_v36 = vpop.f32.mrb[4].mxu0 }
 0x47c   : > { %v5682_v59 = vadd.f32 %v5681_v36, %v5642_v33  ;;  %v5683_v60 = vpop.f32.mrb[5].mxu0 }
 0x47d   : > { %v5684_v37 = vpop.f32.mrb[6].mxu0 }
 0x47e   : > { %v5687_v38 = vmax.f32 %v5682_v59, 0.0  ;;  %v5685_v63 = vpop.f32.mrb[7].mxu0 }
 0x480   : > { %v5689_v39 = vmul.f32 %v5688_v6, %v5687_v38 }
 0x482   : > { %6622 = vmatmul.mubr.msk.f32.vlgmr.msra.gmra.mrb[4].mxu1 %vm5712_vm9, %v5689_v39 }
 0x555   : > { %v5782_v41 = vpop.f32.mrb[4].mxu1 }
 0x556   : > { %v5783_v45 = vadd.f32 %v6525_v57, %v5782_v41  ;;  %v6623_v5 = vpop.f32.mrb[5].mxu1 }
 0x558   : > { %5787 = vst.msk [vmem:[#allocation3] sm:$0x3] %vm5786_vm10, %v5783_v45 }
 0x559 PF: > { %p6720_p7 = scmp.eq.s32.totalorder %s7823_s10, 2  ;;  %s7766_s18 = smov [#allocation3]  }
 0x55a   : > { %s5795_s19 = sshll.u32 %s7766_s18, 4  ;;  %s5796_s19 = int_to_ptr.vmem [resolvable:$true] %s5795_s19 }
 0x55b   : > { %s7721_s20 = scalar_lea.vmem %s5796_s19, 32  ;;  %p7728_p11 = scmp.lt.s32.totalorder %s5796_s19, %s5796_s19 }
 0x55c   : > { %p7722_p8 = scmp.ne.s32.totalorder %s5796_s19, %s7721_s20  ;;  %p7729_p12 = scmp.lt.s32.totalorder %s7721_s20, %s7721_s20 }
 0x55e   : > { %p7723_p9 = pnand %p7722_p8, %p6720_p7  ;;  %p7730_p13 = por %p7729_p12, %p7728_p11 }
 0x560   : > { %p7724_p10 = pneg %p7723_p9 }
 0x562   : > { %p7731_p0 = pnand %p7730_p13, %p7724_p10 }
 0x564   : > { %7734 = shalt.err (!%p7731_p0)
}
 0x565   : > { %s7735_s23 = scalar_lea.hbm %s8854_s9, 32 }
 0x566   : > { %p7736_p1 = scmp.ne.s32.totalorder %s8854_s9, %s7735_s23  ;;  %p7741_p4 = scmp.lt.u32.totalorder %s7735_s23, %s8854_s9 }
 0x568   : > { %p7737_p2 = pnand %p7736_p1, %p6720_p7 }
 0x56a   : > { %p7738_p3 = pneg %p7737_p2 }
 0x56c   : > { %p7743_p5 = pnand %p7741_p4, %p7738_p3 }
 0x56e   : > { %7746 = shalt.err (!%p7743_p5)
}
 0x56f   : > { %6717 = dma.vmem_to_hbm [thread:$0]  (%p6720_p7), %s5796_s19, 32, %s8854_s9, [#allocation4]  }
 0x570   : > { %7752 = dma.done.wait (%p6720_p7), [#allocation4], 32  }
 0x571   : > { %7754 = vsyncadd (%p6720_p7), [#allocation4], 4294967264 }
 0x572 PF: > { %s20_s30 = sadd.s32 1, %s7757_s30  }
 0x573   : > { %p17_p6 = scmp.ge.s32.totalorder %s20_s30, 5  }
 0x575   :  { %19 = sbr.rel (!%p17_p6) target bundleno = 1 (0x1), region = 94 }
 0x57c   :  { %5808 = vsyncpa [#allocation4], 1 }
 0x57d   :  { %5810 = vsyncpa [#allocation4 + $0x1], 1 }

</bundles_post_ra>
